<compile_context>
chip_gen: v5e
topology: v5e:2x2
jax: 0.10.0
libtpu: 0.0.40
codegen_flags: <defaults>
</compile_context>

<pallas_src>
import functools

import jax
import jax.numpy as jnp
from jax import lax
from jax.experimental import pallas as pl

# ----------------------------- model config ---------------------------------
D_MODEL = 32
NHEAD = 4
HEAD_DIM = D_MODEL // NHEAD
DFF = 64
NUM_LAYERS = 2
LN_EPS = 1e-5

# canonical per-layer parameter ordering used for the fused kernel's arguments
_LAYER_KEYS = (
    "sa_q_w", "sa_k_w", "sa_v_w", "sa_q_b", "sa_k_b", "sa_v_b", "sa_o_w", "sa_o_b",
    "ca_q_w", "ca_k_w", "ca_v_w", "ca_q_b", "ca_k_b", "ca_v_b", "ca_o_w", "ca_o_b",
    "l1_w", "l1_b", "l2_w", "l2_b",
    "n1_w", "n1_b", "n2_w", "n2_b", "n3_w", "n3_b",
)

# weights that feed the MXU -> cast to bf16 in the wrapper (biases / LN stay f32)
_MATMUL_WEIGHT_KEYS = frozenset({
    "sa_q_w", "sa_k_w", "sa_v_w", "sa_o_w",
    "ca_q_w", "ca_k_w", "ca_v_w", "ca_o_w",
    "l1_w", "l2_w",
})


# ------------------------- shared batch-folded math --------------------------
# (used inside the Pallas kernel with mm_dtype=bf16 / approx=True, and by the
#  pure-JAX f32 reference with mm_dtype=f32 / approx=False)
def _layernorm(x, w, b):
    mu = jnp.mean(x, axis=-1, keepdims=True)
    xc = x - mu
    var = jnp.mean(xc * xc, axis=-1, keepdims=True)
    return xc * lax.rsqrt(var + LN_EPS) * w + b


def _softmax(x, approx=False):
    m = jnp.max(x, axis=-1, keepdims=True)
    e = jnp.exp(x - m)
    s = jnp.sum(e, axis=-1, keepdims=True)
    if approx:
        return e * pl.reciprocal(s, approx=True)   # EUP slot, otherwise idle here
    return e / s


def _mha(q_in, k_in, v_in, wq, wk, wv, bq, bk, bv, wo, bo, nhead, mm_dtype, approx):
    """nn.MultiheadAttention semantics, batch-folded, head-major weights, masks=None.

    q_in:(B,T,D); k_in,v_in:(B,S,D) in f32.
    wq/wk/wv:(H,D,hd)  (== in_proj_weight[i*D+h*hd : i*D+(h+1)*hd, :].T)
    bq/bk/bv:(H,1,hd); wo:(H,hd,D) (== out_proj.weight.T split head-major); bo:(1,D).
    Returns (out:(B,T,D) f32, attn averaged over heads:(B,T,S) f32).
    """
    B, T, Dm = q_in.shape
    S = k_in.shape[1]
    hd = wq.shape[-1]
    scale = 1.0 / float(hd) ** 0.5

    # 2-D row views for the projections (leading-dim merge: layout no-op), then bf16.
    q2 = q_in.reshape(B * T, Dm).astype(mm_dtype)
    if k_in is q_in:
        k2 = q2
    else:
        k2 = k_in.reshape(B * S, Dm).astype(mm_dtype)
    if v_in is k_in:
        v2 = k2
    else:
        v2 = v_in.reshape(B * S, Dm).astype(mm_dtype)

    out2 = jnp.zeros((B * T, Dm), jnp.float32)
    attn_sum = jnp.zeros((B, T, S), jnp.float32)

    for h in range(nhead):  # static unroll; no lane slicing anywhere
        q_h = (jnp.dot(q2, wq[h], preferred_element_type=jnp.float32) + bq[h]) * scale
        k_h = jnp.dot(k2, wk[h], preferred_element_type=jnp.float32) + bk[h]
        v_h = jnp.dot(v2, wv[h], preferred_element_type=jnp.float32) + bv[h]

        qh = q_h.reshape(B, T, hd).astype(mm_dtype)
        kh = k_h.reshape(B, S, hd).astype(mm_dtype)
        vh = v_h.reshape(B, S, hd).astype(mm_dtype)

        s = jnp.einsum("btk,bsk->bts", qh, kh,
                       preferred_element_type=jnp.float32)          # (B,T,S)
        a = _softmax(s, approx=approx)                               # (B,T,S) f32
        ctx = jnp.einsum("bts,bsk->btk", a.astype(mm_dtype), vh,
                         preferred_element_type=jnp.float32)         # (B,T,hd)

        out2 = out2 + jnp.dot(ctx.reshape(B * T, hd).astype(mm_dtype), wo[h],
                              preferred_element_type=jnp.float32)
        attn_sum = attn_sum + a

    out = (out2 + bo).reshape(B, T, Dm)
    return out, attn_sum * (1.0 / nhead)


def _layer_compute(x, mem, qpos, mem_pos, p, nhead, mm_dtype, approx):
    """One post-norm decoder layer, whole batch at once."""
    # self-attention: q = k = x + query_pos, v = x
    q = x + qpos
    sa_out, sa_attn = _mha(q, q, x,
                           p["sa_q_w"], p["sa_k_w"], p["sa_v_w"],
                           p["sa_q_b"], p["sa_k_b"], p["sa_v_b"],
                           p["sa_o_w"], p["sa_o_b"], nhead, mm_dtype, approx)
    x = _layernorm(x + sa_out, p["n1_w"], p["n1_b"])

    # cross-attention: q = x + query_pos, k = memory + pos, v = memory
    ca_out, ca_attn = _mha(x + qpos, mem_pos, mem,
                           p["ca_q_w"], p["ca_k_w"], p["ca_v_w"],
                           p["ca_q_b"], p["ca_k_b"], p["ca_v_b"],
                           p["ca_o_w"], p["ca_o_b"], nhead, mm_dtype, approx)
    x = _layernorm(x + ca_out, p["n2_w"], p["n2_b"])

    # feed-forward (ReLU), dropout = identity (eval mode)
    B, T, Dm = x.shape
    x2 = x.reshape(B * T, Dm)
    h = jnp.maximum(jnp.dot(x2.astype(mm_dtype), p["l1_w"],
                            preferred_element_type=jnp.float32) + p["l1_b"], 0.0)
    ff = jnp.dot(h.astype(mm_dtype), p["l2_w"],
                 preferred_element_type=jnp.float32) + p["l2_b"]
    x = _layernorm(x + ff.reshape(B, T, Dm), p["n3_w"], p["n3_b"])
    return x, sa_attn, ca_attn


# ------------------------------ fused Pallas kernel --------------------------
def fused_decoder_kernel(nhead, num_layers, *refs):
    n_w = len(_LAYER_KEYS)
    tgt_ref, mem_ref, qpos_ref, pos_ref = refs[0:4]
    layer_w_refs = refs[4:4 + n_w]
    fnorm_w_ref = refs[4 + n_w]
    fnorm_b_ref = refs[5 + n_w]
    out_ref, sattn_ref, cattn_ref = refs[6 + n_w:9 + n_w]

    x = tgt_ref[...]                     # (B,T,D) f32
    mem = mem_ref[...]                   # (B,S,D) f32
    qpos = qpos_ref[...]                 # (B,T,D) f32
    mem_pos = mem + pos_ref[...]         # hoisted: constant across layers

    # static unroll over layers; all stacked weights stay resident in VMEM
    for li in range(num_layers):
        p = {k: layer_w_refs[i][li] for i, k in enumerate(_LAYER_KEYS)}
        x, sa, ca = _layer_compute(x, mem, qpos, mem_pos, p, nhead,
                                   mm_dtype=jnp.bfloat16, approx=True)
        sattn_ref[li] = sa
        cattn_ref[li] = ca

    out_ref[...] = _layernorm(x, fnorm_w_ref[...], fnorm_b_ref[...])


# ------------------------------ wrapper --------------------------------------
def transformer_decoder_forward(tgt, memory, params, pos=None, query_pos=None):
    """Mirrors TransformerDecoder.forward (masks=None, eval mode).

    tgt:(T,B,D), memory:(S,B,D) -> (output:(T,B,D),
      {'self_attn':(L,B,T,T), 'cross_attn':(L,B,T,S)}).

    Single grid-less pallas_call: the whole batch / all layers run in one
    invocation (no per-grid-step overhead on single-TC v5e/v6e; at a few us of
    total work a 2-way v7x core split would not amortize its sync cost).
    """
    if pos is None:
        pos = jnp.zeros_like(memory)
    if query_pos is None:
        query_pos = jnp.zeros_like(tgt)

    T, B, D = tgt.shape
    S = memory.shape[0]
    L = params["sa_q_w"].shape[0]

    # batch-major internally
    x = jnp.transpose(tgt, (1, 0, 2))         # (B,T,D)
    mem = jnp.transpose(memory, (1, 0, 2))    # (B,S,D)
    qp = jnp.transpose(query_pos, (1, 0, 2))  # (B,T,D)
    pp = jnp.transpose(pos, (1, 0, 2))        # (B,S,D)

    weight_args = [params[k].astype(jnp.bfloat16) if k in _MATMUL_WEIGHT_KEYS
                   else params[k] for k in _LAYER_KEYS]
    weight_args += [params["norm_w"], params["norm_b"]]

    out_shape = [
        jax.ShapeDtypeStruct((B, T, D), jnp.float32),
        jax.ShapeDtypeStruct((L, B, T, T), jnp.float32),
        jax.ShapeDtypeStruct((L, B, T, S), jnp.float32),
    ]

    out, sattn, cattn = pl.pallas_call(
        functools.partial(fused_decoder_kernel, NHEAD, L),
        out_shape=out_shape,
    )(x, mem, qp, pp, *weight_args)

    output = jnp.transpose(out, (1, 0, 2))    # back to (T,B,D)
    return output, {"self_attn": sattn, "cross_attn": cattn}


# --------------------------- pure-JAX reference ------------------------------
def reference_forward(tgt, memory, params, pos, query_pos):
    x = jnp.transpose(tgt, (1, 0, 2))
    mem = jnp.transpose(memory, (1, 0, 2))
    qp = jnp.transpose(query_pos, (1, 0, 2))
    pp = jnp.transpose(pos, (1, 0, 2))
    mem_pos = mem + pp
    L = params["sa_q_w"].shape[0]
    self_atts, cross_atts = [], []
    for li in range(L):
        p = {k: params[k][li] for k in _LAYER_KEYS}
        x, sa, ca = _layer_compute(x, mem, qp, mem_pos, p, NHEAD,
                                   mm_dtype=jnp.float32, approx=False)
        self_atts.append(sa)
        cross_atts.append(ca)
    x = _layernorm(x, params["norm_w"], params["norm_b"])
    out = jnp.transpose(x, (1, 0, 2))
    return out, {"self_attn": jnp.stack(self_atts),
                 "cross_attn": jnp.stack(cross_atts)}


# ------------------------------- params --------------------------------------
def init_params(key):
    def lin(k, fan_in, shape):
        return jax.random.normal(k, shape, jnp.float32) * (1.0 / float(fan_in) ** 0.5)

    def small(k, shape):
        return 0.02 * jax.random.normal(k, shape, jnp.float32)

    keys = jax.random.split(key, NUM_LAYERS)
    per_layer = {k: [] for k in _LAYER_KEYS}
    for li in range(NUM_LAYERS):
        ks = jax.random.split(keys[li], 20)
        lp = {
            # head-major Q/K/V projection weights: (H, D, hd)  (= in_proj_weight^T per head)
            "sa_q_w": lin(ks[0], D_MODEL, (NHEAD, D_MODEL, HEAD_DIM)),
            "sa_k_w": lin(ks[1], D_MODEL, (NHEAD, D_MODEL, HEAD_DIM)),
            "sa_v_w": lin(ks[2], D_MODEL, (NHEAD, D_MODEL, HEAD_DIM)),
            "sa_q_b": small(ks[3], (NHEAD, 1, HEAD_DIM)),
            "sa_k_b": small(ks[4], (NHEAD, 1, HEAD_DIM)),
            "sa_v_b": small(ks[5], (NHEAD, 1, HEAD_DIM)),
            # out_proj.weight^T split head-major: (H, hd, D)
            "sa_o_w": lin(ks[6], D_MODEL, (NHEAD, HEAD_DIM, D_MODEL)),
            "sa_o_b": small(ks[7], (1, D_MODEL)),
            "ca_q_w": lin(ks[8], D_MODEL, (NHEAD, D_MODEL, HEAD_DIM)),
            "ca_k_w": lin(ks[9], D_MODEL, (NHEAD, D_MODEL, HEAD_DIM)),
            "ca_v_w": lin(ks[10], D_MODEL, (NHEAD, D_MODEL, HEAD_DIM)),
            "ca_q_b": small(ks[11], (NHEAD, 1, HEAD_DIM)),
            "ca_k_b": small(ks[12], (NHEAD, 1, HEAD_DIM)),
            "ca_v_b": small(ks[13], (NHEAD, 1, HEAD_DIM)),
            "ca_o_w": lin(ks[14], D_MODEL, (NHEAD, HEAD_DIM, D_MODEL)),
            "ca_o_b": small(ks[15], (1, D_MODEL)),
            "l1_w": lin(ks[16], D_MODEL, (D_MODEL, DFF)),
            "l1_b": small(ks[17], (1, DFF)),
            "l2_w": lin(ks[18], DFF, (DFF, D_MODEL)),
            "l2_b": small(ks[19], (1, D_MODEL)),
            "n1_w": jnp.ones((1, D_MODEL), jnp.float32),
            "n1_b": jnp.zeros((1, D_MODEL), jnp.float32),
            "n2_w": jnp.ones((1, D_MODEL), jnp.float32),
            "n2_b": jnp.zeros((1, D_MODEL), jnp.float32),
            "n3_w": jnp.ones((1, D_MODEL), jnp.float32),
            "n3_b": jnp.zeros((1, D_MODEL), jnp.float32),
        }
        for k in _LAYER_KEYS:
            per_layer[k].append(lp[k])

    params = {k: jnp.stack(per_layer[k]) for k in _LAYER_KEYS}  # leading L axis
    params["norm_w"] = jnp.ones((1, D_MODEL), jnp.float32)
    params["norm_b"] = jnp.zeros((1, D_MODEL), jnp.float32)
    return params


# --------------------------------- main ---------------------------------------
if __name__ == "__main__":
    T, S, B = 8, 16, 2
    key = jax.random.PRNGKey(0)
    k1, k2, k3, k4, kp = jax.random.split(key, 5)

    tgt = jax.random.normal(k1, (T, B, D_MODEL), jnp.float32)
    memory = jax.random.normal(k2, (S, B, D_MODEL), jnp.float32)
    query_pos = 0.1 * jax.random.normal(k3, (T, B, D_MODEL), jnp.float32)
    pos = 0.1 * jax.random.normal(k4, (S, B, D_MODEL), jnp.float32)
    params = init_params(kp)

    fwd = jax.jit(transformer_decoder_forward)
    out, atts = fwd(tgt, memory, params, pos=pos, query_pos=query_pos)
    jax.block_until_ready((out, atts))

    ref_out, ref_atts = reference_forward(tgt, memory, params, pos, query_pos)
    assert out.shape == (T, B, D_MODEL)
    assert atts["self_attn"].shape == (NUM_LAYERS, B, T, T)
    assert atts["cross_attn"].shape == (NUM_LAYERS, B, T, S)
    # Tolerances sized for bf16 matmul operands + approx reciprocal vs exact f32 ref.
    assert jnp.allclose(out, ref_out, atol=5e-2, rtol=5e-2)
    assert jnp.allclose(atts["self_attn"], ref_atts["self_attn"], atol=2e-2, rtol=2e-2)
    assert jnp.allclose(atts["cross_attn"], ref_atts["cross_attn"], atol=2e-2, rtol=2e-2)

    print("KERNEL_OK")
</pallas_src>

<mosaic_0001>
module attributes {stable_mosaic.version = 11 : i64} {
  func.func @fused_decoder_kernel(%arg0: memref<2x8x32xf32, #tpu.memory_space<vmem>>, %arg1: memref<2x16x32xf32, #tpu.memory_space<vmem>>, %arg2: memref<2x8x32xf32, #tpu.memory_space<vmem>>, %arg3: memref<2x16x32xf32, #tpu.memory_space<vmem>>, %arg4: memref<2x4x32x8xbf16, #tpu.memory_space<vmem>>, %arg5: memref<2x4x32x8xbf16, #tpu.memory_space<vmem>>, %arg6: memref<2x4x32x8xbf16, #tpu.memory_space<vmem>>, %arg7: memref<2x4x1x8xf32, #tpu.memory_space<vmem>>, %arg8: memref<2x4x1x8xf32, #tpu.memory_space<vmem>>, %arg9: memref<2x4x1x8xf32, #tpu.memory_space<vmem>>, %arg10: memref<2x4x8x32xbf16, #tpu.memory_space<vmem>>, %arg11: memref<2x1x32xf32, #tpu.memory_space<vmem>>, %arg12: memref<2x4x32x8xbf16, #tpu.memory_space<vmem>>, %arg13: memref<2x4x32x8xbf16, #tpu.memory_space<vmem>>, %arg14: memref<2x4x32x8xbf16, #tpu.memory_space<vmem>>, %arg15: memref<2x4x1x8xf32, #tpu.memory_space<vmem>>, %arg16: memref<2x4x1x8xf32, #tpu.memory_space<vmem>>, %arg17: memref<2x4x1x8xf32, #tpu.memory_space<vmem>>, %arg18: memref<2x4x8x32xbf16, #tpu.memory_space<vmem>>, %arg19: memref<2x1x32xf32, #tpu.memory_space<vmem>>, %arg20: memref<2x32x64xbf16, #tpu.memory_space<vmem>>, %arg21: memref<2x1x64xf32, #tpu.memory_space<vmem>>, %arg22: memref<2x64x32xbf16, #tpu.memory_space<vmem>>, %arg23: memref<2x1x32xf32, #tpu.memory_space<vmem>>, %arg24: memref<2x1x32xf32, #tpu.memory_space<vmem>>, %arg25: memref<2x1x32xf32, #tpu.memory_space<vmem>>, %arg26: memref<2x1x32xf32, #tpu.memory_space<vmem>>, %arg27: memref<2x1x32xf32, #tpu.memory_space<vmem>>, %arg28: memref<2x1x32xf32, #tpu.memory_space<vmem>>, %arg29: memref<2x1x32xf32, #tpu.memory_space<vmem>>, %arg30: memref<1x32xf32, #tpu.memory_space<vmem>>, %arg31: memref<1x32xf32, #tpu.memory_space<vmem>>, %arg32: memref<2x8x32xf32, #tpu.memory_space<vmem>>, %arg33: memref<2x2x8x8xf32, #tpu.memory_space<vmem>>, %arg34: memref<2x2x8x16xf32, #tpu.memory_space<vmem>>) attributes {dimension_semantics = [], scalar_prefetch = 0 : i64, scratch_operands = 0 : i64, tpu.core_type = #tpu.core_type<tc>} {
    %c0 = arith.constant 0 : index
    %c0_0 = arith.constant 0 : index
    %c0_1 = arith.constant 0 : index
    %0 = vector.load %arg0[%c0, %c0_0, %c0_1] : memref<2x8x32xf32, #tpu.memory_space<vmem>>, vector<2x8x32xf32>
    %c0_2 = arith.constant 0 : index
    %c0_3 = arith.constant 0 : index
    %c0_4 = arith.constant 0 : index
    %1 = vector.load %arg1[%c0_2, %c0_3, %c0_4] : memref<2x16x32xf32, #tpu.memory_space<vmem>>, vector<2x16x32xf32>
    %c0_5 = arith.constant 0 : index
    %c0_6 = arith.constant 0 : index
    %c0_7 = arith.constant 0 : index
    %2 = vector.load %arg2[%c0_5, %c0_6, %c0_7] : memref<2x8x32xf32, #tpu.memory_space<vmem>>, vector<2x8x32xf32>
    %c0_8 = arith.constant 0 : index
    %c0_9 = arith.constant 0 : index
    %c0_10 = arith.constant 0 : index
    %3 = vector.load %arg3[%c0_8, %c0_9, %c0_10] : memref<2x16x32xf32, #tpu.memory_space<vmem>>, vector<2x16x32xf32>
    %4 = arith.addf %1, %3 : vector<2x16x32xf32>
    %c0_11 = arith.constant 0 : index
    %c0_12 = arith.constant 0 : index
    %c0_13 = arith.constant 0 : index
    %c0_14 = arith.constant 0 : index
    %5 = vector.load %arg4[%c0_11, %c0_12, %c0_13, %c0_14] : memref<2x4x32x8xbf16, #tpu.memory_space<vmem>>, vector<1x4x32x8xbf16>
    %6 = vector.shape_cast %5 : vector<1x4x32x8xbf16> to vector<4x32x8xbf16>
    %c0_15 = arith.constant 0 : index
    %c0_16 = arith.constant 0 : index
    %c0_17 = arith.constant 0 : index
    %c0_18 = arith.constant 0 : index
    %7 = vector.load %arg5[%c0_15, %c0_16, %c0_17, %c0_18] : memref<2x4x32x8xbf16, #tpu.memory_space<vmem>>, vector<1x4x32x8xbf16>
    %8 = vector.shape_cast %7 : vector<1x4x32x8xbf16> to vector<4x32x8xbf16>
    %c0_19 = arith.constant 0 : index
    %c0_20 = arith.constant 0 : index
    %c0_21 = arith.constant 0 : index
    %c0_22 = arith.constant 0 : index
    %9 = vector.load %arg6[%c0_19, %c0_20, %c0_21, %c0_22] : memref<2x4x32x8xbf16, #tpu.memory_space<vmem>>, vector<1x4x32x8xbf16>
    %10 = vector.shape_cast %9 : vector<1x4x32x8xbf16> to vector<4x32x8xbf16>
    %c0_23 = arith.constant 0 : index
    %c0_24 = arith.constant 0 : index
    %c0_25 = arith.constant 0 : index
    %c0_26 = arith.constant 0 : index
    %11 = vector.load %arg7[%c0_23, %c0_24, %c0_25, %c0_26] : memref<2x4x1x8xf32, #tpu.memory_space<vmem>>, vector<1x4x1x8xf32>
    %12 = vector.shape_cast %11 : vector<1x4x1x8xf32> to vector<4x1x8xf32>
    %c0_27 = arith.constant 0 : index
    %c0_28 = arith.constant 0 : index
    %c0_29 = arith.constant 0 : index
    %c0_30 = arith.constant 0 : index
    %13 = vector.load %arg8[%c0_27, %c0_28, %c0_29, %c0_30] : memref<2x4x1x8xf32, #tpu.memory_space<vmem>>, vector<1x4x1x8xf32>
    %14 = vector.shape_cast %13 : vector<1x4x1x8xf32> to vector<4x1x8xf32>
    %c0_31 = arith.constant 0 : index
    %c0_32 = arith.constant 0 : index
    %c0_33 = arith.constant 0 : index
    %c0_34 = arith.constant 0 : index
    %15 = vector.load %arg9[%c0_31, %c0_32, %c0_33, %c0_34] : memref<2x4x1x8xf32, #tpu.memory_space<vmem>>, vector<1x4x1x8xf32>
    %16 = vector.shape_cast %15 : vector<1x4x1x8xf32> to vector<4x1x8xf32>
    %c0_35 = arith.constant 0 : index
    %c0_36 = arith.constant 0 : index
    %c0_37 = arith.constant 0 : index
    %c0_38 = arith.constant 0 : index
    %17 = vector.load %arg10[%c0_35, %c0_36, %c0_37, %c0_38] : memref<2x4x8x32xbf16, #tpu.memory_space<vmem>>, vector<1x4x8x32xbf16>
    %18 = vector.shape_cast %17 : vector<1x4x8x32xbf16> to vector<4x8x32xbf16>
    %c0_39 = arith.constant 0 : index
    %c0_40 = arith.constant 0 : index
    %c0_41 = arith.constant 0 : index
    %19 = vector.load %arg11[%c0_39, %c0_40, %c0_41] : memref<2x1x32xf32, #tpu.memory_space<vmem>>, vector<1x1x32xf32>
    %20 = vector.shape_cast %19 : vector<1x1x32xf32> to vector<1x32xf32>
    %c0_42 = arith.constant 0 : index
    %c0_43 = arith.constant 0 : index
    %c0_44 = arith.constant 0 : index
    %c0_45 = arith.constant 0 : index
    %21 = vector.load %arg12[%c0_42, %c0_43, %c0_44, %c0_45] : memref<2x4x32x8xbf16, #tpu.memory_space<vmem>>, vector<1x4x32x8xbf16>
    %22 = vector.shape_cast %21 : vector<1x4x32x8xbf16> to vector<4x32x8xbf16>
    %c0_46 = arith.constant 0 : index
    %c0_47 = arith.constant 0 : index
    %c0_48 = arith.constant 0 : index
    %c0_49 = arith.constant 0 : index
    %23 = vector.load %arg13[%c0_46, %c0_47, %c0_48, %c0_49] : memref<2x4x32x8xbf16, #tpu.memory_space<vmem>>, vector<1x4x32x8xbf16>
    %24 = vector.shape_cast %23 : vector<1x4x32x8xbf16> to vector<4x32x8xbf16>
    %c0_50 = arith.constant 0 : index
    %c0_51 = arith.constant 0 : index
    %c0_52 = arith.constant 0 : index
    %c0_53 = arith.constant 0 : index
    %25 = vector.load %arg14[%c0_50, %c0_51, %c0_52, %c0_53] : memref<2x4x32x8xbf16, #tpu.memory_space<vmem>>, vector<1x4x32x8xbf16>
    %26 = vector.shape_cast %25 : vector<1x4x32x8xbf16> to vector<4x32x8xbf16>
    %c0_54 = arith.constant 0 : index
    %c0_55 = arith.constant 0 : index
    %c0_56 = arith.constant 0 : index
    %c0_57 = arith.constant 0 : index
    %27 = vector.load %arg15[%c0_54, %c0_55, %c0_56, %c0_57] : memref<2x4x1x8xf32, #tpu.memory_space<vmem>>, vector<1x4x1x8xf32>
    %28 = vector.shape_cast %27 : vector<1x4x1x8xf32> to vector<4x1x8xf32>
    %c0_58 = arith.constant 0 : index
    %c0_59 = arith.constant 0 : index
    %c0_60 = arith.constant 0 : index
    %c0_61 = arith.constant 0 : index
    %29 = vector.load %arg16[%c0_58, %c0_59, %c0_60, %c0_61] : memref<2x4x1x8xf32, #tpu.memory_space<vmem>>, vector<1x4x1x8xf32>
    %30 = vector.shape_cast %29 : vector<1x4x1x8xf32> to vector<4x1x8xf32>
    %c0_62 = arith.constant 0 : index
    %c0_63 = arith.constant 0 : index
    %c0_64 = arith.constant 0 : index
    %c0_65 = arith.constant 0 : index
    %31 = vector.load %arg17[%c0_62, %c0_63, %c0_64, %c0_65] : memref<2x4x1x8xf32, #tpu.memory_space<vmem>>, vector<1x4x1x8xf32>
    %32 = vector.shape_cast %31 : vector<1x4x1x8xf32> to vector<4x1x8xf32>
    %c0_66 = arith.constant 0 : index
    %c0_67 = arith.constant 0 : index
    %c0_68 = arith.constant 0 : index
    %c0_69 = arith.constant 0 : index
    %33 = vector.load %arg18[%c0_66, %c0_67, %c0_68, %c0_69] : memref<2x4x8x32xbf16, #tpu.memory_space<vmem>>, vector<1x4x8x32xbf16>
    %34 = vector.shape_cast %33 : vector<1x4x8x32xbf16> to vector<4x8x32xbf16>
    %c0_70 = arith.constant 0 : index
    %c0_71 = arith.constant 0 : index
    %c0_72 = arith.constant 0 : index
    %35 = vector.load %arg19[%c0_70, %c0_71, %c0_72] : memref<2x1x32xf32, #tpu.memory_space<vmem>>, vector<1x1x32xf32>
    %36 = vector.shape_cast %35 : vector<1x1x32xf32> to vector<1x32xf32>
    %c0_73 = arith.constant 0 : index
    %c0_74 = arith.constant 0 : index
    %c0_75 = arith.constant 0 : index
    %37 = vector.load %arg20[%c0_73, %c0_74, %c0_75] : memref<2x32x64xbf16, #tpu.memory_space<vmem>>, vector<1x32x64xbf16>
    %38 = vector.shape_cast %37 : vector<1x32x64xbf16> to vector<32x64xbf16>
    %c0_76 = arith.constant 0 : index
    %c0_77 = arith.constant 0 : index
    %c0_78 = arith.constant 0 : index
    %39 = vector.load %arg21[%c0_76, %c0_77, %c0_78] : memref<2x1x64xf32, #tpu.memory_space<vmem>>, vector<1x1x64xf32>
    %40 = vector.shape_cast %39 : vector<1x1x64xf32> to vector<1x64xf32>
    %c0_79 = arith.constant 0 : index
    %c0_80 = arith.constant 0 : index
    %c0_81 = arith.constant 0 : index
    %41 = vector.load %arg22[%c0_79, %c0_80, %c0_81] : memref<2x64x32xbf16, #tpu.memory_space<vmem>>, vector<1x64x32xbf16>
    %42 = vector.shape_cast %41 : vector<1x64x32xbf16> to vector<64x32xbf16>
    %c0_82 = arith.constant 0 : index
    %c0_83 = arith.constant 0 : index
    %c0_84 = arith.constant 0 : index
    %43 = vector.load %arg23[%c0_82, %c0_83, %c0_84] : memref<2x1x32xf32, #tpu.memory_space<vmem>>, vector<1x1x32xf32>
    %44 = vector.shape_cast %43 : vector<1x1x32xf32> to vector<1x32xf32>
    %c0_85 = arith.constant 0 : index
    %c0_86 = arith.constant 0 : index
    %c0_87 = arith.constant 0 : index
    %45 = vector.load %arg24[%c0_85, %c0_86, %c0_87] : memref<2x1x32xf32, #tpu.memory_space<vmem>>, vector<1x1x32xf32>
    %46 = vector.shape_cast %45 : vector<1x1x32xf32> to vector<1x32xf32>
    %c0_88 = arith.constant 0 : index
    %c0_89 = arith.constant 0 : index
    %c0_90 = arith.constant 0 : index
    %47 = vector.load %arg25[%c0_88, %c0_89, %c0_90] : memref<2x1x32xf32, #tpu.memory_space<vmem>>, vector<1x1x32xf32>
    %48 = vector.shape_cast %47 : vector<1x1x32xf32> to vector<1x32xf32>
    %c0_91 = arith.constant 0 : index
    %c0_92 = arith.constant 0 : index
    %c0_93 = arith.constant 0 : index
    %49 = vector.load %arg26[%c0_91, %c0_92, %c0_93] : memref<2x1x32xf32, #tpu.memory_space<vmem>>, vector<1x1x32xf32>
    %50 = vector.shape_cast %49 : vector<1x1x32xf32> to vector<1x32xf32>
    %c0_94 = arith.constant 0 : index
    %c0_95 = arith.constant 0 : index
    %c0_96 = arith.constant 0 : index
    %51 = vector.load %arg27[%c0_94, %c0_95, %c0_96] : memref<2x1x32xf32, #tpu.memory_space<vmem>>, vector<1x1x32xf32>
    %52 = vector.shape_cast %51 : vector<1x1x32xf32> to vector<1x32xf32>
    %c0_97 = arith.constant 0 : index
    %c0_98 = arith.constant 0 : index
    %c0_99 = arith.constant 0 : index
    %53 = vector.load %arg28[%c0_97, %c0_98, %c0_99] : memref<2x1x32xf32, #tpu.memory_space<vmem>>, vector<1x1x32xf32>
    %54 = vector.shape_cast %53 : vector<1x1x32xf32> to vector<1x32xf32>
    %c0_100 = arith.constant 0 : index
    %c0_101 = arith.constant 0 : index
    %c0_102 = arith.constant 0 : index
    %55 = vector.load %arg29[%c0_100, %c0_101, %c0_102] : memref<2x1x32xf32, #tpu.memory_space<vmem>>, vector<1x1x32xf32>
    %56 = vector.shape_cast %55 : vector<1x1x32xf32> to vector<1x32xf32>
    %57 = arith.addf %0, %2 : vector<2x8x32xf32>
    %58 = vector.shape_cast %57 : vector<2x8x32xf32> to vector<16x32xf32>
    %59 = arith.truncf %58 : vector<16x32xf32> to vector<16x32xbf16>
    %60 = vector.shape_cast %0 : vector<2x8x32xf32> to vector<16x32xf32>
    %61 = arith.truncf %60 : vector<16x32xf32> to vector<16x32xbf16>
    %cst = arith.constant 0.000000e+00 : f32
    %62 = vector.broadcast %cst : f32 to vector<16x32xf32>
    %cst_103 = arith.constant 0.000000e+00 : f32
    %63 = vector.broadcast %cst_103 : f32 to vector<2x8x8xf32>
    %64 = vector.extract_strided_slice %6 {offsets = [0, 0, 0], sizes = [1, 32, 8], strides = [1, 1, 1]} : vector<4x32x8xbf16> to vector<1x32x8xbf16>
    %65 = vector.shape_cast %64 : vector<1x32x8xbf16> to vector<32x8xbf16>
    %cst_104 = arith.constant dense<0.000000e+00> : vector<16x8xf32>
    %66 = tpu.matmul %59, %65, %cst_104 {dimension_numbers = #tpu.dot_dimension_numbers<[1], [0], [0], [1], [0, 0, 1, 1], [], []>} : vector<16x32xbf16>, vector<32x8xbf16>, vector<16x8xf32> -> vector<16x8xf32>
    %67 = vector.extract_strided_slice %12 {offsets = [0, 0, 0], sizes = [1, 1, 8], strides = [1, 1, 1]} : vector<4x1x8xf32> to vector<1x1x8xf32>
    %68 = vector.shape_cast %67 : vector<1x1x8xf32> to vector<1x8xf32>
    %69 = vector.broadcast %68 : vector<1x8xf32> to vector<16x8xf32>
    %70 = arith.addf %66, %69 : vector<16x8xf32>
    %cst_105 = arith.constant 0.353553385 : f32
    %71 = vector.broadcast %cst_105 : f32 to vector<16x8xf32>
    %72 = arith.mulf %70, %71 : vector<16x8xf32>
    %73 = vector.extract_strided_slice %8 {offsets = [0, 0, 0], sizes = [1, 32, 8], strides = [1, 1, 1]} : vector<4x32x8xbf16> to vector<1x32x8xbf16>
    %74 = vector.shape_cast %73 : vector<1x32x8xbf16> to vector<32x8xbf16>
    %cst_106 = arith.constant dense<0.000000e+00> : vector<16x8xf32>
    %75 = tpu.matmul %59, %74, %cst_106 {dimension_numbers = #tpu.dot_dimension_numbers<[1], [0], [0], [1], [0, 0, 1, 1], [], []>} : vector<16x32xbf16>, vector<32x8xbf16>, vector<16x8xf32> -> vector<16x8xf32>
    %76 = vector.extract_strided_slice %14 {offsets = [0, 0, 0], sizes = [1, 1, 8], strides = [1, 1, 1]} : vector<4x1x8xf32> to vector<1x1x8xf32>
    %77 = vector.shape_cast %76 : vector<1x1x8xf32> to vector<1x8xf32>
    %78 = vector.broadcast %77 : vector<1x8xf32> to vector<16x8xf32>
    %79 = arith.addf %75, %78 : vector<16x8xf32>
    %80 = vector.extract_strided_slice %10 {offsets = [0, 0, 0], sizes = [1, 32, 8], strides = [1, 1, 1]} : vector<4x32x8xbf16> to vector<1x32x8xbf16>
    %81 = vector.shape_cast %80 : vector<1x32x8xbf16> to vector<32x8xbf16>
    %cst_107 = arith.constant dense<0.000000e+00> : vector<16x8xf32>
    %82 = tpu.matmul %61, %81, %cst_107 {dimension_numbers = #tpu.dot_dimension_numbers<[1], [0], [0], [1], [0, 0, 1, 1], [], []>} : vector<16x32xbf16>, vector<32x8xbf16>, vector<16x8xf32> -> vector<16x8xf32>
    %83 = vector.extract_strided_slice %16 {offsets = [0, 0, 0], sizes = [1, 1, 8], strides = [1, 1, 1]} : vector<4x1x8xf32> to vector<1x1x8xf32>
    %84 = vector.shape_cast %83 : vector<1x1x8xf32> to vector<1x8xf32>
    %85 = vector.broadcast %84 : vector<1x8xf32> to vector<16x8xf32>
    %86 = arith.addf %82, %85 : vector<16x8xf32>
    %87 = vector.shape_cast %72 : vector<16x8xf32> to vector<2x8x8xf32>
    %88 = arith.truncf %87 : vector<2x8x8xf32> to vector<2x8x8xbf16>
    %89 = vector.shape_cast %79 : vector<16x8xf32> to vector<2x8x8xf32>
    %90 = arith.truncf %89 : vector<2x8x8xf32> to vector<2x8x8xbf16>
    %91 = vector.shape_cast %86 : vector<16x8xf32> to vector<2x8x8xf32>
    %92 = arith.truncf %91 : vector<2x8x8xf32> to vector<2x8x8xbf16>
    "tpu.trace_start"() <{level = 10 : i32, message = "btk,bsk->bts"}> : () -> ()
    %cst_108 = arith.constant dense<0.000000e+00> : vector<2x8x8xf32>
    %93 = tpu.matmul %88, %90, %cst_108 {dimension_numbers = #tpu.dot_dimension_numbers<[2], [2], [1], [1], [0, 0, 0, 1, 1, 1], [0], [0]>} : vector<2x8x8xbf16>, vector<2x8x8xbf16>, vector<2x8x8xf32> -> vector<2x8x8xf32>
    "tpu.trace_stop"() : () -> ()
    %cst_109 = arith.constant dense<0xFF800000> : vector<2x8xf32>
    %94 = vector.multi_reduction <maximumf>, %93, %cst_109 [2] : vector<2x8x8xf32> to vector<2x8xf32>
    %95 = vector.shape_cast %94 : vector<2x8xf32> to vector<2x8x1xf32>
    %96 = vector.broadcast %95 : vector<2x8x1xf32> to vector<2x8x8xf32>
    %97 = arith.subf %93, %96 : vector<2x8x8xf32>
    %98 = math.exp %97 : vector<2x8x8xf32>
    %cst_110 = arith.constant dense<0.000000e+00> : vector<2x8xf32>
    %99 = vector.multi_reduction <add>, %98, %cst_110 [2] : vector<2x8x8xf32> to vector<2x8xf32>
    %100 = vector.shape_cast %99 : vector<2x8xf32> to vector<2x8x1xf32>
    %101 = tpu.reciprocal %100 {approx = true} : vector<2x8x1xf32> -> vector<2x8x1xf32>
    %102 = vector.broadcast %101 : vector<2x8x1xf32> to vector<2x8x8xf32>
    %103 = arith.mulf %98, %102 : vector<2x8x8xf32>
    %104 = arith.truncf %103 : vector<2x8x8xf32> to vector<2x8x8xbf16>
    "tpu.trace_start"() <{level = 10 : i32, message = "bts,bsk->btk"}> : () -> ()
    %cst_111 = arith.constant dense<0.000000e+00> : vector<2x8x8xf32>
    %105 = tpu.matmul %104, %92, %cst_111 {dimension_numbers = #tpu.dot_dimension_numbers<[2], [1], [1], [2], [0, 0, 0, 1, 1, 2], [0], [0]>} : vector<2x8x8xbf16>, vector<2x8x8xbf16>, vector<2x8x8xf32> -> vector<2x8x8xf32>
    "tpu.trace_stop"() : () -> ()
    %106 = vector.shape_cast %105 : vector<2x8x8xf32> to vector<16x8xf32>
    %107 = arith.truncf %106 : vector<16x8xf32> to vector<16x8xbf16>
    %108 = vector.extract_strided_slice %18 {offsets = [0, 0, 0], sizes = [1, 8, 32], strides = [1, 1, 1]} : vector<4x8x32xbf16> to vector<1x8x32xbf16>
    %109 = vector.shape_cast %108 : vector<1x8x32xbf16> to vector<8x32xbf16>
    %cst_112 = arith.constant dense<0.000000e+00> : vector<16x32xf32>
    %110 = tpu.matmul %107, %109, %cst_112 {dimension_numbers = #tpu.dot_dimension_numbers<[1], [0], [0], [1], [0, 0, 1, 1], [], []>} : vector<16x8xbf16>, vector<8x32xbf16>, vector<16x32xf32> -> vector<16x32xf32>
    %111 = arith.addf %62, %110 : vector<16x32xf32>
    %112 = arith.addf %63, %103 : vector<2x8x8xf32>
    %113 = vector.extract_strided_slice %6 {offsets = [1, 0, 0], sizes = [1, 32, 8], strides = [1, 1, 1]} : vector<4x32x8xbf16> to vector<1x32x8xbf16>
    %114 = vector.shape_cast %113 : vector<1x32x8xbf16> to vector<32x8xbf16>
    %cst_113 = arith.constant dense<0.000000e+00> : vector<16x8xf32>
    %115 = tpu.matmul %59, %114, %cst_113 {dimension_numbers = #tpu.dot_dimension_numbers<[1], [0], [0], [1], [0, 0, 1, 1], [], []>} : vector<16x32xbf16>, vector<32x8xbf16>, vector<16x8xf32> -> vector<16x8xf32>
    %116 = vector.extract_strided_slice %12 {offsets = [1, 0, 0], sizes = [1, 1, 8], strides = [1, 1, 1]} : vector<4x1x8xf32> to vector<1x1x8xf32>
    %117 = vector.shape_cast %116 : vector<1x1x8xf32> to vector<1x8xf32>
    %118 = vector.broadcast %117 : vector<1x8xf32> to vector<16x8xf32>
    %119 = arith.addf %115, %118 : vector<16x8xf32>
    %cst_114 = arith.constant 0.353553385 : f32
    %120 = vector.broadcast %cst_114 : f32 to vector<16x8xf32>
    %121 = arith.mulf %119, %120 : vector<16x8xf32>
    %122 = vector.extract_strided_slice %8 {offsets = [1, 0, 0], sizes = [1, 32, 8], strides = [1, 1, 1]} : vector<4x32x8xbf16> to vector<1x32x8xbf16>
    %123 = vector.shape_cast %122 : vector<1x32x8xbf16> to vector<32x8xbf16>
    %cst_115 = arith.constant dense<0.000000e+00> : vector<16x8xf32>
    %124 = tpu.matmul %59, %123, %cst_115 {dimension_numbers = #tpu.dot_dimension_numbers<[1], [0], [0], [1], [0, 0, 1, 1], [], []>} : vector<16x32xbf16>, vector<32x8xbf16>, vector<16x8xf32> -> vector<16x8xf32>
    %125 = vector.extract_strided_slice %14 {offsets = [1, 0, 0], sizes = [1, 1, 8], strides = [1, 1, 1]} : vector<4x1x8xf32> to vector<1x1x8xf32>
    %126 = vector.shape_cast %125 : vector<1x1x8xf32> to vector<1x8xf32>
    %127 = vector.broadcast %126 : vector<1x8xf32> to vector<16x8xf32>
    %128 = arith.addf %124, %127 : vector<16x8xf32>
    %129 = vector.extract_strided_slice %10 {offsets = [1, 0, 0], sizes = [1, 32, 8], strides = [1, 1, 1]} : vector<4x32x8xbf16> to vector<1x32x8xbf16>
    %130 = vector.shape_cast %129 : vector<1x32x8xbf16> to vector<32x8xbf16>
    %cst_116 = arith.constant dense<0.000000e+00> : vector<16x8xf32>
    %131 = tpu.matmul %61, %130, %cst_116 {dimension_numbers = #tpu.dot_dimension_numbers<[1], [0], [0], [1], [0, 0, 1, 1], [], []>} : vector<16x32xbf16>, vector<32x8xbf16>, vector<16x8xf32> -> vector<16x8xf32>
    %132 = vector.extract_strided_slice %16 {offsets = [1, 0, 0], sizes = [1, 1, 8], strides = [1, 1, 1]} : vector<4x1x8xf32> to vector<1x1x8xf32>
    %133 = vector.shape_cast %132 : vector<1x1x8xf32> to vector<1x8xf32>
    %134 = vector.broadcast %133 : vector<1x8xf32> to vector<16x8xf32>
    %135 = arith.addf %131, %134 : vector<16x8xf32>
    %136 = vector.shape_cast %121 : vector<16x8xf32> to vector<2x8x8xf32>
    %137 = arith.truncf %136 : vector<2x8x8xf32> to vector<2x8x8xbf16>
    %138 = vector.shape_cast %128 : vector<16x8xf32> to vector<2x8x8xf32>
    %139 = arith.truncf %138 : vector<2x8x8xf32> to vector<2x8x8xbf16>
    %140 = vector.shape_cast %135 : vector<16x8xf32> to vector<2x8x8xf32>
    %141 = arith.truncf %140 : vector<2x8x8xf32> to vector<2x8x8xbf16>
    "tpu.trace_start"() <{level = 10 : i32, message = "btk,bsk->bts"}> : () -> ()
    %cst_117 = arith.constant dense<0.000000e+00> : vector<2x8x8xf32>
    %142 = tpu.matmul %137, %139, %cst_117 {dimension_numbers = #tpu.dot_dimension_numbers<[2], [2], [1], [1], [0, 0, 0, 1, 1, 1], [0], [0]>} : vector<2x8x8xbf16>, vector<2x8x8xbf16>, vector<2x8x8xf32> -> vector<2x8x8xf32>
    "tpu.trace_stop"() : () -> ()
    %cst_118 = arith.constant dense<0xFF800000> : vector<2x8xf32>
    %143 = vector.multi_reduction <maximumf>, %142, %cst_118 [2] : vector<2x8x8xf32> to vector<2x8xf32>
    %144 = vector.shape_cast %143 : vector<2x8xf32> to vector<2x8x1xf32>
    %145 = vector.broadcast %144 : vector<2x8x1xf32> to vector<2x8x8xf32>
    %146 = arith.subf %142, %145 : vector<2x8x8xf32>
    %147 = math.exp %146 : vector<2x8x8xf32>
    %cst_119 = arith.constant dense<0.000000e+00> : vector<2x8xf32>
    %148 = vector.multi_reduction <add>, %147, %cst_119 [2] : vector<2x8x8xf32> to vector<2x8xf32>
    %149 = vector.shape_cast %148 : vector<2x8xf32> to vector<2x8x1xf32>
    %150 = tpu.reciprocal %149 {approx = true} : vector<2x8x1xf32> -> vector<2x8x1xf32>
    %151 = vector.broadcast %150 : vector<2x8x1xf32> to vector<2x8x8xf32>
    %152 = arith.mulf %147, %151 : vector<2x8x8xf32>
    %153 = arith.truncf %152 : vector<2x8x8xf32> to vector<2x8x8xbf16>
    "tpu.trace_start"() <{level = 10 : i32, message = "bts,bsk->btk"}> : () -> ()
    %cst_120 = arith.constant dense<0.000000e+00> : vector<2x8x8xf32>
    %154 = tpu.matmul %153, %141, %cst_120 {dimension_numbers = #tpu.dot_dimension_numbers<[2], [1], [1], [2], [0, 0, 0, 1, 1, 2], [0], [0]>} : vector<2x8x8xbf16>, vector<2x8x8xbf16>, vector<2x8x8xf32> -> vector<2x8x8xf32>
    "tpu.trace_stop"() : () -> ()
    %155 = vector.shape_cast %154 : vector<2x8x8xf32> to vector<16x8xf32>
    %156 = arith.truncf %155 : vector<16x8xf32> to vector<16x8xbf16>
    %157 = vector.extract_strided_slice %18 {offsets = [1, 0, 0], sizes = [1, 8, 32], strides = [1, 1, 1]} : vector<4x8x32xbf16> to vector<1x8x32xbf16>
    %158 = vector.shape_cast %157 : vector<1x8x32xbf16> to vector<8x32xbf16>
    %cst_121 = arith.constant dense<0.000000e+00> : vector<16x32xf32>
    %159 = tpu.matmul %156, %158, %cst_121 {dimension_numbers = #tpu.dot_dimension_numbers<[1], [0], [0], [1], [0, 0, 1, 1], [], []>} : vector<16x8xbf16>, vector<8x32xbf16>, vector<16x32xf32> -> vector<16x32xf32>
    %160 = arith.addf %111, %159 : vector<16x32xf32>
    %161 = arith.addf %112, %152 : vector<2x8x8xf32>
    %162 = vector.extract_strided_slice %6 {offsets = [2, 0, 0], sizes = [1, 32, 8], strides = [1, 1, 1]} : vector<4x32x8xbf16> to vector<1x32x8xbf16>
    %163 = vector.shape_cast %162 : vector<1x32x8xbf16> to vector<32x8xbf16>
    %cst_122 = arith.constant dense<0.000000e+00> : vector<16x8xf32>
    %164 = tpu.matmul %59, %163, %cst_122 {dimension_numbers = #tpu.dot_dimension_numbers<[1], [0], [0], [1], [0, 0, 1, 1], [], []>} : vector<16x32xbf16>, vector<32x8xbf16>, vector<16x8xf32> -> vector<16x8xf32>
    %165 = vector.extract_strided_slice %12 {offsets = [2, 0, 0], sizes = [1, 1, 8], strides = [1, 1, 1]} : vector<4x1x8xf32> to vector<1x1x8xf32>
    %166 = vector.shape_cast %165 : vector<1x1x8xf32> to vector<1x8xf32>
    %167 = vector.broadcast %166 : vector<1x8xf32> to vector<16x8xf32>
    %168 = arith.addf %164, %167 : vector<16x8xf32>
    %cst_123 = arith.constant 0.353553385 : f32
    %169 = vector.broadcast %cst_123 : f32 to vector<16x8xf32>
    %170 = arith.mulf %168, %169 : vector<16x8xf32>
    %171 = vector.extract_strided_slice %8 {offsets = [2, 0, 0], sizes = [1, 32, 8], strides = [1, 1, 1]} : vector<4x32x8xbf16> to vector<1x32x8xbf16>
    %172 = vector.shape_cast %171 : vector<1x32x8xbf16> to vector<32x8xbf16>
    %cst_124 = arith.constant dense<0.000000e+00> : vector<16x8xf32>
    %173 = tpu.matmul %59, %172, %cst_124 {dimension_numbers = #tpu.dot_dimension_numbers<[1], [0], [0], [1], [0, 0, 1, 1], [], []>} : vector<16x32xbf16>, vector<32x8xbf16>, vector<16x8xf32> -> vector<16x8xf32>
    %174 = vector.extract_strided_slice %14 {offsets = [2, 0, 0], sizes = [1, 1, 8], strides = [1, 1, 1]} : vector<4x1x8xf32> to vector<1x1x8xf32>
    %175 = vector.shape_cast %174 : vector<1x1x8xf32> to vector<1x8xf32>
    %176 = vector.broadcast %175 : vector<1x8xf32> to vector<16x8xf32>
    %177 = arith.addf %173, %176 : vector<16x8xf32>
    %178 = vector.extract_strided_slice %10 {offsets = [2, 0, 0], sizes = [1, 32, 8], strides = [1, 1, 1]} : vector<4x32x8xbf16> to vector<1x32x8xbf16>
    %179 = vector.shape_cast %178 : vector<1x32x8xbf16> to vector<32x8xbf16>
    %cst_125 = arith.constant dense<0.000000e+00> : vector<16x8xf32>
    %180 = tpu.matmul %61, %179, %cst_125 {dimension_numbers = #tpu.dot_dimension_numbers<[1], [0], [0], [1], [0, 0, 1, 1], [], []>} : vector<16x32xbf16>, vector<32x8xbf16>, vector<16x8xf32> -> vector<16x8xf32>
    %181 = vector.extract_strided_slice %16 {offsets = [2, 0, 0], sizes = [1, 1, 8], strides = [1, 1, 1]} : vector<4x1x8xf32> to vector<1x1x8xf32>
    %182 = vector.shape_cast %181 : vector<1x1x8xf32> to vector<1x8xf32>
    %183 = vector.broadcast %182 : vector<1x8xf32> to vector<16x8xf32>
    %184 = arith.addf %180, %183 : vector<16x8xf32>
    %185 = vector.shape_cast %170 : vector<16x8xf32> to vector<2x8x8xf32>
    %186 = arith.truncf %185 : vector<2x8x8xf32> to vector<2x8x8xbf16>
    %187 = vector.shape_cast %177 : vector<16x8xf32> to vector<2x8x8xf32>
    %188 = arith.truncf %187 : vector<2x8x8xf32> to vector<2x8x8xbf16>
    %189 = vector.shape_cast %184 : vector<16x8xf32> to vector<2x8x8xf32>
    %190 = arith.truncf %189 : vector<2x8x8xf32> to vector<2x8x8xbf16>
    "tpu.trace_start"() <{level = 10 : i32, message = "btk,bsk->bts"}> : () -> ()
    %cst_126 = arith.constant dense<0.000000e+00> : vector<2x8x8xf32>
    %191 = tpu.matmul %186, %188, %cst_126 {dimension_numbers = #tpu.dot_dimension_numbers<[2], [2], [1], [1], [0, 0, 0, 1, 1, 1], [0], [0]>} : vector<2x8x8xbf16>, vector<2x8x8xbf16>, vector<2x8x8xf32> -> vector<2x8x8xf32>
    "tpu.trace_stop"() : () -> ()
    %cst_127 = arith.constant dense<0xFF800000> : vector<2x8xf32>
    %192 = vector.multi_reduction <maximumf>, %191, %cst_127 [2] : vector<2x8x8xf32> to vector<2x8xf32>
    %193 = vector.shape_cast %192 : vector<2x8xf32> to vector<2x8x1xf32>
    %194 = vector.broadcast %193 : vector<2x8x1xf32> to vector<2x8x8xf32>
    %195 = arith.subf %191, %194 : vector<2x8x8xf32>
    %196 = math.exp %195 : vector<2x8x8xf32>
    %cst_128 = arith.constant dense<0.000000e+00> : vector<2x8xf32>
    %197 = vector.multi_reduction <add>, %196, %cst_128 [2] : vector<2x8x8xf32> to vector<2x8xf32>
    %198 = vector.shape_cast %197 : vector<2x8xf32> to vector<2x8x1xf32>
    %199 = tpu.reciprocal %198 {approx = true} : vector<2x8x1xf32> -> vector<2x8x1xf32>
    %200 = vector.broadcast %199 : vector<2x8x1xf32> to vector<2x8x8xf32>
    %201 = arith.mulf %196, %200 : vector<2x8x8xf32>
    %202 = arith.truncf %201 : vector<2x8x8xf32> to vector<2x8x8xbf16>
    "tpu.trace_start"() <{level = 10 : i32, message = "bts,bsk->btk"}> : () -> ()
    %cst_129 = arith.constant dense<0.000000e+00> : vector<2x8x8xf32>
    %203 = tpu.matmul %202, %190, %cst_129 {dimension_numbers = #tpu.dot_dimension_numbers<[2], [1], [1], [2], [0, 0, 0, 1, 1, 2], [0], [0]>} : vector<2x8x8xbf16>, vector<2x8x8xbf16>, vector<2x8x8xf32> -> vector<2x8x8xf32>
    "tpu.trace_stop"() : () -> ()
    %204 = vector.shape_cast %203 : vector<2x8x8xf32> to vector<16x8xf32>
    %205 = arith.truncf %204 : vector<16x8xf32> to vector<16x8xbf16>
    %206 = vector.extract_strided_slice %18 {offsets = [2, 0, 0], sizes = [1, 8, 32], strides = [1, 1, 1]} : vector<4x8x32xbf16> to vector<1x8x32xbf16>
    %207 = vector.shape_cast %206 : vector<1x8x32xbf16> to vector<8x32xbf16>
    %cst_130 = arith.constant dense<0.000000e+00> : vector<16x32xf32>
    %208 = tpu.matmul %205, %207, %cst_130 {dimension_numbers = #tpu.dot_dimension_numbers<[1], [0], [0], [1], [0, 0, 1, 1], [], []>} : vector<16x8xbf16>, vector<8x32xbf16>, vector<16x32xf32> -> vector<16x32xf32>
    %209 = arith.addf %160, %208 : vector<16x32xf32>
    %210 = arith.addf %161, %201 : vector<2x8x8xf32>
    %211 = vector.extract_strided_slice %6 {offsets = [3, 0, 0], sizes = [1, 32, 8], strides = [1, 1, 1]} : vector<4x32x8xbf16> to vector<1x32x8xbf16>
    %212 = vector.shape_cast %211 : vector<1x32x8xbf16> to vector<32x8xbf16>
    %cst_131 = arith.constant dense<0.000000e+00> : vector<16x8xf32>
    %213 = tpu.matmul %59, %212, %cst_131 {dimension_numbers = #tpu.dot_dimension_numbers<[1], [0], [0], [1], [0, 0, 1, 1], [], []>} : vector<16x32xbf16>, vector<32x8xbf16>, vector<16x8xf32> -> vector<16x8xf32>
    %214 = vector.extract_strided_slice %12 {offsets = [3, 0, 0], sizes = [1, 1, 8], strides = [1, 1, 1]} : vector<4x1x8xf32> to vector<1x1x8xf32>
    %215 = vector.shape_cast %214 : vector<1x1x8xf32> to vector<1x8xf32>
    %216 = vector.broadcast %215 : vector<1x8xf32> to vector<16x8xf32>
    %217 = arith.addf %213, %216 : vector<16x8xf32>
    %cst_132 = arith.constant 0.353553385 : f32
    %218 = vector.broadcast %cst_132 : f32 to vector<16x8xf32>
    %219 = arith.mulf %217, %218 : vector<16x8xf32>
    %220 = vector.extract_strided_slice %8 {offsets = [3, 0, 0], sizes = [1, 32, 8], strides = [1, 1, 1]} : vector<4x32x8xbf16> to vector<1x32x8xbf16>
    %221 = vector.shape_cast %220 : vector<1x32x8xbf16> to vector<32x8xbf16>
    %cst_133 = arith.constant dense<0.000000e+00> : vector<16x8xf32>
    %222 = tpu.matmul %59, %221, %cst_133 {dimension_numbers = #tpu.dot_dimension_numbers<[1], [0], [0], [1], [0, 0, 1, 1], [], []>} : vector<16x32xbf16>, vector<32x8xbf16>, vector<16x8xf32> -> vector<16x8xf32>
    %223 = vector.extract_strided_slice %14 {offsets = [3, 0, 0], sizes = [1, 1, 8], strides = [1, 1, 1]} : vector<4x1x8xf32> to vector<1x1x8xf32>
    %224 = vector.shape_cast %223 : vector<1x1x8xf32> to vector<1x8xf32>
    %225 = vector.broadcast %224 : vector<1x8xf32> to vector<16x8xf32>
    %226 = arith.addf %222, %225 : vector<16x8xf32>
    %227 = vector.extract_strided_slice %10 {offsets = [3, 0, 0], sizes = [1, 32, 8], strides = [1, 1, 1]} : vector<4x32x8xbf16> to vector<1x32x8xbf16>
    %228 = vector.shape_cast %227 : vector<1x32x8xbf16> to vector<32x8xbf16>
    %cst_134 = arith.constant dense<0.000000e+00> : vector<16x8xf32>
    %229 = tpu.matmul %61, %228, %cst_134 {dimension_numbers = #tpu.dot_dimension_numbers<[1], [0], [0], [1], [0, 0, 1, 1], [], []>} : vector<16x32xbf16>, vector<32x8xbf16>, vector<16x8xf32> -> vector<16x8xf32>
    %230 = vector.extract_strided_slice %16 {offsets = [3, 0, 0], sizes = [1, 1, 8], strides = [1, 1, 1]} : vector<4x1x8xf32> to vector<1x1x8xf32>
    %231 = vector.shape_cast %230 : vector<1x1x8xf32> to vector<1x8xf32>
    %232 = vector.broadcast %231 : vector<1x8xf32> to vector<16x8xf32>
    %233 = arith.addf %229, %232 : vector<16x8xf32>
    %234 = vector.shape_cast %219 : vector<16x8xf32> to vector<2x8x8xf32>
    %235 = arith.truncf %234 : vector<2x8x8xf32> to vector<2x8x8xbf16>
    %236 = vector.shape_cast %226 : vector<16x8xf32> to vector<2x8x8xf32>
    %237 = arith.truncf %236 : vector<2x8x8xf32> to vector<2x8x8xbf16>
    %238 = vector.shape_cast %233 : vector<16x8xf32> to vector<2x8x8xf32>
    %239 = arith.truncf %238 : vector<2x8x8xf32> to vector<2x8x8xbf16>
    "tpu.trace_start"() <{level = 10 : i32, message = "btk,bsk->bts"}> : () -> ()
    %cst_135 = arith.constant dense<0.000000e+00> : vector<2x8x8xf32>
    %240 = tpu.matmul %235, %237, %cst_135 {dimension_numbers = #tpu.dot_dimension_numbers<[2], [2], [1], [1], [0, 0, 0, 1, 1, 1], [0], [0]>} : vector<2x8x8xbf16>, vector<2x8x8xbf16>, vector<2x8x8xf32> -> vector<2x8x8xf32>
    "tpu.trace_stop"() : () -> ()
    %cst_136 = arith.constant dense<0xFF800000> : vector<2x8xf32>
    %241 = vector.multi_reduction <maximumf>, %240, %cst_136 [2] : vector<2x8x8xf32> to vector<2x8xf32>
    %242 = vector.shape_cast %241 : vector<2x8xf32> to vector<2x8x1xf32>
    %243 = vector.broadcast %242 : vector<2x8x1xf32> to vector<2x8x8xf32>
    %244 = arith.subf %240, %243 : vector<2x8x8xf32>
    %245 = math.exp %244 : vector<2x8x8xf32>
    %cst_137 = arith.constant dense<0.000000e+00> : vector<2x8xf32>
    %246 = vector.multi_reduction <add>, %245, %cst_137 [2] : vector<2x8x8xf32> to vector<2x8xf32>
    %247 = vector.shape_cast %246 : vector<2x8xf32> to vector<2x8x1xf32>
    %248 = tpu.reciprocal %247 {approx = true} : vector<2x8x1xf32> -> vector<2x8x1xf32>
    %249 = vector.broadcast %248 : vector<2x8x1xf32> to vector<2x8x8xf32>
    %250 = arith.mulf %245, %249 : vector<2x8x8xf32>
    %251 = arith.truncf %250 : vector<2x8x8xf32> to vector<2x8x8xbf16>
    "tpu.trace_start"() <{level = 10 : i32, message = "bts,bsk->btk"}> : () -> ()
    %cst_138 = arith.constant dense<0.000000e+00> : vector<2x8x8xf32>
    %252 = tpu.matmul %251, %239, %cst_138 {dimension_numbers = #tpu.dot_dimension_numbers<[2], [1], [1], [2], [0, 0, 0, 1, 1, 2], [0], [0]>} : vector<2x8x8xbf16>, vector<2x8x8xbf16>, vector<2x8x8xf32> -> vector<2x8x8xf32>
    "tpu.trace_stop"() : () -> ()
    %253 = vector.shape_cast %252 : vector<2x8x8xf32> to vector<16x8xf32>
    %254 = arith.truncf %253 : vector<16x8xf32> to vector<16x8xbf16>
    %255 = vector.extract_strided_slice %18 {offsets = [3, 0, 0], sizes = [1, 8, 32], strides = [1, 1, 1]} : vector<4x8x32xbf16> to vector<1x8x32xbf16>
    %256 = vector.shape_cast %255 : vector<1x8x32xbf16> to vector<8x32xbf16>
    %cst_139 = arith.constant dense<0.000000e+00> : vector<16x32xf32>
    %257 = tpu.matmul %254, %256, %cst_139 {dimension_numbers = #tpu.dot_dimension_numbers<[1], [0], [0], [1], [0, 0, 1, 1], [], []>} : vector<16x8xbf16>, vector<8x32xbf16>, vector<16x32xf32> -> vector<16x32xf32>
    %258 = arith.addf %209, %257 : vector<16x32xf32>
    %259 = arith.addf %210, %250 : vector<2x8x8xf32>
    %260 = vector.broadcast %20 : vector<1x32xf32> to vector<16x32xf32>
    %261 = arith.addf %258, %260 : vector<16x32xf32>
    %262 = vector.shape_cast %261 : vector<16x32xf32> to vector<2x8x32xf32>
    %cst_140 = arith.constant 2.500000e-01 : f32
    %263 = vector.broadcast %cst_140 : f32 to vector<2x8x8xf32>
    %264 = arith.mulf %259, %263 : vector<2x8x8xf32>
    %265 = arith.addf %0, %262 : vector<2x8x32xf32>
    %cst_141 = arith.constant dense<0.000000e+00> : vector<2x8xf32>
    %266 = vector.multi_reduction <add>, %265, %cst_141 [2] : vector<2x8x32xf32> to vector<2x8xf32>
    %267 = vector.shape_cast %266 : vector<2x8xf32> to vector<2x8x1xf32>
    %cst_142 = arith.constant 3.200000e+01 : f32
    %268 = vector.broadcast %cst_142 : f32 to vector<2x8x1xf32>
    %269 = arith.divf %267, %268 : vector<2x8x1xf32>
    %270 = vector.broadcast %269 : vector<2x8x1xf32> to vector<2x8x32xf32>
    %271 = arith.subf %265, %270 : vector<2x8x32xf32>
    %272 = arith.mulf %271, %271 : vector<2x8x32xf32>
    %cst_143 = arith.constant dense<0.000000e+00> : vector<2x8xf32>
    %273 = vector.multi_reduction <add>, %272, %cst_143 [2] : vector<2x8x32xf32> to vector<2x8xf32>
    %274 = vector.shape_cast %273 : vector<2x8xf32> to vector<2x8x1xf32>
    %cst_144 = arith.constant 3.200000e+01 : f32
    %275 = vector.broadcast %cst_144 : f32 to vector<2x8x1xf32>
    %276 = arith.divf %274, %275 : vector<2x8x1xf32>
    %cst_145 = arith.constant 9.99999974E-6 : f32
    %277 = vector.broadcast %cst_145 : f32 to vector<2x8x1xf32>
    %278 = arith.addf %276, %277 : vector<2x8x1xf32>
    %279 = math.rsqrt %278 : vector<2x8x1xf32>
    %280 = vector.broadcast %279 : vector<2x8x1xf32> to vector<2x8x32xf32>
    %281 = arith.mulf %271, %280 : vector<2x8x32xf32>
    %282 = vector.shape_cast %46 : vector<1x32xf32> to vector<1x1x32xf32>
    %283 = vector.broadcast %282 : vector<1x1x32xf32> to vector<2x8x32xf32>
    %284 = arith.mulf %281, %283 : vector<2x8x32xf32>
    %285 = vector.shape_cast %48 : vector<1x32xf32> to vector<1x1x32xf32>
    %286 = vector.broadcast %285 : vector<1x1x32xf32> to vector<2x8x32xf32>
    %287 = arith.addf %284, %286 : vector<2x8x32xf32>
    %288 = arith.addf %287, %2 : vector<2x8x32xf32>
    %289 = vector.shape_cast %288 : vector<2x8x32xf32> to vector<16x32xf32>
    %290 = arith.truncf %289 : vector<16x32xf32> to vector<16x32xbf16>
    %291 = vector.shape_cast %4 : vector<2x16x32xf32> to vector<32x32xf32>
    %292 = arith.truncf %291 : vector<32x32xf32> to vector<32x32xbf16>
    %293 = vector.shape_cast %1 : vector<2x16x32xf32> to vector<32x32xf32>
    %294 = arith.truncf %293 : vector<32x32xf32> to vector<32x32xbf16>
    %cst_146 = arith.constant 0.000000e+00 : f32
    %295 = vector.broadcast %cst_146 : f32 to vector<16x32xf32>
    %cst_147 = arith.constant 0.000000e+00 : f32
    %296 = vector.broadcast %cst_147 : f32 to vector<2x8x16xf32>
    %297 = vector.extract_strided_slice %22 {offsets = [0, 0, 0], sizes = [1, 32, 8], strides = [1, 1, 1]} : vector<4x32x8xbf16> to vector<1x32x8xbf16>
    %298 = vector.shape_cast %297 : vector<1x32x8xbf16> to vector<32x8xbf16>
    %cst_148 = arith.constant dense<0.000000e+00> : vector<16x8xf32>
    %299 = tpu.matmul %290, %298, %cst_148 {dimension_numbers = #tpu.dot_dimension_numbers<[1], [0], [0], [1], [0, 0, 1, 1], [], []>} : vector<16x32xbf16>, vector<32x8xbf16>, vector<16x8xf32> -> vector<16x8xf32>
    %300 = vector.extract_strided_slice %28 {offsets = [0, 0, 0], sizes = [1, 1, 8], strides = [1, 1, 1]} : vector<4x1x8xf32> to vector<1x1x8xf32>
    %301 = vector.shape_cast %300 : vector<1x1x8xf32> to vector<1x8xf32>
    %302 = vector.broadcast %301 : vector<1x8xf32> to vector<16x8xf32>
    %303 = arith.addf %299, %302 : vector<16x8xf32>
    %cst_149 = arith.constant 0.353553385 : f32
    %304 = vector.broadcast %cst_149 : f32 to vector<16x8xf32>
    %305 = arith.mulf %303, %304 : vector<16x8xf32>
    %306 = vector.extract_strided_slice %24 {offsets = [0, 0, 0], sizes = [1, 32, 8], strides = [1, 1, 1]} : vector<4x32x8xbf16> to vector<1x32x8xbf16>
    %307 = vector.shape_cast %306 : vector<1x32x8xbf16> to vector<32x8xbf16>
    %cst_150 = arith.constant dense<0.000000e+00> : vector<32x8xf32>
    %308 = tpu.matmul %292, %307, %cst_150 {dimension_numbers = #tpu.dot_dimension_numbers<[1], [0], [0], [1], [0, 0, 1, 1], [], []>} : vector<32x32xbf16>, vector<32x8xbf16>, vector<32x8xf32> -> vector<32x8xf32>
    %309 = vector.extract_strided_slice %30 {offsets = [0, 0, 0], sizes = [1, 1, 8], strides = [1, 1, 1]} : vector<4x1x8xf32> to vector<1x1x8xf32>
    %310 = vector.shape_cast %309 : vector<1x1x8xf32> to vector<1x8xf32>
    %311 = vector.broadcast %310 : vector<1x8xf32> to vector<32x8xf32>
    %312 = arith.addf %308, %311 : vector<32x8xf32>
    %313 = vector.extract_strided_slice %26 {offsets = [0, 0, 0], sizes = [1, 32, 8], strides = [1, 1, 1]} : vector<4x32x8xbf16> to vector<1x32x8xbf16>
    %314 = vector.shape_cast %313 : vector<1x32x8xbf16> to vector<32x8xbf16>
    %cst_151 = arith.constant dense<0.000000e+00> : vector<32x8xf32>
    %315 = tpu.matmul %294, %314, %cst_151 {dimension_numbers = #tpu.dot_dimension_numbers<[1], [0], [0], [1], [0, 0, 1, 1], [], []>} : vector<32x32xbf16>, vector<32x8xbf16>, vector<32x8xf32> -> vector<32x8xf32>
    %316 = vector.extract_strided_slice %32 {offsets = [0, 0, 0], sizes = [1, 1, 8], strides = [1, 1, 1]} : vector<4x1x8xf32> to vector<1x1x8xf32>
    %317 = vector.shape_cast %316 : vector<1x1x8xf32> to vector<1x8xf32>
    %318 = vector.broadcast %317 : vector<1x8xf32> to vector<32x8xf32>
    %319 = arith.addf %315, %318 : vector<32x8xf32>
    %320 = vector.shape_cast %305 : vector<16x8xf32> to vector<2x8x8xf32>
    %321 = arith.truncf %320 : vector<2x8x8xf32> to vector<2x8x8xbf16>
    %322 = vector.shape_cast %312 : vector<32x8xf32> to vector<2x16x8xf32>
    %323 = arith.truncf %322 : vector<2x16x8xf32> to vector<2x16x8xbf16>
    %324 = vector.shape_cast %319 : vector<32x8xf32> to vector<2x16x8xf32>
    %325 = arith.truncf %324 : vector<2x16x8xf32> to vector<2x16x8xbf16>
    "tpu.trace_start"() <{level = 10 : i32, message = "btk,bsk->bts"}> : () -> ()
    %cst_152 = arith.constant dense<0.000000e+00> : vector<2x8x16xf32>
    %326 = tpu.matmul %321, %323, %cst_152 {dimension_numbers = #tpu.dot_dimension_numbers<[2], [2], [1], [1], [0, 0, 0, 1, 1, 1], [0], [0]>} : vector<2x8x8xbf16>, vector<2x16x8xbf16>, vector<2x8x16xf32> -> vector<2x8x16xf32>
    "tpu.trace_stop"() : () -> ()
    %cst_153 = arith.constant dense<0xFF800000> : vector<2x8xf32>
    %327 = vector.multi_reduction <maximumf>, %326, %cst_153 [2] : vector<2x8x16xf32> to vector<2x8xf32>
    %328 = vector.shape_cast %327 : vector<2x8xf32> to vector<2x8x1xf32>
    %329 = vector.broadcast %328 : vector<2x8x1xf32> to vector<2x8x16xf32>
    %330 = arith.subf %326, %329 : vector<2x8x16xf32>
    %331 = math.exp %330 : vector<2x8x16xf32>
    %cst_154 = arith.constant dense<0.000000e+00> : vector<2x8xf32>
    %332 = vector.multi_reduction <add>, %331, %cst_154 [2] : vector<2x8x16xf32> to vector<2x8xf32>
    %333 = vector.shape_cast %332 : vector<2x8xf32> to vector<2x8x1xf32>
    %334 = tpu.reciprocal %333 {approx = true} : vector<2x8x1xf32> -> vector<2x8x1xf32>
    %335 = vector.broadcast %334 : vector<2x8x1xf32> to vector<2x8x16xf32>
    %336 = arith.mulf %331, %335 : vector<2x8x16xf32>
    %337 = arith.truncf %336 : vector<2x8x16xf32> to vector<2x8x16xbf16>
    "tpu.trace_start"() <{level = 10 : i32, message = "bts,bsk->btk"}> : () -> ()
    %cst_155 = arith.constant dense<0.000000e+00> : vector<2x8x8xf32>
    %338 = tpu.matmul %337, %325, %cst_155 {dimension_numbers = #tpu.dot_dimension_numbers<[2], [1], [1], [2], [0, 0, 0, 1, 1, 2], [0], [0]>} : vector<2x8x16xbf16>, vector<2x16x8xbf16>, vector<2x8x8xf32> -> vector<2x8x8xf32>
    "tpu.trace_stop"() : () -> ()
    %339 = vector.shape_cast %338 : vector<2x8x8xf32> to vector<16x8xf32>
    %340 = arith.truncf %339 : vector<16x8xf32> to vector<16x8xbf16>
    %341 = vector.extract_strided_slice %34 {offsets = [0, 0, 0], sizes = [1, 8, 32], strides = [1, 1, 1]} : vector<4x8x32xbf16> to vector<1x8x32xbf16>
    %342 = vector.shape_cast %341 : vector<1x8x32xbf16> to vector<8x32xbf16>
    %cst_156 = arith.constant dense<0.000000e+00> : vector<16x32xf32>
    %343 = tpu.matmul %340, %342, %cst_156 {dimension_numbers = #tpu.dot_dimension_numbers<[1], [0], [0], [1], [0, 0, 1, 1], [], []>} : vector<16x8xbf16>, vector<8x32xbf16>, vector<16x32xf32> -> vector<16x32xf32>
    %344 = arith.addf %295, %343 : vector<16x32xf32>
    %345 = arith.addf %296, %336 : vector<2x8x16xf32>
    %346 = vector.extract_strided_slice %22 {offsets = [1, 0, 0], sizes = [1, 32, 8], strides = [1, 1, 1]} : vector<4x32x8xbf16> to vector<1x32x8xbf16>
    %347 = vector.shape_cast %346 : vector<1x32x8xbf16> to vector<32x8xbf16>
    %cst_157 = arith.constant dense<0.000000e+00> : vector<16x8xf32>
    %348 = tpu.matmul %290, %347, %cst_157 {dimension_numbers = #tpu.dot_dimension_numbers<[1], [0], [0], [1], [0, 0, 1, 1], [], []>} : vector<16x32xbf16>, vector<32x8xbf16>, vector<16x8xf32> -> vector<16x8xf32>
    %349 = vector.extract_strided_slice %28 {offsets = [1, 0, 0], sizes = [1, 1, 8], strides = [1, 1, 1]} : vector<4x1x8xf32> to vector<1x1x8xf32>
    %350 = vector.shape_cast %349 : vector<1x1x8xf32> to vector<1x8xf32>
    %351 = vector.broadcast %350 : vector<1x8xf32> to vector<16x8xf32>
    %352 = arith.addf %348, %351 : vector<16x8xf32>
    %cst_158 = arith.constant 0.353553385 : f32
    %353 = vector.broadcast %cst_158 : f32 to vector<16x8xf32>
    %354 = arith.mulf %352, %353 : vector<16x8xf32>
    %355 = vector.extract_strided_slice %24 {offsets = [1, 0, 0], sizes = [1, 32, 8], strides = [1, 1, 1]} : vector<4x32x8xbf16> to vector<1x32x8xbf16>
    %356 = vector.shape_cast %355 : vector<1x32x8xbf16> to vector<32x8xbf16>
    %cst_159 = arith.constant dense<0.000000e+00> : vector<32x8xf32>
    %357 = tpu.matmul %292, %356, %cst_159 {dimension_numbers = #tpu.dot_dimension_numbers<[1], [0], [0], [1], [0, 0, 1, 1], [], []>} : vector<32x32xbf16>, vector<32x8xbf16>, vector<32x8xf32> -> vector<32x8xf32>
    %358 = vector.extract_strided_slice %30 {offsets = [1, 0, 0], sizes = [1, 1, 8], strides = [1, 1, 1]} : vector<4x1x8xf32> to vector<1x1x8xf32>
    %359 = vector.shape_cast %358 : vector<1x1x8xf32> to vector<1x8xf32>
    %360 = vector.broadcast %359 : vector<1x8xf32> to vector<32x8xf32>
    %361 = arith.addf %357, %360 : vector<32x8xf32>
    %362 = vector.extract_strided_slice %26 {offsets = [1, 0, 0], sizes = [1, 32, 8], strides = [1, 1, 1]} : vector<4x32x8xbf16> to vector<1x32x8xbf16>
    %363 = vector.shape_cast %362 : vector<1x32x8xbf16> to vector<32x8xbf16>
    %cst_160 = arith.constant dense<0.000000e+00> : vector<32x8xf32>
    %364 = tpu.matmul %294, %363, %cst_160 {dimension_numbers = #tpu.dot_dimension_numbers<[1], [0], [0], [1], [0, 0, 1, 1], [], []>} : vector<32x32xbf16>, vector<32x8xbf16>, vector<32x8xf32> -> vector<32x8xf32>
    %365 = vector.extract_strided_slice %32 {offsets = [1, 0, 0], sizes = [1, 1, 8], strides = [1, 1, 1]} : vector<4x1x8xf32> to vector<1x1x8xf32>
    %366 = vector.shape_cast %365 : vector<1x1x8xf32> to vector<1x8xf32>
    %367 = vector.broadcast %366 : vector<1x8xf32> to vector<32x8xf32>
    %368 = arith.addf %364, %367 : vector<32x8xf32>
    %369 = vector.shape_cast %354 : vector<16x8xf32> to vector<2x8x8xf32>
    %370 = arith.truncf %369 : vector<2x8x8xf32> to vector<2x8x8xbf16>
    %371 = vector.shape_cast %361 : vector<32x8xf32> to vector<2x16x8xf32>
    %372 = arith.truncf %371 : vector<2x16x8xf32> to vector<2x16x8xbf16>
    %373 = vector.shape_cast %368 : vector<32x8xf32> to vector<2x16x8xf32>
    %374 = arith.truncf %373 : vector<2x16x8xf32> to vector<2x16x8xbf16>
    "tpu.trace_start"() <{level = 10 : i32, message = "btk,bsk->bts"}> : () -> ()
    %cst_161 = arith.constant dense<0.000000e+00> : vector<2x8x16xf32>
    %375 = tpu.matmul %370, %372, %cst_161 {dimension_numbers = #tpu.dot_dimension_numbers<[2], [2], [1], [1], [0, 0, 0, 1, 1, 1], [0], [0]>} : vector<2x8x8xbf16>, vector<2x16x8xbf16>, vector<2x8x16xf32> -> vector<2x8x16xf32>
    "tpu.trace_stop"() : () -> ()
    %cst_162 = arith.constant dense<0xFF800000> : vector<2x8xf32>
    %376 = vector.multi_reduction <maximumf>, %375, %cst_162 [2] : vector<2x8x16xf32> to vector<2x8xf32>
    %377 = vector.shape_cast %376 : vector<2x8xf32> to vector<2x8x1xf32>
    %378 = vector.broadcast %377 : vector<2x8x1xf32> to vector<2x8x16xf32>
    %379 = arith.subf %375, %378 : vector<2x8x16xf32>
    %380 = math.exp %379 : vector<2x8x16xf32>
    %cst_163 = arith.constant dense<0.000000e+00> : vector<2x8xf32>
    %381 = vector.multi_reduction <add>, %380, %cst_163 [2] : vector<2x8x16xf32> to vector<2x8xf32>
    %382 = vector.shape_cast %381 : vector<2x8xf32> to vector<2x8x1xf32>
    %383 = tpu.reciprocal %382 {approx = true} : vector<2x8x1xf32> -> vector<2x8x1xf32>
    %384 = vector.broadcast %383 : vector<2x8x1xf32> to vector<2x8x16xf32>
    %385 = arith.mulf %380, %384 : vector<2x8x16xf32>
    %386 = arith.truncf %385 : vector<2x8x16xf32> to vector<2x8x16xbf16>
    "tpu.trace_start"() <{level = 10 : i32, message = "bts,bsk->btk"}> : () -> ()
    %cst_164 = arith.constant dense<0.000000e+00> : vector<2x8x8xf32>
    %387 = tpu.matmul %386, %374, %cst_164 {dimension_numbers = #tpu.dot_dimension_numbers<[2], [1], [1], [2], [0, 0, 0, 1, 1, 2], [0], [0]>} : vector<2x8x16xbf16>, vector<2x16x8xbf16>, vector<2x8x8xf32> -> vector<2x8x8xf32>
    "tpu.trace_stop"() : () -> ()
    %388 = vector.shape_cast %387 : vector<2x8x8xf32> to vector<16x8xf32>
    %389 = arith.truncf %388 : vector<16x8xf32> to vector<16x8xbf16>
    %390 = vector.extract_strided_slice %34 {offsets = [1, 0, 0], sizes = [1, 8, 32], strides = [1, 1, 1]} : vector<4x8x32xbf16> to vector<1x8x32xbf16>
    %391 = vector.shape_cast %390 : vector<1x8x32xbf16> to vector<8x32xbf16>
    %cst_165 = arith.constant dense<0.000000e+00> : vector<16x32xf32>
    %392 = tpu.matmul %389, %391, %cst_165 {dimension_numbers = #tpu.dot_dimension_numbers<[1], [0], [0], [1], [0, 0, 1, 1], [], []>} : vector<16x8xbf16>, vector<8x32xbf16>, vector<16x32xf32> -> vector<16x32xf32>
    %393 = arith.addf %344, %392 : vector<16x32xf32>
    %394 = arith.addf %345, %385 : vector<2x8x16xf32>
    %395 = vector.extract_strided_slice %22 {offsets = [2, 0, 0], sizes = [1, 32, 8], strides = [1, 1, 1]} : vector<4x32x8xbf16> to vector<1x32x8xbf16>
    %396 = vector.shape_cast %395 : vector<1x32x8xbf16> to vector<32x8xbf16>
    %cst_166 = arith.constant dense<0.000000e+00> : vector<16x8xf32>
    %397 = tpu.matmul %290, %396, %cst_166 {dimension_numbers = #tpu.dot_dimension_numbers<[1], [0], [0], [1], [0, 0, 1, 1], [], []>} : vector<16x32xbf16>, vector<32x8xbf16>, vector<16x8xf32> -> vector<16x8xf32>
    %398 = vector.extract_strided_slice %28 {offsets = [2, 0, 0], sizes = [1, 1, 8], strides = [1, 1, 1]} : vector<4x1x8xf32> to vector<1x1x8xf32>
    %399 = vector.shape_cast %398 : vector<1x1x8xf32> to vector<1x8xf32>
    %400 = vector.broadcast %399 : vector<1x8xf32> to vector<16x8xf32>
    %401 = arith.addf %397, %400 : vector<16x8xf32>
    %cst_167 = arith.constant 0.353553385 : f32
    %402 = vector.broadcast %cst_167 : f32 to vector<16x8xf32>
    %403 = arith.mulf %401, %402 : vector<16x8xf32>
    %404 = vector.extract_strided_slice %24 {offsets = [2, 0, 0], sizes = [1, 32, 8], strides = [1, 1, 1]} : vector<4x32x8xbf16> to vector<1x32x8xbf16>
    %405 = vector.shape_cast %404 : vector<1x32x8xbf16> to vector<32x8xbf16>
    %cst_168 = arith.constant dense<0.000000e+00> : vector<32x8xf32>
    %406 = tpu.matmul %292, %405, %cst_168 {dimension_numbers = #tpu.dot_dimension_numbers<[1], [0], [0], [1], [0, 0, 1, 1], [], []>} : vector<32x32xbf16>, vector<32x8xbf16>, vector<32x8xf32> -> vector<32x8xf32>
    %407 = vector.extract_strided_slice %30 {offsets = [2, 0, 0], sizes = [1, 1, 8], strides = [1, 1, 1]} : vector<4x1x8xf32> to vector<1x1x8xf32>
    %408 = vector.shape_cast %407 : vector<1x1x8xf32> to vector<1x8xf32>
    %409 = vector.broadcast %408 : vector<1x8xf32> to vector<32x8xf32>
    %410 = arith.addf %406, %409 : vector<32x8xf32>
    %411 = vector.extract_strided_slice %26 {offsets = [2, 0, 0], sizes = [1, 32, 8], strides = [1, 1, 1]} : vector<4x32x8xbf16> to vector<1x32x8xbf16>
    %412 = vector.shape_cast %411 : vector<1x32x8xbf16> to vector<32x8xbf16>
    %cst_169 = arith.constant dense<0.000000e+00> : vector<32x8xf32>
    %413 = tpu.matmul %294, %412, %cst_169 {dimension_numbers = #tpu.dot_dimension_numbers<[1], [0], [0], [1], [0, 0, 1, 1], [], []>} : vector<32x32xbf16>, vector<32x8xbf16>, vector<32x8xf32> -> vector<32x8xf32>
    %414 = vector.extract_strided_slice %32 {offsets = [2, 0, 0], sizes = [1, 1, 8], strides = [1, 1, 1]} : vector<4x1x8xf32> to vector<1x1x8xf32>
    %415 = vector.shape_cast %414 : vector<1x1x8xf32> to vector<1x8xf32>
    %416 = vector.broadcast %415 : vector<1x8xf32> to vector<32x8xf32>
    %417 = arith.addf %413, %416 : vector<32x8xf32>
    %418 = vector.shape_cast %403 : vector<16x8xf32> to vector<2x8x8xf32>
    %419 = arith.truncf %418 : vector<2x8x8xf32> to vector<2x8x8xbf16>
    %420 = vector.shape_cast %410 : vector<32x8xf32> to vector<2x16x8xf32>
    %421 = arith.truncf %420 : vector<2x16x8xf32> to vector<2x16x8xbf16>
    %422 = vector.shape_cast %417 : vector<32x8xf32> to vector<2x16x8xf32>
    %423 = arith.truncf %422 : vector<2x16x8xf32> to vector<2x16x8xbf16>
    "tpu.trace_start"() <{level = 10 : i32, message = "btk,bsk->bts"}> : () -> ()
    %cst_170 = arith.constant dense<0.000000e+00> : vector<2x8x16xf32>
    %424 = tpu.matmul %419, %421, %cst_170 {dimension_numbers = #tpu.dot_dimension_numbers<[2], [2], [1], [1], [0, 0, 0, 1, 1, 1], [0], [0]>} : vector<2x8x8xbf16>, vector<2x16x8xbf16>, vector<2x8x16xf32> -> vector<2x8x16xf32>
    "tpu.trace_stop"() : () -> ()
    %cst_171 = arith.constant dense<0xFF800000> : vector<2x8xf32>
    %425 = vector.multi_reduction <maximumf>, %424, %cst_171 [2] : vector<2x8x16xf32> to vector<2x8xf32>
    %426 = vector.shape_cast %425 : vector<2x8xf32> to vector<2x8x1xf32>
    %427 = vector.broadcast %426 : vector<2x8x1xf32> to vector<2x8x16xf32>
    %428 = arith.subf %424, %427 : vector<2x8x16xf32>
    %429 = math.exp %428 : vector<2x8x16xf32>
    %cst_172 = arith.constant dense<0.000000e+00> : vector<2x8xf32>
    %430 = vector.multi_reduction <add>, %429, %cst_172 [2] : vector<2x8x16xf32> to vector<2x8xf32>
    %431 = vector.shape_cast %430 : vector<2x8xf32> to vector<2x8x1xf32>
    %432 = tpu.reciprocal %431 {approx = true} : vector<2x8x1xf32> -> vector<2x8x1xf32>
    %433 = vector.broadcast %432 : vector<2x8x1xf32> to vector<2x8x16xf32>
    %434 = arith.mulf %429, %433 : vector<2x8x16xf32>
    %435 = arith.truncf %434 : vector<2x8x16xf32> to vector<2x8x16xbf16>
    "tpu.trace_start"() <{level = 10 : i32, message = "bts,bsk->btk"}> : () -> ()
    %cst_173 = arith.constant dense<0.000000e+00> : vector<2x8x8xf32>
    %436 = tpu.matmul %435, %423, %cst_173 {dimension_numbers = #tpu.dot_dimension_numbers<[2], [1], [1], [2], [0, 0, 0, 1, 1, 2], [0], [0]>} : vector<2x8x16xbf16>, vector<2x16x8xbf16>, vector<2x8x8xf32> -> vector<2x8x8xf32>
    "tpu.trace_stop"() : () -> ()
    %437 = vector.shape_cast %436 : vector<2x8x8xf32> to vector<16x8xf32>
    %438 = arith.truncf %437 : vector<16x8xf32> to vector<16x8xbf16>
    %439 = vector.extract_strided_slice %34 {offsets = [2, 0, 0], sizes = [1, 8, 32], strides = [1, 1, 1]} : vector<4x8x32xbf16> to vector<1x8x32xbf16>
    %440 = vector.shape_cast %439 : vector<1x8x32xbf16> to vector<8x32xbf16>
    %cst_174 = arith.constant dense<0.000000e+00> : vector<16x32xf32>
    %441 = tpu.matmul %438, %440, %cst_174 {dimension_numbers = #tpu.dot_dimension_numbers<[1], [0], [0], [1], [0, 0, 1, 1], [], []>} : vector<16x8xbf16>, vector<8x32xbf16>, vector<16x32xf32> -> vector<16x32xf32>
    %442 = arith.addf %393, %441 : vector<16x32xf32>
    %443 = arith.addf %394, %434 : vector<2x8x16xf32>
    %444 = vector.extract_strided_slice %22 {offsets = [3, 0, 0], sizes = [1, 32, 8], strides = [1, 1, 1]} : vector<4x32x8xbf16> to vector<1x32x8xbf16>
    %445 = vector.shape_cast %444 : vector<1x32x8xbf16> to vector<32x8xbf16>
    %cst_175 = arith.constant dense<0.000000e+00> : vector<16x8xf32>
    %446 = tpu.matmul %290, %445, %cst_175 {dimension_numbers = #tpu.dot_dimension_numbers<[1], [0], [0], [1], [0, 0, 1, 1], [], []>} : vector<16x32xbf16>, vector<32x8xbf16>, vector<16x8xf32> -> vector<16x8xf32>
    %447 = vector.extract_strided_slice %28 {offsets = [3, 0, 0], sizes = [1, 1, 8], strides = [1, 1, 1]} : vector<4x1x8xf32> to vector<1x1x8xf32>
    %448 = vector.shape_cast %447 : vector<1x1x8xf32> to vector<1x8xf32>
    %449 = vector.broadcast %448 : vector<1x8xf32> to vector<16x8xf32>
    %450 = arith.addf %446, %449 : vector<16x8xf32>
    %cst_176 = arith.constant 0.353553385 : f32
    %451 = vector.broadcast %cst_176 : f32 to vector<16x8xf32>
    %452 = arith.mulf %450, %451 : vector<16x8xf32>
    %453 = vector.extract_strided_slice %24 {offsets = [3, 0, 0], sizes = [1, 32, 8], strides = [1, 1, 1]} : vector<4x32x8xbf16> to vector<1x32x8xbf16>
    %454 = vector.shape_cast %453 : vector<1x32x8xbf16> to vector<32x8xbf16>
    %cst_177 = arith.constant dense<0.000000e+00> : vector<32x8xf32>
    %455 = tpu.matmul %292, %454, %cst_177 {dimension_numbers = #tpu.dot_dimension_numbers<[1], [0], [0], [1], [0, 0, 1, 1], [], []>} : vector<32x32xbf16>, vector<32x8xbf16>, vector<32x8xf32> -> vector<32x8xf32>
    %456 = vector.extract_strided_slice %30 {offsets = [3, 0, 0], sizes = [1, 1, 8], strides = [1, 1, 1]} : vector<4x1x8xf32> to vector<1x1x8xf32>
    %457 = vector.shape_cast %456 : vector<1x1x8xf32> to vector<1x8xf32>
    %458 = vector.broadcast %457 : vector<1x8xf32> to vector<32x8xf32>
    %459 = arith.addf %455, %458 : vector<32x8xf32>
    %460 = vector.extract_strided_slice %26 {offsets = [3, 0, 0], sizes = [1, 32, 8], strides = [1, 1, 1]} : vector<4x32x8xbf16> to vector<1x32x8xbf16>
    %461 = vector.shape_cast %460 : vector<1x32x8xbf16> to vector<32x8xbf16>
    %cst_178 = arith.constant dense<0.000000e+00> : vector<32x8xf32>
    %462 = tpu.matmul %294, %461, %cst_178 {dimension_numbers = #tpu.dot_dimension_numbers<[1], [0], [0], [1], [0, 0, 1, 1], [], []>} : vector<32x32xbf16>, vector<32x8xbf16>, vector<32x8xf32> -> vector<32x8xf32>
    %463 = vector.extract_strided_slice %32 {offsets = [3, 0, 0], sizes = [1, 1, 8], strides = [1, 1, 1]} : vector<4x1x8xf32> to vector<1x1x8xf32>
    %464 = vector.shape_cast %463 : vector<1x1x8xf32> to vector<1x8xf32>
    %465 = vector.broadcast %464 : vector<1x8xf32> to vector<32x8xf32>
    %466 = arith.addf %462, %465 : vector<32x8xf32>
    %467 = vector.shape_cast %452 : vector<16x8xf32> to vector<2x8x8xf32>
    %468 = arith.truncf %467 : vector<2x8x8xf32> to vector<2x8x8xbf16>
    %469 = vector.shape_cast %459 : vector<32x8xf32> to vector<2x16x8xf32>
    %470 = arith.truncf %469 : vector<2x16x8xf32> to vector<2x16x8xbf16>
    %471 = vector.shape_cast %466 : vector<32x8xf32> to vector<2x16x8xf32>
    %472 = arith.truncf %471 : vector<2x16x8xf32> to vector<2x16x8xbf16>
    "tpu.trace_start"() <{level = 10 : i32, message = "btk,bsk->bts"}> : () -> ()
    %cst_179 = arith.constant dense<0.000000e+00> : vector<2x8x16xf32>
    %473 = tpu.matmul %468, %470, %cst_179 {dimension_numbers = #tpu.dot_dimension_numbers<[2], [2], [1], [1], [0, 0, 0, 1, 1, 1], [0], [0]>} : vector<2x8x8xbf16>, vector<2x16x8xbf16>, vector<2x8x16xf32> -> vector<2x8x16xf32>
    "tpu.trace_stop"() : () -> ()
    %cst_180 = arith.constant dense<0xFF800000> : vector<2x8xf32>
    %474 = vector.multi_reduction <maximumf>, %473, %cst_180 [2] : vector<2x8x16xf32> to vector<2x8xf32>
    %475 = vector.shape_cast %474 : vector<2x8xf32> to vector<2x8x1xf32>
    %476 = vector.broadcast %475 : vector<2x8x1xf32> to vector<2x8x16xf32>
    %477 = arith.subf %473, %476 : vector<2x8x16xf32>
    %478 = math.exp %477 : vector<2x8x16xf32>
    %cst_181 = arith.constant dense<0.000000e+00> : vector<2x8xf32>
    %479 = vector.multi_reduction <add>, %478, %cst_181 [2] : vector<2x8x16xf32> to vector<2x8xf32>
    %480 = vector.shape_cast %479 : vector<2x8xf32> to vector<2x8x1xf32>
    %481 = tpu.reciprocal %480 {approx = true} : vector<2x8x1xf32> -> vector<2x8x1xf32>
    %482 = vector.broadcast %481 : vector<2x8x1xf32> to vector<2x8x16xf32>
    %483 = arith.mulf %478, %482 : vector<2x8x16xf32>
    %484 = arith.truncf %483 : vector<2x8x16xf32> to vector<2x8x16xbf16>
    "tpu.trace_start"() <{level = 10 : i32, message = "bts,bsk->btk"}> : () -> ()
    %cst_182 = arith.constant dense<0.000000e+00> : vector<2x8x8xf32>
    %485 = tpu.matmul %484, %472, %cst_182 {dimension_numbers = #tpu.dot_dimension_numbers<[2], [1], [1], [2], [0, 0, 0, 1, 1, 2], [0], [0]>} : vector<2x8x16xbf16>, vector<2x16x8xbf16>, vector<2x8x8xf32> -> vector<2x8x8xf32>
    "tpu.trace_stop"() : () -> ()
    %486 = vector.shape_cast %485 : vector<2x8x8xf32> to vector<16x8xf32>
    %487 = arith.truncf %486 : vector<16x8xf32> to vector<16x8xbf16>
    %488 = vector.extract_strided_slice %34 {offsets = [3, 0, 0], sizes = [1, 8, 32], strides = [1, 1, 1]} : vector<4x8x32xbf16> to vector<1x8x32xbf16>
    %489 = vector.shape_cast %488 : vector<1x8x32xbf16> to vector<8x32xbf16>
    %cst_183 = arith.constant dense<0.000000e+00> : vector<16x32xf32>
    %490 = tpu.matmul %487, %489, %cst_183 {dimension_numbers = #tpu.dot_dimension_numbers<[1], [0], [0], [1], [0, 0, 1, 1], [], []>} : vector<16x8xbf16>, vector<8x32xbf16>, vector<16x32xf32> -> vector<16x32xf32>
    %491 = arith.addf %442, %490 : vector<16x32xf32>
    %492 = arith.addf %443, %483 : vector<2x8x16xf32>
    %493 = vector.broadcast %36 : vector<1x32xf32> to vector<16x32xf32>
    %494 = arith.addf %491, %493 : vector<16x32xf32>
    %495 = vector.shape_cast %494 : vector<16x32xf32> to vector<2x8x32xf32>
    %cst_184 = arith.constant 2.500000e-01 : f32
    %496 = vector.broadcast %cst_184 : f32 to vector<2x8x16xf32>
    %497 = arith.mulf %492, %496 : vector<2x8x16xf32>
    %498 = arith.addf %287, %495 : vector<2x8x32xf32>
    %cst_185 = arith.constant dense<0.000000e+00> : vector<2x8xf32>
    %499 = vector.multi_reduction <add>, %498, %cst_185 [2] : vector<2x8x32xf32> to vector<2x8xf32>
    %500 = vector.shape_cast %499 : vector<2x8xf32> to vector<2x8x1xf32>
    %cst_186 = arith.constant 3.200000e+01 : f32
    %501 = vector.broadcast %cst_186 : f32 to vector<2x8x1xf32>
    %502 = arith.divf %500, %501 : vector<2x8x1xf32>
    %503 = vector.broadcast %502 : vector<2x8x1xf32> to vector<2x8x32xf32>
    %504 = arith.subf %498, %503 : vector<2x8x32xf32>
    %505 = arith.mulf %504, %504 : vector<2x8x32xf32>
    %cst_187 = arith.constant dense<0.000000e+00> : vector<2x8xf32>
    %506 = vector.multi_reduction <add>, %505, %cst_187 [2] : vector<2x8x32xf32> to vector<2x8xf32>
    %507 = vector.shape_cast %506 : vector<2x8xf32> to vector<2x8x1xf32>
    %cst_188 = arith.constant 3.200000e+01 : f32
    %508 = vector.broadcast %cst_188 : f32 to vector<2x8x1xf32>
    %509 = arith.divf %507, %508 : vector<2x8x1xf32>
    %cst_189 = arith.constant 9.99999974E-6 : f32
    %510 = vector.broadcast %cst_189 : f32 to vector<2x8x1xf32>
    %511 = arith.addf %509, %510 : vector<2x8x1xf32>
    %512 = math.rsqrt %511 : vector<2x8x1xf32>
    %513 = vector.broadcast %512 : vector<2x8x1xf32> to vector<2x8x32xf32>
    %514 = arith.mulf %504, %513 : vector<2x8x32xf32>
    %515 = vector.shape_cast %50 : vector<1x32xf32> to vector<1x1x32xf32>
    %516 = vector.broadcast %515 : vector<1x1x32xf32> to vector<2x8x32xf32>
    %517 = arith.mulf %514, %516 : vector<2x8x32xf32>
    %518 = vector.shape_cast %52 : vector<1x32xf32> to vector<1x1x32xf32>
    %519 = vector.broadcast %518 : vector<1x1x32xf32> to vector<2x8x32xf32>
    %520 = arith.addf %517, %519 : vector<2x8x32xf32>
    %521 = vector.shape_cast %520 : vector<2x8x32xf32> to vector<16x32xf32>
    %522 = arith.truncf %521 : vector<16x32xf32> to vector<16x32xbf16>
    %cst_190 = arith.constant dense<0.000000e+00> : vector<16x64xf32>
    %523 = tpu.matmul %522, %38, %cst_190 {dimension_numbers = #tpu.dot_dimension_numbers<[1], [0], [0], [1], [0, 0, 1, 1], [], []>} : vector<16x32xbf16>, vector<32x64xbf16>, vector<16x64xf32> -> vector<16x64xf32>
    %524 = vector.broadcast %40 : vector<1x64xf32> to vector<16x64xf32>
    %525 = arith.addf %523, %524 : vector<16x64xf32>
    %cst_191 = arith.constant 0.000000e+00 : f32
    %526 = vector.broadcast %cst_191 : f32 to vector<16x64xf32>
    %527 = arith.maximumf %525, %526 : vector<16x64xf32>
    %528 = arith.truncf %527 : vector<16x64xf32> to vector<16x64xbf16>
    %cst_192 = arith.constant dense<0.000000e+00> : vector<16x32xf32>
    %529 = tpu.matmul %528, %42, %cst_192 {dimension_numbers = #tpu.dot_dimension_numbers<[1], [0], [0], [1], [0, 0, 1, 1], [], []>} : vector<16x64xbf16>, vector<64x32xbf16>, vector<16x32xf32> -> vector<16x32xf32>
    %530 = vector.broadcast %44 : vector<1x32xf32> to vector<16x32xf32>
    %531 = arith.addf %529, %530 : vector<16x32xf32>
    %532 = vector.shape_cast %531 : vector<16x32xf32> to vector<2x8x32xf32>
    %533 = arith.addf %520, %532 : vector<2x8x32xf32>
    %cst_193 = arith.constant dense<0.000000e+00> : vector<2x8xf32>
    %534 = vector.multi_reduction <add>, %533, %cst_193 [2] : vector<2x8x32xf32> to vector<2x8xf32>
    %535 = vector.shape_cast %534 : vector<2x8xf32> to vector<2x8x1xf32>
    %cst_194 = arith.constant 3.200000e+01 : f32
    %536 = vector.broadcast %cst_194 : f32 to vector<2x8x1xf32>
    %537 = arith.divf %535, %536 : vector<2x8x1xf32>
    %538 = vector.broadcast %537 : vector<2x8x1xf32> to vector<2x8x32xf32>
    %539 = arith.subf %533, %538 : vector<2x8x32xf32>
    %540 = arith.mulf %539, %539 : vector<2x8x32xf32>
    %cst_195 = arith.constant dense<0.000000e+00> : vector<2x8xf32>
    %541 = vector.multi_reduction <add>, %540, %cst_195 [2] : vector<2x8x32xf32> to vector<2x8xf32>
    %542 = vector.shape_cast %541 : vector<2x8xf32> to vector<2x8x1xf32>
    %cst_196 = arith.constant 3.200000e+01 : f32
    %543 = vector.broadcast %cst_196 : f32 to vector<2x8x1xf32>
    %544 = arith.divf %542, %543 : vector<2x8x1xf32>
    %cst_197 = arith.constant 9.99999974E-6 : f32
    %545 = vector.broadcast %cst_197 : f32 to vector<2x8x1xf32>
    %546 = arith.addf %544, %545 : vector<2x8x1xf32>
    %547 = math.rsqrt %546 : vector<2x8x1xf32>
    %548 = vector.broadcast %547 : vector<2x8x1xf32> to vector<2x8x32xf32>
    %549 = arith.mulf %539, %548 : vector<2x8x32xf32>
    %550 = vector.shape_cast %54 : vector<1x32xf32> to vector<1x1x32xf32>
    %551 = vector.broadcast %550 : vector<1x1x32xf32> to vector<2x8x32xf32>
    %552 = arith.mulf %549, %551 : vector<2x8x32xf32>
    %553 = vector.shape_cast %56 : vector<1x32xf32> to vector<1x1x32xf32>
    %554 = vector.broadcast %553 : vector<1x1x32xf32> to vector<2x8x32xf32>
    %555 = arith.addf %552, %554 : vector<2x8x32xf32>
    %c0_198 = arith.constant 0 : index
    %c0_199 = arith.constant 0 : index
    %c0_200 = arith.constant 0 : index
    %c0_201 = arith.constant 0 : index
    %556 = vector.load %arg33[%c0_198, %c0_199, %c0_200, %c0_201] : memref<2x2x8x8xf32, #tpu.memory_space<vmem>>, vector<1x2x8x8xf32>
    %557 = vector.shape_cast %556 : vector<1x2x8x8xf32> to vector<2x8x8xf32>
    %558 = vector.shape_cast %264 : vector<2x8x8xf32> to vector<1x2x8x8xf32>
    tpu.vector_store %arg33[%c0_198, %c0_199, %c0_200, %c0_201], %558 {strides = array<i32>} : memref<2x2x8x8xf32, #tpu.memory_space<vmem>>, vector<1x2x8x8xf32>,
    %c0_202 = arith.constant 0 : index
    %c0_203 = arith.constant 0 : index
    %c0_204 = arith.constant 0 : index
    %c0_205 = arith.constant 0 : index
    %559 = vector.load %arg34[%c0_202, %c0_203, %c0_204, %c0_205] : memref<2x2x8x16xf32, #tpu.memory_space<vmem>>, vector<1x2x8x16xf32>
    %560 = vector.shape_cast %559 : vector<1x2x8x16xf32> to vector<2x8x16xf32>
    %561 = vector.shape_cast %497 : vector<2x8x16xf32> to vector<1x2x8x16xf32>
    tpu.vector_store %arg34[%c0_202, %c0_203, %c0_204, %c0_205], %561 {strides = array<i32>} : memref<2x2x8x16xf32, #tpu.memory_space<vmem>>, vector<1x2x8x16xf32>,
    %c1 = arith.constant 1 : index
    %c0_206 = arith.constant 0 : index
    %c0_207 = arith.constant 0 : index
    %c0_208 = arith.constant 0 : index
    %562 = vector.load %arg4[%c1, %c0_206, %c0_207, %c0_208] : memref<2x4x32x8xbf16, #tpu.memory_space<vmem>>, vector<1x4x32x8xbf16>
    %563 = vector.shape_cast %562 : vector<1x4x32x8xbf16> to vector<4x32x8xbf16>
    %c1_209 = arith.constant 1 : index
    %c0_210 = arith.constant 0 : index
    %c0_211 = arith.constant 0 : index
    %c0_212 = arith.constant 0 : index
    %564 = vector.load %arg5[%c1_209, %c0_210, %c0_211, %c0_212] : memref<2x4x32x8xbf16, #tpu.memory_space<vmem>>, vector<1x4x32x8xbf16>
    %565 = vector.shape_cast %564 : vector<1x4x32x8xbf16> to vector<4x32x8xbf16>
    %c1_213 = arith.constant 1 : index
    %c0_214 = arith.constant 0 : index
    %c0_215 = arith.constant 0 : index
    %c0_216 = arith.constant 0 : index
    %566 = vector.load %arg6[%c1_213, %c0_214, %c0_215, %c0_216] : memref<2x4x32x8xbf16, #tpu.memory_space<vmem>>, vector<1x4x32x8xbf16>
    %567 = vector.shape_cast %566 : vector<1x4x32x8xbf16> to vector<4x32x8xbf16>
    %c1_217 = arith.constant 1 : index
    %c0_218 = arith.constant 0 : index
    %c0_219 = arith.constant 0 : index
    %c0_220 = arith.constant 0 : index
    %568 = vector.load %arg7[%c1_217, %c0_218, %c0_219, %c0_220] : memref<2x4x1x8xf32, #tpu.memory_space<vmem>>, vector<1x4x1x8xf32>
    %569 = vector.shape_cast %568 : vector<1x4x1x8xf32> to vector<4x1x8xf32>
    %c1_221 = arith.constant 1 : index
    %c0_222 = arith.constant 0 : index
    %c0_223 = arith.constant 0 : index
    %c0_224 = arith.constant 0 : index
    %570 = vector.load %arg8[%c1_221, %c0_222, %c0_223, %c0_224] : memref<2x4x1x8xf32, #tpu.memory_space<vmem>>, vector<1x4x1x8xf32>
    %571 = vector.shape_cast %570 : vector<1x4x1x8xf32> to vector<4x1x8xf32>
    %c1_225 = arith.constant 1 : index
    %c0_226 = arith.constant 0 : index
    %c0_227 = arith.constant 0 : index
    %c0_228 = arith.constant 0 : index
    %572 = vector.load %arg9[%c1_225, %c0_226, %c0_227, %c0_228] : memref<2x4x1x8xf32, #tpu.memory_space<vmem>>, vector<1x4x1x8xf32>
    %573 = vector.shape_cast %572 : vector<1x4x1x8xf32> to vector<4x1x8xf32>
    %c1_229 = arith.constant 1 : index
    %c0_230 = arith.constant 0 : index
    %c0_231 = arith.constant 0 : index
    %c0_232 = arith.constant 0 : index
    %574 = vector.load %arg10[%c1_229, %c0_230, %c0_231, %c0_232] : memref<2x4x8x32xbf16, #tpu.memory_space<vmem>>, vector<1x4x8x32xbf16>
    %575 = vector.shape_cast %574 : vector<1x4x8x32xbf16> to vector<4x8x32xbf16>
    %c1_233 = arith.constant 1 : index
    %c0_234 = arith.constant 0 : index
    %c0_235 = arith.constant 0 : index
    %576 = vector.load %arg11[%c1_233, %c0_234, %c0_235] : memref<2x1x32xf32, #tpu.memory_space<vmem>>, vector<1x1x32xf32>
    %577 = vector.shape_cast %576 : vector<1x1x32xf32> to vector<1x32xf32>
    %c1_236 = arith.constant 1 : index
    %c0_237 = arith.constant 0 : index
    %c0_238 = arith.constant 0 : index
    %c0_239 = arith.constant 0 : index
    %578 = vector.load %arg12[%c1_236, %c0_237, %c0_238, %c0_239] : memref<2x4x32x8xbf16, #tpu.memory_space<vmem>>, vector<1x4x32x8xbf16>
    %579 = vector.shape_cast %578 : vector<1x4x32x8xbf16> to vector<4x32x8xbf16>
    %c1_240 = arith.constant 1 : index
    %c0_241 = arith.constant 0 : index
    %c0_242 = arith.constant 0 : index
    %c0_243 = arith.constant 0 : index
    %580 = vector.load %arg13[%c1_240, %c0_241, %c0_242, %c0_243] : memref<2x4x32x8xbf16, #tpu.memory_space<vmem>>, vector<1x4x32x8xbf16>
    %581 = vector.shape_cast %580 : vector<1x4x32x8xbf16> to vector<4x32x8xbf16>
    %c1_244 = arith.constant 1 : index
    %c0_245 = arith.constant 0 : index
    %c0_246 = arith.constant 0 : index
    %c0_247 = arith.constant 0 : index
    %582 = vector.load %arg14[%c1_244, %c0_245, %c0_246, %c0_247] : memref<2x4x32x8xbf16, #tpu.memory_space<vmem>>, vector<1x4x32x8xbf16>
    %583 = vector.shape_cast %582 : vector<1x4x32x8xbf16> to vector<4x32x8xbf16>
    %c1_248 = arith.constant 1 : index
    %c0_249 = arith.constant 0 : index
    %c0_250 = arith.constant 0 : index
    %c0_251 = arith.constant 0 : index
    %584 = vector.load %arg15[%c1_248, %c0_249, %c0_250, %c0_251] : memref<2x4x1x8xf32, #tpu.memory_space<vmem>>, vector<1x4x1x8xf32>
    %585 = vector.shape_cast %584 : vector<1x4x1x8xf32> to vector<4x1x8xf32>
    %c1_252 = arith.constant 1 : index
    %c0_253 = arith.constant 0 : index
    %c0_254 = arith.constant 0 : index
    %c0_255 = arith.constant 0 : index
    %586 = vector.load %arg16[%c1_252, %c0_253, %c0_254, %c0_255] : memref<2x4x1x8xf32, #tpu.memory_space<vmem>>, vector<1x4x1x8xf32>
    %587 = vector.shape_cast %586 : vector<1x4x1x8xf32> to vector<4x1x8xf32>
    %c1_256 = arith.constant 1 : index
    %c0_257 = arith.constant 0 : index
    %c0_258 = arith.constant 0 : index
    %c0_259 = arith.constant 0 : index
    %588 = vector.load %arg17[%c1_256, %c0_257, %c0_258, %c0_259] : memref<2x4x1x8xf32, #tpu.memory_space<vmem>>, vector<1x4x1x8xf32>
    %589 = vector.shape_cast %588 : vector<1x4x1x8xf32> to vector<4x1x8xf32>
    %c1_260 = arith.constant 1 : index
    %c0_261 = arith.constant 0 : index
    %c0_262 = arith.constant 0 : index
    %c0_263 = arith.constant 0 : index
    %590 = vector.load %arg18[%c1_260, %c0_261, %c0_262, %c0_263] : memref<2x4x8x32xbf16, #tpu.memory_space<vmem>>, vector<1x4x8x32xbf16>
    %591 = vector.shape_cast %590 : vector<1x4x8x32xbf16> to vector<4x8x32xbf16>
    %c1_264 = arith.constant 1 : index
    %c0_265 = arith.constant 0 : index
    %c0_266 = arith.constant 0 : index
    %592 = vector.load %arg19[%c1_264, %c0_265, %c0_266] : memref<2x1x32xf32, #tpu.memory_space<vmem>>, vector<1x1x32xf32>
    %593 = vector.shape_cast %592 : vector<1x1x32xf32> to vector<1x32xf32>
    %c1_267 = arith.constant 1 : index
    %c0_268 = arith.constant 0 : index
    %c0_269 = arith.constant 0 : index
    %594 = vector.load %arg20[%c1_267, %c0_268, %c0_269] : memref<2x32x64xbf16, #tpu.memory_space<vmem>>, vector<1x32x64xbf16>
    %595 = vector.shape_cast %594 : vector<1x32x64xbf16> to vector<32x64xbf16>
    %c1_270 = arith.constant 1 : index
    %c0_271 = arith.constant 0 : index
    %c0_272 = arith.constant 0 : index
    %596 = vector.load %arg21[%c1_270, %c0_271, %c0_272] : memref<2x1x64xf32, #tpu.memory_space<vmem>>, vector<1x1x64xf32>
    %597 = vector.shape_cast %596 : vector<1x1x64xf32> to vector<1x64xf32>
    %c1_273 = arith.constant 1 : index
    %c0_274 = arith.constant 0 : index
    %c0_275 = arith.constant 0 : index
    %598 = vector.load %arg22[%c1_273, %c0_274, %c0_275] : memref<2x64x32xbf16, #tpu.memory_space<vmem>>, vector<1x64x32xbf16>
    %599 = vector.shape_cast %598 : vector<1x64x32xbf16> to vector<64x32xbf16>
    %c1_276 = arith.constant 1 : index
    %c0_277 = arith.constant 0 : index
    %c0_278 = arith.constant 0 : index
    %600 = vector.load %arg23[%c1_276, %c0_277, %c0_278] : memref<2x1x32xf32, #tpu.memory_space<vmem>>, vector<1x1x32xf32>
    %601 = vector.shape_cast %600 : vector<1x1x32xf32> to vector<1x32xf32>
    %c1_279 = arith.constant 1 : index
    %c0_280 = arith.constant 0 : index
    %c0_281 = arith.constant 0 : index
    %602 = vector.load %arg24[%c1_279, %c0_280, %c0_281] : memref<2x1x32xf32, #tpu.memory_space<vmem>>, vector<1x1x32xf32>
    %603 = vector.shape_cast %602 : vector<1x1x32xf32> to vector<1x32xf32>
    %c1_282 = arith.constant 1 : index
    %c0_283 = arith.constant 0 : index
    %c0_284 = arith.constant 0 : index
    %604 = vector.load %arg25[%c1_282, %c0_283, %c0_284] : memref<2x1x32xf32, #tpu.memory_space<vmem>>, vector<1x1x32xf32>
    %605 = vector.shape_cast %604 : vector<1x1x32xf32> to vector<1x32xf32>
    %c1_285 = arith.constant 1 : index
    %c0_286 = arith.constant 0 : index
    %c0_287 = arith.constant 0 : index
    %606 = vector.load %arg26[%c1_285, %c0_286, %c0_287] : memref<2x1x32xf32, #tpu.memory_space<vmem>>, vector<1x1x32xf32>
    %607 = vector.shape_cast %606 : vector<1x1x32xf32> to vector<1x32xf32>
    %c1_288 = arith.constant 1 : index
    %c0_289 = arith.constant 0 : index
    %c0_290 = arith.constant 0 : index
    %608 = vector.load %arg27[%c1_288, %c0_289, %c0_290] : memref<2x1x32xf32, #tpu.memory_space<vmem>>, vector<1x1x32xf32>
    %609 = vector.shape_cast %608 : vector<1x1x32xf32> to vector<1x32xf32>
    %c1_291 = arith.constant 1 : index
    %c0_292 = arith.constant 0 : index
    %c0_293 = arith.constant 0 : index
    %610 = vector.load %arg28[%c1_291, %c0_292, %c0_293] : memref<2x1x32xf32, #tpu.memory_space<vmem>>, vector<1x1x32xf32>
    %611 = vector.shape_cast %610 : vector<1x1x32xf32> to vector<1x32xf32>
    %c1_294 = arith.constant 1 : index
    %c0_295 = arith.constant 0 : index
    %c0_296 = arith.constant 0 : index
    %612 = vector.load %arg29[%c1_294, %c0_295, %c0_296] : memref<2x1x32xf32, #tpu.memory_space<vmem>>, vector<1x1x32xf32>
    %613 = vector.shape_cast %612 : vector<1x1x32xf32> to vector<1x32xf32>
    %614 = arith.addf %555, %2 : vector<2x8x32xf32>
    %615 = vector.shape_cast %614 : vector<2x8x32xf32> to vector<16x32xf32>
    %616 = arith.truncf %615 : vector<16x32xf32> to vector<16x32xbf16>
    %617 = vector.shape_cast %555 : vector<2x8x32xf32> to vector<16x32xf32>
    %618 = arith.truncf %617 : vector<16x32xf32> to vector<16x32xbf16>
    %cst_297 = arith.constant 0.000000e+00 : f32
    %619 = vector.broadcast %cst_297 : f32 to vector<16x32xf32>
    %cst_298 = arith.constant 0.000000e+00 : f32
    %620 = vector.broadcast %cst_298 : f32 to vector<2x8x8xf32>
    %621 = vector.extract_strided_slice %563 {offsets = [0, 0, 0], sizes = [1, 32, 8], strides = [1, 1, 1]} : vector<4x32x8xbf16> to vector<1x32x8xbf16>
    %622 = vector.shape_cast %621 : vector<1x32x8xbf16> to vector<32x8xbf16>
    %cst_299 = arith.constant dense<0.000000e+00> : vector<16x8xf32>
    %623 = tpu.matmul %616, %622, %cst_299 {dimension_numbers = #tpu.dot_dimension_numbers<[1], [0], [0], [1], [0, 0, 1, 1], [], []>} : vector<16x32xbf16>, vector<32x8xbf16>, vector<16x8xf32> -> vector<16x8xf32>
    %624 = vector.extract_strided_slice %569 {offsets = [0, 0, 0], sizes = [1, 1, 8], strides = [1, 1, 1]} : vector<4x1x8xf32> to vector<1x1x8xf32>
    %625 = vector.shape_cast %624 : vector<1x1x8xf32> to vector<1x8xf32>
    %626 = vector.broadcast %625 : vector<1x8xf32> to vector<16x8xf32>
    %627 = arith.addf %623, %626 : vector<16x8xf32>
    %cst_300 = arith.constant 0.353553385 : f32
    %628 = vector.broadcast %cst_300 : f32 to vector<16x8xf32>
    %629 = arith.mulf %627, %628 : vector<16x8xf32>
    %630 = vector.extract_strided_slice %565 {offsets = [0, 0, 0], sizes = [1, 32, 8], strides = [1, 1, 1]} : vector<4x32x8xbf16> to vector<1x32x8xbf16>
    %631 = vector.shape_cast %630 : vector<1x32x8xbf16> to vector<32x8xbf16>
    %cst_301 = arith.constant dense<0.000000e+00> : vector<16x8xf32>
    %632 = tpu.matmul %616, %631, %cst_301 {dimension_numbers = #tpu.dot_dimension_numbers<[1], [0], [0], [1], [0, 0, 1, 1], [], []>} : vector<16x32xbf16>, vector<32x8xbf16>, vector<16x8xf32> -> vector<16x8xf32>
    %633 = vector.extract_strided_slice %571 {offsets = [0, 0, 0], sizes = [1, 1, 8], strides = [1, 1, 1]} : vector<4x1x8xf32> to vector<1x1x8xf32>
    %634 = vector.shape_cast %633 : vector<1x1x8xf32> to vector<1x8xf32>
    %635 = vector.broadcast %634 : vector<1x8xf32> to vector<16x8xf32>
    %636 = arith.addf %632, %635 : vector<16x8xf32>
    %637 = vector.extract_strided_slice %567 {offsets = [0, 0, 0], sizes = [1, 32, 8], strides = [1, 1, 1]} : vector<4x32x8xbf16> to vector<1x32x8xbf16>
    %638 = vector.shape_cast %637 : vector<1x32x8xbf16> to vector<32x8xbf16>
    %cst_302 = arith.constant dense<0.000000e+00> : vector<16x8xf32>
    %639 = tpu.matmul %618, %638, %cst_302 {dimension_numbers = #tpu.dot_dimension_numbers<[1], [0], [0], [1], [0, 0, 1, 1], [], []>} : vector<16x32xbf16>, vector<32x8xbf16>, vector<16x8xf32> -> vector<16x8xf32>
    %640 = vector.extract_strided_slice %573 {offsets = [0, 0, 0], sizes = [1, 1, 8], strides = [1, 1, 1]} : vector<4x1x8xf32> to vector<1x1x8xf32>
    %641 = vector.shape_cast %640 : vector<1x1x8xf32> to vector<1x8xf32>
    %642 = vector.broadcast %641 : vector<1x8xf32> to vector<16x8xf32>
    %643 = arith.addf %639, %642 : vector<16x8xf32>
    %644 = vector.shape_cast %629 : vector<16x8xf32> to vector<2x8x8xf32>
    %645 = arith.truncf %644 : vector<2x8x8xf32> to vector<2x8x8xbf16>
    %646 = vector.shape_cast %636 : vector<16x8xf32> to vector<2x8x8xf32>
    %647 = arith.truncf %646 : vector<2x8x8xf32> to vector<2x8x8xbf16>
    %648 = vector.shape_cast %643 : vector<16x8xf32> to vector<2x8x8xf32>
    %649 = arith.truncf %648 : vector<2x8x8xf32> to vector<2x8x8xbf16>
    "tpu.trace_start"() <{level = 10 : i32, message = "btk,bsk->bts"}> : () -> ()
    %cst_303 = arith.constant dense<0.000000e+00> : vector<2x8x8xf32>
    %650 = tpu.matmul %645, %647, %cst_303 {dimension_numbers = #tpu.dot_dimension_numbers<[2], [2], [1], [1], [0, 0, 0, 1, 1, 1], [0], [0]>} : vector<2x8x8xbf16>, vector<2x8x8xbf16>, vector<2x8x8xf32> -> vector<2x8x8xf32>
    "tpu.trace_stop"() : () -> ()
    %cst_304 = arith.constant dense<0xFF800000> : vector<2x8xf32>
    %651 = vector.multi_reduction <maximumf>, %650, %cst_304 [2] : vector<2x8x8xf32> to vector<2x8xf32>
    %652 = vector.shape_cast %651 : vector<2x8xf32> to vector<2x8x1xf32>
    %653 = vector.broadcast %652 : vector<2x8x1xf32> to vector<2x8x8xf32>
    %654 = arith.subf %650, %653 : vector<2x8x8xf32>
    %655 = math.exp %654 : vector<2x8x8xf32>
    %cst_305 = arith.constant dense<0.000000e+00> : vector<2x8xf32>
    %656 = vector.multi_reduction <add>, %655, %cst_305 [2] : vector<2x8x8xf32> to vector<2x8xf32>
    %657 = vector.shape_cast %656 : vector<2x8xf32> to vector<2x8x1xf32>
    %658 = tpu.reciprocal %657 {approx = true} : vector<2x8x1xf32> -> vector<2x8x1xf32>
    %659 = vector.broadcast %658 : vector<2x8x1xf32> to vector<2x8x8xf32>
    %660 = arith.mulf %655, %659 : vector<2x8x8xf32>
    %661 = arith.truncf %660 : vector<2x8x8xf32> to vector<2x8x8xbf16>
    "tpu.trace_start"() <{level = 10 : i32, message = "bts,bsk->btk"}> : () -> ()
    %cst_306 = arith.constant dense<0.000000e+00> : vector<2x8x8xf32>
    %662 = tpu.matmul %661, %649, %cst_306 {dimension_numbers = #tpu.dot_dimension_numbers<[2], [1], [1], [2], [0, 0, 0, 1, 1, 2], [0], [0]>} : vector<2x8x8xbf16>, vector<2x8x8xbf16>, vector<2x8x8xf32> -> vector<2x8x8xf32>
    "tpu.trace_stop"() : () -> ()
    %663 = vector.shape_cast %662 : vector<2x8x8xf32> to vector<16x8xf32>
    %664 = arith.truncf %663 : vector<16x8xf32> to vector<16x8xbf16>
    %665 = vector.extract_strided_slice %575 {offsets = [0, 0, 0], sizes = [1, 8, 32], strides = [1, 1, 1]} : vector<4x8x32xbf16> to vector<1x8x32xbf16>
    %666 = vector.shape_cast %665 : vector<1x8x32xbf16> to vector<8x32xbf16>
    %cst_307 = arith.constant dense<0.000000e+00> : vector<16x32xf32>
    %667 = tpu.matmul %664, %666, %cst_307 {dimension_numbers = #tpu.dot_dimension_numbers<[1], [0], [0], [1], [0, 0, 1, 1], [], []>} : vector<16x8xbf16>, vector<8x32xbf16>, vector<16x32xf32> -> vector<16x32xf32>
    %668 = arith.addf %619, %667 : vector<16x32xf32>
    %669 = arith.addf %620, %660 : vector<2x8x8xf32>
    %670 = vector.extract_strided_slice %563 {offsets = [1, 0, 0], sizes = [1, 32, 8], strides = [1, 1, 1]} : vector<4x32x8xbf16> to vector<1x32x8xbf16>
    %671 = vector.shape_cast %670 : vector<1x32x8xbf16> to vector<32x8xbf16>
    %cst_308 = arith.constant dense<0.000000e+00> : vector<16x8xf32>
    %672 = tpu.matmul %616, %671, %cst_308 {dimension_numbers = #tpu.dot_dimension_numbers<[1], [0], [0], [1], [0, 0, 1, 1], [], []>} : vector<16x32xbf16>, vector<32x8xbf16>, vector<16x8xf32> -> vector<16x8xf32>
    %673 = vector.extract_strided_slice %569 {offsets = [1, 0, 0], sizes = [1, 1, 8], strides = [1, 1, 1]} : vector<4x1x8xf32> to vector<1x1x8xf32>
    %674 = vector.shape_cast %673 : vector<1x1x8xf32> to vector<1x8xf32>
    %675 = vector.broadcast %674 : vector<1x8xf32> to vector<16x8xf32>
    %676 = arith.addf %672, %675 : vector<16x8xf32>
    %cst_309 = arith.constant 0.353553385 : f32
    %677 = vector.broadcast %cst_309 : f32 to vector<16x8xf32>
    %678 = arith.mulf %676, %677 : vector<16x8xf32>
    %679 = vector.extract_strided_slice %565 {offsets = [1, 0, 0], sizes = [1, 32, 8], strides = [1, 1, 1]} : vector<4x32x8xbf16> to vector<1x32x8xbf16>
    %680 = vector.shape_cast %679 : vector<1x32x8xbf16> to vector<32x8xbf16>
    %cst_310 = arith.constant dense<0.000000e+00> : vector<16x8xf32>
    %681 = tpu.matmul %616, %680, %cst_310 {dimension_numbers = #tpu.dot_dimension_numbers<[1], [0], [0], [1], [0, 0, 1, 1], [], []>} : vector<16x32xbf16>, vector<32x8xbf16>, vector<16x8xf32> -> vector<16x8xf32>
    %682 = vector.extract_strided_slice %571 {offsets = [1, 0, 0], sizes = [1, 1, 8], strides = [1, 1, 1]} : vector<4x1x8xf32> to vector<1x1x8xf32>
    %683 = vector.shape_cast %682 : vector<1x1x8xf32> to vector<1x8xf32>
    %684 = vector.broadcast %683 : vector<1x8xf32> to vector<16x8xf32>
    %685 = arith.addf %681, %684 : vector<16x8xf32>
    %686 = vector.extract_strided_slice %567 {offsets = [1, 0, 0], sizes = [1, 32, 8], strides = [1, 1, 1]} : vector<4x32x8xbf16> to vector<1x32x8xbf16>
    %687 = vector.shape_cast %686 : vector<1x32x8xbf16> to vector<32x8xbf16>
    %cst_311 = arith.constant dense<0.000000e+00> : vector<16x8xf32>
    %688 = tpu.matmul %618, %687, %cst_311 {dimension_numbers = #tpu.dot_dimension_numbers<[1], [0], [0], [1], [0, 0, 1, 1], [], []>} : vector<16x32xbf16>, vector<32x8xbf16>, vector<16x8xf32> -> vector<16x8xf32>
    %689 = vector.extract_strided_slice %573 {offsets = [1, 0, 0], sizes = [1, 1, 8], strides = [1, 1, 1]} : vector<4x1x8xf32> to vector<1x1x8xf32>
    %690 = vector.shape_cast %689 : vector<1x1x8xf32> to vector<1x8xf32>
    %691 = vector.broadcast %690 : vector<1x8xf32> to vector<16x8xf32>
    %692 = arith.addf %688, %691 : vector<16x8xf32>
    %693 = vector.shape_cast %678 : vector<16x8xf32> to vector<2x8x8xf32>
    %694 = arith.truncf %693 : vector<2x8x8xf32> to vector<2x8x8xbf16>
    %695 = vector.shape_cast %685 : vector<16x8xf32> to vector<2x8x8xf32>
    %696 = arith.truncf %695 : vector<2x8x8xf32> to vector<2x8x8xbf16>
    %697 = vector.shape_cast %692 : vector<16x8xf32> to vector<2x8x8xf32>
    %698 = arith.truncf %697 : vector<2x8x8xf32> to vector<2x8x8xbf16>
    "tpu.trace_start"() <{level = 10 : i32, message = "btk,bsk->bts"}> : () -> ()
    %cst_312 = arith.constant dense<0.000000e+00> : vector<2x8x8xf32>
    %699 = tpu.matmul %694, %696, %cst_312 {dimension_numbers = #tpu.dot_dimension_numbers<[2], [2], [1], [1], [0, 0, 0, 1, 1, 1], [0], [0]>} : vector<2x8x8xbf16>, vector<2x8x8xbf16>, vector<2x8x8xf32> -> vector<2x8x8xf32>
    "tpu.trace_stop"() : () -> ()
    %cst_313 = arith.constant dense<0xFF800000> : vector<2x8xf32>
    %700 = vector.multi_reduction <maximumf>, %699, %cst_313 [2] : vector<2x8x8xf32> to vector<2x8xf32>
    %701 = vector.shape_cast %700 : vector<2x8xf32> to vector<2x8x1xf32>
    %702 = vector.broadcast %701 : vector<2x8x1xf32> to vector<2x8x8xf32>
    %703 = arith.subf %699, %702 : vector<2x8x8xf32>
    %704 = math.exp %703 : vector<2x8x8xf32>
    %cst_314 = arith.constant dense<0.000000e+00> : vector<2x8xf32>
    %705 = vector.multi_reduction <add>, %704, %cst_314 [2] : vector<2x8x8xf32> to vector<2x8xf32>
    %706 = vector.shape_cast %705 : vector<2x8xf32> to vector<2x8x1xf32>
    %707 = tpu.reciprocal %706 {approx = true} : vector<2x8x1xf32> -> vector<2x8x1xf32>
    %708 = vector.broadcast %707 : vector<2x8x1xf32> to vector<2x8x8xf32>
    %709 = arith.mulf %704, %708 : vector<2x8x8xf32>
    %710 = arith.truncf %709 : vector<2x8x8xf32> to vector<2x8x8xbf16>
    "tpu.trace_start"() <{level = 10 : i32, message = "bts,bsk->btk"}> : () -> ()
    %cst_315 = arith.constant dense<0.000000e+00> : vector<2x8x8xf32>
    %711 = tpu.matmul %710, %698, %cst_315 {dimension_numbers = #tpu.dot_dimension_numbers<[2], [1], [1], [2], [0, 0, 0, 1, 1, 2], [0], [0]>} : vector<2x8x8xbf16>, vector<2x8x8xbf16>, vector<2x8x8xf32> -> vector<2x8x8xf32>
    "tpu.trace_stop"() : () -> ()
    %712 = vector.shape_cast %711 : vector<2x8x8xf32> to vector<16x8xf32>
    %713 = arith.truncf %712 : vector<16x8xf32> to vector<16x8xbf16>
    %714 = vector.extract_strided_slice %575 {offsets = [1, 0, 0], sizes = [1, 8, 32], strides = [1, 1, 1]} : vector<4x8x32xbf16> to vector<1x8x32xbf16>
    %715 = vector.shape_cast %714 : vector<1x8x32xbf16> to vector<8x32xbf16>
    %cst_316 = arith.constant dense<0.000000e+00> : vector<16x32xf32>
    %716 = tpu.matmul %713, %715, %cst_316 {dimension_numbers = #tpu.dot_dimension_numbers<[1], [0], [0], [1], [0, 0, 1, 1], [], []>} : vector<16x8xbf16>, vector<8x32xbf16>, vector<16x32xf32> -> vector<16x32xf32>
    %717 = arith.addf %668, %716 : vector<16x32xf32>
    %718 = arith.addf %669, %709 : vector<2x8x8xf32>
    %719 = vector.extract_strided_slice %563 {offsets = [2, 0, 0], sizes = [1, 32, 8], strides = [1, 1, 1]} : vector<4x32x8xbf16> to vector<1x32x8xbf16>
    %720 = vector.shape_cast %719 : vector<1x32x8xbf16> to vector<32x8xbf16>
    %cst_317 = arith.constant dense<0.000000e+00> : vector<16x8xf32>
    %721 = tpu.matmul %616, %720, %cst_317 {dimension_numbers = #tpu.dot_dimension_numbers<[1], [0], [0], [1], [0, 0, 1, 1], [], []>} : vector<16x32xbf16>, vector<32x8xbf16>, vector<16x8xf32> -> vector<16x8xf32>
    %722 = vector.extract_strided_slice %569 {offsets = [2, 0, 0], sizes = [1, 1, 8], strides = [1, 1, 1]} : vector<4x1x8xf32> to vector<1x1x8xf32>
    %723 = vector.shape_cast %722 : vector<1x1x8xf32> to vector<1x8xf32>
    %724 = vector.broadcast %723 : vector<1x8xf32> to vector<16x8xf32>
    %725 = arith.addf %721, %724 : vector<16x8xf32>
    %cst_318 = arith.constant 0.353553385 : f32
    %726 = vector.broadcast %cst_318 : f32 to vector<16x8xf32>
    %727 = arith.mulf %725, %726 : vector<16x8xf32>
    %728 = vector.extract_strided_slice %565 {offsets = [2, 0, 0], sizes = [1, 32, 8], strides = [1, 1, 1]} : vector<4x32x8xbf16> to vector<1x32x8xbf16>
    %729 = vector.shape_cast %728 : vector<1x32x8xbf16> to vector<32x8xbf16>
    %cst_319 = arith.constant dense<0.000000e+00> : vector<16x8xf32>
    %730 = tpu.matmul %616, %729, %cst_319 {dimension_numbers = #tpu.dot_dimension_numbers<[1], [0], [0], [1], [0, 0, 1, 1], [], []>} : vector<16x32xbf16>, vector<32x8xbf16>, vector<16x8xf32> -> vector<16x8xf32>
    %731 = vector.extract_strided_slice %571 {offsets = [2, 0, 0], sizes = [1, 1, 8], strides = [1, 1, 1]} : vector<4x1x8xf32> to vector<1x1x8xf32>
    %732 = vector.shape_cast %731 : vector<1x1x8xf32> to vector<1x8xf32>
    %733 = vector.broadcast %732 : vector<1x8xf32> to vector<16x8xf32>
    %734 = arith.addf %730, %733 : vector<16x8xf32>
    %735 = vector.extract_strided_slice %567 {offsets = [2, 0, 0], sizes = [1, 32, 8], strides = [1, 1, 1]} : vector<4x32x8xbf16> to vector<1x32x8xbf16>
    %736 = vector.shape_cast %735 : vector<1x32x8xbf16> to vector<32x8xbf16>
    %cst_320 = arith.constant dense<0.000000e+00> : vector<16x8xf32>
    %737 = tpu.matmul %618, %736, %cst_320 {dimension_numbers = #tpu.dot_dimension_numbers<[1], [0], [0], [1], [0, 0, 1, 1], [], []>} : vector<16x32xbf16>, vector<32x8xbf16>, vector<16x8xf32> -> vector<16x8xf32>
    %738 = vector.extract_strided_slice %573 {offsets = [2, 0, 0], sizes = [1, 1, 8], strides = [1, 1, 1]} : vector<4x1x8xf32> to vector<1x1x8xf32>
    %739 = vector.shape_cast %738 : vector<1x1x8xf32> to vector<1x8xf32>
    %740 = vector.broadcast %739 : vector<1x8xf32> to vector<16x8xf32>
    %741 = arith.addf %737, %740 : vector<16x8xf32>
    %742 = vector.shape_cast %727 : vector<16x8xf32> to vector<2x8x8xf32>
    %743 = arith.truncf %742 : vector<2x8x8xf32> to vector<2x8x8xbf16>
    %744 = vector.shape_cast %734 : vector<16x8xf32> to vector<2x8x8xf32>
    %745 = arith.truncf %744 : vector<2x8x8xf32> to vector<2x8x8xbf16>
    %746 = vector.shape_cast %741 : vector<16x8xf32> to vector<2x8x8xf32>
    %747 = arith.truncf %746 : vector<2x8x8xf32> to vector<2x8x8xbf16>
    "tpu.trace_start"() <{level = 10 : i32, message = "btk,bsk->bts"}> : () -> ()
    %cst_321 = arith.constant dense<0.000000e+00> : vector<2x8x8xf32>
    %748 = tpu.matmul %743, %745, %cst_321 {dimension_numbers = #tpu.dot_dimension_numbers<[2], [2], [1], [1], [0, 0, 0, 1, 1, 1], [0], [0]>} : vector<2x8x8xbf16>, vector<2x8x8xbf16>, vector<2x8x8xf32> -> vector<2x8x8xf32>
    "tpu.trace_stop"() : () -> ()
    %cst_322 = arith.constant dense<0xFF800000> : vector<2x8xf32>
    %749 = vector.multi_reduction <maximumf>, %748, %cst_322 [2] : vector<2x8x8xf32> to vector<2x8xf32>
    %750 = vector.shape_cast %749 : vector<2x8xf32> to vector<2x8x1xf32>
    %751 = vector.broadcast %750 : vector<2x8x1xf32> to vector<2x8x8xf32>
    %752 = arith.subf %748, %751 : vector<2x8x8xf32>
    %753 = math.exp %752 : vector<2x8x8xf32>
    %cst_323 = arith.constant dense<0.000000e+00> : vector<2x8xf32>
    %754 = vector.multi_reduction <add>, %753, %cst_323 [2] : vector<2x8x8xf32> to vector<2x8xf32>
    %755 = vector.shape_cast %754 : vector<2x8xf32> to vector<2x8x1xf32>
    %756 = tpu.reciprocal %755 {approx = true} : vector<2x8x1xf32> -> vector<2x8x1xf32>
    %757 = vector.broadcast %756 : vector<2x8x1xf32> to vector<2x8x8xf32>
    %758 = arith.mulf %753, %757 : vector<2x8x8xf32>
    %759 = arith.truncf %758 : vector<2x8x8xf32> to vector<2x8x8xbf16>
    "tpu.trace_start"() <{level = 10 : i32, message = "bts,bsk->btk"}> : () -> ()
    %cst_324 = arith.constant dense<0.000000e+00> : vector<2x8x8xf32>
    %760 = tpu.matmul %759, %747, %cst_324 {dimension_numbers = #tpu.dot_dimension_numbers<[2], [1], [1], [2], [0, 0, 0, 1, 1, 2], [0], [0]>} : vector<2x8x8xbf16>, vector<2x8x8xbf16>, vector<2x8x8xf32> -> vector<2x8x8xf32>
    "tpu.trace_stop"() : () -> ()
    %761 = vector.shape_cast %760 : vector<2x8x8xf32> to vector<16x8xf32>
    %762 = arith.truncf %761 : vector<16x8xf32> to vector<16x8xbf16>
    %763 = vector.extract_strided_slice %575 {offsets = [2, 0, 0], sizes = [1, 8, 32], strides = [1, 1, 1]} : vector<4x8x32xbf16> to vector<1x8x32xbf16>
    %764 = vector.shape_cast %763 : vector<1x8x32xbf16> to vector<8x32xbf16>
    %cst_325 = arith.constant dense<0.000000e+00> : vector<16x32xf32>
    %765 = tpu.matmul %762, %764, %cst_325 {dimension_numbers = #tpu.dot_dimension_numbers<[1], [0], [0], [1], [0, 0, 1, 1], [], []>} : vector<16x8xbf16>, vector<8x32xbf16>, vector<16x32xf32> -> vector<16x32xf32>
    %766 = arith.addf %717, %765 : vector<16x32xf32>
    %767 = arith.addf %718, %758 : vector<2x8x8xf32>
    %768 = vector.extract_strided_slice %563 {offsets = [3, 0, 0], sizes = [1, 32, 8], strides = [1, 1, 1]} : vector<4x32x8xbf16> to vector<1x32x8xbf16>
    %769 = vector.shape_cast %768 : vector<1x32x8xbf16> to vector<32x8xbf16>
    %cst_326 = arith.constant dense<0.000000e+00> : vector<16x8xf32>
    %770 = tpu.matmul %616, %769, %cst_326 {dimension_numbers = #tpu.dot_dimension_numbers<[1], [0], [0], [1], [0, 0, 1, 1], [], []>} : vector<16x32xbf16>, vector<32x8xbf16>, vector<16x8xf32> -> vector<16x8xf32>
    %771 = vector.extract_strided_slice %569 {offsets = [3, 0, 0], sizes = [1, 1, 8], strides = [1, 1, 1]} : vector<4x1x8xf32> to vector<1x1x8xf32>
    %772 = vector.shape_cast %771 : vector<1x1x8xf32> to vector<1x8xf32>
    %773 = vector.broadcast %772 : vector<1x8xf32> to vector<16x8xf32>
    %774 = arith.addf %770, %773 : vector<16x8xf32>
    %cst_327 = arith.constant 0.353553385 : f32
    %775 = vector.broadcast %cst_327 : f32 to vector<16x8xf32>
    %776 = arith.mulf %774, %775 : vector<16x8xf32>
    %777 = vector.extract_strided_slice %565 {offsets = [3, 0, 0], sizes = [1, 32, 8], strides = [1, 1, 1]} : vector<4x32x8xbf16> to vector<1x32x8xbf16>
    %778 = vector.shape_cast %777 : vector<1x32x8xbf16> to vector<32x8xbf16>
    %cst_328 = arith.constant dense<0.000000e+00> : vector<16x8xf32>
    %779 = tpu.matmul %616, %778, %cst_328 {dimension_numbers = #tpu.dot_dimension_numbers<[1], [0], [0], [1], [0, 0, 1, 1], [], []>} : vector<16x32xbf16>, vector<32x8xbf16>, vector<16x8xf32> -> vector<16x8xf32>
    %780 = vector.extract_strided_slice %571 {offsets = [3, 0, 0], sizes = [1, 1, 8], strides = [1, 1, 1]} : vector<4x1x8xf32> to vector<1x1x8xf32>
    %781 = vector.shape_cast %780 : vector<1x1x8xf32> to vector<1x8xf32>
    %782 = vector.broadcast %781 : vector<1x8xf32> to vector<16x8xf32>
    %783 = arith.addf %779, %782 : vector<16x8xf32>
    %784 = vector.extract_strided_slice %567 {offsets = [3, 0, 0], sizes = [1, 32, 8], strides = [1, 1, 1]} : vector<4x32x8xbf16> to vector<1x32x8xbf16>
    %785 = vector.shape_cast %784 : vector<1x32x8xbf16> to vector<32x8xbf16>
    %cst_329 = arith.constant dense<0.000000e+00> : vector<16x8xf32>
    %786 = tpu.matmul %618, %785, %cst_329 {dimension_numbers = #tpu.dot_dimension_numbers<[1], [0], [0], [1], [0, 0, 1, 1], [], []>} : vector<16x32xbf16>, vector<32x8xbf16>, vector<16x8xf32> -> vector<16x8xf32>
    %787 = vector.extract_strided_slice %573 {offsets = [3, 0, 0], sizes = [1, 1, 8], strides = [1, 1, 1]} : vector<4x1x8xf32> to vector<1x1x8xf32>
    %788 = vector.shape_cast %787 : vector<1x1x8xf32> to vector<1x8xf32>
    %789 = vector.broadcast %788 : vector<1x8xf32> to vector<16x8xf32>
    %790 = arith.addf %786, %789 : vector<16x8xf32>
    %791 = vector.shape_cast %776 : vector<16x8xf32> to vector<2x8x8xf32>
    %792 = arith.truncf %791 : vector<2x8x8xf32> to vector<2x8x8xbf16>
    %793 = vector.shape_cast %783 : vector<16x8xf32> to vector<2x8x8xf32>
    %794 = arith.truncf %793 : vector<2x8x8xf32> to vector<2x8x8xbf16>
    %795 = vector.shape_cast %790 : vector<16x8xf32> to vector<2x8x8xf32>
    %796 = arith.truncf %795 : vector<2x8x8xf32> to vector<2x8x8xbf16>
    "tpu.trace_start"() <{level = 10 : i32, message = "btk,bsk->bts"}> : () -> ()
    %cst_330 = arith.constant dense<0.000000e+00> : vector<2x8x8xf32>
    %797 = tpu.matmul %792, %794, %cst_330 {dimension_numbers = #tpu.dot_dimension_numbers<[2], [2], [1], [1], [0, 0, 0, 1, 1, 1], [0], [0]>} : vector<2x8x8xbf16>, vector<2x8x8xbf16>, vector<2x8x8xf32> -> vector<2x8x8xf32>
    "tpu.trace_stop"() : () -> ()
    %cst_331 = arith.constant dense<0xFF800000> : vector<2x8xf32>
    %798 = vector.multi_reduction <maximumf>, %797, %cst_331 [2] : vector<2x8x8xf32> to vector<2x8xf32>
    %799 = vector.shape_cast %798 : vector<2x8xf32> to vector<2x8x1xf32>
    %800 = vector.broadcast %799 : vector<2x8x1xf32> to vector<2x8x8xf32>
    %801 = arith.subf %797, %800 : vector<2x8x8xf32>
    %802 = math.exp %801 : vector<2x8x8xf32>
    %cst_332 = arith.constant dense<0.000000e+00> : vector<2x8xf32>
    %803 = vector.multi_reduction <add>, %802, %cst_332 [2] : vector<2x8x8xf32> to vector<2x8xf32>
    %804 = vector.shape_cast %803 : vector<2x8xf32> to vector<2x8x1xf32>
    %805 = tpu.reciprocal %804 {approx = true} : vector<2x8x1xf32> -> vector<2x8x1xf32>
    %806 = vector.broadcast %805 : vector<2x8x1xf32> to vector<2x8x8xf32>
    %807 = arith.mulf %802, %806 : vector<2x8x8xf32>
    %808 = arith.truncf %807 : vector<2x8x8xf32> to vector<2x8x8xbf16>
    "tpu.trace_start"() <{level = 10 : i32, message = "bts,bsk->btk"}> : () -> ()
    %cst_333 = arith.constant dense<0.000000e+00> : vector<2x8x8xf32>
    %809 = tpu.matmul %808, %796, %cst_333 {dimension_numbers = #tpu.dot_dimension_numbers<[2], [1], [1], [2], [0, 0, 0, 1, 1, 2], [0], [0]>} : vector<2x8x8xbf16>, vector<2x8x8xbf16>, vector<2x8x8xf32> -> vector<2x8x8xf32>
    "tpu.trace_stop"() : () -> ()
    %810 = vector.shape_cast %809 : vector<2x8x8xf32> to vector<16x8xf32>
    %811 = arith.truncf %810 : vector<16x8xf32> to vector<16x8xbf16>
    %812 = vector.extract_strided_slice %575 {offsets = [3, 0, 0], sizes = [1, 8, 32], strides = [1, 1, 1]} : vector<4x8x32xbf16> to vector<1x8x32xbf16>
    %813 = vector.shape_cast %812 : vector<1x8x32xbf16> to vector<8x32xbf16>
    %cst_334 = arith.constant dense<0.000000e+00> : vector<16x32xf32>
    %814 = tpu.matmul %811, %813, %cst_334 {dimension_numbers = #tpu.dot_dimension_numbers<[1], [0], [0], [1], [0, 0, 1, 1], [], []>} : vector<16x8xbf16>, vector<8x32xbf16>, vector<16x32xf32> -> vector<16x32xf32>
    %815 = arith.addf %766, %814 : vector<16x32xf32>
    %816 = arith.addf %767, %807 : vector<2x8x8xf32>
    %817 = vector.broadcast %577 : vector<1x32xf32> to vector<16x32xf32>
    %818 = arith.addf %815, %817 : vector<16x32xf32>
    %819 = vector.shape_cast %818 : vector<16x32xf32> to vector<2x8x32xf32>
    %cst_335 = arith.constant 2.500000e-01 : f32
    %820 = vector.broadcast %cst_335 : f32 to vector<2x8x8xf32>
    %821 = arith.mulf %816, %820 : vector<2x8x8xf32>
    %822 = arith.addf %555, %819 : vector<2x8x32xf32>
    %cst_336 = arith.constant dense<0.000000e+00> : vector<2x8xf32>
    %823 = vector.multi_reduction <add>, %822, %cst_336 [2] : vector<2x8x32xf32> to vector<2x8xf32>
    %824 = vector.shape_cast %823 : vector<2x8xf32> to vector<2x8x1xf32>
    %cst_337 = arith.constant 3.200000e+01 : f32
    %825 = vector.broadcast %cst_337 : f32 to vector<2x8x1xf32>
    %826 = arith.divf %824, %825 : vector<2x8x1xf32>
    %827 = vector.broadcast %826 : vector<2x8x1xf32> to vector<2x8x32xf32>
    %828 = arith.subf %822, %827 : vector<2x8x32xf32>
    %829 = arith.mulf %828, %828 : vector<2x8x32xf32>
    %cst_338 = arith.constant dense<0.000000e+00> : vector<2x8xf32>
    %830 = vector.multi_reduction <add>, %829, %cst_338 [2] : vector<2x8x32xf32> to vector<2x8xf32>
    %831 = vector.shape_cast %830 : vector<2x8xf32> to vector<2x8x1xf32>
    %cst_339 = arith.constant 3.200000e+01 : f32
    %832 = vector.broadcast %cst_339 : f32 to vector<2x8x1xf32>
    %833 = arith.divf %831, %832 : vector<2x8x1xf32>
    %cst_340 = arith.constant 9.99999974E-6 : f32
    %834 = vector.broadcast %cst_340 : f32 to vector<2x8x1xf32>
    %835 = arith.addf %833, %834 : vector<2x8x1xf32>
    %836 = math.rsqrt %835 : vector<2x8x1xf32>
    %837 = vector.broadcast %836 : vector<2x8x1xf32> to vector<2x8x32xf32>
    %838 = arith.mulf %828, %837 : vector<2x8x32xf32>
    %839 = vector.shape_cast %603 : vector<1x32xf32> to vector<1x1x32xf32>
    %840 = vector.broadcast %839 : vector<1x1x32xf32> to vector<2x8x32xf32>
    %841 = arith.mulf %838, %840 : vector<2x8x32xf32>
    %842 = vector.shape_cast %605 : vector<1x32xf32> to vector<1x1x32xf32>
    %843 = vector.broadcast %842 : vector<1x1x32xf32> to vector<2x8x32xf32>
    %844 = arith.addf %841, %843 : vector<2x8x32xf32>
    %845 = arith.addf %844, %2 : vector<2x8x32xf32>
    %846 = vector.shape_cast %845 : vector<2x8x32xf32> to vector<16x32xf32>
    %847 = arith.truncf %846 : vector<16x32xf32> to vector<16x32xbf16>
    %848 = vector.shape_cast %4 : vector<2x16x32xf32> to vector<32x32xf32>
    %849 = arith.truncf %848 : vector<32x32xf32> to vector<32x32xbf16>
    %850 = vector.shape_cast %1 : vector<2x16x32xf32> to vector<32x32xf32>
    %851 = arith.truncf %850 : vector<32x32xf32> to vector<32x32xbf16>
    %cst_341 = arith.constant 0.000000e+00 : f32
    %852 = vector.broadcast %cst_341 : f32 to vector<16x32xf32>
    %cst_342 = arith.constant 0.000000e+00 : f32
    %853 = vector.broadcast %cst_342 : f32 to vector<2x8x16xf32>
    %854 = vector.extract_strided_slice %579 {offsets = [0, 0, 0], sizes = [1, 32, 8], strides = [1, 1, 1]} : vector<4x32x8xbf16> to vector<1x32x8xbf16>
    %855 = vector.shape_cast %854 : vector<1x32x8xbf16> to vector<32x8xbf16>
    %cst_343 = arith.constant dense<0.000000e+00> : vector<16x8xf32>
    %856 = tpu.matmul %847, %855, %cst_343 {dimension_numbers = #tpu.dot_dimension_numbers<[1], [0], [0], [1], [0, 0, 1, 1], [], []>} : vector<16x32xbf16>, vector<32x8xbf16>, vector<16x8xf32> -> vector<16x8xf32>
    %857 = vector.extract_strided_slice %585 {offsets = [0, 0, 0], sizes = [1, 1, 8], strides = [1, 1, 1]} : vector<4x1x8xf32> to vector<1x1x8xf32>
    %858 = vector.shape_cast %857 : vector<1x1x8xf32> to vector<1x8xf32>
    %859 = vector.broadcast %858 : vector<1x8xf32> to vector<16x8xf32>
    %860 = arith.addf %856, %859 : vector<16x8xf32>
    %cst_344 = arith.constant 0.353553385 : f32
    %861 = vector.broadcast %cst_344 : f32 to vector<16x8xf32>
    %862 = arith.mulf %860, %861 : vector<16x8xf32>
    %863 = vector.extract_strided_slice %581 {offsets = [0, 0, 0], sizes = [1, 32, 8], strides = [1, 1, 1]} : vector<4x32x8xbf16> to vector<1x32x8xbf16>
    %864 = vector.shape_cast %863 : vector<1x32x8xbf16> to vector<32x8xbf16>
    %cst_345 = arith.constant dense<0.000000e+00> : vector<32x8xf32>
    %865 = tpu.matmul %849, %864, %cst_345 {dimension_numbers = #tpu.dot_dimension_numbers<[1], [0], [0], [1], [0, 0, 1, 1], [], []>} : vector<32x32xbf16>, vector<32x8xbf16>, vector<32x8xf32> -> vector<32x8xf32>
    %866 = vector.extract_strided_slice %587 {offsets = [0, 0, 0], sizes = [1, 1, 8], strides = [1, 1, 1]} : vector<4x1x8xf32> to vector<1x1x8xf32>
    %867 = vector.shape_cast %866 : vector<1x1x8xf32> to vector<1x8xf32>
    %868 = vector.broadcast %867 : vector<1x8xf32> to vector<32x8xf32>
    %869 = arith.addf %865, %868 : vector<32x8xf32>
    %870 = vector.extract_strided_slice %583 {offsets = [0, 0, 0], sizes = [1, 32, 8], strides = [1, 1, 1]} : vector<4x32x8xbf16> to vector<1x32x8xbf16>
    %871 = vector.shape_cast %870 : vector<1x32x8xbf16> to vector<32x8xbf16>
    %cst_346 = arith.constant dense<0.000000e+00> : vector<32x8xf32>
    %872 = tpu.matmul %851, %871, %cst_346 {dimension_numbers = #tpu.dot_dimension_numbers<[1], [0], [0], [1], [0, 0, 1, 1], [], []>} : vector<32x32xbf16>, vector<32x8xbf16>, vector<32x8xf32> -> vector<32x8xf32>
    %873 = vector.extract_strided_slice %589 {offsets = [0, 0, 0], sizes = [1, 1, 8], strides = [1, 1, 1]} : vector<4x1x8xf32> to vector<1x1x8xf32>
    %874 = vector.shape_cast %873 : vector<1x1x8xf32> to vector<1x8xf32>
    %875 = vector.broadcast %874 : vector<1x8xf32> to vector<32x8xf32>
    %876 = arith.addf %872, %875 : vector<32x8xf32>
    %877 = vector.shape_cast %862 : vector<16x8xf32> to vector<2x8x8xf32>
    %878 = arith.truncf %877 : vector<2x8x8xf32> to vector<2x8x8xbf16>
    %879 = vector.shape_cast %869 : vector<32x8xf32> to vector<2x16x8xf32>
    %880 = arith.truncf %879 : vector<2x16x8xf32> to vector<2x16x8xbf16>
    %881 = vector.shape_cast %876 : vector<32x8xf32> to vector<2x16x8xf32>
    %882 = arith.truncf %881 : vector<2x16x8xf32> to vector<2x16x8xbf16>
    "tpu.trace_start"() <{level = 10 : i32, message = "btk,bsk->bts"}> : () -> ()
    %cst_347 = arith.constant dense<0.000000e+00> : vector<2x8x16xf32>
    %883 = tpu.matmul %878, %880, %cst_347 {dimension_numbers = #tpu.dot_dimension_numbers<[2], [2], [1], [1], [0, 0, 0, 1, 1, 1], [0], [0]>} : vector<2x8x8xbf16>, vector<2x16x8xbf16>, vector<2x8x16xf32> -> vector<2x8x16xf32>
    "tpu.trace_stop"() : () -> ()
    %cst_348 = arith.constant dense<0xFF800000> : vector<2x8xf32>
    %884 = vector.multi_reduction <maximumf>, %883, %cst_348 [2] : vector<2x8x16xf32> to vector<2x8xf32>
    %885 = vector.shape_cast %884 : vector<2x8xf32> to vector<2x8x1xf32>
    %886 = vector.broadcast %885 : vector<2x8x1xf32> to vector<2x8x16xf32>
    %887 = arith.subf %883, %886 : vector<2x8x16xf32>
    %888 = math.exp %887 : vector<2x8x16xf32>
    %cst_349 = arith.constant dense<0.000000e+00> : vector<2x8xf32>
    %889 = vector.multi_reduction <add>, %888, %cst_349 [2] : vector<2x8x16xf32> to vector<2x8xf32>
    %890 = vector.shape_cast %889 : vector<2x8xf32> to vector<2x8x1xf32>
    %891 = tpu.reciprocal %890 {approx = true} : vector<2x8x1xf32> -> vector<2x8x1xf32>
    %892 = vector.broadcast %891 : vector<2x8x1xf32> to vector<2x8x16xf32>
    %893 = arith.mulf %888, %892 : vector<2x8x16xf32>
    %894 = arith.truncf %893 : vector<2x8x16xf32> to vector<2x8x16xbf16>
    "tpu.trace_start"() <{level = 10 : i32, message = "bts,bsk->btk"}> : () -> ()
    %cst_350 = arith.constant dense<0.000000e+00> : vector<2x8x8xf32>
    %895 = tpu.matmul %894, %882, %cst_350 {dimension_numbers = #tpu.dot_dimension_numbers<[2], [1], [1], [2], [0, 0, 0, 1, 1, 2], [0], [0]>} : vector<2x8x16xbf16>, vector<2x16x8xbf16>, vector<2x8x8xf32> -> vector<2x8x8xf32>
    "tpu.trace_stop"() : () -> ()
    %896 = vector.shape_cast %895 : vector<2x8x8xf32> to vector<16x8xf32>
    %897 = arith.truncf %896 : vector<16x8xf32> to vector<16x8xbf16>
    %898 = vector.extract_strided_slice %591 {offsets = [0, 0, 0], sizes = [1, 8, 32], strides = [1, 1, 1]} : vector<4x8x32xbf16> to vector<1x8x32xbf16>
    %899 = vector.shape_cast %898 : vector<1x8x32xbf16> to vector<8x32xbf16>
    %cst_351 = arith.constant dense<0.000000e+00> : vector<16x32xf32>
    %900 = tpu.matmul %897, %899, %cst_351 {dimension_numbers = #tpu.dot_dimension_numbers<[1], [0], [0], [1], [0, 0, 1, 1], [], []>} : vector<16x8xbf16>, vector<8x32xbf16>, vector<16x32xf32> -> vector<16x32xf32>
    %901 = arith.addf %852, %900 : vector<16x32xf32>
    %902 = arith.addf %853, %893 : vector<2x8x16xf32>
    %903 = vector.extract_strided_slice %579 {offsets = [1, 0, 0], sizes = [1, 32, 8], strides = [1, 1, 1]} : vector<4x32x8xbf16> to vector<1x32x8xbf16>
    %904 = vector.shape_cast %903 : vector<1x32x8xbf16> to vector<32x8xbf16>
    %cst_352 = arith.constant dense<0.000000e+00> : vector<16x8xf32>
    %905 = tpu.matmul %847, %904, %cst_352 {dimension_numbers = #tpu.dot_dimension_numbers<[1], [0], [0], [1], [0, 0, 1, 1], [], []>} : vector<16x32xbf16>, vector<32x8xbf16>, vector<16x8xf32> -> vector<16x8xf32>
    %906 = vector.extract_strided_slice %585 {offsets = [1, 0, 0], sizes = [1, 1, 8], strides = [1, 1, 1]} : vector<4x1x8xf32> to vector<1x1x8xf32>
    %907 = vector.shape_cast %906 : vector<1x1x8xf32> to vector<1x8xf32>
    %908 = vector.broadcast %907 : vector<1x8xf32> to vector<16x8xf32>
    %909 = arith.addf %905, %908 : vector<16x8xf32>
    %cst_353 = arith.constant 0.353553385 : f32
    %910 = vector.broadcast %cst_353 : f32 to vector<16x8xf32>
    %911 = arith.mulf %909, %910 : vector<16x8xf32>
    %912 = vector.extract_strided_slice %581 {offsets = [1, 0, 0], sizes = [1, 32, 8], strides = [1, 1, 1]} : vector<4x32x8xbf16> to vector<1x32x8xbf16>
    %913 = vector.shape_cast %912 : vector<1x32x8xbf16> to vector<32x8xbf16>
    %cst_354 = arith.constant dense<0.000000e+00> : vector<32x8xf32>
    %914 = tpu.matmul %849, %913, %cst_354 {dimension_numbers = #tpu.dot_dimension_numbers<[1], [0], [0], [1], [0, 0, 1, 1], [], []>} : vector<32x32xbf16>, vector<32x8xbf16>, vector<32x8xf32> -> vector<32x8xf32>
    %915 = vector.extract_strided_slice %587 {offsets = [1, 0, 0], sizes = [1, 1, 8], strides = [1, 1, 1]} : vector<4x1x8xf32> to vector<1x1x8xf32>
    %916 = vector.shape_cast %915 : vector<1x1x8xf32> to vector<1x8xf32>
    %917 = vector.broadcast %916 : vector<1x8xf32> to vector<32x8xf32>
    %918 = arith.addf %914, %917 : vector<32x8xf32>
    %919 = vector.extract_strided_slice %583 {offsets = [1, 0, 0], sizes = [1, 32, 8], strides = [1, 1, 1]} : vector<4x32x8xbf16> to vector<1x32x8xbf16>
    %920 = vector.shape_cast %919 : vector<1x32x8xbf16> to vector<32x8xbf16>
    %cst_355 = arith.constant dense<0.000000e+00> : vector<32x8xf32>
    %921 = tpu.matmul %851, %920, %cst_355 {dimension_numbers = #tpu.dot_dimension_numbers<[1], [0], [0], [1], [0, 0, 1, 1], [], []>} : vector<32x32xbf16>, vector<32x8xbf16>, vector<32x8xf32> -> vector<32x8xf32>
    %922 = vector.extract_strided_slice %589 {offsets = [1, 0, 0], sizes = [1, 1, 8], strides = [1, 1, 1]} : vector<4x1x8xf32> to vector<1x1x8xf32>
    %923 = vector.shape_cast %922 : vector<1x1x8xf32> to vector<1x8xf32>
    %924 = vector.broadcast %923 : vector<1x8xf32> to vector<32x8xf32>
    %925 = arith.addf %921, %924 : vector<32x8xf32>
    %926 = vector.shape_cast %911 : vector<16x8xf32> to vector<2x8x8xf32>
    %927 = arith.truncf %926 : vector<2x8x8xf32> to vector<2x8x8xbf16>
    %928 = vector.shape_cast %918 : vector<32x8xf32> to vector<2x16x8xf32>
    %929 = arith.truncf %928 : vector<2x16x8xf32> to vector<2x16x8xbf16>
    %930 = vector.shape_cast %925 : vector<32x8xf32> to vector<2x16x8xf32>
    %931 = arith.truncf %930 : vector<2x16x8xf32> to vector<2x16x8xbf16>
    "tpu.trace_start"() <{level = 10 : i32, message = "btk,bsk->bts"}> : () -> ()
    %cst_356 = arith.constant dense<0.000000e+00> : vector<2x8x16xf32>
    %932 = tpu.matmul %927, %929, %cst_356 {dimension_numbers = #tpu.dot_dimension_numbers<[2], [2], [1], [1], [0, 0, 0, 1, 1, 1], [0], [0]>} : vector<2x8x8xbf16>, vector<2x16x8xbf16>, vector<2x8x16xf32> -> vector<2x8x16xf32>
    "tpu.trace_stop"() : () -> ()
    %cst_357 = arith.constant dense<0xFF800000> : vector<2x8xf32>
    %933 = vector.multi_reduction <maximumf>, %932, %cst_357 [2] : vector<2x8x16xf32> to vector<2x8xf32>
    %934 = vector.shape_cast %933 : vector<2x8xf32> to vector<2x8x1xf32>
    %935 = vector.broadcast %934 : vector<2x8x1xf32> to vector<2x8x16xf32>
    %936 = arith.subf %932, %935 : vector<2x8x16xf32>
    %937 = math.exp %936 : vector<2x8x16xf32>
    %cst_358 = arith.constant dense<0.000000e+00> : vector<2x8xf32>
    %938 = vector.multi_reduction <add>, %937, %cst_358 [2] : vector<2x8x16xf32> to vector<2x8xf32>
    %939 = vector.shape_cast %938 : vector<2x8xf32> to vector<2x8x1xf32>
    %940 = tpu.reciprocal %939 {approx = true} : vector<2x8x1xf32> -> vector<2x8x1xf32>
    %941 = vector.broadcast %940 : vector<2x8x1xf32> to vector<2x8x16xf32>
    %942 = arith.mulf %937, %941 : vector<2x8x16xf32>
    %943 = arith.truncf %942 : vector<2x8x16xf32> to vector<2x8x16xbf16>
    "tpu.trace_start"() <{level = 10 : i32, message = "bts,bsk->btk"}> : () -> ()
    %cst_359 = arith.constant dense<0.000000e+00> : vector<2x8x8xf32>
    %944 = tpu.matmul %943, %931, %cst_359 {dimension_numbers = #tpu.dot_dimension_numbers<[2], [1], [1], [2], [0, 0, 0, 1, 1, 2], [0], [0]>} : vector<2x8x16xbf16>, vector<2x16x8xbf16>, vector<2x8x8xf32> -> vector<2x8x8xf32>
    "tpu.trace_stop"() : () -> ()
    %945 = vector.shape_cast %944 : vector<2x8x8xf32> to vector<16x8xf32>
    %946 = arith.truncf %945 : vector<16x8xf32> to vector<16x8xbf16>
    %947 = vector.extract_strided_slice %591 {offsets = [1, 0, 0], sizes = [1, 8, 32], strides = [1, 1, 1]} : vector<4x8x32xbf16> to vector<1x8x32xbf16>
    %948 = vector.shape_cast %947 : vector<1x8x32xbf16> to vector<8x32xbf16>
    %cst_360 = arith.constant dense<0.000000e+00> : vector<16x32xf32>
    %949 = tpu.matmul %946, %948, %cst_360 {dimension_numbers = #tpu.dot_dimension_numbers<[1], [0], [0], [1], [0, 0, 1, 1], [], []>} : vector<16x8xbf16>, vector<8x32xbf16>, vector<16x32xf32> -> vector<16x32xf32>
    %950 = arith.addf %901, %949 : vector<16x32xf32>
    %951 = arith.addf %902, %942 : vector<2x8x16xf32>
    %952 = vector.extract_strided_slice %579 {offsets = [2, 0, 0], sizes = [1, 32, 8], strides = [1, 1, 1]} : vector<4x32x8xbf16> to vector<1x32x8xbf16>
    %953 = vector.shape_cast %952 : vector<1x32x8xbf16> to vector<32x8xbf16>
    %cst_361 = arith.constant dense<0.000000e+00> : vector<16x8xf32>
    %954 = tpu.matmul %847, %953, %cst_361 {dimension_numbers = #tpu.dot_dimension_numbers<[1], [0], [0], [1], [0, 0, 1, 1], [], []>} : vector<16x32xbf16>, vector<32x8xbf16>, vector<16x8xf32> -> vector<16x8xf32>
    %955 = vector.extract_strided_slice %585 {offsets = [2, 0, 0], sizes = [1, 1, 8], strides = [1, 1, 1]} : vector<4x1x8xf32> to vector<1x1x8xf32>
    %956 = vector.shape_cast %955 : vector<1x1x8xf32> to vector<1x8xf32>
    %957 = vector.broadcast %956 : vector<1x8xf32> to vector<16x8xf32>
    %958 = arith.addf %954, %957 : vector<16x8xf32>
    %cst_362 = arith.constant 0.353553385 : f32
    %959 = vector.broadcast %cst_362 : f32 to vector<16x8xf32>
    %960 = arith.mulf %958, %959 : vector<16x8xf32>
    %961 = vector.extract_strided_slice %581 {offsets = [2, 0, 0], sizes = [1, 32, 8], strides = [1, 1, 1]} : vector<4x32x8xbf16> to vector<1x32x8xbf16>
    %962 = vector.shape_cast %961 : vector<1x32x8xbf16> to vector<32x8xbf16>
    %cst_363 = arith.constant dense<0.000000e+00> : vector<32x8xf32>
    %963 = tpu.matmul %849, %962, %cst_363 {dimension_numbers = #tpu.dot_dimension_numbers<[1], [0], [0], [1], [0, 0, 1, 1], [], []>} : vector<32x32xbf16>, vector<32x8xbf16>, vector<32x8xf32> -> vector<32x8xf32>
    %964 = vector.extract_strided_slice %587 {offsets = [2, 0, 0], sizes = [1, 1, 8], strides = [1, 1, 1]} : vector<4x1x8xf32> to vector<1x1x8xf32>
    %965 = vector.shape_cast %964 : vector<1x1x8xf32> to vector<1x8xf32>
    %966 = vector.broadcast %965 : vector<1x8xf32> to vector<32x8xf32>
    %967 = arith.addf %963, %966 : vector<32x8xf32>
    %968 = vector.extract_strided_slice %583 {offsets = [2, 0, 0], sizes = [1, 32, 8], strides = [1, 1, 1]} : vector<4x32x8xbf16> to vector<1x32x8xbf16>
    %969 = vector.shape_cast %968 : vector<1x32x8xbf16> to vector<32x8xbf16>
    %cst_364 = arith.constant dense<0.000000e+00> : vector<32x8xf32>
    %970 = tpu.matmul %851, %969, %cst_364 {dimension_numbers = #tpu.dot_dimension_numbers<[1], [0], [0], [1], [0, 0, 1, 1], [], []>} : vector<32x32xbf16>, vector<32x8xbf16>, vector<32x8xf32> -> vector<32x8xf32>
    %971 = vector.extract_strided_slice %589 {offsets = [2, 0, 0], sizes = [1, 1, 8], strides = [1, 1, 1]} : vector<4x1x8xf32> to vector<1x1x8xf32>
    %972 = vector.shape_cast %971 : vector<1x1x8xf32> to vector<1x8xf32>
    %973 = vector.broadcast %972 : vector<1x8xf32> to vector<32x8xf32>
    %974 = arith.addf %970, %973 : vector<32x8xf32>
    %975 = vector.shape_cast %960 : vector<16x8xf32> to vector<2x8x8xf32>
    %976 = arith.truncf %975 : vector<2x8x8xf32> to vector<2x8x8xbf16>
    %977 = vector.shape_cast %967 : vector<32x8xf32> to vector<2x16x8xf32>
    %978 = arith.truncf %977 : vector<2x16x8xf32> to vector<2x16x8xbf16>
    %979 = vector.shape_cast %974 : vector<32x8xf32> to vector<2x16x8xf32>
    %980 = arith.truncf %979 : vector<2x16x8xf32> to vector<2x16x8xbf16>
    "tpu.trace_start"() <{level = 10 : i32, message = "btk,bsk->bts"}> : () -> ()
    %cst_365 = arith.constant dense<0.000000e+00> : vector<2x8x16xf32>
    %981 = tpu.matmul %976, %978, %cst_365 {dimension_numbers = #tpu.dot_dimension_numbers<[2], [2], [1], [1], [0, 0, 0, 1, 1, 1], [0], [0]>} : vector<2x8x8xbf16>, vector<2x16x8xbf16>, vector<2x8x16xf32> -> vector<2x8x16xf32>
    "tpu.trace_stop"() : () -> ()
    %cst_366 = arith.constant dense<0xFF800000> : vector<2x8xf32>
    %982 = vector.multi_reduction <maximumf>, %981, %cst_366 [2] : vector<2x8x16xf32> to vector<2x8xf32>
    %983 = vector.shape_cast %982 : vector<2x8xf32> to vector<2x8x1xf32>
    %984 = vector.broadcast %983 : vector<2x8x1xf32> to vector<2x8x16xf32>
    %985 = arith.subf %981, %984 : vector<2x8x16xf32>
    %986 = math.exp %985 : vector<2x8x16xf32>
    %cst_367 = arith.constant dense<0.000000e+00> : vector<2x8xf32>
    %987 = vector.multi_reduction <add>, %986, %cst_367 [2] : vector<2x8x16xf32> to vector<2x8xf32>
    %988 = vector.shape_cast %987 : vector<2x8xf32> to vector<2x8x1xf32>
    %989 = tpu.reciprocal %988 {approx = true} : vector<2x8x1xf32> -> vector<2x8x1xf32>
    %990 = vector.broadcast %989 : vector<2x8x1xf32> to vector<2x8x16xf32>
    %991 = arith.mulf %986, %990 : vector<2x8x16xf32>
    %992 = arith.truncf %991 : vector<2x8x16xf32> to vector<2x8x16xbf16>
    "tpu.trace_start"() <{level = 10 : i32, message = "bts,bsk->btk"}> : () -> ()
    %cst_368 = arith.constant dense<0.000000e+00> : vector<2x8x8xf32>
    %993 = tpu.matmul %992, %980, %cst_368 {dimension_numbers = #tpu.dot_dimension_numbers<[2], [1], [1], [2], [0, 0, 0, 1, 1, 2], [0], [0]>} : vector<2x8x16xbf16>, vector<2x16x8xbf16>, vector<2x8x8xf32> -> vector<2x8x8xf32>
    "tpu.trace_stop"() : () -> ()
    %994 = vector.shape_cast %993 : vector<2x8x8xf32> to vector<16x8xf32>
    %995 = arith.truncf %994 : vector<16x8xf32> to vector<16x8xbf16>
    %996 = vector.extract_strided_slice %591 {offsets = [2, 0, 0], sizes = [1, 8, 32], strides = [1, 1, 1]} : vector<4x8x32xbf16> to vector<1x8x32xbf16>
    %997 = vector.shape_cast %996 : vector<1x8x32xbf16> to vector<8x32xbf16>
    %cst_369 = arith.constant dense<0.000000e+00> : vector<16x32xf32>
    %998 = tpu.matmul %995, %997, %cst_369 {dimension_numbers = #tpu.dot_dimension_numbers<[1], [0], [0], [1], [0, 0, 1, 1], [], []>} : vector<16x8xbf16>, vector<8x32xbf16>, vector<16x32xf32> -> vector<16x32xf32>
    %999 = arith.addf %950, %998 : vector<16x32xf32>
    %1000 = arith.addf %951, %991 : vector<2x8x16xf32>
    %1001 = vector.extract_strided_slice %579 {offsets = [3, 0, 0], sizes = [1, 32, 8], strides = [1, 1, 1]} : vector<4x32x8xbf16> to vector<1x32x8xbf16>
    %1002 = vector.shape_cast %1001 : vector<1x32x8xbf16> to vector<32x8xbf16>
    %cst_370 = arith.constant dense<0.000000e+00> : vector<16x8xf32>
    %1003 = tpu.matmul %847, %1002, %cst_370 {dimension_numbers = #tpu.dot_dimension_numbers<[1], [0], [0], [1], [0, 0, 1, 1], [], []>} : vector<16x32xbf16>, vector<32x8xbf16>, vector<16x8xf32> -> vector<16x8xf32>
    %1004 = vector.extract_strided_slice %585 {offsets = [3, 0, 0], sizes = [1, 1, 8], strides = [1, 1, 1]} : vector<4x1x8xf32> to vector<1x1x8xf32>
    %1005 = vector.shape_cast %1004 : vector<1x1x8xf32> to vector<1x8xf32>
    %1006 = vector.broadcast %1005 : vector<1x8xf32> to vector<16x8xf32>
    %1007 = arith.addf %1003, %1006 : vector<16x8xf32>
    %cst_371 = arith.constant 0.353553385 : f32
    %1008 = vector.broadcast %cst_371 : f32 to vector<16x8xf32>
    %1009 = arith.mulf %1007, %1008 : vector<16x8xf32>
    %1010 = vector.extract_strided_slice %581 {offsets = [3, 0, 0], sizes = [1, 32, 8], strides = [1, 1, 1]} : vector<4x32x8xbf16> to vector<1x32x8xbf16>
    %1011 = vector.shape_cast %1010 : vector<1x32x8xbf16> to vector<32x8xbf16>
    %cst_372 = arith.constant dense<0.000000e+00> : vector<32x8xf32>
    %1012 = tpu.matmul %849, %1011, %cst_372 {dimension_numbers = #tpu.dot_dimension_numbers<[1], [0], [0], [1], [0, 0, 1, 1], [], []>} : vector<32x32xbf16>, vector<32x8xbf16>, vector<32x8xf32> -> vector<32x8xf32>
    %1013 = vector.extract_strided_slice %587 {offsets = [3, 0, 0], sizes = [1, 1, 8], strides = [1, 1, 1]} : vector<4x1x8xf32> to vector<1x1x8xf32>
    %1014 = vector.shape_cast %1013 : vector<1x1x8xf32> to vector<1x8xf32>
    %1015 = vector.broadcast %1014 : vector<1x8xf32> to vector<32x8xf32>
    %1016 = arith.addf %1012, %1015 : vector<32x8xf32>
    %1017 = vector.extract_strided_slice %583 {offsets = [3, 0, 0], sizes = [1, 32, 8], strides = [1, 1, 1]} : vector<4x32x8xbf16> to vector<1x32x8xbf16>
    %1018 = vector.shape_cast %1017 : vector<1x32x8xbf16> to vector<32x8xbf16>
    %cst_373 = arith.constant dense<0.000000e+00> : vector<32x8xf32>
    %1019 = tpu.matmul %851, %1018, %cst_373 {dimension_numbers = #tpu.dot_dimension_numbers<[1], [0], [0], [1], [0, 0, 1, 1], [], []>} : vector<32x32xbf16>, vector<32x8xbf16>, vector<32x8xf32> -> vector<32x8xf32>
    %1020 = vector.extract_strided_slice %589 {offsets = [3, 0, 0], sizes = [1, 1, 8], strides = [1, 1, 1]} : vector<4x1x8xf32> to vector<1x1x8xf32>
    %1021 = vector.shape_cast %1020 : vector<1x1x8xf32> to vector<1x8xf32>
    %1022 = vector.broadcast %1021 : vector<1x8xf32> to vector<32x8xf32>
    %1023 = arith.addf %1019, %1022 : vector<32x8xf32>
    %1024 = vector.shape_cast %1009 : vector<16x8xf32> to vector<2x8x8xf32>
    %1025 = arith.truncf %1024 : vector<2x8x8xf32> to vector<2x8x8xbf16>
    %1026 = vector.shape_cast %1016 : vector<32x8xf32> to vector<2x16x8xf32>
    %1027 = arith.truncf %1026 : vector<2x16x8xf32> to vector<2x16x8xbf16>
    %1028 = vector.shape_cast %1023 : vector<32x8xf32> to vector<2x16x8xf32>
    %1029 = arith.truncf %1028 : vector<2x16x8xf32> to vector<2x16x8xbf16>
    "tpu.trace_start"() <{level = 10 : i32, message = "btk,bsk->bts"}> : () -> ()
    %cst_374 = arith.constant dense<0.000000e+00> : vector<2x8x16xf32>
    %1030 = tpu.matmul %1025, %1027, %cst_374 {dimension_numbers = #tpu.dot_dimension_numbers<[2], [2], [1], [1], [0, 0, 0, 1, 1, 1], [0], [0]>} : vector<2x8x8xbf16>, vector<2x16x8xbf16>, vector<2x8x16xf32> -> vector<2x8x16xf32>
    "tpu.trace_stop"() : () -> ()
    %cst_375 = arith.constant dense<0xFF800000> : vector<2x8xf32>
    %1031 = vector.multi_reduction <maximumf>, %1030, %cst_375 [2] : vector<2x8x16xf32> to vector<2x8xf32>
    %1032 = vector.shape_cast %1031 : vector<2x8xf32> to vector<2x8x1xf32>
    %1033 = vector.broadcast %1032 : vector<2x8x1xf32> to vector<2x8x16xf32>
    %1034 = arith.subf %1030, %1033 : vector<2x8x16xf32>
    %1035 = math.exp %1034 : vector<2x8x16xf32>
    %cst_376 = arith.constant dense<0.000000e+00> : vector<2x8xf32>
    %1036 = vector.multi_reduction <add>, %1035, %cst_376 [2] : vector<2x8x16xf32> to vector<2x8xf32>
    %1037 = vector.shape_cast %1036 : vector<2x8xf32> to vector<2x8x1xf32>
    %1038 = tpu.reciprocal %1037 {approx = true} : vector<2x8x1xf32> -> vector<2x8x1xf32>
    %1039 = vector.broadcast %1038 : vector<2x8x1xf32> to vector<2x8x16xf32>
    %1040 = arith.mulf %1035, %1039 : vector<2x8x16xf32>
    %1041 = arith.truncf %1040 : vector<2x8x16xf32> to vector<2x8x16xbf16>
    "tpu.trace_start"() <{level = 10 : i32, message = "bts,bsk->btk"}> : () -> ()
    %cst_377 = arith.constant dense<0.000000e+00> : vector<2x8x8xf32>
    %1042 = tpu.matmul %1041, %1029, %cst_377 {dimension_numbers = #tpu.dot_dimension_numbers<[2], [1], [1], [2], [0, 0, 0, 1, 1, 2], [0], [0]>} : vector<2x8x16xbf16>, vector<2x16x8xbf16>, vector<2x8x8xf32> -> vector<2x8x8xf32>
    "tpu.trace_stop"() : () -> ()
    %1043 = vector.shape_cast %1042 : vector<2x8x8xf32> to vector<16x8xf32>
    %1044 = arith.truncf %1043 : vector<16x8xf32> to vector<16x8xbf16>
    %1045 = vector.extract_strided_slice %591 {offsets = [3, 0, 0], sizes = [1, 8, 32], strides = [1, 1, 1]} : vector<4x8x32xbf16> to vector<1x8x32xbf16>
    %1046 = vector.shape_cast %1045 : vector<1x8x32xbf16> to vector<8x32xbf16>
    %cst_378 = arith.constant dense<0.000000e+00> : vector<16x32xf32>
    %1047 = tpu.matmul %1044, %1046, %cst_378 {dimension_numbers = #tpu.dot_dimension_numbers<[1], [0], [0], [1], [0, 0, 1, 1], [], []>} : vector<16x8xbf16>, vector<8x32xbf16>, vector<16x32xf32> -> vector<16x32xf32>
    %1048 = arith.addf %999, %1047 : vector<16x32xf32>
    %1049 = arith.addf %1000, %1040 : vector<2x8x16xf32>
    %1050 = vector.broadcast %593 : vector<1x32xf32> to vector<16x32xf32>
    %1051 = arith.addf %1048, %1050 : vector<16x32xf32>
    %1052 = vector.shape_cast %1051 : vector<16x32xf32> to vector<2x8x32xf32>
    %cst_379 = arith.constant 2.500000e-01 : f32
    %1053 = vector.broadcast %cst_379 : f32 to vector<2x8x16xf32>
    %1054 = arith.mulf %1049, %1053 : vector<2x8x16xf32>
    %1055 = arith.addf %844, %1052 : vector<2x8x32xf32>
    %cst_380 = arith.constant dense<0.000000e+00> : vector<2x8xf32>
    %1056 = vector.multi_reduction <add>, %1055, %cst_380 [2] : vector<2x8x32xf32> to vector<2x8xf32>
    %1057 = vector.shape_cast %1056 : vector<2x8xf32> to vector<2x8x1xf32>
    %cst_381 = arith.constant 3.200000e+01 : f32
    %1058 = vector.broadcast %cst_381 : f32 to vector<2x8x1xf32>
    %1059 = arith.divf %1057, %1058 : vector<2x8x1xf32>
    %1060 = vector.broadcast %1059 : vector<2x8x1xf32> to vector<2x8x32xf32>
    %1061 = arith.subf %1055, %1060 : vector<2x8x32xf32>
    %1062 = arith.mulf %1061, %1061 : vector<2x8x32xf32>
    %cst_382 = arith.constant dense<0.000000e+00> : vector<2x8xf32>
    %1063 = vector.multi_reduction <add>, %1062, %cst_382 [2] : vector<2x8x32xf32> to vector<2x8xf32>
    %1064 = vector.shape_cast %1063 : vector<2x8xf32> to vector<2x8x1xf32>
    %cst_383 = arith.constant 3.200000e+01 : f32
    %1065 = vector.broadcast %cst_383 : f32 to vector<2x8x1xf32>
    %1066 = arith.divf %1064, %1065 : vector<2x8x1xf32>
    %cst_384 = arith.constant 9.99999974E-6 : f32
    %1067 = vector.broadcast %cst_384 : f32 to vector<2x8x1xf32>
    %1068 = arith.addf %1066, %1067 : vector<2x8x1xf32>
    %1069 = math.rsqrt %1068 : vector<2x8x1xf32>
    %1070 = vector.broadcast %1069 : vector<2x8x1xf32> to vector<2x8x32xf32>
    %1071 = arith.mulf %1061, %1070 : vector<2x8x32xf32>
    %1072 = vector.shape_cast %607 : vector<1x32xf32> to vector<1x1x32xf32>
    %1073 = vector.broadcast %1072 : vector<1x1x32xf32> to vector<2x8x32xf32>
    %1074 = arith.mulf %1071, %1073 : vector<2x8x32xf32>
    %1075 = vector.shape_cast %609 : vector<1x32xf32> to vector<1x1x32xf32>
    %1076 = vector.broadcast %1075 : vector<1x1x32xf32> to vector<2x8x32xf32>
    %1077 = arith.addf %1074, %1076 : vector<2x8x32xf32>
    %1078 = vector.shape_cast %1077 : vector<2x8x32xf32> to vector<16x32xf32>
    %1079 = arith.truncf %1078 : vector<16x32xf32> to vector<16x32xbf16>
    %cst_385 = arith.constant dense<0.000000e+00> : vector<16x64xf32>
    %1080 = tpu.matmul %1079, %595, %cst_385 {dimension_numbers = #tpu.dot_dimension_numbers<[1], [0], [0], [1], [0, 0, 1, 1], [], []>} : vector<16x32xbf16>, vector<32x64xbf16>, vector<16x64xf32> -> vector<16x64xf32>
    %1081 = vector.broadcast %597 : vector<1x64xf32> to vector<16x64xf32>
    %1082 = arith.addf %1080, %1081 : vector<16x64xf32>
    %cst_386 = arith.constant 0.000000e+00 : f32
    %1083 = vector.broadcast %cst_386 : f32 to vector<16x64xf32>
    %1084 = arith.maximumf %1082, %1083 : vector<16x64xf32>
    %1085 = arith.truncf %1084 : vector<16x64xf32> to vector<16x64xbf16>
    %cst_387 = arith.constant dense<0.000000e+00> : vector<16x32xf32>
    %1086 = tpu.matmul %1085, %599, %cst_387 {dimension_numbers = #tpu.dot_dimension_numbers<[1], [0], [0], [1], [0, 0, 1, 1], [], []>} : vector<16x64xbf16>, vector<64x32xbf16>, vector<16x32xf32> -> vector<16x32xf32>
    %1087 = vector.broadcast %601 : vector<1x32xf32> to vector<16x32xf32>
    %1088 = arith.addf %1086, %1087 : vector<16x32xf32>
    %1089 = vector.shape_cast %1088 : vector<16x32xf32> to vector<2x8x32xf32>
    %1090 = arith.addf %1077, %1089 : vector<2x8x32xf32>
    %cst_388 = arith.constant dense<0.000000e+00> : vector<2x8xf32>
    %1091 = vector.multi_reduction <add>, %1090, %cst_388 [2] : vector<2x8x32xf32> to vector<2x8xf32>
    %1092 = vector.shape_cast %1091 : vector<2x8xf32> to vector<2x8x1xf32>
    %cst_389 = arith.constant 3.200000e+01 : f32
    %1093 = vector.broadcast %cst_389 : f32 to vector<2x8x1xf32>
    %1094 = arith.divf %1092, %1093 : vector<2x8x1xf32>
    %1095 = vector.broadcast %1094 : vector<2x8x1xf32> to vector<2x8x32xf32>
    %1096 = arith.subf %1090, %1095 : vector<2x8x32xf32>
    %1097 = arith.mulf %1096, %1096 : vector<2x8x32xf32>
    %cst_390 = arith.constant dense<0.000000e+00> : vector<2x8xf32>
    %1098 = vector.multi_reduction <add>, %1097, %cst_390 [2] : vector<2x8x32xf32> to vector<2x8xf32>
    %1099 = vector.shape_cast %1098 : vector<2x8xf32> to vector<2x8x1xf32>
    %cst_391 = arith.constant 3.200000e+01 : f32
    %1100 = vector.broadcast %cst_391 : f32 to vector<2x8x1xf32>
    %1101 = arith.divf %1099, %1100 : vector<2x8x1xf32>
    %cst_392 = arith.constant 9.99999974E-6 : f32
    %1102 = vector.broadcast %cst_392 : f32 to vector<2x8x1xf32>
    %1103 = arith.addf %1101, %1102 : vector<2x8x1xf32>
    %1104 = math.rsqrt %1103 : vector<2x8x1xf32>
    %1105 = vector.broadcast %1104 : vector<2x8x1xf32> to vector<2x8x32xf32>
    %1106 = arith.mulf %1096, %1105 : vector<2x8x32xf32>
    %1107 = vector.shape_cast %611 : vector<1x32xf32> to vector<1x1x32xf32>
    %1108 = vector.broadcast %1107 : vector<1x1x32xf32> to vector<2x8x32xf32>
    %1109 = arith.mulf %1106, %1108 : vector<2x8x32xf32>
    %1110 = vector.shape_cast %613 : vector<1x32xf32> to vector<1x1x32xf32>
    %1111 = vector.broadcast %1110 : vector<1x1x32xf32> to vector<2x8x32xf32>
    %1112 = arith.addf %1109, %1111 : vector<2x8x32xf32>
    %c1_393 = arith.constant 1 : index
    %c0_394 = arith.constant 0 : index
    %c0_395 = arith.constant 0 : index
    %c0_396 = arith.constant 0 : index
    %1113 = vector.load %arg33[%c1_393, %c0_394, %c0_395, %c0_396] : memref<2x2x8x8xf32, #tpu.memory_space<vmem>>, vector<1x2x8x8xf32>
    %1114 = vector.shape_cast %1113 : vector<1x2x8x8xf32> to vector<2x8x8xf32>
    %1115 = vector.shape_cast %821 : vector<2x8x8xf32> to vector<1x2x8x8xf32>
    tpu.vector_store %arg33[%c1_393, %c0_394, %c0_395, %c0_396], %1115 {strides = array<i32>} : memref<2x2x8x8xf32, #tpu.memory_space<vmem>>, vector<1x2x8x8xf32>,
    %c1_397 = arith.constant 1 : index
    %c0_398 = arith.constant 0 : index
    %c0_399 = arith.constant 0 : index
    %c0_400 = arith.constant 0 : index
    %1116 = vector.load %arg34[%c1_397, %c0_398, %c0_399, %c0_400] : memref<2x2x8x16xf32, #tpu.memory_space<vmem>>, vector<1x2x8x16xf32>
    %1117 = vector.shape_cast %1116 : vector<1x2x8x16xf32> to vector<2x8x16xf32>
    %1118 = vector.shape_cast %1054 : vector<2x8x16xf32> to vector<1x2x8x16xf32>
    tpu.vector_store %arg34[%c1_397, %c0_398, %c0_399, %c0_400], %1118 {strides = array<i32>} : memref<2x2x8x16xf32, #tpu.memory_space<vmem>>, vector<1x2x8x16xf32>,
    %c0_401 = arith.constant 0 : index
    %c0_402 = arith.constant 0 : index
    %1119 = vector.load %arg30[%c0_401, %c0_402] : memref<1x32xf32, #tpu.memory_space<vmem>>, vector<1x32xf32>
    %c0_403 = arith.constant 0 : index
    %c0_404 = arith.constant 0 : index
    %1120 = vector.load %arg31[%c0_403, %c0_404] : memref<1x32xf32, #tpu.memory_space<vmem>>, vector<1x32xf32>
    %cst_405 = arith.constant dense<0.000000e+00> : vector<2x8xf32>
    %1121 = vector.multi_reduction <add>, %1112, %cst_405 [2] : vector<2x8x32xf32> to vector<2x8xf32>
    %1122 = vector.shape_cast %1121 : vector<2x8xf32> to vector<2x8x1xf32>
    %cst_406 = arith.constant 3.200000e+01 : f32
    %1123 = vector.broadcast %cst_406 : f32 to vector<2x8x1xf32>
    %1124 = arith.divf %1122, %1123 : vector<2x8x1xf32>
    %1125 = vector.broadcast %1124 : vector<2x8x1xf32> to vector<2x8x32xf32>
    %1126 = arith.subf %1112, %1125 : vector<2x8x32xf32>
    %1127 = arith.mulf %1126, %1126 : vector<2x8x32xf32>
    %cst_407 = arith.constant dense<0.000000e+00> : vector<2x8xf32>
    %1128 = vector.multi_reduction <add>, %1127, %cst_407 [2] : vector<2x8x32xf32> to vector<2x8xf32>
    %1129 = vector.shape_cast %1128 : vector<2x8xf32> to vector<2x8x1xf32>
    %cst_408 = arith.constant 3.200000e+01 : f32
    %1130 = vector.broadcast %cst_408 : f32 to vector<2x8x1xf32>
    %1131 = arith.divf %1129, %1130 : vector<2x8x1xf32>
    %cst_409 = arith.constant 9.99999974E-6 : f32
    %1132 = vector.broadcast %cst_409 : f32 to vector<2x8x1xf32>
    %1133 = arith.addf %1131, %1132 : vector<2x8x1xf32>
    %1134 = math.rsqrt %1133 : vector<2x8x1xf32>
    %1135 = vector.broadcast %1134 : vector<2x8x1xf32> to vector<2x8x32xf32>
    %1136 = arith.mulf %1126, %1135 : vector<2x8x32xf32>
    %1137 = vector.shape_cast %1119 : vector<1x32xf32> to vector<1x1x32xf32>
    %1138 = vector.broadcast %1137 : vector<1x1x32xf32> to vector<2x8x32xf32>
    %1139 = arith.mulf %1136, %1138 : vector<2x8x32xf32>
    %1140 = vector.shape_cast %1120 : vector<1x32xf32> to vector<1x1x32xf32>
    %1141 = vector.broadcast %1140 : vector<1x1x32xf32> to vector<2x8x32xf32>
    %1142 = arith.addf %1139, %1141 : vector<2x8x32xf32>
    %c0_410 = arith.constant 0 : index
    %c0_411 = arith.constant 0 : index
    %c0_412 = arith.constant 0 : index
    %1143 = vector.load %arg32[%c0_410, %c0_411, %c0_412] : memref<2x8x32xf32, #tpu.memory_space<vmem>>, vector<2x8x32xf32>
    tpu.vector_store %arg32[%c0_410, %c0_411, %c0_412], %1142 {strides = array<i32>} : memref<2x8x32xf32, #tpu.memory_space<vmem>>, vector<2x8x32xf32>,
    return
  }
}

</mosaic_0001>

<bundles_post_ra>
// kernel: transformer_decoder_forward.1
= control target key start
LH: loop header
LB: loop body
LE: loop exit
PB: predicated region body
PF: predicated region fallthrough
CT: control target
= control target key end

     0   :  { %s6115_s6 = smov 1   ;;  %s6116_s10 = smov 2   ;;  %s7216_s0 = inlined_call_operand.smem [shape: u32[35], index: -1, kind: input, shape index: {}] }
   0x1   :  { %s6162_s5 = sld [smem:[%s7216_s0]]   ;;  %s6117_s14 = smov 3  }
   0x2   :  { %s6167_s9 = sld [smem:[%s7216_s0 + %s6115_s6]]   ;;  %s6118_s18 = smov 4  }
   0x3   :  { %s6172_s13 = sld [smem:[%s7216_s0 + %s6116_s10]]   ;;  %s6119_s22 = smov 5  }
   0x4   :  { %s6177_s17 = sld [smem:[%s7216_s0 + %s6117_s14]]   ;;  %s6120_s26 = smov 6  }
   0x5   :  { %s6182_s21 = sld [smem:[%s7216_s0 + %s6118_s18]]   ;;  %s6121_s30 = smov 7  }
   0x6   :  { %s6187_s25 = sld [smem:[%s7216_s0 + %s6119_s22]]   ;;  %s6122_s4 = smov 8  }
   0x7   :  { %s6192_s29 = sld [smem:[%s7216_s0 + %s6120_s26]]   ;;  %s6123_s10 = smov 9  }
   0x8   :  { %s6197_s3 = sld [smem:[%s7216_s0 + %s6121_s30]]   ;;  %s6124_s15 = smov 10  }
   0x9   :  { %s6202_s8 = sld [smem:[%s7216_s0 + %s6122_s4]]   ;;  %s6125_s20 = smov 11  }
   0xa   :  { %s6207_s14 = sld [smem:[%s7216_s0 + %s6123_s10]]   ;;  %s6126_s26 = smov 12  }
   0xb   :  { %s6212_s19 = sld [smem:[%s7216_s0 + %s6124_s15]]   ;;  %s6127_s1 = smov 13  }
   0xc   :  { %s6217_s24 = sld [smem:[%s7216_s0 + %s6125_s20]]   ;;  %s6128_s7 = smov 14  }
   0xd   :  { %s6222_s30 = sld [smem:[%s7216_s0 + %s6126_s26]]   ;;  %s6129_s15 = smov 15  }
   0xe   :  { %s6227_s6 = sld [smem:[%s7216_s0 + %s6127_s1]]   ;;  %s6130_s22 = smov 16  }
   0xf   :  { %s6232_s12 = sld [smem:[%s7216_s0 + %s6128_s7]]   ;;  %s6131_s28 = smov 17  }
  0x10   :  { %s6237_s20 = sld [smem:[%s7216_s0 + %s6129_s15]]   ;;  %s6132_s7 = smov 18  }
  0x11   :  { %s6242_s27 = sld [smem:[%s7216_s0 + %s6130_s22]]   ;;  %s6133_s15 = smov 19  }
  0x12   :  { %s6247_s4 = sld [smem:[%s7216_s0 + %s6131_s28]]   ;;  %s6134_s22 = smov 20  }
  0x13   :  { %7233 = sst [smem:[#allocation8_spill]] %s6222_s30  ;;  %s6135_s28 = smov 21  }
  0x14   :  { %s6252_s30 = sld [smem:[%s7216_s0 + %s6132_s7]]   ;;  %s6136_s7 = smov 22  }
  0x16   :  { %7234 = sst [smem:[#allocation9_spill]] %s6237_s20 }
  0x17   :  { %7235 = sst [smem:[#allocation10_spill]] %s6242_s27 }
  0x18   :  { %7236 = sst [smem:[#allocation11_spill]] %s6247_s4 }
  0x19   :  { %s6257_s20 = sld [smem:[%s7216_s0 + %s6133_s15]]   ;;  %s6137_s15 = smov 23  }
  0x1a   :  { %7237 = sst [smem:[#allocation12_spill]] %s6252_s30 }
  0x1b   :  { %s6262_s27 = sld [smem:[%s7216_s0 + %s6134_s22]]   ;;  %s6138_s22 = smov 24  }
  0x1c   :  { %s6267_s4 = sld [smem:[%s7216_s0 + %s6135_s28]]   ;;  %s6139_s28 = smov 25  }
  0x1d   :  { %s6272_s30 = sld [smem:[%s7216_s0 + %s6136_s7]]   ;;  %s6140_s7 = smov 26  }
  0x1f   :  { %7238 = sst [smem:[#allocation13_spill]] %s6257_s20 }
  0x20   :  { %s6277_s20 = sld [smem:[%s7216_s0 + %s6137_s15]]   ;;  %s6141_s15 = smov 27  }
  0x21   :  { %7239 = sst [smem:[#allocation14_spill]] %s6262_s27 }
  0x22   :  { %7240 = sst [smem:[#allocation15_spill]] %s6267_s4 }
  0x23   :  { %7241 = sst [smem:[#allocation16_spill]] %s6272_s30 }
  0x24   :  { %s6282_s27 = sld [smem:[%s7216_s0 + %s6138_s22]]   ;;  %s6142_s22 = smov 28  }
  0x25   :  { %s6287_s4 = sld [smem:[%s7216_s0 + %s6139_s28]]   ;;  %s6143_s28 = smov 29  }
  0x26   :  { %7242 = sst [smem:[#allocation17_spill]] %s6277_s20 }
  0x27   :  { %s6292_s30 = sld [smem:[%s7216_s0 + %s6140_s7]]   ;;  %s6144_s7 = smov 30  }
  0x28   :  { %s6297_s20 = sld [smem:[%s7216_s0 + %s6141_s15]]   ;;  %s6145_s15 = smov 31  }
  0x2a   :  { %7243 = sst [smem:[#allocation18_spill]] %s6282_s27 }
  0x2b   :  { %7244 = sst [smem:[#allocation19_spill]] %s6287_s4 }
  0x2c   :  { %s6302_s27 = sld [smem:[%s7216_s0 + %s6142_s22]]   ;;  %s6146_s22 = smov 32  }
  0x2d   :  { %7245 = sst [smem:[#allocation20_spill]] %s6292_s30 }
  0x2e   :  { %7246 = sst [smem:[#allocation21_spill]] %s6297_s20 }
  0x2f   :  { %s6307_s4 = sld [smem:[%s7216_s0 + %s6143_s28]]   ;;  %s6147_s28 = smov 33  }
  0x30   :  { %s6312_s30 = sld [smem:[%s7216_s0 + %s6144_s7]]   ;;  %s6148_s7 = smov 34  }
  0x31   :  { %s6317_s20 = sld [smem:[%s7216_s0 + %s6145_s15]]  }
  0x32   :  { %7247 = sst [smem:[#allocation22_spill]] %s6302_s27 }
  0x33   :  { %s6322_s27 = sld [smem:[%s7216_s0 + %s6146_s22]]  }
  0x35   :  { %7248 = sst [smem:[#allocation23_spill]] %s6307_s4 }
  0x36   :  { %7249 = sst [smem:[#allocation24_spill]] %s6312_s30 }
  0x37   :  { %s6327_s4 = sld [smem:[%s7216_s0 + %s6147_s28]]  }
  0x38   :  { %s6332_s30 = sld [smem:[%s7216_s0 + %s6148_s7]]  }
  0x39   :  { %75 = vsyncpa [#allocation3], 0  ;;  %v5685_v0 = vld [vmem:[%s6182_s21 + $0x8] sm:$0xff]  ;;  %v5684_v2 = vld [vmem:[%s6182_s21] sm:$0xff]  ;;  %vm327_vm0 = vcmask 261120  }
  0x3a   :  { %v5693_v1 = vld [vmem:[%s6187_s25 + $0x8] sm:$0xff]  ;;  %v5692_v3 = vld [vmem:[%s6187_s25] sm:$0xff]  ;;  %337 = vmatpush.bf16.msra.mxu0 %v5685_v0 }
  0x3b   :  { %v6339_v4 = vld [vmem:[%s6162_s5] sm:$0xff]  ;;  %v6342_v5 = vld [vmem:[%s6162_s5 + $0x8] sm:$0xff]  ;;  %368 = vmatpush.bf16.msra.mxu1 %v5693_v1 }
  0x3c   :  { %v148_v6 = vld [vmem:[%s6172_s13] sm:$0xff]  ;;  %v149_v7 = vld [vmem:[%s6172_s13 + $0x8] sm:$0xff] }
  0x3d   :  { %v308_v8 = vadd.f32 %v148_v6, %v6339_v4  ;;  %v309_v9 = vadd.f32 %v149_v7, %v6342_v5 }
  0x3e   :  { %338 = vmatpush.bf16.msra.mxu0 %v5684_v2 }
  0x3f   :  { %v6348_v10 = vpack.c.bf16 %v309_v9, %v308_v8  ;;  %369 = vmatpush.bf16.msra.mxu1 %v5692_v3 }
  0x41   :  { %4962 = vmatmul.msk.bf16.vlgmr.msra.gmra.mxu0 %vm327_vm0, %v6348_v10 }
  0x42   :  { %4971 = vmatmul.msk.bf16.vlgmr.msra.gmra.mxu1 %vm327_vm0, %v6348_v10 }
  0x43   :  { %76 = vsyncpa [#allocation5], 0  ;;  %v5831_v11 = vld [vmem:[%s6197_s3] ss:$0 sm:$0xff]  ;;  %vm414_vm1 = vcmask 64512   ;;  %v5687_v18 = vld [vmem:[%s6182_s21 + $0x18] sm:$0xff]  ;;  %v6374_v41 = vpack.c.bf16 %v6342_v5, %v6339_v4 }
  0x44   :  { %v5832_v12 = vld [vmem:[%s6202_s8] ss:$0 sm:$0xff]  ;;  %v5686_v21 = vld [vmem:[%s6182_s21 + $0x10] sm:$0xff]  ;;  %v5695_v28 = vld [vmem:[%s6187_s25 + $0x18] sm:$0xff]  ;;  %vm480_vm2 = vcmask 1043456   ;;  %s7250_s0 = sld [smem:[#allocation8_spill]] }
  0x45   :  { %v5694_v31 = vld [vmem:[%s6187_s25 + $0x10] sm:$0xff]  ;;  %v5701_v37 = vld [vmem:[%s6192_s29 + $0x8] sm:$0xff]  ;;  %v5700_v39 = vld [vmem:[%s6192_s29] sm:$0xff]  ;;  %s7251_s5 = sld [smem:[#allocation18_spill]]  ;;  %vm1446_vm10 = vcmask 130048  }
  0x46   :  { %400 = vmatpush.bf16.msra.mxu2 %v5701_v37  ;;  %v5834_v42 = vld [vmem:[%s6197_s3 + $0x1] ss:$0 sm:$0xff]  ;;  %v5835_v2 = vld [vmem:[%s6207_s14] ss:$0 sm:$0xff]  ;;  %s7254_s15 = sld [smem:[#allocation10_spill]] }
  0x47   :  { %v5833_v44 = vld [vmem:[%s6202_s8 + $0x1] ss:$0 sm:$0xff]  ;;  %s7255_s16 = sld [smem:[#allocation9_spill]] }
  0x48   :  { %s7256_s18 = sld [smem:[#allocation12_spill]] }
  0x49   :  { %s7257_s22 = sld [smem:[#allocation13_spill]] }
  0x4a   :  { %401 = vmatpush.bf16.msra.mxu2 %v5700_v39  ;;  %s7258_s23 = sld [smem:[#allocation14_spill]] }
  0x4b   :  { %s7259_s26 = sld [smem:[#allocation20_spill]] }
  0x4c   :  { %s7260_s28 = sld [smem:[#allocation21_spill]] }
  0x4d   :  { %4980 = vmatmul.msk.bf16.vlgmr.msra.gmra.mxu2 %vm327_vm0, %v6374_v41  ;;  %s7261_s1 = sld [smem:[#allocation16_spill]] }
  0x4e   :  { %s7262_s2 = sld [smem:[#allocation15_spill]] }
  0x4f   :  { %s7263_s7 = sld [smem:[#allocation17_spill]] }
  0x50   :  { %s7264_s10 = sld [smem:[#allocation22_spill]] }
  0x51   :  { %s7265_s11 = sld [smem:[#allocation23_spill]] }
  0xbe   :  { %v340_v13 = vpop.f32.mrf.mxu0 }
  0xbf   :  { %v371_v14 = vpop.f32.mrf.mxu1  ;;  %v341_v15 = vadd.f32 %v5831_v11, %v340_v13 }
  0xc0   :  { %v372_v16 = vadd.f32 %v5832_v12, %v371_v14 }
  0xc1   :  { %v345_v19 = vmul.f32 0.35355338, %v341_v15 }
  0xc2   :  { %v410_v17 = vpack.c.bf16 %v372_v16, %v372_v16 }
  0xc3   :  { %v408_v24 = vpack.c.bf16 %v345_v19, %v345_v19  ;;  %v5703_v19 = vld [vmem:[%s6192_s29 + $0x18] sm:$0xff] }
  0xc4   :  { %v419_v20 = vsel %vm414_vm1, %v410_v17, 0 }
  0xc5   :  { %428 = vmatpush.bf16.xpose.msra.mxu3 %v419_v20 }
  0xc6   :  { %v342_v22 = vpop.f32.mrf.mxu0 }
  0xc7   :  { %v373_v23 = vpop.f32.mrf.mxu1  ;;  %v343_v26 = vadd.f32 %v5831_v11, %v342_v22 }
  0xc8   :  { %v374_v25 = vadd.f32 %v5832_v12, %v373_v23 }
  0xc9   :  { %v346_v30 = vmul.f32 0.35355338, %v343_v26 }
  0xca   :  { %v411_v27 = vpack.c.bf16 %v374_v25, %v374_v25 }
  0xcb   :  { %v409_v32 = vpack.c.bf16 %v346_v30, %v346_v30 }
  0xcc   :  { %4981 = vmatmul.msk.bf16.vlgmr.msra.gmra.mxu3 %vm414_vm1, %v408_v24  ;;  %v438_v29 = vsel %vm414_vm1, %v411_v27, 0 }
  0xcd   :  { %540 = vmatpush.bf16.msrb.mxu3 %v5687_v18  ;;  %447 = vmatpush.bf16.xpose.msrb.mxu0 %v438_v29 }
  0xd0   :  { %v403_v3 = vpop.f32.mrf.mxu2 }
  0xd1   :  { %541 = vmatpush.bf16.msrb.mxu3 %v5686_v21  ;;  %v404_v6 = vadd.f32 %v5835_v2, %v403_v3  ;;  %v5702_v21 = vld [vmem:[%s6192_s29 + $0x10] sm:$0xff]  ;;  %v5697_v3 = vld [vmem:[%s6187_s25 + $0x28] sm:$0xff] }
  0xd3   :  { %v412_v7 = vpack.c.bf16 %v404_v6, %v404_v6  ;;  %v5696_v6 = vld [vmem:[%s6187_s25 + $0x20] sm:$0xff] }
  0xd4   :  { %4982 = vmatmul.msk.bf16.vlgmr.msrb.gmra.mxu0 %vm414_vm1, %v409_v32 }
  0xd5   :  { %571 = vmatpush.bf16.msra.mxu0 %v5695_v28  ;;  %v482_v8 = vsel %vm480_vm2, %v412_v7, 0  ;;  %v5689_v7 = vld [vmem:[%s6182_s21 + $0x28] sm:$0xff] }
  0xd6   :  { %491 = vmatpush.bf16.msrb.mxu1 %v482_v8  ;;  %v5688_v8 = vld [vmem:[%s6182_s21 + $0x20] sm:$0xff] }
  0xd8   :  { %v405_v11 = vpop.f32.mrf.mxu2 }
  0xd9   :  { %572 = vmatpush.bf16.msra.mxu0 %v5694_v31  ;;  %v406_v12 = vadd.f32 %v5835_v2, %v405_v11 }
  0xda   :  { %600 = vmatpush.bf16.msra.mxu1 %v5703_v19 }
  0xdb   :  { %v413_v13 = vpack.c.bf16 %v406_v12, %v406_v12 }
  0xdc   :  { %4993 = vmatmul.msk.bf16.vlgmr.msrb.gmra.mxu3 %vm327_vm0, %v6348_v10 }
  0xdd   :  { %v501_v15 = vsel %vm480_vm2, %v413_v13, 0 }
  0xde   :  { %510 = vmatpush.bf16.msrb.mxu2 %v501_v15  ;;  %601 = vmatpush.bf16.msra.mxu1 %v5702_v21 }
  0xe4   :  { %5002 = vmatmul.msk.bf16.vlgmr.msra.gmra.mxu0 %vm327_vm0, %v6348_v10 }
 0x14f   :  { %v430_v33 = vpop.f32.mrf.mxu3 }
 0x150   :  { %v453_v34 = vsel %vm414_vm1, %v430_v33, -inf }
 0x151   :  { %v449_v35 = vpop.f32.mrf.mxu0  ;;  %454 = vmax.xlane.f32.xlu1 %v453_v34 }
 0x152   :  { %v456_v36 = vsel %vm414_vm1, %v449_v35, -inf }
 0x153   :  { %457 = vmax.xlane.f32.xlu0 %v456_v36  ;;  %v218_v36 = vld [vmem:[%s6212_s19] sm:$0xf] }
 0x154   :  { %v739_v37 = vsel %vm480_vm2, %v218_v36, 0 }
 0x157   :  { %v432_v38 = vpop.f32.mrf.mxu3 }
 0x159   :  { %v451_v40 = vpop.f32.mrf.mxu0 }
 0x15f   :  { %v543_v43 = vpop.f32.mrf.mxu3 }
 0x160   :  { %v544_v45 = vadd.f32 %v5834_v42, %v543_v43  ;;  %v5836_v43 = vld [vmem:[%s6207_s14 + $0x1] ss:$0 sm:$0xff] }
 0x161   :  { %v574_v46 = vpop.f32.mrf.mxu0 }
 0x162   :  { %v575_v47 = vadd.f32 %v5833_v44, %v574_v46  ;;  %v548_v29 = vmul.f32 0.35355338, %v544_v45 }
 0x164   :  { %v610_v9 = vpack.c.bf16 %v575_v47, %v575_v47  ;;  %v608_v30 = vpack.c.bf16 %v548_v29, %v548_v29 }
 0x166   :  { %v618_v14 = vsel %vm414_vm1, %v610_v9, 0 }
 0x167   :  { %v545_v48 = vpop.f32.mrf.mxu3  ;;  %627 = vmatpush.bf16.xpose.msra.mxu2 %v618_v14  ;;  %v219_v14 = vld [vmem:[%s6212_s19 + $0x4] sm:$0xf] }
 0x168   :  { %v546_v51 = vadd.f32 %v5834_v42, %v545_v48  ;;  %v719_v15 = vsel %vm480_vm2, %v219_v14, 0  ;;  %v5690_v14 = vld [vmem:[%s6182_s21 + $0x30] sm:$0xff] }
 0x169   :  { %v576_v49 = vpop.f32.mrf.mxu0 }
 0x16a   :  { %v577_v50 = vadd.f32 %v5833_v44, %v576_v49  ;;  %v549_v53 = vmul.f32 0.35355338, %v546_v51 }
 0x16c   :  { %v611_v52 = vpack.c.bf16 %v577_v50, %v577_v50  ;;  %v609_v55 = vpack.c.bf16 %v549_v53, %v549_v53 }
 0x16e   :  { %v637_v54 = vsel %vm414_vm1, %v611_v52, 0 }
 0x16f   :  { %646 = vmatpush.bf16.xpose.msra.mxu3 %v637_v54 }
 0x176   :  { %5013 = vmatmul.msk.bf16.vlgmr.msra.gmra.mxu3 %vm414_vm1, %v609_v55 }
 0x177   :  { %748 = vmatpush.bf16.msrb.mxu3 %v739_v37 }
 0x1c4   :  { %v455_v56 = vpop.xlane.xlu1 %454 }
 0x1c5   :  { %v459_v57 = vsub.f32 %v430_v33, %v455_v56 }
 0x1c6   :  { %v458_v58 = vpop.xlane.xlu0 %457 }
 0x1c7   :  { %v461_v59 = vmul.f32 1.442695, %v459_v57  ;;  %v460_v60 = vsub.f32 %v449_v35, %v458_v58 }
 0x1c9   :  { %5901 = vpow2.f32 %v461_v59  ;;  %v463_v61 = vmul.f32 1.442695, %v460_v60 }
 0x1cb   :  { %5903 = vpow2.f32 %v463_v61 }
 0x1cf   :  { %v5902_v62 = vpop.eup %5901 }
 0x1d0   :  { %v465_v63 = vsel %vm414_vm1, %v5902_v62, 0.0 }
 0x1d1   :  { %v5904_v0 = vpop.eup %5903  ;;  %466 = vadd.xlane.f32.xlu1 %v465_v63 }
 0x1d2   :  { %v468_v1 = vsel %vm414_vm1, %v5904_v0, 0.0 }
 0x1d3   :  { %469 = vadd.xlane.f32.xlu0 %v468_v1 }
 0x1f9   :  { %v648_v16 = vpop.f32.mrf.mxu3 }
 0x1fa   :  { %v655_v17 = vsel %vm414_vm1, %v648_v16, -inf }
 0x1fb   :  { %656 = vmax.xlane.f32.xlu2 %v655_v17 }
 0x201   :  { %v650_v18 = vpop.f32.mrf.mxu3 }
 0x244   :  { %v467_v20 = vpop.xlane.xlu1 %466 }
 0x245   :  { %5905 = vrcp.f32 %v467_v20 }
 0x246   :  { %v470_v22 = vpop.xlane.xlu0 %469 }
 0x247   :  { %5907 = vrcp.f32 %v470_v22 }
 0x24b   :  { %v5906_v23 = vpop.eup %5905 }
 0x24c   :  { %v6391_v24 = vmul.f32 %v5906_v23, %v5902_v62 }
 0x24d   :  { %v5908_v25 = vpop.eup %5907 }
 0x24e   :  { %v6393_v26 = vmul.f32 %v5908_v25, %v5904_v0  ;;  %v475_v27 = vpack.c.bf16 %v6391_v24, %v6391_v24 }
 0x250   :  { %4983 = vmatmul.msk.bf16.vlgmr.msrb.gmra.mxu1 %vm414_vm1, %v475_v27  ;;  %v476_v28 = vpack.c.bf16 %v6393_v26, %v6393_v26 }
 0x252   :  { %4984 = vmatmul.msk.bf16.vlgmr.msrb.gmra.mxu2 %vm414_vm1, %v476_v28 }
 0x253   :  { %728 = vmatpush.bf16.msrb.mxu2 %v719_v15  ;;  %v5698_v15 = vld [vmem:[%s6187_s25 + $0x30] sm:$0xff] }
 0x260   :  { %5011 = vmatmul.msk.bf16.vlgmr.msra.gmra.mxu1 %vm327_vm0, %v6374_v41 }
 0x262   :  { %5012 = vmatmul.msk.bf16.vlgmr.msra.gmra.mxu2 %vm414_vm1, %v608_v30  ;;  %v5838_v30 = vld [vmem:[%s6197_s3 + $0x2] ss:$0 sm:$0xff] }
 0x26e   :  { %v657_v31 = vpop.xlane.xlu2 %656 }
 0x26f   :  { %v659_v32 = vsub.f32 %v648_v16, %v657_v31  ;;  %v5837_v16 = vld [vmem:[%s6202_s8 + $0x2] ss:$0 sm:$0xff] }
 0x271   :  { %v662_v33 = vmul.f32 1.442695, %v659_v32 }
 0x273   :  { %5909 = vpow2.f32 %v662_v33 }
 0x279   :  { %v5910_v34 = vpop.eup %5909 }
 0x27a   :  { %v667_v35 = vsel %vm414_vm1, %v5910_v34, 0.0 }
 0x27b   :  { %668 = vadd.xlane.f32.xlu0 %v667_v35 }
 0x2cd   :  { %v493_v38 = vpop.f32.mrf.mxu1 }
 0x2d5   :  { %v495_v39 = vpop.f32.mrf.mxu1  ;;  %v512_v40 = vpop.f32.mrf.mxu2 }
 0x2d6   :  { %v516_v42 = vpack.c.bf16 %v512_v40, %v493_v38  ;;  %v5705_v39 = vld [vmem:[%s6192_s29 + $0x28] sm:$0xff]  ;;  %v5704_v40 = vld [vmem:[%s6192_s29 + $0x20] sm:$0xff] }
 0x2d7   :  { %838 = vmatpush.bf16.msra.mxu2 %v5705_v39 }
 0x2d8   :  { %5017 = vmatmul.msk.bf16.vlgmr.msrb.gmra.mxu3 %vm414_vm1, %v516_v42 }
 0x2db   :  { %839 = vmatpush.bf16.msra.mxu2 %v5704_v40 }
 0x2dd   :  { %v514_v44 = vpop.f32.mrf.mxu2  ;;  %v603_v45 = vpop.f32.mrf.mxu1 }
 0x2de   :  { %v604_v46 = vadd.f32 %v5836_v43, %v603_v45 }
 0x2e0   :  { %v612_v47 = vpack.c.bf16 %v604_v46, %v604_v46 }
 0x2e2   :  { %v680_v48 = vsel %vm480_vm2, %v612_v47, 0 }
 0x2e3   :  { %689 = vmatpush.bf16.msrb.mxu0 %v680_v48 }
 0x2e5   :  { %v629_v49 = vpop.f32.mrf.mxu2  ;;  %v605_v50 = vpop.f32.mrf.mxu1 }
 0x2e6   :  { %v652_v51 = vsel %vm414_vm1, %v629_v49, -inf  ;;  %v606_v52 = vadd.f32 %v5836_v43, %v605_v50 }
 0x2e7   :  { %653 = vmax.xlane.f32.xlu2 %v652_v51  ;;  %778 = vmatpush.bf16.msra.mxu0 %v5689_v7 }
 0x2e8   :  { %v613_v53 = vpack.c.bf16 %v606_v52, %v606_v52  ;;  %v5839_v52 = vld [vmem:[%s6207_s14 + $0x2] ss:$0 sm:$0xff] }
 0x2ea   :  { %v699_v54 = vsel %vm480_vm2, %v613_v53, 0 }
 0x2eb   :  { %708 = vmatpush.bf16.msrb.mxu1 %v699_v54  ;;  %779 = vmatpush.bf16.msra.mxu0 %v5688_v8 }
 0x2ed   :  { %v631_v55 = vpop.f32.mrf.mxu2 }
 0x2ee   :  { %v669_v56 = vpop.xlane.xlu0 %668 }
 0x2ef   :  { %5911 = vrcp.f32 %v669_v56  ;;  %809 = vmatpush.bf16.msra.mxu1 %v5697_v3 }
 0x2f3   :  { %810 = vmatpush.bf16.msra.mxu1 %v5696_v6 }
 0x2f5   :  { %v5912_v57 = vpop.eup %5911 }
 0x2f6   :  { %v6412_v58 = vmul.f32 %v5912_v57, %v5910_v34 }
 0x2f8   :  { %v675_v59 = vpack.c.bf16 %v6412_v58, %v6412_v58 }
 0x2fa   :  { %5015 = vmatmul.msk.bf16.vlgmr.msrb.gmra.mxu1 %vm414_vm1, %v675_v59 }
 0x30a   :  { %5035 = vmatmul.msk.bf16.vlgmr.msra.gmra.mxu1 %vm327_vm0, %v6348_v10 }
 0x35a   :  { %v654_v60 = vpop.xlane.xlu2 %653 }
 0x35b   :  { %v658_v61 = vsub.f32 %v629_v49, %v654_v60  ;;  %v6442_v42 = vpop.f32.mrf.mxu3 }
 0x35d   :  { %v660_v62 = vmul.f32 1.442695, %v658_v61 }
 0x35f   :  { %5913 = vpow2.f32 %v660_v62 }
 0x363   :  { %v6446_v43 = vpop.f32.mrf.mxu3 }
 0x365   :  { %v5914_v63 = vpop.eup %5913 }
 0x366   :  { %v664_v0 = vsel %vm414_vm1, %v5914_v63, 0.0 }
 0x367   :  { %665 = vadd.xlane.f32.xlu1 %v664_v0 }
 0x377   :  { %v710_v1 = vpop.f32.mrf.mxu1 }
 0x37f   :  { %v712_v2 = vpop.f32.mrf.mxu1 }
 0x387   :  { %v812_v17 = vpop.f32.mrf.mxu1 }
 0x388   :  { %v813_v18 = vadd.f32 %v5837_v16, %v812_v17 }
 0x38a   :  { %v848_v19 = vpack.c.bf16 %v813_v18, %v813_v18 }
 0x38c   :  { %v856_v20 = vsel %vm414_vm1, %v848_v19, 0 }
 0x38d   :  { %865 = vmatpush.bf16.xpose.msra.mxu3 %v856_v20 }
 0x38f   :  { %v814_v21 = vpop.f32.mrf.mxu1 }
 0x390   :  { %v815_v22 = vadd.f32 %v5837_v16, %v814_v21 }
 0x392   :  { %v849_v23 = vpack.c.bf16 %v815_v22, %v815_v22  ;;  %v756_v22 = vadd.f32 %v6412_v58, %v6393_v26 }
 0x394   :  { %v875_v25 = vsel %vm414_vm1, %v849_v23, 0 }
 0x3da   :  { %v666_v9 = vpop.xlane.xlu1 %665 }
 0x3db   :  { %5915 = vrcp.f32 %v666_v9 }
 0x3e1   :  { %v5916_v11 = vpop.eup %5915 }
 0x3e2   :  { %v6424_v12 = vmul.f32 %v5916_v11, %v5914_v63  ;;  %v5691_v11 = vld [vmem:[%s6182_s21 + $0x38] sm:$0xff] }
 0x3e4   :  { %v674_v13 = vpack.c.bf16 %v6424_v12, %v6424_v12  ;;  %v755_v19 = vadd.f32 %v6424_v12, %v6391_v24  ;;  %v220_v24 = vld [vmem:[%s6212_s19 + $0x8] sm:$0xf] }
 0x3e5   :  { %v957_v12 = vsel %vm480_vm2, %v220_v24, 0 }
 0x3e6   :  { %5014 = vmatmul.msk.bf16.vlgmr.msrb.gmra.mxu0 %vm414_vm1, %v674_v13  ;;  %v5699_v13 = vld [vmem:[%s6187_s25 + $0x38] sm:$0xff]  ;;  %966 = vmatpush.bf16.msrb.mxu3 %v957_v12 }
 0x3e7   :  { %884 = vmatpush.bf16.xpose.msrb.mxu0 %v875_v25 }
 0x3f6   :  { %5026 = vmatmul.msk.bf16.vlgmr.msra.gmra.mxu0 %vm327_vm0, %v6348_v10 }
 0x3f7   :  { %998 = vmatpush.bf16.msra.mxu0 %v5691_v11 }
 0x3fb   :  { %999 = vmatpush.bf16.msra.mxu0 %v5690_v14 }
 0x463   :  { %v691_v27 = vpop.f32.mrf.mxu0 }
 0x464   :  { %v714_v28 = vpack.c.bf16 %v710_v1, %v691_v27 }
 0x466   :  { %5016 = vmatmul.msk.bf16.vlgmr.msrb.gmra.mxu2 %vm414_vm1, %v714_v28 }
 0x46b   :  { %v693_v29 = vpop.f32.mrf.mxu0 }
 0x473   :  { %v781_v31 = vpop.f32.mrf.mxu0 }
 0x474   :  { %v782_v32 = vadd.f32 %v5838_v30, %v781_v31 }
 0x476   :  { %v786_v33 = vmul.f32 0.35355338, %v782_v32  ;;  %5044 = vmatmul.msk.bf16.vlgmr.msra.gmra.mxu2 %vm327_vm0, %v6374_v41  ;;  %v5840_v32 = vld [vmem:[%s6197_s3 + $0x3] ss:$0 sm:$0xff] }
 0x478   :  { %v846_v34 = vpack.c.bf16 %v786_v33, %v786_v33  ;;  %v5841_v33 = vld [vmem:[%s6202_s8 + $0x3] ss:$0 sm:$0xff] }
 0x47a   :  { %5045 = vmatmul.msk.bf16.vlgmr.msra.gmra.mxu3 %vm414_vm1, %v846_v34 }
 0x47b   :  { %v783_v35 = vpop.f32.mrf.mxu0 }
 0x47c   :  { %v784_v36 = vadd.f32 %v5838_v30, %v783_v35 }
 0x47e   :  { %v787_v37 = vmul.f32 0.35355338, %v784_v36 }
 0x480   :  { %v847_v38 = vpack.c.bf16 %v787_v37, %v787_v37 }
 0x482   :  { %5046 = vmatmul.msk.bf16.vlgmr.msrb.gmra.mxu0 %vm414_vm1, %v847_v38 }
 0x492   :  { %5058 = vmatmul.msk.bf16.vlgmr.msra.gmra.mxu0 %vm327_vm0, %v6348_v10 }
 0x4e9   :  { %v6450_v50 = vpop.f32.mrf.mxu2 }
 0x4f1   :  { %v6452_v51 = vpop.f32.mrf.mxu2 }
 0x4f9   :  { %v841_v55 = vpop.f32.mrf.mxu2 }
 0x4fa   :  { %v842_v57 = vadd.f32 %v5839_v52, %v841_v55  ;;  %v5707_v55 = vld [vmem:[%s6192_s29 + $0x38] sm:$0xff] }
 0x4fc   :  { %v850_v61 = vpack.c.bf16 %v842_v57, %v842_v57  ;;  %v751_v57 = vadd.f32 %v6442_v42, %v6450_v50  ;;  %v5842_v42 = vld [vmem:[%s6207_s14 + $0x3] ss:$0 sm:$0xff] }
 0x4fd   :  { %v867_v44 = vpop.f32.mrf.mxu3 }
 0x4fe   :  { %v890_v45 = vsel %vm414_vm1, %v867_v44, -inf  ;;  %v918_v63 = vsel %vm480_vm2, %v850_v61, 0 }
 0x4ff   :  { %v886_v46 = vpop.f32.mrf.mxu0  ;;  %891 = vmax.xlane.f32.xlu2 %v890_v45  ;;  %927 = vmatpush.bf16.msrb.mxu1 %v918_v63 }
 0x500   :  { %v893_v47 = vsel %vm414_vm1, %v886_v46, -inf }
 0x501   :  { %894 = vmax.xlane.f32.xlu0 %v893_v47  ;;  %v843_v6 = vpop.f32.mrf.mxu2 }
 0x502   :  { %v844_v7 = vadd.f32 %v5839_v52, %v843_v6 }
 0x503   :  { %1029 = vmatpush.bf16.msra.mxu1 %v5699_v13 }
 0x504   :  { %v851_v8 = vpack.c.bf16 %v844_v7, %v844_v7 }
 0x505   :  { %v869_v48 = vpop.f32.mrf.mxu3 }
 0x506   :  { %v937_v9 = vsel %vm480_vm2, %v851_v8, 0 }
 0x507   :  { %v888_v49 = vpop.f32.mrf.mxu0  ;;  %946 = vmatpush.bf16.msrb.mxu2 %v937_v9  ;;  %1030 = vmatpush.bf16.msra.mxu1 %v5698_v15 }
 0x50b   :  { %1058 = vmatpush.bf16.msra.mxu2 %v5707_v55 }
 0x50f   :  { %v1001_v34 = vpop.f32.mrf.mxu0 }
 0x510   :  { %v1002_v37 = vadd.f32 %v5840_v32, %v1001_v34 }
 0x572   :  { %v892_v53 = vpop.xlane.xlu2 %891 }
 0x573   :  { %v896_v54 = vsub.f32 %v867_v44, %v892_v53  ;;  %v1003_v44 = vpop.f32.mrf.mxu0 }
 0x574   :  { %v895_v56 = vpop.xlane.xlu0 %894  ;;  %v1004_v48 = vadd.f32 %v5840_v32, %v1003_v44 }
 0x575   :  { %v898_v59 = vmul.f32 1.442695, %v896_v54  ;;  %v897_v60 = vsub.f32 %v886_v46, %v895_v56  ;;  %v5706_v56 = vld [vmem:[%s6192_s29 + $0x30] sm:$0xff] }
 0x576   :  { %v1007_v53 = vmul.f32 0.35355338, %v1004_v48  ;;  %1059 = vmatpush.bf16.msra.mxu2 %v5706_v56 }
 0x577   :  { %5917 = vpow2.f32 %v898_v59  ;;  %v900_v62 = vmul.f32 1.442695, %v897_v60 }
 0x578   :  { %v1067_v54 = vpack.c.bf16 %v1007_v53, %v1007_v53 }
 0x579   :  { %5919 = vpow2.f32 %v900_v62 }
 0x57d   :  { %v5918_v0 = vpop.eup %5917 }
 0x57e   :  { %v902_v1 = vsel %vm414_vm1, %v5918_v0, 0.0 }
 0x57f   :  { %v5920_v2 = vpop.eup %5919  ;;  %903 = vadd.xlane.f32.xlu1 %v902_v1 }
 0x580   :  { %v905_v3 = vsel %vm414_vm1, %v5920_v2, 0.0 }
 0x581   :  { %906 = vadd.xlane.f32.xlu2 %v905_v3 }
 0x5f2   :  { %v904_v16 = vpop.xlane.xlu1 %903 }
 0x5f3   :  { %5921 = vrcp.f32 %v904_v16 }
 0x5f4   :  { %v907_v17 = vpop.xlane.xlu2 %906 }
 0x5f5   :  { %5923 = vrcp.f32 %v907_v17 }
 0x5f9   :  { %v5922_v18 = vpop.eup %5921 }
 0x5fa   :  { %v910_v20 = vmul.f32 %v5922_v18, %v5918_v0 }
 0x5fb   :  { %v5924_v21 = vpop.eup %5923 }
 0x5fc   :  { %v912_v23 = vpack.c.bf16 %v910_v20, %v910_v20  ;;  %v6469_v25 = vadd.f32 %v910_v20, %v755_v19  ;;  %v911_v27 = vmul.f32 %v5924_v21, %v5920_v2 }
 0x5fe   :  { %v913_v28 = vpack.c.bf16 %v911_v27, %v911_v27  ;;  %v6471_v29 = vadd.f32 %v911_v27, %v756_v22  ;;  %5047 = vmatmul.msk.bf16.vlgmr.msrb.gmra.mxu1 %vm414_vm1, %v912_v23 }
 0x600   :  { %5048 = vmatmul.msk.bf16.vlgmr.msrb.gmra.mxu2 %vm414_vm1, %v913_v28 }
 0x60e   :  { %5067 = vmatmul.msk.bf16.vlgmr.msra.gmra.mxu1 %vm327_vm0, %v6348_v10  ;;  %v1006_v10 = vmul.f32 0.35355338, %v1002_v37 }
 0x610   :  { %v1066_v46 = vpack.c.bf16 %v1006_v10, %v1006_v10  ;;  %5076 = vmatmul.msk.bf16.vlgmr.msra.gmra.mxu2 %vm327_vm0, %v6374_v41 }
 0x67b   :  { %v929_v26 = vpop.f32.mrf.mxu1 }
 0x683   :  { %v931_v58 = vpop.f32.mrf.mxu1  ;;  %v948_v30 = vpop.f32.mrf.mxu2 }
 0x684   :  { %v952_v31 = vpack.c.bf16 %v948_v30, %v929_v26 }
 0x686   :  { %5049 = vmatmul.msk.bf16.vlgmr.msrb.gmra.mxu3 %vm414_vm1, %v952_v31 }
 0x68b   :  { %v950_v35 = vpop.f32.mrf.mxu2  ;;  %v1032_v36 = vpop.f32.mrf.mxu1 }
 0x68c   :  { %v1033_v38 = vadd.f32 %v5841_v33, %v1032_v36  ;;  %v221_v36 = vld [vmem:[%s6212_s19 + $0xc] sm:$0xf] }
 0x68d   :  { %v1177_v37 = vsel %vm480_vm2, %v221_v36, 0  ;;  %v5708_v36 = vld [vmem:[%s7250_s0] sm:$0xff] }
 0x68e   :  { %v1068_v39 = vpack.c.bf16 %v1033_v38, %v1033_v38 }
 0x690   :  { %v1076_v40 = vsel %vm414_vm1, %v1068_v39, 0 }
 0x691   :  { %1085 = vmatpush.bf16.xpose.msra.mxu3 %v1076_v40  ;;  %v5843_v40 = vld [vmem:[%s6217_s24] ss:$0 sm:$0xff] }
 0x693   :  { %v1034_v45 = vpop.f32.mrf.mxu1  ;;  %v1061_v7 = vpop.f32.mrf.mxu2 }
 0x694   :  { %v1035_v47 = vadd.f32 %v5841_v33, %v1034_v45  ;;  %v1062_v9 = vadd.f32 %v5842_v42, %v1061_v7  ;;  %v147_v7 = vld [vmem:[%s6167_s9 + $0x18] sm:$0xff] }
 0x696   :  { %v1069_v49 = vpack.c.bf16 %v1035_v47, %v1035_v47  ;;  %v1070_v13 = vpack.c.bf16 %v1062_v9, %v1062_v9  ;;  %v753_v47 = vadd.f32 %v6446_v43, %v6452_v51  ;;  %v6149_v43 = vmov 32.0  }
 0x698   :  { %5077 = vmatmul.msk.bf16.vlgmr.msra.gmra.mxu3 %vm414_vm1, %v1066_v46  ;;  %v1095_v52 = vsel %vm414_vm1, %v1069_v49, 0  ;;  %v1138_v15 = vsel %vm480_vm2, %v1070_v13, 0 }
 0x699   :  { %1104 = vmatpush.bf16.xpose.msrb.mxu0 %v1095_v52  ;;  %1147 = vmatpush.bf16.msrb.mxu1 %v1138_v15 }
 0x69a   :  { %1186 = vmatpush.bf16.msrb.mxu3 %v1177_v37  ;;  %v5710_v37 = vld [vmem:[%s7250_s0 + $0x10] sm:$0xff] }
 0x69b   :  { %v1063_v16 = vpop.f32.mrf.mxu2 }
 0x69c   :  { %v1064_v17 = vadd.f32 %v5842_v42, %v1063_v16 }
 0x69e   :  { %v1071_v20 = vpack.c.bf16 %v1064_v17, %v1064_v17 }
 0x6a0   :  { %5078 = vmatmul.msk.bf16.vlgmr.msrb.gmra.mxu0 %vm414_vm1, %v1067_v54  ;;  %v1157_v23 = vsel %vm480_vm2, %v1071_v20, 0  ;;  %v150_v20 = vld [vmem:[%s6177_s17] sm:$0xff] }
 0x6a1   :  { %1166 = vmatpush.bf16.msrb.mxu2 %v1157_v23 }
 0x709   :  { %v968_v59 = vpop.f32.mrf.mxu3 }
 0x70a   :  { %v6490_v60 = vadd.f32 %v968_v59, %v751_v57  ;;  %v5725_v59 = vld [vmem:[%s6232_s12 + $0x8] sm:$0xff] }
 0x70b   :  { %1375 = vmatpush.bf16.msra.mxu2 %v5725_v59 }
 0x711   :  { %v6494_v61 = vpop.f32.mrf.mxu3 }
 0x712   :  { %v974_v49 = vadd.f32 %v6494_v61, %v753_v47 }
 0x71b   :  { %v1087_v62 = vpop.f32.mrf.mxu3 }
 0x71c   :  { %v1110_v63 = vsel %vm414_vm1, %v1087_v62, -inf }
 0x71d   :  { %v1106_v0 = vpop.f32.mrf.mxu0  ;;  %1111 = vmax.xlane.f32.xlu1 %v1110_v63  ;;  %v145_v63 = vld [vmem:[%s6167_s9 + $0x8] sm:$0xff] }
 0x71e   :  { %v1113_v1 = vsel %vm414_vm1, %v1106_v0, -inf }
 0x71f   :  { %1114 = vmax.xlane.f32.xlu0 %v1113_v1 }
 0x723   :  { %v1089_v2 = vpop.f32.mrf.mxu3 }
 0x725   :  { %v1108_v3 = vpop.f32.mrf.mxu0 }
 0x790   :  { %v1112_v50 = vpop.xlane.xlu1 %1111 }
 0x791   :  { %v1116_v6 = vsub.f32 %v1087_v62, %v1112_v50  ;;  %v144_v62 = vld [vmem:[%s6167_s9] sm:$0xff] }
 0x792   :  { %v1115_v8 = vpop.xlane.xlu0 %1114  ;;  %v6526_v1 = vpack.c.bf16 %v145_v63, %v144_v62 }
 0x793   :  { %v1118_v11 = vmul.f32 1.442695, %v1116_v6  ;;  %v1117_v41 = vsub.f32 %v1106_v0, %v1115_v8  ;;  %v5717_v0 = vld [vmem:[%s6227_s6 + $0x8] sm:$0xff]  ;;  %v146_v6 = vld [vmem:[%s6167_s9 + $0x10] sm:$0xff]  ;;  %s7252_s9 = sld [smem:[#allocation19_spill]] }
 0x794   :  { %1335 = vmatpush.bf16.msra.mxu1 %v5717_v0 }
 0x795   :  { %5925 = vpow2.f32 %v1118_v11  ;;  %v1120_v14 = vmul.f32 1.442695, %v1117_v41  ;;  %v6539_v11 = vpack.c.bf16 %v147_v7, %v146_v6 }
 0x797   :  { %5927 = vpow2.f32 %v1120_v14 }
 0x79b   :  { %v5926_v18 = vpop.eup %5925 }
 0x79c   :  { %v1122_v19 = vsel %vm414_vm1, %v5926_v18, 0.0 }
 0x79d   :  { %v5928_v21 = vpop.eup %5927  ;;  %1123 = vadd.xlane.f32.xlu0 %v1122_v19  ;;  %v5716_v19 = vld [vmem:[%s6227_s6] sm:$0xff] }
 0x79e   :  { %v1125_v22 = vsel %vm414_vm1, %v5928_v21, 0.0  ;;  %1336 = vmatpush.bf16.msra.mxu1 %v5716_v19 }
 0x79f   :  { %1126 = vadd.xlane.f32.xlu2 %v1125_v22  ;;  %v154_v22 = vadd.f32 %v150_v20, %v144_v62  ;;  %v5848_v20 = vld [vmem:[%s7254_s15 + $0x1] ss:$0 sm:$0xff] }
 0x810   :  { %v1124_v27 = vpop.xlane.xlu0 %1123 }
 0x811   :  { %5929 = vrcp.f32 %v1124_v27  ;;  %v5718_v27 = vld [vmem:[%s6227_s6 + $0x10] sm:$0xff] }
 0x812   :  { %v1127_v28 = vpop.xlane.xlu2 %1126 }
 0x813   :  { %5931 = vrcp.f32 %v1127_v28 }
 0x814   :  { %5933 = vrcp.f32 %v6149_v43  ;;  %v5845_v43 = vld [vmem:[%s7252_s9] ss:$0 sm:$0xff] }
 0x817   :  { %v5930_v24 = vpop.eup %5929 }
 0x818   :  { %v1130_v12 = vmul.f32 %v5930_v24, %v5926_v18  ;;  %v5719_v18 = vld [vmem:[%s6227_s6 + $0x18] sm:$0xff]  ;;  %v152_v24 = vld [vmem:[%s6177_s17 + $0x10] sm:$0xff] }
 0x819   :  { %v5932_v26 = vpop.eup %5931 }
 0x81a   :  { %v1132_v58 = vpack.c.bf16 %v1130_v12, %v1130_v12  ;;  %v1195_v30 = vadd.f32 %v1130_v12, %v6469_v25  ;;  %v1131_v31 = vmul.f32 %v5932_v26, %v5928_v21  ;;  %v5934_v51 = vpop.eup %5933  ;;  %v151_v21 = vld [vmem:[%s6177_s17 + $0x8] sm:$0xff]  ;;  %v153_v12 = vld [vmem:[%s6177_s17 + $0x18] sm:$0xff]  ;;  %v156_v26 = vadd.f32 %v152_v24, %v146_v6  ;;  %s7253_s17 = sld [smem:[#allocation11_spill]] }
 0x81b   :  { %vm1217_vm3 = vweird.f32 %v5934_v51  ;;  %v155_v23 = vadd.f32 %v151_v21, %v145_v63  ;;  %v6059_v63 = vld [vmem:[%s6172_s13] sm:$0xff] }
 0x81c   :  { %v1202_v32 = vmul.f32 0.25, %v1195_v30  ;;  %v1133_v33 = vpack.c.bf16 %v1131_v31, %v1131_v31  ;;  %v1196_v34 = vadd.f32 %v1131_v31, %v6471_v29  ;;  %5079 = vmatmul.msk.bf16.vlgmr.msrb.gmra.mxu1 %vm414_vm1, %v1132_v58  ;;  %v157_v58 = vadd.f32 %v153_v12, %v147_v7 }
 0x81d   :  { %v6555_v28 = vpack.c.bf16 %v155_v23, %v154_v22 }
 0x81e   :  { %2486 = vst.msk [vmem:[#allocation2] sm:$0xff] %vm414_vm1, %v1202_v32  ;;  %v1203_v35 = vmul.f32 0.25, %v1196_v34  ;;  %5080 = vmatmul.msk.bf16.vlgmr.msrb.gmra.mxu2 %vm414_vm1, %v1133_v33  ;;  %v6563_v30 = vpack.c.bf16 %v157_v58, %v156_v26  ;;  %v5709_v32 = vld [vmem:[%s7250_s0 + $0x8] sm:$0xff]  ;;  %v5711_v33 = vld [vmem:[%s7250_s0 + $0x18] sm:$0xff] }
 0x81f   :  { %1298 = vmatpush.bf16.msra.mxu0 %v5709_v32  ;;  %1539 = vmatpush.bf16.msrb.mxu1 %v5711_v33 }
 0x820   :  { %2487 = vst.msk [vmem:[#allocation2 + $0x8] sm:$0xff] %vm414_vm1, %v1203_v35 }
 0x823   :  { %1299 = vmatpush.bf16.msra.mxu0 %v5708_v36  ;;  %1540 = vmatpush.bf16.msrb.mxu1 %v5710_v37 }
 0x82c   :  { %5099 = vmatmul.msk.bf16.vlgmr.msra.gmra.mxu1 %vm327_vm0, %v6555_v28 }
 0x83c   :  { %5100 = vmatmul.msk.bf16.gmra.mxu1 %vm327_vm0, %v6563_v30 }
 0x899   :  { %v1149_v25 = vpop.f32.mrf.mxu1 }
 0x8a1   :  { %v1151_v38 = vpop.f32.mrf.mxu1  ;;  %v1168_v39 = vpop.f32.mrf.mxu2 }
 0x8a2   :  { %v1172_v10 = vpack.c.bf16 %v1168_v39, %v1149_v25 }
 0x8a4   :  { %5081 = vmatmul.msk.bf16.vlgmr.msrb.gmra.mxu3 %vm414_vm1, %v1172_v10 }
 0x8a9   :  { %v1170_v29 = vpop.f32.mrf.mxu2 }
 0x927   :  { %v1188_v44 = vpop.f32.mrf.mxu3 }
 0x928   :  { %v1193_v45 = vadd.f32 %v1188_v44, %v6490_v60  ;;  %v5724_v60 = vld [vmem:[%s6232_s12] sm:$0xff] }
 0x929   :  { %1376 = vmatpush.bf16.msra.mxu2 %v5724_v60 }
 0x92a   :  { %v1200_v46 = vadd.f32 %v5843_v40, %v1193_v45 }
 0x92c   :  { %v1204_v48 = vadd.f32 %v1200_v46, %v6339_v4  ;;  %v1213_v4 = vmul.f32 32.0, %v5934_v51  ;;  %5109 = vmatmul.msk.bf16.vlgmr.msra.gmra.mxu2 %vm327_vm0, %v6526_v1 }
 0x92d   :  { %1570 = vmatpush.bf16.msrb.mxu2 %v5719_v18 }
 0x92e   :  { %v1206_v52 = vsel %vm327_vm0, %v1204_v48, 0.0  ;;  %v1214_v61 = vsub.f32 1.0, %v1213_v4 }
 0x92f   :  { %1207 = vadd.xlane.f32.xlu1 %v1206_v52  ;;  %v1190_v53 = vpop.f32.mrf.mxu3 }
 0x930   :  { %v1194_v54 = vadd.f32 %v1190_v53, %v974_v49 }
 0x931   :  { %1571 = vmatpush.bf16.msrb.mxu2 %v5718_v27 }
 0x932   :  { %v1201_v55 = vadd.f32 %v5843_v40, %v1194_v54  ;;  %v5844_v54 = vld [vmem:[%s7251_s5] ss:$0 sm:$0xff] }
 0x934   :  { %v1205_v56 = vadd.f32 %v1201_v55, %v6342_v5  ;;  %v1215_v5 = vmul.f32 %v5934_v51, %v1214_v61 }
 0x936   :  { %v1209_v57 = vsel %vm327_vm0, %v1205_v56, 0.0  ;;  %v1216_v2 = vadd.f32 %v5934_v51, %v1215_v5  ;;  %v6060_v5 = vld [vmem:[%s6172_s13 + $0x8] sm:$0xff] }
 0x937   :  { %1210 = vadd.xlane.f32.xlu2 %v1209_v57 }
 0x938   :  { %v6530_v3 = vsel %vm1217_vm3, %v5934_v51, %v1216_v2 }
 0x93c   :  { %5110 = vmatmul.msk.bf16.gmra.mxu2 %vm327_vm0, %v6539_v11 }
 0x94c   :  { %5132 = vmatmul.msk.bf16.vlgmr.msrb.gmra.mxu2 %vm327_vm0, %v6555_v28 }
 0x95c   :  { %5133 = vmatmul.msk.bf16.gmra.mxu2 %vm327_vm0, %v6563_v30 }
 0x9a2   :  { %v1208_v42 = vpop.xlane.xlu1 %1207 }
 0x9a3   :  { %v1219_v50 = vmul.f32 %v6530_v3, %v1208_v42 }
 0x9a5   :  { %v6535_v8 = vsub.f32 %v1204_v48, %v1219_v50 }
 0x9a7   :  { %v1223_v9 = vmul.f32 %v6535_v8, %v6535_v8 }
 0x9a9   :  { %v1225_v41 = vsel %vm327_vm0, %v1223_v9, 0.0  ;;  %v5846_v9 = vld [vmem:[%s7253_s17] ss:$0 sm:$0xff] }
 0x9aa   :  { %1226 = vadd.xlane.f32.xlu0 %v1225_v41  ;;  %v1211_v13 = vpop.xlane.xlu2 %1210  ;;  %v5847_v41 = vld [vmem:[%s7254_s15] ss:$0 sm:$0xff] }
 0x9ab   :  { %v1220_v14 = vmul.f32 %v6530_v3, %v1211_v13  ;;  %v1338_v13 = vpop.f32.mrf.mxu1 }
 0x9ad   :  { %v6545_v15 = vsub.f32 %v1205_v56, %v1220_v14 }
 0x9af   :  { %v1224_v16 = vmul.f32 %v6545_v15, %v6545_v15  ;;  %v1378_v50 = vpop.f32.mrf.mxu2 }
 0x9b0   :  { %v1379_v14 = vadd.f32 %v5846_v9, %v1378_v50 }
 0x9b1   :  { %v1228_v17 = vsel %vm327_vm0, %v1224_v16, 0.0  ;;  %v1339_v16 = vadd.f32 %v5847_v41, %v1338_v13 }
 0x9b2   :  { %1229 = vadd.xlane.f32.xlu1 %v1228_v17  ;;  %v1394_v17 = vpack.c.bf16 %v1379_v14, %v1379_v14 }
 0x9b3   :  { %v1390_v19 = vpack.c.bf16 %v1339_v16, %v1339_v16  ;;  %v1340_v21 = vpop.f32.mrf.mxu1 }
 0x9b4   :  { %v1341_v23 = vadd.f32 %v5847_v41, %v1340_v21  ;;  %v1473_v24 = vunpack.c.l.b16 %v1394_v17 }
 0x9b5   :  { %v1400_v26 = vunpack.c.l.b16 %v1390_v19 }
 0x9b6   :  { %v1391_v58 = vpack.c.bf16 %v1341_v23, %v1341_v23 }
 0x9b7   :  { %v1380_v6 = vpop.f32.mrf.mxu2 }
 0x9bf   :  { %v1383_v7 = vpop.f32.mrf.mxu2 }
 0xa1d   :  { %v1227_v31 = vpop.xlane.xlu0 %1226 }
 0xa1e   :  { %v1231_v34 = vmul.f32 %v1227_v31, %v6530_v3  ;;  %v1401_v31 = vunpack.c.l.b16 %v1391_v58 }
 0xa20   :  { %v1233_v35 = vadd.f32 1e-05, %v1231_v34  ;;  %v1402_v33 = vpack.c.b16 %v1401_v31, %v1400_v26 }
 0xa22   :  { %5935 = vrsqrt.f32 %v1233_v35  ;;  %vm1241_vm5 = vweird.f32 %v1233_v35 }
 0xa25   :  { %v1230_v25 = vpop.xlane.xlu1 %1229 }
 0xa26   :  { %v1232_v38 = vmul.f32 %v1230_v25, %v6530_v3  ;;  %v1407_v25 = vsel %vm414_vm1, %v1402_v33, 0 }
 0xa27   :  { %1416 = vmatpush.bf16.xpose.msra.mxu3 %v1407_v25 }
 0xa28   :  { %v5936_v39 = vpop.eup %5935  ;;  %v1234_v10 = vadd.f32 1e-05, %v1232_v38  ;;  %v1384_v38 = vadd.f32 %v5846_v9, %v1383_v7 }
 0xa29   :  { %v1236_v29 = vmul.f32 %v5936_v39, %v1233_v35  ;;  %vm1242_vm4 = vweird.f32 %v5936_v39  ;;  %v1343_v35 = vpop.f32.mrf.mxu1 }
 0xa2a   :  { %5937 = vrsqrt.f32 %v1234_v10  ;;  %vm1243_vm6 = vmor %vm1241_vm5, %vm1242_vm4  ;;  %vm1251_vm8 = vweird.f32 %v1234_v10  ;;  %vm2412_vm4 = vcmask 523264  }
 0xa2b   :  { %v1237_v40 = vmul.f32 %v5936_v39, %v1236_v29  ;;  %v1344_v29 = vadd.f32 %v5847_v41, %v1343_v35 }
 0xa2d   :  { %v1238_v44 = vmul.f32 0.5, %v1237_v40 }
 0xa2f   :  { %v1239_v45 = vsub.f32 1.5, %v1238_v44 }
 0xa30   :  { %v5938_v46 = vpop.eup %5937 }
 0xa31   :  { %v1240_v47 = vmul.f32 %v5936_v39, %v1239_v45  ;;  %v1246_v48 = vmul.f32 %v5938_v46, %v1234_v10  ;;  %vm1252_vm7 = vweird.f32 %v5938_v46  ;;  %v1396_v45 = vpack.c.bf16 %v1384_v38, %v1384_v38 }
 0xa32   :  { %vm1253_vm9 = vmor %vm1251_vm8, %vm1252_vm7 }
 0xa33   :  { %v1244_v49 = vsel %vm1243_vm6, %v5936_v39, %v1240_v47  ;;  %v1247_v52 = vmul.f32 %v5938_v46, %v1246_v48  ;;  %v1392_v47 = vpack.c.bf16 %v1344_v29, %v1344_v29 }
 0xa34   :  { %v1255_v55 = vmul.f32 %v1244_v49, %v6535_v8  ;;  %v1385_v8 = vpop.f32.mrf.mxu2  ;;  %v1345_v49 = vpop.f32.mrf.mxu1 }
 0xa35   :  { %v1248_v53 = vmul.f32 0.5, %v1247_v52  ;;  %v1386_v39 = vadd.f32 %v5846_v9, %v1385_v8 }
 0xa36   :  { %v1260_v51 = vmul.f32 %v5844_v54, %v1255_v55 }
 0xa37   :  { %v1249_v56 = vsub.f32 1.5, %v1248_v53  ;;  %v1346_v53 = vadd.f32 %v5847_v41, %v1345_v49  ;;  %v5850_v41 = vld [vmem:[%s7255_s16 + $0x1] ss:$0 sm:$0xff] }
 0xa38   :  { %v6579_v60 = vadd.f32 %v5845_v43, %v1260_v51 }
 0xa39   :  { %v1250_v57 = vmul.f32 %v5938_v46, %v1249_v56  ;;  %v1424_v56 = vunpack.c.l.b16 %v1392_v47 }
 0xa3a   :  { %v1267_v0 = vadd.f32 %v6059_v63, %v6579_v60 }
 0xa3b   :  { %v1254_v4 = vsel %vm1253_vm9, %v5938_v46, %v1250_v57  ;;  %v1397_v46 = vpack.c.bf16 %v1386_v39, %v1386_v39  ;;  %v1393_v57 = vpack.c.bf16 %v1346_v53, %v1346_v53 }
 0xa3c   :  { %v1256_v59 = vmul.f32 %v1254_v4, %v6545_v15  ;;  %v1381_v15 = vadd.f32 %v5846_v9, %v1380_v6  ;;  %v1573_v22 = vpop.f32.mrf.mxu2  ;;  %v5849_v9 = vld [vmem:[%s7255_s16] ss:$0 sm:$0xff] }
 0xa3d   :  { %v1574_v27 = vadd.f32 %v5848_v20, %v1573_v22  ;;  %v1496_v55 = vunpack.c.l.b16 %v1397_v46  ;;  %v1425_v51 = vunpack.c.l.b16 %v1393_v57  ;;  %v5726_v57 = vld [vmem:[%s6232_s12 + $0x10] sm:$0xff] }
 0xa3e   :  { %v1261_v61 = vmul.f32 %v5844_v54, %v1256_v59  ;;  %v1395_v18 = vpack.c.bf16 %v1381_v15, %v1381_v15  ;;  %v1495_v54 = vunpack.c.l.b16 %v1396_v45 }
 0xa3f   :  { %v1619_v34 = vpack.c.bf16 %v1574_v27, %v1574_v27  ;;  %v1426_v59 = vpack.c.b16 %v1425_v51, %v1424_v56  ;;  %v5727_v56 = vld [vmem:[%s6232_s12 + $0x18] sm:$0xff] }
 0xa40   :  { %v6581_v62 = vadd.f32 %v5845_v43, %v1261_v61  ;;  %v1474_v12 = vunpack.c.l.b16 %v1395_v18  ;;  %v1497_v4 = vpack.c.b16 %v1496_v55, %v1495_v54 }
 0xa41   :  { %v6597_v10 = vunpack.c.l.b16 %v1619_v34 }
 0xa42   :  { %v1268_v2 = vadd.f32 %v6060_v5, %v6581_v62  ;;  %v1475_v32 = vpack.c.b16 %v1474_v12, %v1473_v24  ;;  %v1431_v5 = vsel %vm414_vm1, %v1426_v59, 0 }
 0xa43   :  { %1440 = vmatpush.bf16.xpose.msrb.mxu0 %v1431_v5 }
 0xa44   :  { %v6587_v42 = vpack.c.bf16 %v1268_v2, %v1267_v0  ;;  %v1575_v36 = vpop.f32.mrf.mxu2  ;;  %1487 = vmatpush.bf16.msrb.mxu3 %v1475_v32 }
 0xa45   :  { %v1576_v37 = vadd.f32 %v5848_v20, %v1575_v36 }
 0xa46   :  { %5090 = vmatmul.msk.bf16.vlgmr.msra.gmra.mxu0 %vm327_vm0, %v6587_v42  ;;  %5123 = vmatmul.msk.bf16.vlgmr.msrb.gmra.mxu1 %vm327_vm0, %v6587_v42 }
 0xa47   :  { %v1620_v40 = vpack.c.bf16 %v1576_v37, %v1576_v37 }
 0xa49   :  { %v1630_v44 = vunpack.c.l.b16 %v1620_v40 }
 0xa4b   :  { %v1631_v48 = vpack.c.b16 %v1630_v44, %v6597_v10  ;;  %1509 = vmatpush.bf16.msra.mxu0 %v1497_v4 }
 0xa4c   :  { %v1578_v52 = vpop.f32.mrf.mxu2 }
 0xa4d   :  { %v1579_v43 = vadd.f32 %v5848_v20, %v1578_v52  ;;  %v1636_v25 = vsel %vm414_vm1, %v1631_v48, 0 }
 0xa4f   :  { %v1621_v61 = vpack.c.bf16 %v1579_v43, %v1579_v43 }
 0xa51   :  { %v1653_v2 = vunpack.c.l.b16 %v1621_v61 }
 0xa54   :  { %v1580_v63 = vpop.f32.mrf.mxu2 }
 0xa55   :  { %v1581_v0 = vadd.f32 %v5848_v20, %v1580_v63 }
 0xa57   :  { %v1622_v50 = vpack.c.bf16 %v1581_v0, %v1581_v0 }
 0xa59   :  { %v1654_v6 = vunpack.c.l.b16 %v1622_v50 }
 0xa5b   :  { %v1655_v7 = vpack.c.b16 %v1654_v6, %v1653_v2 }
 0xa5d   :  { %v1660_v8 = vsel %vm414_vm1, %v1655_v7, 0 }
 0xa5e   :  { %1669 = vmatpush.bf16.xpose.msra.mxu1 %v1660_v8 }
 0xac3   :  { %v1301_v13 = vpop.f32.mrf.mxu0  ;;  %v1542_v14 = vpop.f32.mrf.mxu1 }
 0xac4   :  { %v1302_v15 = vadd.f32 %v5849_v9, %v1301_v13  ;;  %v6604_v16 = vadd.f32 %v5850_v41, %v1542_v14 }
 0xac6   :  { %v1306_v17 = vmul.f32 0.35355338, %v1302_v15  ;;  %v1547_v8 = vmul.f32 0.35355338, %v6604_v16 }
 0xac8   :  { %v1388_v18 = vpack.c.bf16 %v1306_v17, %v1306_v17 }
 0xaca   :  { %5111 = vmatmul.msk.bf16.vlgmr.msra.gmra.mxu3 %vm414_vm1, %v1388_v18 }
 0xacb   :  { %v1303_v19 = vpop.f32.mrf.mxu0  ;;  %v1544_v20 = vpop.f32.mrf.mxu1  ;;  %1604 = vmatpush.bf16.msra.mxu3 %v5727_v56  ;;  %v5712_v56 = vld [vmem:[%s7250_s0 + $0x20] sm:$0xff] }
 0xacc   :  { %v1304_v21 = vadd.f32 %v5849_v9, %v1303_v19  ;;  %v1545_v22 = vadd.f32 %v5850_v41, %v1544_v20  ;;  %v1617_v9 = vpack.c.bf16 %v1547_v8, %v1547_v8  ;;  %v283_v41 = vld [vmem:[%s7256_s18] sm:$0xf]  ;;  %v284_v8 = vld [vmem:[%s7256_s18 + $0x4] sm:$0xf] }
 0xacd   :  { %v1768_v13 = vsel %vm480_vm2, %v283_v41, 0 }
 0xace   :  { %v1307_v23 = vmul.f32 0.35355338, %v1304_v21  ;;  %v1548_v27 = vmul.f32 0.35355338, %v1545_v22  ;;  %v5851_v22 = vld [vmem:[%s7253_s17 + $0x1] ss:$0 sm:$0xff] }
 0xacf   :  { %1605 = vmatpush.bf16.msra.mxu3 %v5726_v57 }
 0xad0   :  { %v1389_v24 = vpack.c.bf16 %v1307_v23, %v1307_v23  ;;  %v1618_v12 = vpack.c.bf16 %v1548_v27, %v1548_v27 }
 0xad2   :  { %5112 = vmatmul.msk.bf16.vlgmr.msrb.gmra.mxu0 %vm414_vm1, %v1389_v24  ;;  %5145 = vmatmul.msk.bf16.vlgmr.msra.gmra.mxu1 %vm414_vm1, %v1618_v12 }
 0xad3   :  { %1645 = vmatpush.bf16.xpose.msrb.mxu0 %v1636_v25 }
 0xb4d   :  { %v1418_v26 = vpop.f32.mrf.mxu3 }
 0xb4e   :  { %v1447_v58 = vsel %vm1446_vm10, %v1418_v26, -inf }
 0xb4f   :  { %v1442_v31 = vpop.f32.mrf.mxu0  ;;  %v1671_v32 = vpop.f32.mrf.mxu1  ;;  %1448 = vmax.xlane.f32.xlu0 %v1447_v58 }
 0xb50   :  { %v1450_v33 = vsel %vm1446_vm10, %v1442_v31, -inf  ;;  %v1678_v35 = vsel %vm1446_vm10, %v1671_v32, -inf }
 0xb51   :  { %1451 = vmax.xlane.f32.xlu2 %v1450_v33 }
 0xb55   :  { %v1420_v34 = vpop.f32.mrf.mxu3 }
 0xb57   :  { %v1444_v36 = vpop.f32.mrf.mxu0  ;;  %v1673_v37 = vpop.f32.mrf.mxu1  ;;  %1679 = vmax.xlane.f32.xlu0 %v1678_v35 }
 0xbc2   :  { %v1449_v38 = vpop.xlane.xlu0 %1448 }
 0xbc3   :  { %v1453_v39 = vsub.f32 %v1418_v26, %v1449_v38 }
 0xbc4   :  { %v1452_v10 = vpop.xlane.xlu2 %1451 }
 0xbc5   :  { %v1455_v29 = vmul.f32 1.442695, %v1453_v39  ;;  %v1454_v40 = vsub.f32 %v1442_v31, %v1452_v10 }
 0xbc7   :  { %5939 = vpow2.f32 %v1455_v29  ;;  %v1457_v44 = vmul.f32 1.442695, %v1454_v40 }
 0xbc9   :  { %5941 = vpow2.f32 %v1457_v44 }
 0xbca   :  { %v1680_v45 = vpop.xlane.xlu0 %1679 }
 0xbcb   :  { %v1682_v46 = vsub.f32 %v1671_v32, %v1680_v45 }
 0xbcd   :  { %v5940_v47 = vpop.eup %5939  ;;  %v1685_v49 = vmul.f32 1.442695, %v1682_v46 }
 0xbce   :  { %v1459_v52 = vsel %vm1446_vm10, %v5940_v47, 0.0 }
 0xbcf   :  { %v5942_v53 = vpop.eup %5941  ;;  %5943 = vpow2.f32 %v1685_v49  ;;  %1460 = vadd.xlane.f32.xlu2 %v1459_v52  ;;  %v5721_v52 = vld [vmem:[%s6227_s6 + $0x28] sm:$0xff] }
 0xbd0   :  { %v1462_v48 = vsel %vm1446_vm10, %v5942_v53, 0.0 }
 0xbd1   :  { %1463 = vadd.xlane.f32.xlu1 %v1462_v48 }
 0xbd5   :  { %v5944_v54 = vpop.eup %5943 }
 0xbd6   :  { %v1690_v55 = vsel %vm1446_vm10, %v5944_v54, 0.0 }
 0xbd7   :  { %1691 = vadd.xlane.f32.xlu2 %v1690_v55  ;;  %v5713_v55 = vld [vmem:[%s7250_s0 + $0x28] sm:$0xff] }
 0xc42   :  { %v1461_v43 = vpop.xlane.xlu2 %1460 }
 0xc43   :  { %5945 = vrcp.f32 %v1461_v43 }
 0xc44   :  { %v1464_v51 = vpop.xlane.xlu1 %1463 }
 0xc45   :  { %5947 = vrcp.f32 %v1464_v51 }
 0xc49   :  { %v5946_v4 = vpop.eup %5945 }
 0xc4a   :  { %v6618_v59 = vmul.f32 %v5946_v4, %v5940_v47  ;;  %v1692_v61 = vpop.xlane.xlu2 %1691 }
 0xc4b   :  { %v5948_v63 = vpop.eup %5947  ;;  %5949 = vrcp.f32 %v1692_v61 }
 0xc4c   :  { %v1469_v0 = vpack.c.bf16 %v6618_v59, %v6618_v59  ;;  %v1468_v5 = vmul.f32 %v5948_v63, %v5942_v53  ;;  %v5720_v53 = vld [vmem:[%s6227_s6 + $0x20] sm:$0xff] }
 0xc4d   :  { %v5852_v63 = vld [vmem:[%s7254_s15 + $0x2] ss:$0 sm:$0xff] }
 0xc4e   :  { %v1470_v2 = vpack.c.bf16 %v1468_v5, %v1468_v5  ;;  %5113 = vmatmul.msk.bf16.vlgmr.msrb.gmra.mxu3 %vm1446_vm10, %v1469_v0 }
 0xc4f   :  { %1777 = vmatpush.bf16.msrb.mxu3 %v1768_v13  ;;  %v1748_v13 = vsel %vm480_vm2, %v284_v8, 0 }
 0xc50   :  { %5114 = vmatmul.msk.bf16.vlgmr.msra.gmra.mxu0 %vm1446_vm10, %v1470_v2  ;;  %1757 = vmatpush.bf16.msra.mxu2 %v1748_v13 }
 0xc51   :  { %v5950_v50 = vpop.eup %5949 }
 0xc52   :  { %v1696_v6 = vmul.f32 %v5950_v50, %v5944_v54 }
 0xc54   :  { %v6624_v7 = vadd.f32 %v1696_v6, %v1468_v5  ;;  %v1698_v40 = vpack.c.bf16 %v1696_v6, %v1696_v6 }
 0xc5e   :  { %5142 = vmatmul.msk.bf16.vlgmr.msra.gmra.mxu3 %vm327_vm0, %v6526_v1 }
 0xc60   :  { %5144 = vmatmul.msk.bf16.vlgmr.msrb.gmra.mxu0 %vm414_vm1, %v1617_v9 }
 0xc6e   :  { %5143 = vmatmul.msk.bf16.gmra.mxu3 %vm327_vm0, %v6539_v11 }
 0xccd   :  { %v1511_v14 = vpop.f32.mrf.mxu0 }
 0xcd1   :  { %v1489_v15 = vpop.f32.mrf.mxu3 }
 0xcd2   :  { %v1515_v17 = vpack.c.bf16 %v1511_v14, %v1489_v15 }
 0xcd4   :  { %5149 = vmatmul.msk.bf16.vlgmr.msrb.gmra.mxu3 %vm414_vm1, %v1515_v17 }
 0xcd5   :  { %v1513_v16 = vpop.f32.mrf.mxu0 }
 0xcd9   :  { %v1491_v18 = vpop.f32.mrf.mxu3 }
 0xcda   :  { %v5729_v18 = vld [vmem:[%s6232_s12 + $0x28] sm:$0xff] }
 0xcdb   :  { %1872 = vmatpush.bf16.msrb.mxu2 %v5729_v18 }
 0xcdd   :  { %v1647_v19 = vpop.f32.mrf.mxu0 }
 0xcde   :  { %v1675_v20 = vsel %vm1446_vm10, %v1647_v19, -inf }
 0xcdf   :  { %1676 = vmax.xlane.f32.xlu1 %v1675_v20 }
 0xce1   :  { %v1607_v21 = vpop.f32.mrf.mxu3 }
 0xce2   :  { %v1608_v23 = vadd.f32 %v5851_v22, %v1607_v21 }
 0xce4   :  { %v1623_v24 = vpack.c.bf16 %v1608_v23, %v1608_v23  ;;  %v5728_v23 = vld [vmem:[%s6232_s12 + $0x20] sm:$0xff] }
 0xce5   :  { %v1649_v27 = vpop.f32.mrf.mxu0  ;;  %1873 = vmatpush.bf16.msrb.mxu2 %v5728_v23 }
 0xce6   :  { %v1701_v58 = vunpack.c.l.b16 %v1623_v24 }
 0xce9   :  { %v1609_v12 = vpop.f32.mrf.mxu3 }
 0xcea   :  { %v1610_v26 = vadd.f32 %v5851_v22, %v1609_v12 }
 0xcec   :  { %v1624_v31 = vpack.c.bf16 %v1610_v26, %v1610_v26 }
 0xcee   :  { %v1702_v32 = vunpack.c.l.b16 %v1624_v31 }
 0xcf0   :  { %v1703_v33 = vpack.c.b16 %v1702_v32, %v1701_v58  ;;  %v5715_v32 = vld [vmem:[%s7250_s0 + $0x38] sm:$0xff] }
 0xcf1   :  { %v1612_v34 = vpop.f32.mrf.mxu3 }
 0xcf2   :  { %1715 = vmatpush.bf16.msra.mxu0 %v1703_v33  ;;  %v1613_v35 = vadd.f32 %v5851_v22, %v1612_v34  ;;  %v5714_v33 = vld [vmem:[%s7250_s0 + $0x30] sm:$0xff] }
 0xcf4   :  { %v1625_v36 = vpack.c.bf16 %v1613_v35, %v1613_v35  ;;  %v5853_v35 = vld [vmem:[%s7255_s16 + $0x2] ss:$0 sm:$0xff] }
 0xcf6   :  { %v1723_v38 = vunpack.c.l.b16 %v1625_v36  ;;  %1807 = vmatpush.bf16.msrb.mxu0 %v5713_v55 }
 0xcf9   :  { %v1614_v37 = vpop.f32.mrf.mxu3 }
 0xcfa   :  { %v1615_v25 = vadd.f32 %v5851_v22, %v1614_v37  ;;  %1808 = vmatpush.bf16.msrb.mxu0 %v5712_v56 }
 0xcfc   :  { %v1626_v39 = vpack.c.bf16 %v1615_v25, %v1615_v25 }
 0xcfe   :  { %v1724_v10 = vunpack.c.l.b16 %v1626_v39 }
 0xd00   :  { %v1725_v29 = vpack.c.b16 %v1724_v10, %v1723_v38 }
 0xd02   :  { %1737 = vmatpush.bf16.msrb.mxu1 %v1725_v29 }
 0xd05   :  { %5147 = vmatmul.msk.bf16.vlgmr.msrb.gmra.mxu1 %vm1446_vm10, %v1698_v40 }
 0xd06   :  { %1838 = vmatpush.bf16.msra.mxu1 %v5721_v52 }
 0xd0a   :  { %1839 = vmatpush.bf16.msra.mxu1 %v5720_v53 }
 0xd15   :  { %5167 = vmatmul.msk.bf16.vlgmr.msra.gmra.mxu1 %vm327_vm0, %v6555_v28 }
 0xd25   :  { %5168 = vmatmul.msk.bf16.gmra.mxu1 %vm327_vm0, %v6563_v30 }
 0xd52   :  { %v1677_v44 = vpop.xlane.xlu1 %1676 }
 0xd53   :  { %v1681_v45 = vsub.f32 %v1647_v19, %v1677_v44 }
 0xd55   :  { %v1683_v46 = vmul.f32 1.442695, %v1681_v45 }
 0xd57   :  { %5951 = vpow2.f32 %v1683_v46  ;;  %v6675_v45 = vpop.f32.mrf.mxu3 }
 0xd5d   :  { %v5952_v47 = vpop.eup %5951 }
 0xd5e   :  { %v1687_v49 = vsel %vm1446_vm10, %v5952_v47, 0.0 }
 0xd5f   :  { %1688 = vadd.xlane.f32.xlu0 %v1687_v49  ;;  %v5854_v49 = vld [vmem:[%s7253_s17 + $0x2] ss:$0 sm:$0xff] }
 0xd82   :  { %v1739_v48 = vpop.f32.mrf.mxu1 }
 0xd8a   :  { %v1741_v54 = vpop.f32.mrf.mxu1 }
 0xd92   :  { %v1841_v61 = vpop.f32.mrf.mxu1 }
 0xd93   :  { %v1842_v5 = vadd.f32 %v5852_v63, %v1841_v61 }
 0xd95   :  { %v1887_v50 = vpack.c.bf16 %v1842_v5, %v1842_v5 }
 0xd97   :  { %v1897_v9 = vunpack.c.l.b16 %v1887_v50 }
 0xd9a   :  { %v1843_v0 = vpop.f32.mrf.mxu1 }
 0xd9b   :  { %v1844_v2 = vadd.f32 %v5852_v63, %v1843_v0 }
 0xd9d   :  { %v1888_v6 = vpack.c.bf16 %v1844_v2, %v1844_v2 }
 0xd9f   :  { %v1898_v41 = vunpack.c.l.b16 %v1888_v6 }
 0xda1   :  { %v1899_v14 = vpack.c.b16 %v1898_v41, %v1897_v9 }
 0xda2   :  { %v1846_v15 = vpop.f32.mrf.mxu1 }
 0xda3   :  { %v1847_v17 = vadd.f32 %v5852_v63, %v1846_v15  ;;  %v1904_v16 = vsel %vm414_vm1, %v1899_v14, 0 }
 0xda4   :  { %1913 = vmatpush.bf16.xpose.msra.mxu3 %v1904_v16 }
 0xda5   :  { %v1889_v19 = vpack.c.bf16 %v1847_v17, %v1847_v17 }
 0xda7   :  { %v1921_v27 = vunpack.c.l.b16 %v1889_v19 }
 0xdaa   :  { %v1848_v20 = vpop.f32.mrf.mxu1 }
 0xdab   :  { %v1849_v21 = vadd.f32 %v5852_v63, %v1848_v20 }
 0xdad   :  { %v1890_v22 = vpack.c.bf16 %v1849_v21, %v1849_v21 }
 0xdaf   :  { %v1922_v24 = vunpack.c.l.b16 %v1890_v22 }
 0xdb1   :  { %v1923_v12 = vpack.c.b16 %v1922_v24, %v1921_v27 }
 0xdb3   :  { %v1928_v26 = vsel %vm414_vm1, %v1923_v12, 0 }
 0xdd2   :  { %v1689_v57 = vpop.xlane.xlu0 %1688 }
 0xdd3   :  { %5953 = vrcp.f32 %v1689_v57 }
 0xdd9   :  { %v5954_v43 = vpop.eup %5953 }
 0xdda   :  { %v6647_v51 = vmul.f32 %v5954_v43, %v5952_v47  ;;  %v6679_v47 = vpop.f32.mrf.mxu3 }
 0xddc   :  { %v1697_v4 = vpack.c.bf16 %v6647_v51, %v6647_v51 }
 0xdde   :  { %5146 = vmatmul.msk.bf16.vlgmr.msra.gmra.mxu0 %vm1446_vm10, %v1697_v4 }
 0xddf   :  { %1937 = vmatpush.bf16.xpose.msra.mxu0 %v1928_v26  ;;  %v5723_v26 = vld [vmem:[%s6227_s6 + $0x38] sm:$0xff] }
 0xdee   :  { %5158 = vmatmul.msk.bf16.vlgmr.msrb.gmra.mxu0 %vm327_vm0, %v6587_v42 }
 0xe5b   :  { %v1717_v58 = vpop.f32.mrf.mxu0 }
 0xe5c   :  { %v1743_v31 = vpack.c.bf16 %v1739_v48, %v1717_v58  ;;  %v5722_v58 = vld [vmem:[%s6227_s6 + $0x30] sm:$0xff] }
 0xe5e   :  { %5148 = vmatmul.msk.bf16.vlgmr.msra.gmra.mxu2 %vm414_vm1, %v1743_v31 }
 0xe5f   :  { %2057 = vmatpush.bf16.msra.mxu2 %v5715_v32 }
 0xe63   :  { %v1719_v34 = vpop.f32.mrf.mxu0  ;;  %2058 = vmatpush.bf16.msra.mxu2 %v5714_v33 }
 0xe64   :  { %v1784_v34 = vadd.f32 %v6647_v51, %v6618_v59  ;;  %v285_v59 = vld [vmem:[%s7256_s18 + $0x8] sm:$0xf] }
 0xe65   :  { %v2016_v51 = vsel %vm480_vm2, %v285_v59, 0 }
 0xe66   :  { %2025 = vmatpush.bf16.msrb.mxu1 %v2016_v51  ;;  %v5857_v51 = vld [vmem:[%s7253_s17 + $0x3] ss:$0 sm:$0xff] }
 0xe6b   :  { %v1810_v36 = vpop.f32.mrf.mxu0 }
 0xe6c   :  { %v1811_v37 = vadd.f32 %v5853_v35, %v1810_v36 }
 0xe6e   :  { %v1815_v25 = vmul.f32 0.35355338, %v1811_v37  ;;  %5177 = vmatmul.msk.bf16.vlgmr.msrb.gmra.mxu2 %vm327_vm0, %v6526_v1 }
 0xe70   :  { %v1885_v38 = vpack.c.bf16 %v1815_v25, %v1815_v25 }
 0xe72   :  { %5179 = vmatmul.msk.bf16.vlgmr.msra.gmra.mxu3 %vm414_vm1, %v1885_v38 }
 0xe73   :  { %v1812_v39 = vpop.f32.mrf.mxu0 }
 0xe74   :  { %v1813_v10 = vadd.f32 %v5853_v35, %v1812_v39 }
 0xe76   :  { %v1816_v29 = vmul.f32 0.35355338, %v1813_v10 }
 0xe78   :  { %v1886_v40 = vpack.c.bf16 %v1816_v29, %v1816_v29 }
 0xe7a   :  { %5180 = vmatmul.msk.bf16.vlgmr.msra.gmra.mxu0 %vm414_vm1, %v1886_v40 }
 0xe7e   :  { %5178 = vmatmul.msk.bf16.gmra.mxu2 %vm327_vm0, %v6539_v11 }
 0xe8e   :  { %5192 = vmatmul.msk.bf16.vlgmr.msra.gmra.mxu2 %vm327_vm0, %v6587_v42 }
 0xee1   :  { %v6673_v44 = vpop.f32.mrf.mxu2 }
 0xee9   :  { %v6677_v46 = vpop.f32.mrf.mxu2 }
 0xef1   :  { %v1875_v52 = vpop.f32.mrf.mxu2 }
 0xef2   :  { %v1876_v53 = vadd.f32 %v5854_v49, %v1875_v52 }
 0xef4   :  { %v1891_v56 = vpack.c.bf16 %v1876_v53, %v1876_v53 }
 0xef5   :  { %v1915_v48 = vpop.f32.mrf.mxu3 }
 0xef6   :  { %v1943_v54 = vsel %vm1446_vm10, %v1915_v48, -inf  ;;  %v1969_v4 = vunpack.c.l.b16 %v1891_v56 }
 0xef7   :  { %v1939_v55 = vpop.f32.mrf.mxu0  ;;  %1944 = vmax.xlane.f32.xlu1 %v1943_v54 }
 0xef8   :  { %v1946_v57 = vsel %vm1446_vm10, %v1939_v55, -inf }
 0xef9   :  { %v1877_v42 = vpop.f32.mrf.mxu2  ;;  %1947 = vmax.xlane.f32.xlu0 %v1946_v57 }
 0xefa   :  { %v1878_v43 = vadd.f32 %v5854_v49, %v1877_v42  ;;  %v5855_v42 = vld [vmem:[%s7255_s16 + $0x3] ss:$0 sm:$0xff] }
 0xefc   :  { %v1892_v61 = vpack.c.bf16 %v1878_v43, %v1878_v43 }
 0xefd   :  { %v1917_v63 = vpop.f32.mrf.mxu3 }
 0xefe   :  { %v1970_v0 = vunpack.c.l.b16 %v1892_v61 }
 0xeff   :  { %v1941_v5 = vpop.f32.mrf.mxu0 }
 0xf00   :  { %v1971_v2 = vpack.c.b16 %v1970_v0, %v1969_v4 }
 0xf01   :  { %v1880_v50 = vpop.f32.mrf.mxu2 }
 0xf02   :  { %1983 = vmatpush.bf16.msrb.mxu3 %v1971_v2  ;;  %v1881_v6 = vadd.f32 %v5854_v49, %v1880_v50 }
 0xf04   :  { %v1893_v8 = vpack.c.bf16 %v1881_v6, %v1881_v6 }
 0xf06   :  { %v1991_v13 = vunpack.c.l.b16 %v1893_v8  ;;  %2088 = vmatpush.bf16.msra.mxu3 %v5723_v26 }
 0xf09   :  { %v1882_v9 = vpop.f32.mrf.mxu2 }
 0xf0a   :  { %v1883_v41 = vadd.f32 %v5854_v49, %v1882_v9  ;;  %2089 = vmatpush.bf16.msra.mxu3 %v5722_v58  ;;  %v5731_v58 = vld [vmem:[%s6232_s12 + $0x38] sm:$0xff] }
 0xf0c   :  { %v1894_v14 = vpack.c.bf16 %v1883_v41, %v1883_v41 }
 0xf0e   :  { %v1992_v15 = vunpack.c.l.b16 %v1894_v14 }
 0xf10   :  { %v1993_v17 = vpack.c.b16 %v1992_v15, %v1991_v13 }
 0xf11   :  { %v2060_v4 = vpop.f32.mrf.mxu2 }
 0xf12   :  { %2005 = vmatpush.bf16.msrb.mxu0 %v1993_v17  ;;  %v2061_v0 = vadd.f32 %v5855_v42, %v2060_v4 }
 0xf14   :  { %v2065_v6 = vmul.f32 0.35355338, %v2061_v0 }
 0xf16   :  { %v2135_v9 = vpack.c.bf16 %v2065_v6, %v2065_v6  ;;  %2122 = vmatpush.bf16.msra.mxu0 %v5731_v58 }
 0xf19   :  { %v2062_v17 = vpop.f32.mrf.mxu2 }
 0xf6a   :  { %v1945_v16 = vpop.xlane.xlu1 %1944 }
 0xf6b   :  { %v1949_v18 = vsub.f32 %v1915_v48, %v1945_v16  ;;  %v5856_v48 = vld [vmem:[%s7254_s15 + $0x3] ss:$0 sm:$0xff] }
 0xf6c   :  { %v1948_v19 = vpop.xlane.xlu0 %1947 }
 0xf6d   :  { %v1951_v20 = vmul.f32 1.442695, %v1949_v18  ;;  %v1950_v21 = vsub.f32 %v1939_v55, %v1948_v19  ;;  %v2063_v19 = vadd.f32 %v5855_v42, %v2062_v17 }
 0xf6f   :  { %5955 = vpow2.f32 %v1951_v20  ;;  %v1953_v22 = vmul.f32 1.442695, %v1950_v21 }
 0xf71   :  { %5957 = vpow2.f32 %v1953_v22  ;;  %v2066_v22 = vmul.f32 0.35355338, %v2063_v19 }
 0xf75   :  { %v5956_v23 = vpop.eup %5955 }
 0xf76   :  { %v1955_v27 = vsel %vm1446_vm10, %v5956_v23, 0.0 }
 0xf77   :  { %v5958_v24 = vpop.eup %5957  ;;  %1956 = vadd.xlane.f32.xlu2 %v1955_v27  ;;  %v1780_v27 = vadd.f32 %v6675_v45, %v6673_v44 }
 0xf78   :  { %v1958_v12 = vsel %vm1446_vm10, %v5958_v24, 0.0 }
 0xf79   :  { %1959 = vadd.xlane.f32.xlu1 %v1958_v12 }
 0xfea   :  { %v1957_v31 = vpop.xlane.xlu2 %1956 }
 0xfeb   :  { %5959 = vrcp.f32 %v1957_v31 }
 0xfec   :  { %v1960_v32 = vpop.xlane.xlu1 %1959 }
 0xfed   :  { %5961 = vrcp.f32 %v1960_v32  ;;  %v5730_v32 = vld [vmem:[%s6232_s12 + $0x30] sm:$0xff] }
 0xfee   :  { %2123 = vmatpush.bf16.msra.mxu0 %v5730_v32 }
 0xff1   :  { %v5960_v33 = vpop.eup %5959 }
 0xff2   :  { %v1963_v35 = vmul.f32 %v5960_v33, %v5956_v23  ;;  %v2136_v23 = vpack.c.bf16 %v2066_v22, %v2066_v22 }
 0xff3   :  { %v5962_v36 = vpop.eup %5961 }
 0xff4   :  { %v1965_v37 = vpack.c.bf16 %v1963_v35, %v1963_v35  ;;  %v6690_v25 = vadd.f32 %v1963_v35, %v1784_v34  ;;  %v1964_v38 = vmul.f32 %v5962_v36, %v5958_v24 }
 0xff6   :  { %v1966_v39 = vpack.c.bf16 %v1964_v38, %v1964_v38  ;;  %v6693_v10 = vadd.f32 %v1964_v38, %v6624_v7  ;;  %5181 = vmatmul.msk.bf16.vlgmr.msrb.gmra.mxu3 %vm1446_vm10, %v1965_v37 }
 0xff8   :  { %5182 = vmatmul.msk.bf16.vlgmr.msrb.gmra.mxu0 %vm1446_vm10, %v1966_v39 }
0x1006   :  { %5201 = vmatmul.msk.bf16.vlgmr.msra.gmra.mxu3 %vm327_vm0, %v6555_v28 }
0x1008   :  { %5211 = vmatmul.msk.bf16.vlgmr.msra.gmra.mxu0 %vm327_vm0, %v6526_v1 }
0x1016   :  { %5202 = vmatmul.msk.bf16.gmra.mxu3 %vm327_vm0, %v6563_v30 }
0x1018   :  { %5212 = vmatmul.msk.bf16.gmra.mxu0 %vm327_vm0, %v6539_v11 }
0x1075   :  { %v2007_v29 = vpop.f32.mrf.mxu0 }
0x1079   :  { %v1985_v40 = vpop.f32.mrf.mxu3 }
0x107a   :  { %v2011_v49 = vpack.c.bf16 %v2007_v29, %v1985_v40 }
0x107c   :  { %5183 = vmatmul.msk.bf16.vlgmr.msrb.gmra.mxu1 %vm414_vm1, %v2011_v49 }
0x107d   :  { %v2009_v7 = vpop.f32.mrf.mxu0 }
0x1081   :  { %v1987_v52 = vpop.f32.mrf.mxu3 }
0x1085   :  { %v2125_v29 = vpop.f32.mrf.mxu0 }
0x1086   :  { %v2126_v40 = vadd.f32 %v5857_v51, %v2125_v29 }
0x1088   :  { %v2141_v7 = vpack.c.bf16 %v2126_v40, %v2126_v40 }
0x1089   :  { %v2091_v53 = vpop.f32.mrf.mxu3 }
0x108a   :  { %v2092_v54 = vadd.f32 %v5856_v48, %v2091_v53 }
0x108c   :  { %v2137_v56 = vpack.c.bf16 %v2092_v54, %v2092_v54 }
0x108d   :  { %v2127_v53 = vpop.f32.mrf.mxu0 }
0x108e   :  { %v2147_v61 = vunpack.c.l.b16 %v2137_v56 }
0x1091   :  { %v2093_v55 = vpop.f32.mrf.mxu3 }
0x1092   :  { %v2094_v57 = vadd.f32 %v5856_v48, %v2093_v55  ;;  %v2219_v55 = vunpack.c.l.b16 %v2141_v7 }
0x1094   :  { %v2138_v43 = vpack.c.bf16 %v2094_v57, %v2094_v57 }
0x1096   :  { %v2148_v63 = vunpack.c.l.b16 %v2138_v43 }
0x1098   :  { %v2149_v5 = vpack.c.b16 %v2148_v63, %v2147_v61  ;;  %v2130_v61 = vpop.f32.mrf.mxu0 }
0x1099   :  { %v2096_v2 = vpop.f32.mrf.mxu3  ;;  %v2131_v63 = vadd.f32 %v5857_v51, %v2130_v61 }
0x109a   :  { %v2154_v50 = vsel %vm414_vm1, %v2149_v5, 0  ;;  %v2097_v8 = vadd.f32 %v5856_v48, %v2096_v2 }
0x109b   :  { %2163 = vmatpush.bf16.xpose.msra.mxu1 %v2154_v50  ;;  %v2143_v2 = vpack.c.bf16 %v2131_v63, %v2131_v63 }
0x109c   :  { %v2139_v13 = vpack.c.bf16 %v2097_v8, %v2097_v8 }
0x109d   :  { %v2241_v6 = vunpack.c.l.b16 %v2143_v2 }
0x109e   :  { %v2171_v16 = vunpack.c.l.b16 %v2139_v13 }
0x10a0   :  { %v2132_v0 = vpop.f32.mrf.mxu0 }
0x10a1   :  { %v2098_v41 = vpop.f32.mrf.mxu3  ;;  %v2133_v5 = vadd.f32 %v5857_v51, %v2132_v0 }
0x10a2   :  { %v2099_v14 = vadd.f32 %v5856_v48, %v2098_v41  ;;  %5213 = vmatmul.msk.bf16.vlgmr.msra.gmra.mxu1 %vm414_vm1, %v2135_v9  ;;  %v2128_v48 = vadd.f32 %v5857_v51, %v2127_v53 }
0x10a3   :  { %v2144_v50 = vpack.c.bf16 %v2133_v5, %v2133_v5 }
0x10a4   :  { %v2140_v15 = vpack.c.bf16 %v2099_v14, %v2099_v14  ;;  %v2142_v56 = vpack.c.bf16 %v2128_v48, %v2128_v48 }
0x10a5   :  { %v2242_v8 = vunpack.c.l.b16 %v2144_v50 }
0x10a6   :  { %v2172_v18 = vunpack.c.l.b16 %v2140_v15  ;;  %v2220_v57 = vunpack.c.l.b16 %v2142_v56  ;;  %v5732_v56 = vld [vmem:[%s7258_s23] sm:$0xff] }
0x10a7   :  { %v2243_v9 = vpack.c.b16 %v2242_v8, %v2241_v6 }
0x10a8   :  { %v2173_v20 = vpack.c.b16 %v2172_v18, %v2171_v16  ;;  %v2221_v42 = vpack.c.b16 %v2220_v57, %v2219_v55 }
0x10aa   :  { %v2178_v21 = vsel %vm414_vm1, %v2173_v20, 0  ;;  %2233 = vmatpush.bf16.msrb.mxu1 %v2221_v42 }
0x10ab   :  { %2187 = vmatpush.bf16.xpose.msrb.mxu2 %v2178_v21 }
0x10b2   :  { %5214 = vmatmul.msk.bf16.vlgmr.msrb.gmra.mxu2 %vm414_vm1, %v2136_v23 }
0x10b3   :  { %2255 = vmatpush.bf16.msra.mxu2 %v2243_v9 }
0x10f9   :  { %v2027_v24 = vpop.f32.mrf.mxu1 }
0x10fa   :  { %v6712_v12 = vadd.f32 %v2027_v24, %v1780_v27  ;;  %v286_v27 = vld [vmem:[%s7256_s18 + $0xc] sm:$0xf] }
0x1101   :  { %v6714_v26 = vpop.f32.mrf.mxu1 }
0x111f   :  { %v2165_v31 = vpop.f32.mrf.mxu1 }
0x1120   :  { %v2193_v33 = vsel %vm1446_vm10, %v2165_v31, -inf }
0x1121   :  { %2194 = vmax.xlane.f32.xlu0 %v2193_v33 }
0x1127   :  { %v2167_v34 = vpop.f32.mrf.mxu1 }
0x1128   :  { %v5858_v34 = vld [vmem:[%s7257_s22] ss:$0 sm:$0xff] }
0x1135   :  { %v2189_v35 = vpop.f32.mrf.mxu2 }
0x1136   :  { %v2196_v44 = vsel %vm1446_vm10, %v2189_v35, -inf }
0x1137   :  { %2197 = vmax.xlane.f32.xlu2 %v2196_v44 }
0x113d   :  { %v2191_v45 = vpop.f32.mrf.mxu2 }
0x113e   :  { %v1782_v45 = vadd.f32 %v6679_v47, %v6677_v46 }
0x1194   :  { %v2195_v36 = vpop.xlane.xlu0 %2194 }
0x1195   :  { %v2199_v37 = vsub.f32 %v2165_v31, %v2195_v36 }
0x1197   :  { %v2201_v38 = vmul.f32 1.442695, %v2199_v37  ;;  %v2033_v37 = vadd.f32 %v6714_v26, %v1782_v45 }
0x1199   :  { %5963 = vpow2.f32 %v2201_v38 }
0x119f   :  { %v5964_v39 = vpop.eup %5963 }
0x11a0   :  { %v2205_v59 = vsel %vm1446_vm10, %v5964_v39, 0.0 }
0x11a1   :  { %2206 = vadd.xlane.f32.xlu2 %v2205_v59 }
0x11aa   :  { %v2198_v49 = vpop.xlane.xlu2 %2197 }
0x11ab   :  { %v2200_v52 = vsub.f32 %v2189_v35, %v2198_v49 }
0x11ad   :  { %v2203_v54 = vmul.f32 1.442695, %v2200_v52 }
0x11af   :  { %5965 = vpow2.f32 %v2203_v54 }
0x11b5   :  { %v5966_v43 = vpop.eup %5965 }
0x11b6   :  { %v2208_v4 = vsel %vm1446_vm10, %v5966_v43, 0.0 }
0x11b7   :  { %2209 = vadd.xlane.f32.xlu1 %v2208_v4 }
0x1214   :  { %v2207_v41 = vpop.xlane.xlu2 %2206 }
0x1215   :  { %5967 = vrcp.f32 %v2207_v41 }
0x121b   :  { %v5968_v13 = vpop.eup %5967 }
0x121c   :  { %v2213_v14 = vmul.f32 %v5968_v13, %v5964_v39 }
0x121e   :  { %v2215_v15 = vpack.c.bf16 %v2213_v14, %v2213_v14  ;;  %v2284_v17 = vadd.f32 %v2213_v14, %v6690_v25  ;;  %v2266_v25 = vsel %vm480_vm2, %v286_v27, 0 }
0x121f   :  { %2275 = vmatpush.bf16.msrb.mxu3 %v2266_v25 }
0x1220   :  { %v2291_v16 = vmul.f32 0.25, %v2284_v17  ;;  %5215 = vmatmul.msk.bf16.vlgmr.msrb.gmra.mxu1 %vm1446_vm10, %v2215_v15  ;;  %v5859_v15 = vld [vmem:[%s7259_s26] ss:$0 sm:$0xff] }
0x1222   :  { %2488 = vst.msk [vmem:[#allocation4] sm:$0xff] %vm1446_vm10, %v2291_v16 }
0x122a   :  { %v2210_v18 = vpop.xlane.xlu1 %2209 }
0x122b   :  { %5969 = vrcp.f32 %v2210_v18 }
0x1231   :  { %v5970_v19 = vpop.eup %5969 }
0x1232   :  { %v2214_v20 = vmul.f32 %v5970_v19, %v5966_v43  ;;  %v5860_v19 = vld [vmem:[%s7260_s28] ss:$0 sm:$0xff] }
0x1234   :  { %v2216_v21 = vpack.c.bf16 %v2214_v20, %v2214_v20  ;;  %v2285_v22 = vadd.f32 %v2214_v20, %v6693_v10 }
0x1236   :  { %v2292_v23 = vmul.f32 0.25, %v2285_v22  ;;  %5216 = vmatmul.msk.bf16.vlgmr.msra.gmra.mxu2 %vm1446_vm10, %v2216_v21 }
0x1238   :  { %2489 = vst.msk [vmem:[#allocation4 + $0x8] sm:$0xff] %vm1446_vm10, %v2292_v23 }
0x129d   :  { %v2235_v24 = vpop.f32.mrf.mxu1 }
0x12a5   :  { %v2237_v58 = vpop.f32.mrf.mxu1 }
0x12a6   :  { %v5736_v58 = vld [vmem:[%s7261_s1 + $0x10] sm:$0xff] }
0x12b9   :  { %v2257_v31 = vpop.f32.mrf.mxu2 }
0x12ba   :  { %v2261_v32 = vpack.c.bf16 %v2257_v31, %v2235_v24  ;;  %v5737_v24 = vld [vmem:[%s7261_s1 + $0x18] sm:$0xff]  ;;  %v5735_v31 = vld [vmem:[%s7261_s1 + $0x8] sm:$0xff] }
0x12bb   :  { %2420 = vmatpush.bf16.msra.mxu1 %v5737_v24 }
0x12bc   :  { %5217 = vmatmul.msk.bf16.vlgmr.msrb.gmra.mxu3 %vm414_vm1, %v2261_v32  ;;  %v5734_v32 = vld [vmem:[%s7261_s1] sm:$0xff] }
0x12bf   :  { %2421 = vmatpush.bf16.msra.mxu1 %v5736_v58 }
0x12c1   :  { %v2259_v33 = vpop.f32.mrf.mxu2 }
0x12c3   :  { %2422 = vmatpush.bf16.msra.mxu1 %v5735_v31 }
0x12c7   :  { %2423 = vmatpush.bf16.msra.mxu1 %v5734_v32 }
0x133f   :  { %v2277_v35 = vpop.f32.mrf.mxu3 }
0x1340   :  { %v2282_v10 = vadd.f32 %v2277_v35, %v6712_v12 }
0x1342   :  { %v2289_v44 = vadd.f32 %v5858_v34, %v2282_v10 }
0x1344   :  { %v2293_v36 = vadd.f32 %v2289_v44, %v6579_v60 }
0x1346   :  { %v2295_v38 = vsel %vm327_vm0, %v2293_v36, 0.0 }
0x1347   :  { %2296 = vadd.xlane.f32.xlu0 %v2295_v38  ;;  %v2279_v39 = vpop.f32.mrf.mxu3  ;;  %v5862_v38 = vld [vmem:[%s7263_s7] ss:$0 sm:$0xff] }
0x1348   :  { %v2283_v59 = vadd.f32 %v2279_v39, %v2033_v37 }
0x134a   :  { %v2290_v51 = vadd.f32 %v5858_v34, %v2283_v59  ;;  %v5861_v34 = vld [vmem:[%s7262_s2] ss:$0 sm:$0xff] }
0x134c   :  { %v2294_v29 = vadd.f32 %v2290_v51, %v6581_v62  ;;  %v5733_v62 = vld [vmem:[%s7258_s23 + $0x8] sm:$0xff] }
0x134d   :  { %2374 = vmatpush.bf16.msrb.mxu0 %v5733_v62 }
0x134e   :  { %v2298_v40 = vsel %vm327_vm0, %v2294_v29, 0.0 }
0x134f   :  { %2299 = vadd.xlane.f32.xlu1 %v2298_v40 }
0x1351   :  { %2375 = vmatpush.bf16.msrb.mxu0 %v5732_v56  ;;  %v5755_v56 = vld [vmem:[%s6192_s29 + $0x48] sm:$0xff] }
0x1355   :  { %2757 = vmatpush.bf16.msra.mxu0 %v5755_v56  ;;  %v5740_v56 = vld [vmem:[%s6182_s21 + $0x50] sm:$0xff] }
0x13ba   :  { %v2297_v12 = vpop.xlane.xlu0 %2296 }
0x13bb   :  { %v2301_v46 = vmul.f32 %v2297_v12, %v6530_v3 }
0x13bd   :  { %v2303_v47 = vsub.f32 %v2293_v36, %v2301_v46 }
0x13bf   :  { %v2305_v60 = vmul.f32 %v2303_v47, %v2303_v47 }
0x13c1   :  { %v2307_v26 = vsel %vm327_vm0, %v2305_v60, 0.0 }
0x13c2   :  { %2308 = vadd.xlane.f32.xlu2 %v2307_v26  ;;  %v2300_v49 = vpop.xlane.xlu1 %2299 }
0x13c3   :  { %v2302_v7 = vmul.f32 %v2300_v49, %v6530_v3 }
0x13c5   :  { %v2304_v52 = vsub.f32 %v2294_v29, %v2302_v7 }
0x13c7   :  { %v2306_v53 = vmul.f32 %v2304_v52, %v2304_v52 }
0x13c9   :  { %v2310_v48 = vsel %vm327_vm0, %v2306_v53, 0.0 }
0x13ca   :  { %2311 = vadd.xlane.f32.xlu0 %v2310_v48 }
0x1435   :  { %v2309_v54 = vpop.xlane.xlu2 %2308 }
0x1436   :  { %v2313_v55 = vmul.f32 %v2309_v54, %v6530_v3 }
0x1438   :  { %v2315_v57 = vadd.f32 1e-05, %v2313_v55 }
0x143a   :  { %5971 = vrsqrt.f32 %v2315_v57  ;;  %vm2323_vm12 = vweird.f32 %v2315_v57 }
0x143d   :  { %v2312_v42 = vpop.xlane.xlu0 %2311 }
0x143e   :  { %v2314_v43 = vmul.f32 %v2312_v42, %v6530_v3  ;;  %v5739_v42 = vld [vmem:[%s6182_s21 + $0x48] sm:$0xff] }
0x143f   :  { %2694 = vmatpush.bf16.msrb.mxu2 %v5739_v42 }
0x1440   :  { %v5972_v4 = vpop.eup %5971  ;;  %v2316_v61 = vadd.f32 1e-05, %v2314_v43  ;;  %v5747_v43 = vld [vmem:[%s6187_s25 + $0x48] sm:$0xff] }
0x1441   :  { %v2318_v63 = vmul.f32 %v5972_v4, %v2315_v57  ;;  %vm2324_vm11 = vweird.f32 %v5972_v4  ;;  %2725 = vmatpush.bf16.msra.mxu3 %v5747_v43 }
0x1442   :  { %5973 = vrsqrt.f32 %v2316_v61  ;;  %vm2325_vm13 = vmor %vm2323_vm12, %vm2324_vm11  ;;  %vm2333_vm15 = vweird.f32 %v2316_v61 }
0x1443   :  { %v2319_v0 = vmul.f32 %v5972_v4, %v2318_v63 }
0x1445   :  { %v2320_v5 = vmul.f32 0.5, %v2319_v0  ;;  %v5738_v0 = vld [vmem:[%s6182_s21 + $0x40] sm:$0xff] }
0x1446   :  { %2695 = vmatpush.bf16.msrb.mxu2 %v5738_v0  ;;  %v5749_v0 = vld [vmem:[%s6187_s25 + $0x58] sm:$0xff] }
0x1447   :  { %v2321_v2 = vsub.f32 1.5, %v2320_v5  ;;  %v5746_v5 = vld [vmem:[%s6187_s25 + $0x40] sm:$0xff] }
0x1448   :  { %v5974_v50 = vpop.eup %5973  ;;  %2726 = vmatpush.bf16.msra.mxu3 %v5746_v5 }
0x1449   :  { %v2322_v6 = vmul.f32 %v5972_v4, %v2321_v2  ;;  %v2328_v8 = vmul.f32 %v5974_v50, %v2316_v61  ;;  %vm2334_vm14 = vweird.f32 %v5974_v50  ;;  %v5754_v61 = vld [vmem:[%s6192_s29 + $0x40] sm:$0xff] }
0x144a   :  { %vm2335_vm3 = vmor %vm2333_vm15, %vm2334_vm14  ;;  %2758 = vmatpush.bf16.msra.mxu0 %v5754_v61 }
0x144b   :  { %v2329_v9 = vmul.f32 %v5974_v50, %v2328_v8  ;;  %v2326_v41 = vsel %vm2325_vm13, %v5972_v4, %v2322_v6 }
0x144c   :  { %v2337_v17 = vmul.f32 %v2326_v41, %v2303_v47 }
0x144d   :  { %v2330_v13 = vmul.f32 0.5, %v2329_v9 }
0x144e   :  { %v2342_v20 = vmul.f32 %v5859_v15, %v2337_v17 }
0x144f   :  { %v2331_v14 = vsub.f32 1.5, %v2330_v13 }
0x1450   :  { %v2347_v23 = vadd.f32 %v5860_v19, %v2342_v20 }
0x1451   :  { %v2332_v16 = vmul.f32 %v5974_v50, %v2331_v14 }
0x1453   :  { %v2336_v18 = vsel %vm2335_vm3, %v5974_v50, %v2332_v16 }
0x1454   :  { %v2338_v21 = vmul.f32 %v2336_v18, %v2304_v52 }
0x1456   :  { %v2343_v22 = vmul.f32 %v5859_v15, %v2338_v21  ;;  %v5863_v21 = vld [vmem:[%s7264_s10] ss:$0 sm:$0xff] }
0x1458   :  { %v2348_v27 = vadd.f32 %v5860_v19, %v2343_v22 }
0x145a   :  { %v2349_v25 = vpack.c.bf16 %v2348_v27, %v2347_v23 }
0x145c   :  { %5226 = vmatmul.msk.bf16.vlgmr.msrb.gmra.mxu0 %vm327_vm0, %v2349_v25  ;;  %v5864_v25 = vld [vmem:[%s7265_s11] ss:$0 sm:$0xff] }
0x14d9   :  { %v2377_v33 = vpop.f32.mrf.mxu0 }
0x14da   :  { %v2378_v35 = vadd.f32 %v5861_v34, %v2377_v33 }
0x14dc   :  { %v2382_v45 = vmax.f32 %v2378_v35, 0.0  ;;  %v6784_v35 = vld [vmem:[%s6172_s13] sm:$0xff] }
0x14e1   :  { %v2379_v10 = vpop.f32.mrf.mxu0 }
0x14e2   :  { %v2380_v44 = vadd.f32 %v5861_v34, %v2379_v10 }
0x14e4   :  { %v2383_v36 = vmax.f32 %v2380_v44, 0.0  ;;  %v6789_v44 = vld [vmem:[%s6172_s13 + $0x8] sm:$0xff]  ;;  %s6150_s13 = smov [#allocation2]  }
0x14e6   :  { %v2384_v37 = vpack.c.bf16 %v2383_v36, %v2382_v45 }
0x14e8   :  { %5243 = vmatmul.msk.bf16.vlgmr.msra.gmra.mxu1 %vm2412_vm4, %v2384_v37 }
0x1565   :  { %v2425_v39 = vpop.f32.mrf.mxu1 }
0x1566   :  { %v2426_v59 = vadd.f32 %v5862_v38, %v2425_v39 }
0x1568   :  { %v2430_v51 = vadd.f32 %v2426_v59, %v2347_v23 }
0x156a   :  { %v2432_v29 = vsel %vm327_vm0, %v2430_v51, 0.0 }
0x156b   :  { %2433 = vadd.xlane.f32.xlu1 %v2432_v29 }
0x156d   :  { %v2427_v40 = vpop.f32.mrf.mxu1 }
0x156e   :  { %v2428_v12 = vadd.f32 %v5862_v38, %v2427_v40  ;;  %v5865_v38 = vld [vmem:[%s6207_s14 + $0x4] ss:$0 sm:$0xff] }
0x156f   :  { %v5867_v40 = vld [vmem:[%s6202_s8 + $0x4] ss:$0 sm:$0xff] }
0x1570   :  { %v2431_v46 = vadd.f32 %v2428_v12, %v2348_v27  ;;  %v5866_v12 = vld [vmem:[%s6197_s3 + $0x4] ss:$0 sm:$0xff] }
0x1572   :  { %v2435_v47 = vsel %vm327_vm0, %v2431_v46, 0.0 }
0x1573   :  { %2436 = vadd.xlane.f32.xlu2 %v2435_v47 }
0x15de   :  { %v2434_v60 = vpop.xlane.xlu1 %2433 }
0x15df   :  { %v2438_v26 = vmul.f32 %v2434_v60, %v6530_v3 }
0x15e1   :  { %v2440_v49 = vsub.f32 %v2430_v51, %v2438_v26 }
0x15e3   :  { %v2442_v7 = vmul.f32 %v2440_v49, %v2440_v49 }
0x15e5   :  { %v2444_v52 = vsel %vm327_vm0, %v2442_v7, 0.0 }
0x15e6   :  { %v2437_v53 = vpop.xlane.xlu2 %2436  ;;  %2445 = vadd.xlane.f32.xlu0 %v2444_v52 }
0x15e7   :  { %v2439_v48 = vmul.f32 %v2437_v53, %v6530_v3  ;;  %v5741_v53 = vld [vmem:[%s6182_s21 + $0x58] sm:$0xff] }
0x15e9   :  { %v2441_v62 = vsub.f32 %v2431_v46, %v2439_v48 }
0x15eb   :  { %v2443_v54 = vmul.f32 %v2441_v62, %v2441_v62 }
0x15ed   :  { %v2447_v55 = vsel %vm327_vm0, %v2443_v54, 0.0 }
0x15ee   :  { %2448 = vadd.xlane.f32.xlu1 %v2447_v55 }
0x1659   :  { %v2446_v57 = vpop.xlane.xlu0 %2445 }
0x165a   :  { %v2450_v4 = vmul.f32 %v2446_v57, %v6530_v3 }
0x165c   :  { %v2452_v63 = vadd.f32 1e-05, %v2450_v4 }
0x165e   :  { %5975 = vrsqrt.f32 %v2452_v63  ;;  %vm2460_vm6 = vweird.f32 %v2452_v63 }
0x1661   :  { %v2449_v2 = vpop.xlane.xlu1 %2448 }
0x1662   :  { %v2451_v50 = vmul.f32 %v2449_v2, %v6530_v3 }
0x1664   :  { %v5976_v6 = vpop.eup %5975  ;;  %v2453_v8 = vadd.f32 1e-05, %v2451_v50  ;;  %v5748_v50 = vld [vmem:[%s6187_s25 + $0x50] sm:$0xff] }
0x1665   :  { %v2455_v9 = vmul.f32 %v5976_v6, %v2452_v63  ;;  %vm2461_vm5 = vweird.f32 %v5976_v6 }
0x1666   :  { %5977 = vrsqrt.f32 %v2453_v8  ;;  %vm2462_vm7 = vmor %vm2460_vm6, %vm2461_vm5  ;;  %vm2470_vm9 = vweird.f32 %v2453_v8 }
0x1667   :  { %v2456_v41 = vmul.f32 %v5976_v6, %v2455_v9 }
0x1669   :  { %v2457_v13 = vmul.f32 0.5, %v2456_v41 }
0x166b   :  { %v2458_v14 = vsub.f32 1.5, %v2457_v13  ;;  %v5868_v13 = vld [vmem:[%s6197_s3 + $0x5] ss:$0 sm:$0xff] }
0x166c   :  { %v5978_v15 = vpop.eup %5977 }
0x166d   :  { %v2459_v17 = vmul.f32 %v5976_v6, %v2458_v14  ;;  %v2465_v16 = vmul.f32 %v5978_v15, %v2453_v8  ;;  %vm2471_vm8 = vweird.f32 %v5978_v15 }
0x166e   :  { %vm2472_vm11 = vmor %vm2470_vm9, %vm2471_vm8 }
0x166f   :  { %v2463_v18 = vsel %vm2462_vm7, %v5976_v6, %v2459_v17  ;;  %v2466_v19 = vmul.f32 %v5978_v15, %v2465_v16 }
0x1670   :  { %v2474_v22 = vmul.f32 %v2463_v18, %v2440_v49 }
0x1671   :  { %v2467_v20 = vmul.f32 0.5, %v2466_v19  ;;  %v5869_v19 = vld [vmem:[%s6202_s8 + $0x5] ss:$0 sm:$0xff] }
0x1672   :  { %v2479_v24 = vmul.f32 %v5863_v21, %v2474_v22 }
0x1673   :  { %v2468_v23 = vsub.f32 1.5, %v2467_v20 }
0x1674   :  { %v6779_v32 = vadd.f32 %v5864_v25, %v2479_v24 }
0x1675   :  { %v2469_v27 = vmul.f32 %v5978_v15, %v2468_v23 }
0x1676   :  { %v2666_v10 = vadd.f32 %v6784_v35, %v6779_v32 }
0x1677   :  { %v2473_v58 = vsel %vm2472_vm11, %v5978_v15, %v2469_v27 }
0x1678   :  { %v2475_v31 = vmul.f32 %v2473_v58, %v2441_v62 }
0x167a   :  { %v2480_v33 = vmul.f32 %v5863_v21, %v2475_v31 }
0x167c   :  { %v6781_v34 = vadd.f32 %v5864_v25, %v2480_v33 }
0x167e   :  { %v2667_v45 = vadd.f32 %v6789_v44, %v6781_v34  ;;  %v6795_v36 = vpack.c.bf16 %v6781_v34, %v6779_v32 }
0x1680   :  { %v6797_v37 = vpack.c.bf16 %v2667_v45, %v2666_v10  ;;  %5420 = vmatmul.msk.bf16.vlgmr.msra.gmra.mxu0 %vm327_vm0, %v6795_v36 }
0x1682   :  { %5402 = vmatmul.msk.bf16.vlgmr.msrb.gmra.mxu2 %vm327_vm0, %v6797_v37  ;;  %5411 = vmatmul.msk.bf16.vlgmr.msra.gmra.mxu3 %vm327_vm0, %v6797_v37 }
0x16fd   :  { %v2760_v39 = vpop.f32.mrf.mxu0 }
0x16fe   :  { %v2761_v59 = vadd.f32 %v5865_v38, %v2760_v39 }
0x1700   :  { %v2769_v51 = vpack.c.bf16 %v2761_v59, %v2761_v59 }
0x1702   :  { %v2837_v29 = vsel %vm480_vm2, %v2769_v51, 0 }
0x1703   :  { %2846 = vmatpush.bf16.msrb.mxu3 %v2837_v29 }
0x1705   :  { %v2697_v46 = vpop.f32.mrf.mxu2  ;;  %v2728_v47 = vpop.f32.mrf.mxu3 }
0x1706   :  { %v2729_v60 = vadd.f32 %v5867_v40, %v2728_v47  ;;  %v2762_v26 = vpop.f32.mrf.mxu0  ;;  %v2698_v7 = vadd.f32 %v5866_v12, %v2697_v46 }
0x1707   :  { %v2763_v49 = vadd.f32 %v5865_v38, %v2762_v26 }
0x1708   :  { %v2767_v52 = vpack.c.bf16 %v2729_v60, %v2729_v60  ;;  %v2702_v55 = vmul.f32 0.35355338, %v2698_v7 }
0x1709   :  { %v2770_v48 = vpack.c.bf16 %v2763_v49, %v2763_v49 }
0x170a   :  { %v2775_v62 = vsel %vm414_vm1, %v2767_v52, 0  ;;  %v2765_v4 = vpack.c.bf16 %v2702_v55, %v2702_v55  ;;  %v5757_v52 = vld [vmem:[%s6192_s29 + $0x58] sm:$0xff] }
0x170b   :  { %2784 = vmatpush.bf16.xpose.msrb.mxu1 %v2775_v62  ;;  %v2856_v54 = vsel %vm480_vm2, %v2770_v48, 0  ;;  %2955 = vmatpush.bf16.msra.mxu3 %v5757_v52 }
0x170c   :  { %2865 = vmatpush.bf16.msrb.mxu0 %v2856_v54 }
0x170d   :  { %v2699_v57 = vpop.f32.mrf.mxu2  ;;  %v2730_v42 = vpop.f32.mrf.mxu3 }
0x170e   :  { %v2731_v43 = vadd.f32 %v5867_v40, %v2730_v42  ;;  %v2700_v61 = vadd.f32 %v5866_v12, %v2699_v57 }
0x1710   :  { %v2768_v63 = vpack.c.bf16 %v2731_v43, %v2731_v43  ;;  %v2703_v2 = vmul.f32 0.35355338, %v2700_v61 }
0x1712   :  { %5421 = vmatmul.msk.bf16.vlgmr.msrb.gmra.mxu1 %vm414_vm1, %v2765_v4  ;;  %v2794_v5 = vsel %vm414_vm1, %v2768_v63, 0  ;;  %v2766_v6 = vpack.c.bf16 %v2703_v2, %v2703_v2 }
0x1713   :  { %2895 = vmatpush.bf16.msra.mxu1 %v5741_v53  ;;  %2803 = vmatpush.bf16.xpose.msra.mxu2 %v2794_v5  ;;  %v5756_v53 = vld [vmem:[%s6192_s29 + $0x50] sm:$0xff] }
0x1714   :  { %2956 = vmatpush.bf16.msra.mxu3 %v5756_v53  ;;  %v5743_v53 = vld [vmem:[%s6182_s21 + $0x68] sm:$0xff] }
0x1717   :  { %2896 = vmatpush.bf16.msra.mxu1 %v5740_v56 }
0x171a   :  { %5422 = vmatmul.msk.bf16.vlgmr.msra.gmra.mxu2 %vm414_vm1, %v2766_v6  ;;  %v5304_v6 = vld [vmem:[%s6212_s19 + $0x10] sm:$0xf] }
0x171b   :  { %2926 = vmatpush.bf16.msrb.mxu2 %v5749_v0 }
0x171f   :  { %2927 = vmatpush.bf16.msrb.mxu2 %v5748_v50 }
0x1722   :  { %5433 = vmatmul.msk.bf16.vlgmr.msra.gmra.mxu1 %vm327_vm0, %v6797_v37 }
0x172a   :  { %5442 = vmatmul.msk.bf16.vlgmr.msrb.gmra.mxu2 %vm327_vm0, %v6797_v37 }
0x178f   :  { %v2786_v8 = vpop.f32.mrf.mxu1 }
0x1790   :  { %v2809_v9 = vsel %vm414_vm1, %v2786_v8, -inf }
0x1791   :  { %2810 = vmax.xlane.f32.xlu1 %v2809_v9 }
0x1797   :  { %v2788_v41 = vpop.f32.mrf.mxu1 }
0x179d   :  { %v2805_v14 = vpop.f32.mrf.mxu2 }
0x179e   :  { %v2812_v15 = vsel %vm414_vm1, %v2805_v14, -inf }
0x179f   :  { %2813 = vmax.xlane.f32.xlu2 %v2812_v15  ;;  %v2898_v17 = vpop.f32.mrf.mxu1  ;;  %v5870_v15 = vld [vmem:[%s6207_s14 + $0x5] ss:$0 sm:$0xff] }
0x17a0   :  { %v2899_v16 = vadd.f32 %v5868_v13, %v2898_v17 }
0x17a2   :  { %v2903_v4 = vmul.f32 0.35355338, %v2899_v16 }
0x17a4   :  { %v2963_v61 = vpack.c.bf16 %v2903_v4, %v2903_v4 }
0x17a5   :  { %v2807_v18 = vpop.f32.mrf.mxu2 }
0x17a7   :  { %v2900_v27 = vpop.f32.mrf.mxu1 }
0x17a8   :  { %v2901_v58 = vadd.f32 %v5868_v13, %v2900_v27 }
0x17aa   :  { %v2904_v10 = vmul.f32 0.35355338, %v2901_v58 }
0x17ac   :  { %v2964_v45 = vpack.c.bf16 %v2904_v10, %v2904_v10 }
0x17ad   :  { %v2929_v20 = vpop.f32.mrf.mxu2 }
0x17ae   :  { %v2930_v21 = vadd.f32 %v5869_v19, %v2929_v20 }
0x17b0   :  { %v2965_v22 = vpack.c.bf16 %v2930_v21, %v2930_v21 }
0x17b2   :  { %v2973_v23 = vsel %vm414_vm1, %v2965_v22, 0 }
0x17b3   :  { %2982 = vmatpush.bf16.xpose.msra.mxu0 %v2973_v23 }
0x17b5   :  { %v2931_v25 = vpop.f32.mrf.mxu2 }
0x17b6   :  { %v2932_v24 = vadd.f32 %v5869_v19, %v2931_v25 }
0x17b8   :  { %v2966_v31 = vpack.c.bf16 %v2932_v24, %v2932_v24  ;;  %v5751_v24 = vld [vmem:[%s6187_s25 + $0x68] sm:$0xff] }
0x17ba   :  { %v2992_v33 = vsel %vm414_vm1, %v2966_v31, 0  ;;  %v5750_v31 = vld [vmem:[%s6187_s25 + $0x60] sm:$0xff] }
0x17bb   :  { %3001 = vmatpush.bf16.xpose.msrb.mxu1 %v2992_v33 }
0x17c2   :  { %5453 = vmatmul.msk.bf16.vlgmr.msrb.gmra.mxu1 %vm414_vm1, %v2964_v45 }
0x1804   :  { %v2811_v38 = vpop.xlane.xlu1 %2810 }
0x1805   :  { %v2815_v39 = vsub.f32 %v2786_v8, %v2811_v38  ;;  %v3094_v8 = vsel %vm480_vm2, %v5304_v6, 0  ;;  %v5745_v6 = vld [vmem:[%s6182_s21 + $0x78] sm:$0xff] }
0x1806   :  { %3103 = vmatpush.bf16.msra.mxu1 %v3094_v8 }
0x1807   :  { %v2817_v59 = vmul.f32 1.442695, %v2815_v39 }
0x1809   :  { %5979 = vpow2.f32 %v2817_v59 }
0x180f   :  { %v5980_v51 = vpop.eup %5979 }
0x1810   :  { %v2821_v29 = vsel %vm414_vm1, %v5980_v51, 0.0 }
0x1811   :  { %2822 = vadd.xlane.f32.xlu2 %v2821_v29 }
0x1812   :  { %v2814_v40 = vpop.xlane.xlu2 %2813 }
0x1813   :  { %v2816_v12 = vsub.f32 %v2805_v14, %v2814_v40 }
0x1815   :  { %v2819_v46 = vmul.f32 1.442695, %v2816_v12 }
0x1817   :  { %5981 = vpow2.f32 %v2819_v46 }
0x181d   :  { %v5982_v47 = vpop.eup %5981 }
0x181e   :  { %v2824_v60 = vsel %vm414_vm1, %v5982_v47, 0.0 }
0x181f   :  { %2825 = vadd.xlane.f32.xlu0 %v2824_v60  ;;  %v5871_v60 = vld [vmem:[%s6202_s8 + $0x6] ss:$0 sm:$0xff] }
0x183f   :  { %v3003_v26 = vpop.f32.mrf.mxu1 }
0x1840   :  { %v3010_v49 = vsel %vm414_vm1, %v3003_v26, -inf }
0x1841   :  { %3011 = vmax.xlane.f32.xlu0 %v3010_v49 }
0x1847   :  { %v3005_v7 = vpop.f32.mrf.mxu1 }
0x1884   :  { %v2823_v48 = vpop.xlane.xlu2 %2822 }
0x1885   :  { %5983 = vrcp.f32 %v2823_v48  ;;  %v5742_v48 = vld [vmem:[%s6182_s21 + $0x60] sm:$0xff] }
0x188b   :  { %v5984_v62 = vpop.eup %5983 }
0x188c   :  { %v6834_v54 = vmul.f32 %v5984_v62, %v5980_v51 }
0x188e   :  { %v2831_v55 = vpack.c.bf16 %v6834_v54, %v6834_v54 }
0x1890   :  { %5423 = vmatmul.msk.bf16.vlgmr.msrb.gmra.mxu3 %vm414_vm1, %v2831_v55 }
0x1892   :  { %v2826_v56 = vpop.xlane.xlu0 %2825 }
0x1893   :  { %5985 = vrcp.f32 %v2826_v56 }
0x1899   :  { %v5986_v57 = vpop.eup %5985 }
0x189a   :  { %v6839_v42 = vmul.f32 %v5986_v57, %v5982_v47 }
0x189c   :  { %v2832_v43 = vpack.c.bf16 %v6839_v42, %v6839_v42 }
0x189e   :  { %5424 = vmatmul.msk.bf16.vlgmr.msrb.gmra.mxu0 %vm414_vm1, %v2832_v43 }
0x18a0   :  { %5451 = vmatmul.msk.bf16.vlgmr.msra.gmra.mxu3 %vm327_vm0, %v6795_v36 }
0x18ae   :  { %5452 = vmatmul.msk.bf16.vlgmr.msra.gmra.mxu0 %vm414_vm1, %v2963_v61 }
0x18b4   :  { %v3012_v63 = vpop.xlane.xlu0 %3011 }
0x18b5   :  { %v3014_v0 = vsub.f32 %v3003_v26, %v3012_v63 }
0x18b7   :  { %v3017_v5 = vmul.f32 1.442695, %v3014_v0  ;;  %v5305_v0 = vld [vmem:[%s6212_s19 + $0x14] sm:$0xf] }
0x18b9   :  { %5987 = vpow2.f32 %v3017_v5  ;;  %v3074_v5 = vsel %vm480_vm2, %v5305_v0, 0  ;;  %v5761_v0 = vld [vmem:[%s6192_s29 + $0x78] sm:$0xff] }
0x18ba   :  { %3083 = vmatpush.bf16.msrb.mxu0 %v3074_v5  ;;  %v5760_v5 = vld [vmem:[%s6192_s29 + $0x70] sm:$0xff] }
0x18bf   :  { %v5988_v2 = vpop.eup %5987 }
0x18c0   :  { %v3022_v50 = vsel %vm414_vm1, %v5988_v2, 0.0 }
0x18c1   :  { %3023 = vadd.xlane.f32.xlu2 %v3022_v50  ;;  %v5758_v50 = vld [vmem:[%s6192_s29 + $0x60] sm:$0xff] }
0x1913   :  { %v2848_v9 = vpop.f32.mrf.mxu3 }
0x191b   :  { %v2850_v41 = vpop.f32.mrf.mxu3  ;;  %v2867_v13 = vpop.f32.mrf.mxu0 }
0x191c   :  { %v2871_v14 = vpack.c.bf16 %v2867_v13, %v2848_v9  ;;  %v5744_v41 = vld [vmem:[%s6182_s21 + $0x70] sm:$0xff]  ;;  %s4886_s21 = sshll.u32 %s6150_s13, 4  ;;  %s4887_s21 = int_to_ptr.vmem [resolvable:$true] %s4886_s21 }
0x191e   :  { %5457 = vmatmul.msk.bf16.vlgmr.msra.gmra.mxu1 %vm414_vm1, %v2871_v14  ;;  %v5872_v14 = vld [vmem:[%s6197_s3 + $0x6] ss:$0 sm:$0xff] }
0x1923   :  { %v2869_v17 = vpop.f32.mrf.mxu0  ;;  %v2958_v16 = vpop.f32.mrf.mxu3 }
0x1924   :  { %v2959_v18 = vadd.f32 %v5870_v15, %v2958_v16 }
0x1926   :  { %v2967_v19 = vpack.c.bf16 %v2959_v18, %v2959_v18 }
0x1928   :  { %v3035_v20 = vsel %vm480_vm2, %v2967_v19, 0 }
0x1929   :  { %3044 = vmatpush.bf16.msra.mxu2 %v3035_v20 }
0x192b   :  { %v2960_v21 = vpop.f32.mrf.mxu3  ;;  %v2984_v22 = vpop.f32.mrf.mxu0 }
0x192c   :  { %v2961_v23 = vadd.f32 %v5870_v15, %v2960_v21  ;;  %v3007_v27 = vsel %vm414_vm1, %v2984_v22, -inf }
0x192d   :  { %3008 = vmax.xlane.f32.xlu1 %v3007_v27  ;;  %3133 = vmatpush.bf16.msrb.mxu2 %v5743_v53 }
0x192e   :  { %v2968_v25 = vpack.c.bf16 %v2961_v23, %v2961_v23 }
0x1930   :  { %v3054_v58 = vsel %vm480_vm2, %v2968_v25, 0 }
0x1931   :  { %3063 = vmatpush.bf16.msrb.mxu3 %v3054_v58  ;;  %3134 = vmatpush.bf16.msrb.mxu2 %v5742_v48  ;;  %v5873_v58 = vld [vmem:[%s6207_s14 + $0x6] ss:$0 sm:$0xff] }
0x1933   :  { %v2986_v33 = vpop.f32.mrf.mxu0 }
0x1934   :  { %v3024_v10 = vpop.xlane.xlu2 %3023 }
0x1935   :  { %3164 = vmatpush.bf16.msra.mxu3 %v5751_v24  ;;  %5989 = vrcp.f32 %v3024_v10 }
0x1939   :  { %3165 = vmatpush.bf16.msra.mxu3 %v5750_v31 }
0x193b   :  { %v5990_v45 = vpop.eup %5989 }
0x193c   :  { %v6857_v38 = vmul.f32 %v5990_v45, %v5988_v2  ;;  %v5759_v2 = vld [vmem:[%s6192_s29 + $0x68] sm:$0xff] }
0x193d   :  { %3193 = vmatpush.bf16.msra.mxu0 %v5759_v2 }
0x193e   :  { %v3030_v39 = vpack.c.bf16 %v6857_v38, %v6857_v38 }
0x1940   :  { %5455 = vmatmul.msk.bf16.vlgmr.msrb.gmra.mxu3 %vm414_vm1, %v3030_v39 }
0x1941   :  { %3194 = vmatpush.bf16.msra.mxu0 %v5758_v50 }
0x1950   :  { %5475 = vmatmul.msk.bf16.vlgmr.msra.gmra.mxu3 %vm327_vm0, %v6797_v37 }
0x199b   :  { %v6893_v27 = vpop.f32.mrf.mxu1 }
0x19a0   :  { %v3009_v59 = vpop.xlane.xlu1 %3008 }
0x19a1   :  { %v3013_v51 = vsub.f32 %v2984_v22, %v3009_v59 }
0x19a3   :  { %v3015_v29 = vmul.f32 1.442695, %v3013_v51  ;;  %v6897_v24 = vpop.f32.mrf.mxu1 }
0x19a5   :  { %5991 = vpow2.f32 %v3015_v29 }
0x19ab   :  { %v5992_v40 = vpop.eup %5991 }
0x19ac   :  { %v3019_v12 = vsel %vm414_vm1, %v5992_v40, 0.0 }
0x19ad   :  { %3020 = vadd.xlane.f32.xlu0 %v3019_v12 }
0x19c3   :  { %v3065_v46 = vpop.f32.mrf.mxu3 }
0x19cb   :  { %v3067_v47 = vpop.f32.mrf.mxu3 }
0x19d3   :  { %v3167_v26 = vpop.f32.mrf.mxu3 }
0x19d4   :  { %v3168_v49 = vadd.f32 %v5871_v60, %v3167_v26 }
0x19d6   :  { %v3203_v7 = vpack.c.bf16 %v3168_v49, %v3168_v49 }
0x19d8   :  { %v3211_v52 = vsel %vm414_vm1, %v3203_v7, 0 }
0x19d9   :  { %3220 = vmatpush.bf16.xpose.msrb.mxu1 %v3211_v52 }
0x19db   :  { %v3169_v55 = vpop.f32.mrf.mxu3 }
0x19dc   :  { %v3170_v56 = vadd.f32 %v5871_v60, %v3169_v55 }
0x19de   :  { %v3204_v43 = vpack.c.bf16 %v3170_v56, %v3170_v56 }
0x19e0   :  { %v3230_v63 = vsel %vm414_vm1, %v3204_v43, 0 }
0x1a20   :  { %v3021_v62 = vpop.xlane.xlu0 %3020 }
0x1a21   :  { %5993 = vrcp.f32 %v3021_v62 }
0x1a27   :  { %v5994_v57 = vpop.eup %5993 }
0x1a28   :  { %v6869_v4 = vmul.f32 %v5994_v57, %v5992_v40 }
0x1a2a   :  { %v3029_v61 = vpack.c.bf16 %v6869_v4, %v6869_v4 }
0x1a2c   :  { %5454 = vmatmul.msk.bf16.vlgmr.msra.gmra.mxu2 %vm414_vm1, %v3029_v61  ;;  %v5753_v61 = vld [vmem:[%s6187_s25 + $0x78] sm:$0xff] }
0x1a2d   :  { %3239 = vmatpush.bf16.xpose.msra.mxu2 %v3230_v63  ;;  %v5752_v63 = vld [vmem:[%s6187_s25 + $0x70] sm:$0xff]  ;;  %s4888_s25 = sshll.u32 %s6327_s4, 4  ;;  %s4889_s25 = int_to_ptr.hbm [resolvable:$true] %s4888_s25 }
0x1a2e   :  { %s6075_s29 = sshra.s32 %s4889_s25, 4  ;;  %s6076_s29 = int_to_ptr.hbm [resolvable:$true] %s6075_s29 }
0x1a2f   :  { %p6080_p1 = scmp.lt.s32.totalorder %s6076_s29, %s6327_s4 }
0x1a3c   :  { %5466 = vmatmul.msk.bf16.vlgmr.msrb.gmra.mxu2 %vm327_vm0, %v6797_v37 }
0x1a3d   :  { %3353 = vmatpush.bf16.msrb.mxu2 %v5745_v6  ;;  %v3110_v6 = vadd.f32 %v6869_v4, %v6834_v54  ;;  %v5306_v54 = vld [vmem:[%s6212_s19 + $0x18] sm:$0xf] }
0x1a3e   :  { %v3312_v4 = vsel %vm480_vm2, %v5306_v54, 0 }
0x1a3f   :  { %3321 = vmatpush.bf16.msra.mxu1 %v3312_v4 }
0x1a41   :  { %3354 = vmatpush.bf16.msrb.mxu2 %v5744_v41 }
0x1aaf   :  { %v3046_v8 = vpop.f32.mrf.mxu2 }
0x1ab0   :  { %v3069_v9 = vpack.c.bf16 %v3065_v46, %v3046_v8 }
0x1ab2   :  { %5456 = vmatmul.msk.bf16.vlgmr.msrb.gmra.mxu0 %vm414_vm1, %v3069_v9 }
0x1ab7   :  { %v3048_v13 = vpop.f32.mrf.mxu2 }
0x1abf   :  { %v3136_v15 = vpop.f32.mrf.mxu2 }
0x1ac0   :  { %v3137_v17 = vadd.f32 %v5872_v14, %v3136_v15  ;;  %v3111_v15 = vadd.f32 %v6857_v38, %v6839_v42 }
0x1ac2   :  { %v3141_v16 = vmul.f32 0.35355338, %v3137_v17  ;;  %5484 = vmatmul.msk.bf16.vlgmr.msra.gmra.mxu0 %vm327_vm0, %v6795_v36 }
0x1ac4   :  { %v3201_v18 = vpack.c.bf16 %v3141_v16, %v3141_v16 }
0x1ac6   :  { %5485 = vmatmul.msk.bf16.vlgmr.msrb.gmra.mxu1 %vm414_vm1, %v3201_v18 }
0x1ac7   :  { %v3138_v19 = vpop.f32.mrf.mxu2 }
0x1ac8   :  { %v3139_v20 = vadd.f32 %v5872_v14, %v3138_v19 }
0x1aca   :  { %v3142_v21 = vmul.f32 0.35355338, %v3139_v20 }
0x1acc   :  { %v3202_v22 = vpack.c.bf16 %v3142_v21, %v3142_v21 }
0x1ace   :  { %5486 = vmatmul.msk.bf16.vlgmr.msra.gmra.mxu2 %vm414_vm1, %v3202_v22  ;;  %v5875_v22 = vld [vmem:[%s6202_s8 + $0x7] ss:$0 sm:$0xff]  ;;  %s6079_s8 = scalar_lea.hbm %s6327_s4, 32 }
0x1ade   :  { %5498 = vmatmul.msk.bf16.vlgmr.msrb.gmra.mxu2 %vm327_vm0, %v6797_v37 }
0x1b2f   :  { %v6891_v23 = vpop.f32.mrf.mxu0 }
0x1b37   :  { %v6895_v25 = vpop.f32.mrf.mxu0 }
0x1b3f   :  { %v3196_v31 = vpop.f32.mrf.mxu0 }
0x1b40   :  { %v3197_v33 = vadd.f32 %v5873_v58, %v3196_v31 }
0x1b42   :  { %v3205_v10 = vpack.c.bf16 %v3197_v33, %v3197_v33 }
0x1b43   :  { %v3222_v45 = vpop.f32.mrf.mxu1 }
0x1b44   :  { %v3273_v39 = vsel %vm480_vm2, %v3205_v10, 0  ;;  %v3245_v59 = vsel %vm414_vm1, %v3222_v45, -inf }
0x1b45   :  { %3246 = vmax.xlane.f32.xlu1 %v3245_v59  ;;  %3282 = vmatpush.bf16.msrb.mxu3 %v3273_v39  ;;  %v5876_v39 = vld [vmem:[%s6207_s14 + $0x7] ss:$0 sm:$0xff] }
0x1b47   :  { %v3198_v51 = vpop.f32.mrf.mxu0 }
0x1b48   :  { %v3199_v29 = vadd.f32 %v5873_v58, %v3198_v51  ;;  %v5874_v58 = vld [vmem:[%s6197_s3 + $0x7] ss:$0 sm:$0xff]  ;;  %s6077_s3 = scalar_lea.hbm %s6076_s29, 32 }
0x1b49   :  { %3384 = vmatpush.bf16.msra.mxu3 %v5753_v61  ;;  %p6078_p0 = scmp.ne.s32.totalorder %s6076_s29, %s6077_s3  ;;  %p6081_p2 = scmp.lt.s32.totalorder %s6079_s8, %s6077_s3 }
0x1b4a   :  { %v3206_v40 = vpack.c.bf16 %v3199_v29, %v3199_v29 }
0x1b4b   :  { %v3224_v12 = vpop.f32.mrf.mxu1  ;;  %p6082_p3 = por %p6081_p2, %p6080_p1 }
0x1b4c   :  { %v3292_v46 = vsel %vm480_vm2, %v3206_v40, 0 }
0x1b4d   :  { %3301 = vmatpush.bf16.msrb.mxu0 %v3292_v46  ;;  %3385 = vmatpush.bf16.msra.mxu3 %v5752_v63  ;;  %p6083_p4 = pnand %p6082_p3, %p6078_p0 }
0x1b51   :  { %v3241_v47 = vpop.f32.mrf.mxu2  ;;  %3413 = vmatpush.bf16.msra.mxu0 %v5761_v0 }
0x1b52   :  { %v3248_v60 = vsel %vm414_vm1, %v3241_v47, -inf }
0x1b53   :  { %3249 = vmax.xlane.f32.xlu2 %v3248_v60 }
0x1b55   :  { %3414 = vmatpush.bf16.msra.mxu0 %v5760_v5 }
0x1b59   :  { %v3243_v26 = vpop.f32.mrf.mxu2 }
0x1b61   :  { %v3356_v21 = vpop.f32.mrf.mxu2 }
0x1b62   :  { %v3357_v10 = vadd.f32 %v5874_v58, %v3356_v21 }
0x1b64   :  { %v3361_v59 = vmul.f32 0.35355338, %v3357_v10 }
0x1b69   :  { %v3358_v51 = vpop.f32.mrf.mxu2 }
0x1b6a   :  { %v3359_v60 = vadd.f32 %v5874_v58, %v3358_v51 }
0x1bb8   :  { %v3247_v49 = vpop.xlane.xlu1 %3246 }
0x1bb9   :  { %v3251_v7 = vsub.f32 %v3222_v45, %v3247_v49 }
0x1bbb   :  { %v3253_v52 = vmul.f32 1.442695, %v3251_v7 }
0x1bbd   :  { %5995 = vpow2.f32 %v3253_v52 }
0x1bc3   :  { %v5996_v53 = vpop.eup %5995 }
0x1bc4   :  { %v3257_v48 = vsel %vm414_vm1, %v5996_v53, 0.0 }
0x1bc5   :  { %3258 = vadd.xlane.f32.xlu0 %v3257_v48 }
0x1bc6   :  { %v3250_v62 = vpop.xlane.xlu2 %3249 }
0x1bc7   :  { %v3252_v55 = vsub.f32 %v3241_v47, %v3250_v62  ;;  %v3421_v47 = vpack.c.bf16 %v3361_v59, %v3361_v59 }
0x1bc9   :  { %v3255_v56 = vmul.f32 1.442695, %v3252_v55 }
0x1bcb   :  { %5997 = vpow2.f32 %v3255_v56 }
0x1bd1   :  { %v5998_v57 = vpop.eup %5997 }
0x1bd2   :  { %v3260_v43 = vsel %vm414_vm1, %v5998_v57, 0.0 }
0x1bd3   :  { %3261 = vadd.xlane.f32.xlu1 %v3260_v43  ;;  %v3106_v43 = vadd.f32 %v6893_v27, %v6891_v23 }
0x1c38   :  { %v3259_v2 = vpop.xlane.xlu0 %3258 }
0x1c39   :  { %5999 = vrcp.f32 %v3259_v2 }
0x1c3f   :  { %v6000_v50 = vpop.eup %5999 }
0x1c40   :  { %v3265_v8 = vmul.f32 %v6000_v50, %v5996_v53  ;;  %v3362_v53 = vmul.f32 0.35355338, %v3359_v60 }
0x1c42   :  { %v3267_v9 = vpack.c.bf16 %v3265_v8, %v3265_v8  ;;  %v6912_v41 = vadd.f32 %v3265_v8, %v3110_v6  ;;  %v3422_v55 = vpack.c.bf16 %v3362_v53, %v3362_v53 }
0x1c44   :  { %5487 = vmatmul.msk.bf16.vlgmr.msrb.gmra.mxu3 %vm414_vm1, %v3267_v9 }
0x1c46   :  { %v3262_v13 = vpop.xlane.xlu1 %3261 }
0x1c47   :  { %6001 = vrcp.f32 %v3262_v13 }
0x1c4d   :  { %v6002_v14 = vpop.eup %6001 }
0x1c4e   :  { %v3266_v17 = vmul.f32 %v6002_v14, %v5998_v57 }
0x1c50   :  { %v3268_v16 = vpack.c.bf16 %v3266_v17, %v3266_v17  ;;  %v6917_v18 = vadd.f32 %v3266_v17, %v3111_v15 }
0x1c52   :  { %5488 = vmatmul.msk.bf16.vlgmr.msrb.gmra.mxu0 %vm414_vm1, %v3268_v16 }
0x1c54   :  { %5507 = vmatmul.msk.bf16.vlgmr.msra.gmra.mxu3 %vm327_vm0, %v6797_v37 }
0x1c62   :  { %5516 = vmatmul.msk.bf16.vlgmr.msra.gmra.mxu0 %vm327_vm0, %v6795_v36 }
0x1cc7   :  { %v3284_v42 = vpop.f32.mrf.mxu3 }
0x1ccf   :  { %v3286_v38 = vpop.f32.mrf.mxu3  ;;  %v3303_v19 = vpop.f32.mrf.mxu0 }
0x1cd0   :  { %v3307_v20 = vpack.c.bf16 %v3303_v19, %v3284_v42 }
0x1cd2   :  { %5489 = vmatmul.msk.bf16.vlgmr.msra.gmra.mxu1 %vm414_vm1, %v3307_v20 }
0x1cd7   :  { %v3305_v31 = vpop.f32.mrf.mxu0  ;;  %v3387_v33 = vpop.f32.mrf.mxu3 }
0x1cd8   :  { %v3388_v37 = vadd.f32 %v5875_v22, %v3387_v33 }
0x1cda   :  { %v3423_v45 = vpack.c.bf16 %v3388_v37, %v3388_v37 }
0x1cdc   :  { %v3431_v36 = vsel %vm414_vm1, %v3423_v45, 0 }
0x1cdd   :  { %3440 = vmatpush.bf16.xpose.msrb.mxu1 %v3431_v36 }
0x1cdf   :  { %v3389_v29 = vpop.f32.mrf.mxu3  ;;  %v3416_v40 = vpop.f32.mrf.mxu0 }
0x1ce0   :  { %v3390_v12 = vadd.f32 %v5875_v22, %v3389_v29  ;;  %v3417_v46 = vadd.f32 %v5876_v39, %v3416_v40 }
0x1ce2   :  { %v3424_v26 = vpack.c.bf16 %v3390_v12, %v3390_v12  ;;  %v3425_v49 = vpack.c.bf16 %v3417_v46, %v3417_v46  ;;  %v5877_v46 = vld [vmem:[%s6217_s24 + $0x1] ss:$0 sm:$0xff] }
0x1ce4   :  { %v3493_v7 = vsel %vm480_vm2, %v3425_v49, 0  ;;  %5517 = vmatmul.msk.bf16.vlgmr.msrb.gmra.mxu1 %vm414_vm1, %v3421_v47  ;;  %v3450_v52 = vsel %vm414_vm1, %v3424_v26, 0  ;;  %v3108_v26 = vadd.f32 %v6897_v24, %v6895_v25 }
0x1ce5   :  { %3459 = vmatpush.bf16.xpose.msra.mxu2 %v3450_v52  ;;  %3502 = vmatpush.bf16.msrb.mxu3 %v3493_v7 }
0x1ce7   :  { %v3418_v48 = vpop.f32.mrf.mxu0 }
0x1ce8   :  { %v3419_v62 = vadd.f32 %v5876_v39, %v3418_v48  ;;  %v5307_v39 = vld [vmem:[%s6212_s19 + $0x1c] sm:$0xf] }
0x1cea   :  { %v3426_v56 = vpack.c.bf16 %v3419_v62, %v3419_v62 }
0x1cec   :  { %v3512_v57 = vsel %vm480_vm2, %v3426_v56, 0  ;;  %5518 = vmatmul.msk.bf16.vlgmr.msra.gmra.mxu2 %vm414_vm1, %v3422_v55 }
0x1ced   :  { %3521 = vmatpush.bf16.msrb.mxu0 %v3512_v57  ;;  %v5779_v57 = vld [vmem:[%s6232_s12 + $0x48] sm:$0xff] }
0x1cf1   :  { %3707 = vmatpush.bf16.msra.mxu0 %v5779_v57 }
0x1d4f   :  { %v3323_v61 = vpop.f32.mrf.mxu1 }
0x1d50   :  { %v3328_v63 = vadd.f32 %v3323_v61, %v3106_v43  ;;  %v5771_v43 = vld [vmem:[%s6227_s6 + $0x48] sm:$0xff]  ;;  %v5778_v61 = vld [vmem:[%s6232_s12 + $0x40] sm:$0xff] }
0x1d51   :  { %3673 = vmatpush.bf16.msra.mxu3 %v5771_v43  ;;  %3708 = vmatpush.bf16.msra.mxu0 %v5778_v61 }
0x1d57   :  { %v3325_v0 = vpop.f32.mrf.mxu1 }
0x1d58   :  { %v3329_v7 = vadd.f32 %v3325_v0, %v3108_v26 }
0x1d61   :  { %v3442_v5 = vpop.f32.mrf.mxu1 }
0x1d62   :  { %v3465_v2 = vsel %vm414_vm1, %v3442_v5, -inf }
0x1d63   :  { %3466 = vmax.xlane.f32.xlu2 %v3465_v2 }
0x1d69   :  { %v3444_v50 = vpop.f32.mrf.mxu1 }
0x1d6f   :  { %v3461_v6 = vpop.f32.mrf.mxu2 }
0x1d70   :  { %v3468_v8 = vsel %vm414_vm1, %v3461_v6, -inf }
0x1d71   :  { %3469 = vmax.xlane.f32.xlu0 %v3468_v8  ;;  %v5770_v8 = vld [vmem:[%s6227_s6 + $0x40] sm:$0xff] }
0x1d72   :  { %3674 = vmatpush.bf16.msra.mxu3 %v5770_v8 }
0x1d77   :  { %v3463_v9 = vpop.f32.mrf.mxu2 }
0x1d78   :  { %v5773_v9 = vld [vmem:[%s6227_s6 + $0x58] sm:$0xff] }
0x1dd6   :  { %v3467_v13 = vpop.xlane.xlu2 %3466 }
0x1dd7   :  { %v3471_v14 = vsub.f32 %v3442_v5, %v3467_v13  ;;  %v5772_v13 = vld [vmem:[%s6227_s6 + $0x50] sm:$0xff] }
0x1dd9   :  { %v3473_v15 = vmul.f32 1.442695, %v3471_v14 }
0x1ddb   :  { %6003 = vpow2.f32 %v3473_v15 }
0x1de1   :  { %v6004_v17 = vpop.eup %6003 }
0x1de2   :  { %v3477_v23 = vsel %vm414_vm1, %v6004_v17, 0.0 }
0x1de3   :  { %3478 = vadd.xlane.f32.xlu1 %v3477_v23  ;;  %v5765_v23 = vld [vmem:[%s7250_s0 + $0x58] sm:$0xff] }
0x1de4   :  { %v3470_v27 = vpop.xlane.xlu0 %3469 }
0x1de5   :  { %v3472_v16 = vsub.f32 %v3461_v6, %v3470_v27 }
0x1de7   :  { %v3475_v54 = vmul.f32 1.442695, %v3472_v16  ;;  %v5762_v16 = vld [vmem:[%s7250_s0 + $0x40] sm:$0xff] }
0x1de9   :  { %6005 = vpow2.f32 %v3475_v54  ;;  %v5764_v54 = vld [vmem:[%s7250_s0 + $0x50] sm:$0xff] }
0x1def   :  { %v6006_v4 = vpop.eup %6005 }
0x1df0   :  { %v3480_v42 = vsel %vm414_vm1, %v6006_v4, 0.0 }
0x1df1   :  { %3481 = vadd.xlane.f32.xlu2 %v3480_v42 }
0x1e56   :  { %v3479_v38 = vpop.xlane.xlu1 %3478 }
0x1e57   :  { %6007 = vrcp.f32 %v3479_v38 }
0x1e5d   :  { %v6008_v19 = vpop.eup %6007 }
0x1e5e   :  { %v3485_v20 = vmul.f32 %v6008_v19, %v6004_v17  ;;  %v5763_v17 = vld [vmem:[%s7250_s0 + $0x48] sm:$0xff] }
0x1e5f   :  { %3642 = vmatpush.bf16.msrb.mxu2 %v5763_v17 }
0x1e60   :  { %v3487_v21 = vpack.c.bf16 %v3485_v20, %v3485_v20  ;;  %v3550_v22 = vadd.f32 %v3485_v20, %v6912_v41  ;;  %v3532_v41 = vsel %vm480_vm2, %v5307_v39, 0  ;;  %v5878_v39 = vld [vmem:[%s7251_s5 + $0x1] ss:$0 sm:$0xff] }
0x1e61   :  { %3541 = vmatpush.bf16.msra.mxu1 %v3532_v41 }
0x1e62   :  { %v3557_v58 = vmul.f32 0.25, %v3550_v22  ;;  %5519 = vmatmul.msk.bf16.vlgmr.msrb.gmra.mxu3 %vm414_vm1, %v3487_v21 }
0x1e63   :  { %3870 = vmatpush.bf16.msrb.mxu3 %v5765_v23  ;;  %3643 = vmatpush.bf16.msrb.mxu2 %v5762_v16 }
0x1e64   :  { %4817 = vst.msk [vmem:[#allocation2 + $0x10] sm:$0xff] %vm414_vm1, %v3557_v58  ;;  %v3482_v31 = vpop.xlane.xlu2 %3481 }
0x1e65   :  { %6009 = vrcp.f32 %v3482_v31 }
0x1e67   :  { %3871 = vmatpush.bf16.msrb.mxu3 %v5764_v54 }
0x1e6b   :  { %v6010_v33 = vpop.eup %6009 }
0x1e6c   :  { %v3486_v37 = vmul.f32 %v6010_v33, %v6006_v4 }
0x1e6e   :  { %v3488_v10 = vpack.c.bf16 %v3486_v37, %v3486_v37  ;;  %v3551_v45 = vadd.f32 %v3486_v37, %v6917_v18 }
0x1e70   :  { %v3558_v36 = vmul.f32 0.25, %v3551_v45  ;;  %5520 = vmatmul.msk.bf16.vlgmr.msrb.gmra.mxu0 %vm414_vm1, %v3488_v10 }
0x1e71   :  { %3901 = vmatpush.bf16.msrb.mxu0 %v5773_v9 }
0x1e72   :  { %4818 = vst.msk [vmem:[#allocation2 + $0x18] sm:$0xff] %vm414_vm1, %v3558_v36  ;;  %5539 = vmatmul.msk.bf16.vlgmr.msra.gmra.mxu3 %vm327_vm0, %v6555_v28 }
0x1e75   :  { %3902 = vmatpush.bf16.msrb.mxu0 %v5772_v13 }
0x1e80   :  { %5549 = vmatmul.msk.bf16.vlgmr.msra.gmra.mxu0 %vm327_vm0, %v6526_v1 }
0x1e82   :  { %5540 = vmatmul.msk.bf16.gmra.mxu3 %vm327_vm0, %v6563_v30 }
0x1e90   :  { %5550 = vmatmul.msk.bf16.gmra.mxu0 %vm327_vm0, %v6539_v11 }
0x1ea0   :  { %5572 = vmatmul.msk.bf16.vlgmr.msrb.gmra.mxu0 %vm327_vm0, %v6555_v28 }
0x1eb0   :  { %5573 = vmatmul.msk.bf16.gmra.mxu0 %vm327_vm0, %v6563_v30 }
0x1ee5   :  { %v3504_v59 = vpop.f32.mrf.mxu3 }
0x1eed   :  { %v3506_v51 = vpop.f32.mrf.mxu3  ;;  %v3523_v29 = vpop.f32.mrf.mxu0 }
0x1eee   :  { %v3527_v40 = vpack.c.bf16 %v3523_v29, %v3504_v59  ;;  %v5879_v29 = vld [vmem:[%s7252_s9 + $0x1] ss:$0 sm:$0xff] }
0x1ef0   :  { %5521 = vmatmul.msk.bf16.vlgmr.msra.gmra.mxu1 %vm414_vm1, %v3527_v40 }
0x1ef5   :  { %v3525_v12 = vpop.f32.mrf.mxu0  ;;  %v3676_v57 = vpop.f32.mrf.mxu3 }
0x1f6d   :  { %v3543_v18 = vpop.f32.mrf.mxu1 }
0x1f6e   :  { %v3548_v47 = vadd.f32 %v3543_v18, %v3328_v63 }
0x1f70   :  { %v3555_v60 = vadd.f32 %v5877_v46, %v3548_v47 }
0x1f72   :  { %v3559_v49 = vadd.f32 %v3555_v60, %v6779_v32 }
0x1f74   :  { %v3561_v52 = vsel %vm327_vm0, %v3559_v49, 0.0 }
0x1f75   :  { %3562 = vadd.xlane.f32.xlu0 %v3561_v52  ;;  %v3545_v53 = vpop.f32.mrf.mxu1  ;;  %v3710_v52 = vpop.f32.mrf.mxu0 }
0x1f76   :  { %v3549_v48 = vadd.f32 %v3545_v53, %v3329_v7 }
0x1f78   :  { %v3556_v62 = vadd.f32 %v5877_v46, %v3549_v48 }
0x1f7a   :  { %v3560_v55 = vadd.f32 %v3556_v62, %v6781_v34 }
0x1f7c   :  { %v3564_v56 = vsel %vm327_vm0, %v3560_v55, 0.0 }
0x1f7d   :  { %3565 = vadd.xlane.f32.xlu1 %v3564_v56  ;;  %v3712_v53 = vpop.f32.mrf.mxu0  ;;  %v5881_v56 = vld [vmem:[%s7254_s15 + $0x4] ss:$0 sm:$0xff] }
0x1f7e   :  { %v3677_v61 = vadd.f32 %v5881_v56, %v3676_v57 }
0x1f85   :  { %v3715_v48 = vpop.f32.mrf.mxu0 }
0x1f8d   :  { %v3717_v62 = vpop.f32.mrf.mxu0 }
0x1fe8   :  { %v3563_v32 = vpop.xlane.xlu0 %3562 }
0x1fe9   :  { %v3567_v25 = vmul.f32 %v3563_v32, %v6530_v3 }
0x1feb   :  { %v3569_v24 = vsub.f32 %v3559_v49, %v3567_v25  ;;  %v3722_v25 = vpack.c.bf16 %v3677_v61, %v3677_v61 }
0x1fed   :  { %v3571_v34 = vmul.f32 %v3569_v24, %v3569_v24 }
0x1fef   :  { %v3573_v63 = vsel %vm327_vm0, %v3571_v34, 0.0  ;;  %v3678_v34 = vpop.f32.mrf.mxu3 }
0x1ff0   :  { %3574 = vadd.xlane.f32.xlu2 %v3573_v63  ;;  %v3566_v0 = vpop.xlane.xlu1 %3565  ;;  %v3904_v63 = vpop.f32.mrf.mxu0 }
0x1ff1   :  { %v3568_v5 = vmul.f32 %v3566_v0, %v6530_v3  ;;  %v3679_v0 = vadd.f32 %v5881_v56, %v3678_v34 }
0x1ff3   :  { %v3570_v2 = vsub.f32 %v3560_v55, %v3568_v5  ;;  %v5880_v55 = vld [vmem:[%s7253_s17 + $0x4] ss:$0 sm:$0xff]  ;;  %v3723_v8 = vpack.c.bf16 %v3679_v0, %v3679_v0 }
0x1ff4   :  { %v3713_v43 = vadd.f32 %v5880_v55, %v3712_v53  ;;  %v3716_v54 = vadd.f32 %v5880_v55, %v3715_v48 }
0x1ff5   :  { %v3572_v50 = vmul.f32 %v3570_v2, %v3570_v2  ;;  %v3733_v9 = vunpack.c.l.b16 %v3723_v8 }
0x1ff6   :  { %v3727_v32 = vpack.c.bf16 %v3713_v43, %v3713_v43 }
0x1ff7   :  { %v3576_v6 = vsel %vm327_vm0, %v3572_v50, 0.0  ;;  %v3681_v17 = vpop.f32.mrf.mxu3 }
0x1ff8   :  { %3577 = vadd.xlane.f32.xlu0 %v3576_v6  ;;  %v3805_v50 = vunpack.c.l.b16 %v3727_v32  ;;  %v3732_v6 = vunpack.c.l.b16 %v3722_v25  ;;  %v3906_v23 = vpop.f32.mrf.mxu0 }
0x2063   :  { %v3575_v14 = vpop.xlane.xlu2 %3574 }
0x2064   :  { %v3579_v15 = vmul.f32 %v3575_v14, %v6530_v3  ;;  %v3734_v14 = vpack.c.b16 %v3733_v9, %v3732_v6 }
0x2066   :  { %v3581_v27 = vadd.f32 1e-05, %v3579_v15  ;;  %v3739_v16 = vsel %vm414_vm1, %v3734_v14, 0 }
0x2067   :  { %3748 = vmatpush.bf16.xpose.msrb.mxu1 %v3739_v16 }
0x2068   :  { %6011 = vrsqrt.f32 %v3581_v27  ;;  %vm3589_vm13 = vweird.f32 %v3581_v27 }
0x206b   :  { %v3578_v4 = vpop.xlane.xlu0 %3577 }
0x206c   :  { %v3580_v42 = vmul.f32 %v3578_v4, %v6530_v3  ;;  %v3718_v4 = vadd.f32 %v5880_v55, %v3717_v62 }
0x206e   :  { %v6012_v38 = vpop.eup %6011  ;;  %v3582_v19 = vadd.f32 1e-05, %v3580_v42 }
0x206f   :  { %v3584_v20 = vmul.f32 %v6012_v38, %v3581_v27  ;;  %vm3590_vm12 = vweird.f32 %v6012_v38 }
0x2070   :  { %6013 = vrsqrt.f32 %v3582_v19  ;;  %vm3591_vm14 = vmor %vm3589_vm13, %vm3590_vm12  ;;  %vm3599_vm3 = vweird.f32 %v3582_v19 }
0x2071   :  { %v3585_v21 = vmul.f32 %v6012_v38, %v3584_v20 }
0x2073   :  { %v3586_v22 = vmul.f32 0.5, %v3585_v21  ;;  %v3728_v21 = vpack.c.bf16 %v3716_v54, %v3716_v54 }
0x2075   :  { %v3587_v58 = vsub.f32 1.5, %v3586_v22  ;;  %v3729_v22 = vpack.c.bf16 %v3718_v4, %v3718_v4 }
0x2076   :  { %v6014_v31 = vpop.eup %6013 }
0x2077   :  { %v3588_v33 = vmul.f32 %v6012_v38, %v3587_v58  ;;  %v3594_v37 = vmul.f32 %v6014_v31, %v3582_v19  ;;  %vm3600_vm15 = vweird.f32 %v6014_v31 }
0x2078   :  { %vm3601_vm5 = vmor %vm3599_vm3, %vm3600_vm15 }
0x2079   :  { %v3592_v10 = vsel %vm3591_vm14, %v6012_v38, %v3588_v33  ;;  %v3595_v45 = vmul.f32 %v6014_v31, %v3594_v37  ;;  %v3682_v38 = vadd.f32 %v5881_v56, %v3681_v17  ;;  %v3683_v33 = vpop.f32.mrf.mxu3  ;;  %v3909_v37 = vpop.f32.mrf.mxu0 }
0x207a   :  { %v3603_v41 = vmul.f32 %v3592_v10, %v3569_v24  ;;  %v5882_v24 = vld [vmem:[%s7254_s15 + $0x5] ss:$0 sm:$0xff]  ;;  %v3684_v10 = vadd.f32 %v5881_v56, %v3683_v33 }
0x207b   :  { %v3596_v36 = vmul.f32 0.5, %v3595_v45  ;;  %v3905_v5 = vadd.f32 %v5882_v24, %v3904_v63  ;;  %v3907_v27 = vadd.f32 %v5882_v24, %v3906_v23  ;;  %v3724_v58 = vpack.c.bf16 %v3682_v38, %v3682_v38  ;;  %v5884_v56 = vld [vmem:[%s7255_s16 + $0x5] ss:$0 sm:$0xff] }
0x207c   :  { %v3608_v40 = vmul.f32 %v5878_v39, %v3603_v41  ;;  %v3826_v45 = vunpack.c.l.b16 %v3728_v21  ;;  %v3725_v41 = vpack.c.bf16 %v3684_v10, %v3684_v10 }
0x207d   :  { %v3597_v59 = vsub.f32 1.5, %v3596_v36  ;;  %v3950_v15 = vpack.c.bf16 %v3905_v5, %v3905_v5  ;;  %v3951_v19 = vpack.c.bf16 %v3907_v27, %v3907_v27  ;;  %v3827_v36 = vunpack.c.l.b16 %v3729_v22 }
0x207e   :  { %v6988_v18 = vadd.f32 %v5879_v29, %v3608_v40 }
0x207f   :  { %v3598_v51 = vmul.f32 %v6014_v31, %v3597_v59  ;;  %v7006_v42 = vunpack.c.l.b16 %v3950_v15  ;;  %v3961_v20 = vunpack.c.l.b16 %v3951_v19  ;;  %v3910_v59 = vadd.f32 %v5882_v24, %v3909_v37  ;;  %v5781_v37 = vld [vmem:[%s6232_s12 + $0x58] sm:$0xff] }
0x2080   :  { %v3615_v26 = vadd.f32 %v6784_v35, %v6988_v18  ;;  %v3711_v35 = vadd.f32 %v5880_v55, %v3710_v52  ;;  %v5883_v55 = vld [vmem:[%s7255_s16 + $0x4] ss:$0 sm:$0xff] }
0x2081   :  { %v3602_v12 = vsel %vm3601_vm5, %v6014_v31, %v3598_v51  ;;  %v3962_v31 = vpack.c.b16 %v3961_v20, %v7006_v42  ;;  %v3757_v51 = vunpack.c.l.b16 %v3725_v41 }
0x2082   :  { %v3604_v46 = vmul.f32 %v3602_v12, %v3570_v2  ;;  %v3952_v12 = vpack.c.bf16 %v3910_v59, %v3910_v59 }
0x2083   :  { %v3967_v4 = vsel %vm414_vm1, %v3962_v31, 0  ;;  %v5780_v31 = vld [vmem:[%s6232_s12 + $0x50] sm:$0xff] }
0x2084   :  { %v3609_v47 = vmul.f32 %v5878_v39, %v3604_v46  ;;  %v3756_v39 = vunpack.c.l.b16 %v3724_v58  ;;  %v3911_v46 = vpop.f32.mrf.mxu0 }
0x2086   :  { %v6990_v60 = vadd.f32 %v5879_v29, %v3609_v47  ;;  %v3828_v29 = vpack.c.b16 %v3827_v36, %v3826_v45  ;;  %v3758_v40 = vpack.c.b16 %v3757_v51, %v3756_v39  ;;  %v3912_v47 = vadd.f32 %v5882_v24, %v3911_v46 }
0x2088   :  { %v3616_v49 = vadd.f32 %v6789_v44, %v6990_v60  ;;  %v3726_v44 = vpack.c.bf16 %v3711_v35, %v3711_v35  ;;  %v3953_v52 = vpack.c.bf16 %v3912_v47, %v3912_v47 }
0x208a   :  { %v6996_v7 = vpack.c.bf16 %v3616_v49, %v3615_v26  ;;  %v3804_v2 = vunpack.c.l.b16 %v3726_v44  ;;  %v3763_v26 = vsel %vm414_vm1, %v3758_v40, 0  ;;  %v3984_v49 = vunpack.c.l.b16 %v3952_v12 }
0x208b   :  { %3772 = vmatpush.bf16.xpose.msra.mxu2 %v3763_v26  ;;  %v3985_v53 = vunpack.c.l.b16 %v3953_v52 }
0x208c   :  { %5530 = vmatmul.msk.bf16.vlgmr.msrb.gmra.mxu2 %vm327_vm0, %v6996_v7  ;;  %5563 = vmatmul.msk.bf16.vlgmr.msrb.gmra.mxu3 %vm327_vm0, %v6996_v7  ;;  %v3806_v13 = vpack.c.b16 %v3805_v50, %v3804_v2 }
0x208d   :  { %v3986_v48 = vpack.c.b16 %v3985_v53, %v3984_v49  ;;  %v5369_v53 = vld [vmem:[%s7256_s18 + $0x10] sm:$0xf] }
0x208e   :  { %3818 = vmatpush.bf16.msra.mxu1 %v3806_v13 }
0x208f   :  { %v3991_v62 = vsel %vm414_vm1, %v3986_v48, 0  ;;  %v4099_v48 = vsel %vm480_vm2, %v5369_v53, 0 }
0x2090   :  { %4000 = vmatpush.bf16.xpose.msra.mxu3 %v3991_v62 }
0x2093   :  { %3840 = vmatpush.bf16.msrb.mxu2 %v3828_v29 }
0x210f   :  { %v3645_v57 = vpop.f32.mrf.mxu2  ;;  %v3873_v35 = vpop.f32.mrf.mxu3 }
0x2110   :  { %v3646_v43 = vadd.f32 %v5883_v55, %v3645_v57  ;;  %v7013_v61 = vadd.f32 %v5884_v56, %v3873_v35  ;;  %v5885_v57 = vld [vmem:[%s7253_s17 + $0x5] ss:$0 sm:$0xff] }
0x2112   :  { %v3650_v44 = vmul.f32 0.35355338, %v3646_v43  ;;  %v3878_v49 = vmul.f32 0.35355338, %v7013_v61 }
0x2114   :  { %v3720_v32 = vpack.c.bf16 %v3650_v44, %v3650_v44  ;;  %v3948_v52 = vpack.c.bf16 %v3878_v49, %v3878_v49 }
0x2116   :  { %5551 = vmatmul.msk.bf16.vlgmr.msrb.gmra.mxu1 %vm414_vm1, %v3720_v32 }
0x2117   :  { %v3647_v25 = vpop.f32.mrf.mxu2  ;;  %v3875_v24 = vpop.f32.mrf.mxu3  ;;  %3935 = vmatpush.bf16.msrb.mxu1 %v5781_v37 }
0x2118   :  { %v3648_v34 = vadd.f32 %v5883_v55, %v3647_v25  ;;  %v3876_v63 = vadd.f32 %v5884_v56, %v3875_v24 }
0x211a   :  { %v3651_v0 = vmul.f32 0.35355338, %v3648_v34  ;;  %v3879_v5 = vmul.f32 0.35355338, %v3876_v63 }
0x211b   :  { %3936 = vmatpush.bf16.msrb.mxu1 %v5780_v31 }
0x211c   :  { %v3721_v2 = vpack.c.bf16 %v3651_v0, %v3651_v0  ;;  %v3949_v50 = vpack.c.bf16 %v3879_v5, %v3879_v5 }
0x211e   :  { %5552 = vmatmul.msk.bf16.vlgmr.msra.gmra.mxu2 %vm414_vm1, %v3721_v2  ;;  %5585 = vmatmul.msk.bf16.vlgmr.msra.gmra.mxu3 %vm414_vm1, %v3949_v50 }
0x211f   :  { %3976 = vmatpush.bf16.xpose.msra.mxu2 %v3967_v4 }
0x2193   :  { %v3750_v6 = vpop.f32.mrf.mxu1 }
0x2194   :  { %v3778_v8 = vsel %vm1446_vm10, %v3750_v6, -inf }
0x2195   :  { %3779 = vmax.xlane.f32.xlu0 %v3778_v8 }
0x219b   :  { %v3752_v9 = vpop.f32.mrf.mxu1 }
0x21a1   :  { %v3774_v13 = vpop.f32.mrf.mxu2  ;;  %v4002_v14 = vpop.f32.mrf.mxu3 }
0x21a2   :  { %v3781_v15 = vsel %vm1446_vm10, %v3774_v13, -inf  ;;  %v4009_v33 = vsel %vm1446_vm10, %v4002_v14, -inf }
0x21a3   :  { %3782 = vmax.xlane.f32.xlu1 %v3781_v15 }
0x21a9   :  { %v3776_v17 = vpop.f32.mrf.mxu2  ;;  %v4004_v23 = vpop.f32.mrf.mxu3 }
0x2208   :  { %v3780_v27 = vpop.xlane.xlu0 %3779 }
0x2209   :  { %v3784_v16 = vsub.f32 %v3750_v6, %v3780_v27 }
0x220b   :  { %v3786_v54 = vmul.f32 1.442695, %v3784_v16 }
0x220d   :  { %6015 = vpow2.f32 %v3786_v54 }
0x2213   :  { %v6016_v42 = vpop.eup %6015 }
0x2214   :  { %v3790_v38 = vsel %vm1446_vm10, %v6016_v42, 0.0 }
0x2215   :  { %3791 = vadd.xlane.f32.xlu1 %v3790_v38 }
0x2216   :  { %v3783_v19 = vpop.xlane.xlu1 %3782 }
0x2217   :  { %v3785_v20 = vsub.f32 %v3774_v13, %v3783_v19 }
0x2219   :  { %v3788_v21 = vmul.f32 1.442695, %v3785_v20 }
0x221b   :  { %6017 = vpow2.f32 %v3788_v21 }
0x2221   :  { %v6018_v22 = vpop.eup %6017 }
0x2222   :  { %v3793_v58 = vsel %vm1446_vm10, %v6018_v22, 0.0 }
0x2223   :  { %3794 = vadd.xlane.f32.xlu2 %v3793_v58  ;;  %v5774_v58 = vld [vmem:[%s6227_s6 + $0x60] sm:$0xff] }
0x222b   :  { %4010 = vmax.xlane.f32.xlu2 %v4009_v33 }
0x2288   :  { %v3792_v10 = vpop.xlane.xlu1 %3791 }
0x2289   :  { %6019 = vrcp.f32 %v3792_v10 }
0x228f   :  { %v6020_v45 = vpop.eup %6019 }
0x2290   :  { %v7026_v36 = vmul.f32 %v6020_v45, %v6016_v42  ;;  %v5767_v45 = vld [vmem:[%s7250_s0 + $0x68] sm:$0xff] }
0x2292   :  { %v3800_v39 = vpack.c.bf16 %v7026_v36, %v7026_v36 }
0x2294   :  { %5553 = vmatmul.msk.bf16.vlgmr.msra.gmra.mxu1 %vm1446_vm10, %v3800_v39  ;;  %v5766_v39 = vld [vmem:[%s7250_s0 + $0x60] sm:$0xff] }
0x2295   :  { %4108 = vmatpush.bf16.msra.mxu1 %v4099_v48 }
0x2296   :  { %v3795_v41 = vpop.xlane.xlu2 %3794 }
0x2297   :  { %6021 = vrcp.f32 %v3795_v41 }
0x229d   :  { %v6022_v59 = vpop.eup %6021 }
0x229e   :  { %v7031_v51 = vmul.f32 %v6022_v59, %v6018_v22  ;;  %v4011_v29 = vpop.xlane.xlu2 %4010  ;;  %v5775_v22 = vld [vmem:[%s6227_s6 + $0x68] sm:$0xff] }
0x229f   :  { %v4013_v40 = vsub.f32 %v4002_v14, %v4011_v29 }
0x22a0   :  { %v3801_v12 = vpack.c.bf16 %v7031_v51, %v7031_v51 }
0x22a1   :  { %v4016_v46 = vmul.f32 1.442695, %v4013_v40 }
0x22a2   :  { %5554 = vmatmul.msk.bf16.vlgmr.msrb.gmra.mxu2 %vm1446_vm10, %v3801_v12 }
0x22a3   :  { %6023 = vpow2.f32 %v4016_v46  ;;  %v5886_v46 = vld [vmem:[%s7254_s15 + $0x6] ss:$0 sm:$0xff] }
0x22a4   :  { %5582 = vmatmul.msk.bf16.vlgmr.msrb.gmra.mxu1 %vm327_vm0, %v6526_v1 }
0x22a9   :  { %v6024_v47 = vpop.eup %6023 }
0x22aa   :  { %v4021_v26 = vsel %vm1446_vm10, %v6024_v47, 0.0 }
0x22ab   :  { %4022 = vadd.xlane.f32.xlu1 %v4021_v26 }
0x22b2   :  { %5584 = vmatmul.msk.bf16.vlgmr.msra.gmra.mxu2 %vm414_vm1, %v3948_v52 }
0x22b4   :  { %5583 = vmatmul.msk.bf16.gmra.mxu1 %vm327_vm0, %v6539_v11 }
0x2311   :  { %v3820_v62 = vpop.f32.mrf.mxu1 }
0x2319   :  { %v3822_v55 = vpop.f32.mrf.mxu1 }
0x231e   :  { %v4023_v50 = vpop.xlane.xlu1 %4022 }
0x231f   :  { %6025 = vrcp.f32 %v4023_v50 }
0x2321   :  { %v3938_v56 = vpop.f32.mrf.mxu1 }
0x2322   :  { %v3939_v35 = vadd.f32 %v5885_v57, %v3938_v56  ;;  %v5370_v56 = vld [vmem:[%s7256_s18 + $0x14] sm:$0xf] }
0x2324   :  { %v3954_v32 = vpack.c.bf16 %v3939_v35, %v3939_v35 }
0x2325   :  { %v3842_v43 = vpop.f32.mrf.mxu2  ;;  %v6026_v17 = vpop.eup %6025 }
0x2326   :  { %v3846_v44 = vpack.c.bf16 %v3842_v43, %v3820_v62  ;;  %v4032_v24 = vunpack.c.l.b16 %v3954_v32  ;;  %v7048_v4 = vmul.f32 %v6026_v17, %v6024_v47  ;;  %v5783_v32 = vld [vmem:[%s6232_s12 + $0x68] sm:$0xff] }
0x2328   :  { %5589 = vmatmul.msk.bf16.vlgmr.msra.gmra.mxu1 %vm414_vm1, %v3846_v44  ;;  %v4029_v38 = vpack.c.bf16 %v7048_v4, %v7048_v4 }
0x2329   :  { %v3940_v61 = vpop.f32.mrf.mxu1 }
0x232a   :  { %v3941_v25 = vadd.f32 %v5885_v57, %v3940_v61 }
0x232c   :  { %v3955_v34 = vpack.c.bf16 %v3941_v25, %v3941_v25 }
0x232d   :  { %v3844_v63 = vpop.f32.mrf.mxu2 }
0x232e   :  { %v4033_v0 = vunpack.c.l.b16 %v3955_v34 }
0x2330   :  { %v4034_v5 = vpack.c.b16 %v4033_v0, %v4032_v24  ;;  %v5782_v0 = vld [vmem:[%s6232_s12 + $0x60] sm:$0xff] }
0x2331   :  { %v3943_v2 = vpop.f32.mrf.mxu1 }
0x2332   :  { %4046 = vmatpush.bf16.msrb.mxu2 %v4034_v5  ;;  %v3944_v6 = vadd.f32 %v5885_v57, %v3943_v2 }
0x2334   :  { %v3956_v13 = vpack.c.bf16 %v3944_v6, %v3944_v6 }
0x2335   :  { %v3978_v8 = vpop.f32.mrf.mxu2 }
0x2336   :  { %v4006_v9 = vsel %vm1446_vm10, %v3978_v8, -inf  ;;  %v4054_v23 = vunpack.c.l.b16 %v3956_v13  ;;  %4138 = vmatpush.bf16.msra.mxu2 %v5767_v45  ;;  %v5768_v13 = vld [vmem:[%s7250_s0 + $0x70] sm:$0xff] }
0x2337   :  { %4007 = vmax.xlane.f32.xlu0 %v4006_v9  ;;  %v5769_v9 = vld [vmem:[%s7250_s0 + $0x78] sm:$0xff] }
0x2339   :  { %v3945_v14 = vpop.f32.mrf.mxu1 }
0x233a   :  { %v3946_v15 = vadd.f32 %v5885_v57, %v3945_v14  ;;  %4139 = vmatpush.bf16.msra.mxu2 %v5766_v39  ;;  %v4079_v57 = vsel %vm480_vm2, %v5370_v56, 0 }
0x233b   :  { %4088 = vmatpush.bf16.msra.mxu0 %v4079_v57 }
0x233c   :  { %v3957_v27 = vpack.c.bf16 %v3946_v15, %v3946_v15  ;;  %v5887_v15 = vld [vmem:[%s7255_s16 + $0x6] ss:$0 sm:$0xff] }
0x233d   :  { %v3980_v16 = vpop.f32.mrf.mxu2 }
0x233e   :  { %v4055_v54 = vunpack.c.l.b16 %v3957_v27 }
0x233f   :  { %4203 = vmatpush.bf16.msrb.mxu0 %v5783_v32 }
0x2340   :  { %v4056_v42 = vpack.c.b16 %v4055_v54, %v4054_v23 }
0x2342   :  { %4068 = vmatpush.bf16.msrb.mxu3 %v4056_v42 }
0x2343   :  { %4204 = vmatpush.bf16.msrb.mxu0 %v5782_v0 }
0x2345   :  { %5587 = vmatmul.msk.bf16.vlgmr.msrb.gmra.mxu3 %vm1446_vm10, %v4029_v38 }
0x2346   :  { %4169 = vmatpush.bf16.msra.mxu3 %v5775_v22 }
0x234a   :  { %4170 = vmatpush.bf16.msra.mxu3 %v5774_v58 }
0x2355   :  { %5607 = vmatmul.msk.bf16.vlgmr.msra.gmra.mxu3 %vm327_vm0, %v6555_v28 }
0x2365   :  { %5608 = vmatmul.msk.bf16.gmra.mxu3 %vm327_vm0, %v6563_v30 }
0x23aa   :  { %v4008_v19 = vpop.xlane.xlu0 %4007 }
0x23ab   :  { %v4012_v20 = vsub.f32 %v3978_v8, %v4008_v19 }
0x23ad   :  { %v4014_v21 = vmul.f32 1.442695, %v4012_v20  ;;  %v7088_v20 = vpop.f32.mrf.mxu1 }
0x23af   :  { %6027 = vpow2.f32 %v4014_v21 }
0x23b5   :  { %v6028_v33 = vpop.eup %6027  ;;  %v4112_v22 = vpop.f32.mrf.mxu1 }
0x23b6   :  { %v4018_v37 = vsel %vm1446_vm10, %v6028_v33, 0.0 }
0x23b7   :  { %4019 = vadd.xlane.f32.xlu2 %v4018_v37  ;;  %v5888_v37 = vld [vmem:[%s7253_s17 + $0x6] ss:$0 sm:$0xff] }
0x23c8   :  { %v4070_v31 = vpop.f32.mrf.mxu3 }
0x23d0   :  { %v4072_v10 = vpop.f32.mrf.mxu3 }
0x23d8   :  { %v4172_v12 = vpop.f32.mrf.mxu3 }
0x23d9   :  { %v4173_v26 = vadd.f32 %v5886_v46, %v4172_v12 }
0x23db   :  { %v4218_v52 = vpack.c.bf16 %v4173_v26, %v4173_v26 }
0x23dd   :  { %v4228_v48 = vunpack.c.l.b16 %v4218_v52 }
0x23e0   :  { %v4174_v47 = vpop.f32.mrf.mxu3 }
0x23e1   :  { %v4175_v49 = vadd.f32 %v5886_v46, %v4174_v47 }
0x23e3   :  { %v4219_v53 = vpack.c.bf16 %v4175_v49, %v4175_v49 }
0x23e5   :  { %v4229_v62 = vunpack.c.l.b16 %v4219_v53 }
0x23e7   :  { %v4230_v55 = vpack.c.b16 %v4229_v62, %v4228_v48 }
0x23e8   :  { %v4177_v35 = vpop.f32.mrf.mxu3 }
0x23e9   :  { %v4235_v43 = vsel %vm414_vm1, %v4230_v55, 0  ;;  %v4178_v44 = vadd.f32 %v5886_v46, %v4177_v35 }
0x23ea   :  { %4244 = vmatpush.bf16.xpose.msrb.mxu1 %v4235_v43 }
0x23eb   :  { %v4220_v61 = vpack.c.bf16 %v4178_v44, %v4178_v44 }
0x23ed   :  { %v4252_v34 = vunpack.c.l.b16 %v4220_v61 }
0x23f0   :  { %v4179_v25 = vpop.f32.mrf.mxu3 }
0x23f1   :  { %v4180_v24 = vadd.f32 %v5886_v46, %v4179_v25 }
0x23f3   :  { %v4221_v63 = vpack.c.bf16 %v4180_v24, %v4180_v24 }
0x23f5   :  { %v4253_v5 = vunpack.c.l.b16 %v4221_v63 }
0x23f7   :  { %v4254_v2 = vpack.c.b16 %v4253_v5, %v4252_v34 }
0x23f9   :  { %v4259_v50 = vsel %vm414_vm1, %v4254_v2, 0 }
0x242a   :  { %v4020_v41 = vpop.xlane.xlu2 %4019 }
0x242b   :  { %6029 = vrcp.f32 %v4020_v41 }
0x2431   :  { %v6030_v59 = vpop.eup %6029 }
0x2432   :  { %v7062_v29 = vmul.f32 %v6030_v59, %v6028_v33 }
0x2434   :  { %v4028_v40 = vpack.c.bf16 %v7062_v29, %v7062_v29 }
0x2436   :  { %5586 = vmatmul.msk.bf16.vlgmr.msrb.gmra.mxu2 %vm1446_vm10, %v4028_v40 }
0x2437   :  { %4268 = vmatpush.bf16.xpose.msrb.mxu2 %v4259_v50 }
0x2446   :  { %5598 = vmatmul.msk.bf16.vlgmr.msra.gmra.mxu2 %vm327_vm0, %v6996_v7 }
0x24b9   :  { %v4048_v6 = vpop.f32.mrf.mxu2 }
0x24ba   :  { %v4074_v8 = vpack.c.bf16 %v4070_v31, %v4048_v6 }
0x24bc   :  { %5588 = vmatmul.msk.bf16.vlgmr.msra.gmra.mxu0 %vm414_vm1, %v4074_v8  ;;  %v5777_v8 = vld [vmem:[%s6227_s6 + $0x78] sm:$0xff] }
0x24bd   :  { %4388 = vmatpush.bf16.msra.mxu0 %v5769_v9  ;;  %v5776_v9 = vld [vmem:[%s6227_s6 + $0x70] sm:$0xff] }
0x24c1   :  { %v4050_v14 = vpop.f32.mrf.mxu2  ;;  %4389 = vmatpush.bf16.msra.mxu0 %v5768_v13 }
0x24c9   :  { %v4141_v17 = vpop.f32.mrf.mxu2 }
0x24ca   :  { %v4142_v23 = vadd.f32 %v5887_v15, %v4141_v17 }
0x24cc   :  { %v4146_v27 = vmul.f32 0.35355338, %v4142_v23  ;;  %5617 = vmatmul.msk.bf16.vlgmr.msrb.gmra.mxu0 %vm327_vm0, %v6526_v1 }
0x24ce   :  { %v4216_v16 = vpack.c.bf16 %v4146_v27, %v4146_v27 }
0x24d0   :  { %5619 = vmatmul.msk.bf16.vlgmr.msrb.gmra.mxu1 %vm414_vm1, %v4216_v16 }
0x24d1   :  { %v4143_v54 = vpop.f32.mrf.mxu2 }
0x24d2   :  { %v4144_v42 = vadd.f32 %v5887_v15, %v4143_v54  ;;  %v4115_v15 = vadd.f32 %v7062_v29, %v7026_v36  ;;  %v5371_v36 = vld [vmem:[%s7256_s18 + $0x18] sm:$0xf] }
0x24d3   :  { %v4347_v29 = vsel %vm480_vm2, %v5371_v36, 0 }
0x24d4   :  { %v4147_v38 = vmul.f32 0.35355338, %v4144_v42  ;;  %v4116_v42 = vadd.f32 %v7048_v4, %v7031_v51  ;;  %4356 = vmatpush.bf16.msrb.mxu3 %v4347_v29  ;;  %v5890_v4 = vld [vmem:[%s7254_s15 + $0x7] ss:$0 sm:$0xff] }
0x24d6   :  { %v4217_v19 = vpack.c.bf16 %v4147_v38, %v4147_v38 }
0x24d8   :  { %5620 = vmatmul.msk.bf16.vlgmr.msrb.gmra.mxu2 %vm414_vm1, %v4217_v19 }
0x24dc   :  { %5618 = vmatmul.msk.bf16.gmra.mxu0 %vm327_vm0, %v6539_v11 }
0x24ec   :  { %5632 = vmatmul.msk.bf16.vlgmr.msra.gmra.mxu0 %vm327_vm0, %v6996_v7 }
0x2539   :  { %v7090_v21 = vpop.f32.mrf.mxu0 }
0x2541   :  { %v4092_v58 = vpop.f32.mrf.mxu0 }
0x2542   :  { %v7092_v33 = vadd.f32 %v4112_v22, %v4092_v58 }
0x2549   :  { %v4206_v31 = vpop.f32.mrf.mxu0 }
0x254a   :  { %v4207_v10 = vadd.f32 %v5888_v37, %v4206_v31 }
0x254c   :  { %v4222_v41 = vpack.c.bf16 %v4207_v10, %v4207_v10 }
0x254d   :  { %v4246_v45 = vpop.f32.mrf.mxu1 }
0x254e   :  { %v4274_v39 = vsel %vm1446_vm10, %v4246_v45, -inf  ;;  %v4300_v12 = vunpack.c.l.b16 %v4222_v41 }
0x254f   :  { %4275 = vmax.xlane.f32.xlu0 %v4274_v39 }
0x2551   :  { %v4208_v59 = vpop.f32.mrf.mxu0 }
0x2552   :  { %v4209_v40 = vadd.f32 %v5888_v37, %v4208_v59  ;;  %v5889_v59 = vld [vmem:[%s7255_s16 + $0x7] ss:$0 sm:$0xff] }
0x2554   :  { %v4223_v7 = vpack.c.bf16 %v4209_v40, %v4209_v40 }
0x2555   :  { %v4248_v46 = vpop.f32.mrf.mxu1 }
0x2556   :  { %v4301_v47 = vunpack.c.l.b16 %v4223_v7 }
0x2558   :  { %v4302_v26 = vpack.c.b16 %v4301_v47, %v4300_v12 }
0x2559   :  { %v4211_v49 = vpop.f32.mrf.mxu0 }
0x255a   :  { %4314 = vmatpush.bf16.msra.mxu1 %v4302_v26  ;;  %v4212_v53 = vadd.f32 %v5888_v37, %v4211_v49 }
0x255b   :  { %v4270_v52 = vpop.f32.mrf.mxu2 }
0x255c   :  { %v4277_v48 = vsel %vm1446_vm10, %v4270_v52, -inf  ;;  %v4224_v62 = vpack.c.bf16 %v4212_v53, %v4212_v53 }
0x255d   :  { %4278 = vmax.xlane.f32.xlu1 %v4277_v48 }
0x255e   :  { %v4322_v35 = vunpack.c.l.b16 %v4224_v62  ;;  %4419 = vmatpush.bf16.msrb.mxu1 %v5777_v8 }
0x2561   :  { %v4213_v55 = vpop.f32.mrf.mxu0 }
0x2562   :  { %v4214_v56 = vadd.f32 %v5888_v37, %v4213_v55  ;;  %4420 = vmatpush.bf16.msrb.mxu1 %v5776_v9 }
0x2563   :  { %v4272_v57 = vpop.f32.mrf.mxu2 }
0x2564   :  { %v4225_v43 = vpack.c.bf16 %v4214_v56, %v4214_v56 }
0x2566   :  { %v4323_v44 = vunpack.c.l.b16 %v4225_v43 }
0x2568   :  { %v4324_v32 = vpack.c.b16 %v4323_v44, %v4322_v35 }
0x2569   :  { %v4391_v12 = vpop.f32.mrf.mxu0 }
0x256a   :  { %4336 = vmatpush.bf16.msra.mxu2 %v4324_v32  ;;  %v4392_v47 = vadd.f32 %v5889_v59, %v4391_v12 }
0x256c   :  { %v4396_v53 = vmul.f32 0.35355338, %v4392_v47 }
0x256e   :  { %v4466_v62 = vpack.c.bf16 %v4396_v53, %v4396_v53 }
0x2571   :  { %v4393_v43 = vpop.f32.mrf.mxu0 }
0x25c2   :  { %v4276_v61 = vpop.xlane.xlu0 %4275 }
0x25c3   :  { %v4280_v25 = vsub.f32 %v4246_v45, %v4276_v61  ;;  %v4394_v61 = vadd.f32 %v5889_v59, %v4393_v43 }
0x25c5   :  { %v4282_v24 = vmul.f32 1.442695, %v4280_v25 }
0x25c7   :  { %6031 = vpow2.f32 %v4282_v24 }
0x25cd   :  { %v6032_v34 = vpop.eup %6031 }
0x25ce   :  { %v4286_v63 = vsel %vm1446_vm10, %v6032_v34, 0.0 }
0x25cf   :  { %4287 = vadd.xlane.f32.xlu2 %v4286_v63 }
0x25d0   :  { %v4279_v0 = vpop.xlane.xlu1 %4278 }
0x25d1   :  { %v4281_v5 = vsub.f32 %v4270_v52, %v4279_v0  ;;  %v4111_v0 = vadd.f32 %v7088_v20, %v7090_v21 }
0x25d3   :  { %v4284_v2 = vmul.f32 1.442695, %v4281_v5 }
0x25d5   :  { %6033 = vpow2.f32 %v4284_v2 }
0x25db   :  { %v6034_v50 = vpop.eup %6033 }
0x25dc   :  { %v4289_v6 = vsel %vm1446_vm10, %v6034_v50, 0.0 }
0x25dd   :  { %4290 = vadd.xlane.f32.xlu0 %v4289_v6  ;;  %v5784_v6 = vld [vmem:[%s6232_s12 + $0x70] sm:$0xff] }
0x2642   :  { %v4288_v13 = vpop.xlane.xlu2 %4287 }
0x2643   :  { %6035 = vrcp.f32 %v4288_v13 }
0x2649   :  { %v6036_v14 = vpop.eup %6035 }
0x264a   :  { %v4294_v17 = vmul.f32 %v6036_v14, %v6032_v34  ;;  %v4397_v34 = vmul.f32 0.35355338, %v4394_v61 }
0x264c   :  { %v4296_v23 = vpack.c.bf16 %v4294_v17, %v4294_v17  ;;  %v7103_v27 = vadd.f32 %v4294_v17, %v4115_v15  ;;  %v4467_v63 = vpack.c.bf16 %v4397_v34, %v4397_v34 }
0x264e   :  { %5621 = vmatmul.msk.bf16.vlgmr.msra.gmra.mxu1 %vm1446_vm10, %v4296_v23 }
0x2650   :  { %v4291_v16 = vpop.xlane.xlu0 %4290 }
0x2651   :  { %6037 = vrcp.f32 %v4291_v16 }
0x2657   :  { %v6038_v54 = vpop.eup %6037 }
0x2658   :  { %v4295_v38 = vmul.f32 %v6038_v54, %v6034_v50  ;;  %v5785_v50 = vld [vmem:[%s6232_s12 + $0x78] sm:$0xff]  ;;  %v5891_v54 = vld [vmem:[%s7253_s17 + $0x7] ss:$0 sm:$0xff] }
0x2659   :  { %4453 = vmatpush.bf16.msrb.mxu2 %v5785_v50 }
0x265a   :  { %v4297_v19 = vpack.c.bf16 %v4295_v38, %v4295_v38  ;;  %v7108_v22 = vadd.f32 %v4295_v38, %v4116_v42 }
0x265c   :  { %5622 = vmatmul.msk.bf16.vlgmr.msra.gmra.mxu2 %vm1446_vm10, %v4297_v19 }
0x265d   :  { %4454 = vmatpush.bf16.msrb.mxu2 %v5784_v6 }
0x265e   :  { %5641 = vmatmul.msk.bf16.vlgmr.msrb.gmra.mxu1 %vm327_vm0, %v6555_v28 }
0x266c   :  { %5651 = vmatmul.msk.bf16.vlgmr.msrb.gmra.mxu2 %vm327_vm0, %v6526_v1 }
0x266e   :  { %5642 = vmatmul.msk.bf16.gmra.mxu1 %vm327_vm0, %v6563_v30 }
0x267c   :  { %5652 = vmatmul.msk.bf16.gmra.mxu2 %vm327_vm0, %v6539_v11 }
0x26cb   :  { %v4316_v58 = vpop.f32.mrf.mxu1 }
0x26d3   :  { %v4318_v37 = vpop.f32.mrf.mxu1 }
0x26db   :  { %v4422_v51 = vpop.f32.mrf.mxu1 }
0x26dc   :  { %v4423_v10 = vadd.f32 %v5890_v4, %v4422_v51 }
0x26de   :  { %v4468_v41 = vpack.c.bf16 %v4423_v10, %v4423_v10 }
0x26df   :  { %v4338_v31 = vpop.f32.mrf.mxu2 }
0x26e0   :  { %v4342_v45 = vpack.c.bf16 %v4338_v31, %v4316_v58  ;;  %v4478_v7 = vunpack.c.l.b16 %v4468_v41 }
0x26e2   :  { %5623 = vmatmul.msk.bf16.vlgmr.msrb.gmra.mxu3 %vm414_vm1, %v4342_v45 }
0x26e3   :  { %v4424_v39 = vpop.f32.mrf.mxu1 }
0x26e4   :  { %v4425_v28 = vadd.f32 %v5890_v4, %v4424_v39 }
0x26e6   :  { %v4469_v40 = vpack.c.bf16 %v4425_v28, %v4425_v28 }
0x26e7   :  { %v4340_v30 = vpop.f32.mrf.mxu2 }
0x26e8   :  { %v4479_v46 = vunpack.c.l.b16 %v4469_v40 }
0x26ea   :  { %v4480_v26 = vpack.c.b16 %v4479_v46, %v4478_v7 }
0x26eb   :  { %v4427_v49 = vpop.f32.mrf.mxu1 }
0x26ec   :  { %v4485_v52 = vsel %vm414_vm1, %v4480_v26, 0  ;;  %v4428_v48 = vadd.f32 %v5890_v4, %v4427_v49  ;;  %v5372_v49 = vld [vmem:[%s7256_s18 + $0x1c] sm:$0xf] }
0x26ed   :  { %4494 = vmatpush.bf16.xpose.msra.mxu3 %v4485_v52  ;;  %v4597_v52 = vsel %vm480_vm2, %v5372_v49, 0 }
0x26ee   :  { %v4470_v56 = vpack.c.bf16 %v4428_v48, %v4428_v48  ;;  %4606 = vmatpush.bf16.msra.mxu1 %v4597_v52  ;;  %v5894_v52 = vld [vmem:[%s7260_s28 + $0x1] ss:$0 sm:$0xff] }
0x26ef   :  { %v4456_v42 = vpop.f32.mrf.mxu2 }
0x26f0   :  { %v4502_v44 = vunpack.c.l.b16 %v4470_v56  ;;  %v4457_v29 = vadd.f32 %v5891_v54, %v4456_v42 }
0x26f2   :  { %v4472_v37 = vpack.c.bf16 %v4457_v29, %v4457_v29 }
0x26f3   :  { %v4429_v55 = vpop.f32.mrf.mxu1 }
0x26f4   :  { %v4430_v57 = vadd.f32 %v5890_v4, %v4429_v55  ;;  %5653 = vmatmul.msk.bf16.vlgmr.msra.gmra.mxu3 %vm414_vm1, %v4466_v62  ;;  %v4550_v4 = vunpack.c.l.b16 %v4472_v37 }
0x26f6   :  { %v4471_v35 = vpack.c.bf16 %v4430_v57, %v4430_v57 }
0x26f7   :  { %v4458_v51 = vpop.f32.mrf.mxu2 }
0x26f8   :  { %v4503_v32 = vunpack.c.l.b16 %v4471_v35  ;;  %v4459_v11 = vadd.f32 %v5891_v54, %v4458_v51 }
0x26fa   :  { %v4504_v25 = vpack.c.b16 %v4503_v32, %v4502_v44  ;;  %v4473_v31 = vpack.c.bf16 %v4459_v11, %v4459_v11 }
0x26fc   :  { %v4509_v24 = vsel %vm414_vm1, %v4504_v25, 0  ;;  %v4551_v39 = vunpack.c.l.b16 %v4473_v31 }
0x26fd   :  { %4518 = vmatpush.bf16.xpose.msrb.mxu0 %v4509_v24 }
0x26fe   :  { %v4552_v41 = vpack.c.b16 %v4551_v39, %v4550_v4 }
0x26ff   :  { %v4461_v28 = vpop.f32.mrf.mxu2 }
0x2700   :  { %4564 = vmatpush.bf16.msrb.mxu3 %v4552_v41  ;;  %v4462_v59 = vadd.f32 %v5891_v54, %v4461_v28 }
0x2702   :  { %v4474_v40 = vpack.c.bf16 %v4462_v59, %v4462_v59 }
0x2704   :  { %5654 = vmatmul.msk.bf16.vlgmr.msrb.gmra.mxu0 %vm414_vm1, %v4467_v63  ;;  %v4572_v7 = vunpack.c.l.b16 %v4474_v40 }
0x2707   :  { %v4463_v12 = vpop.f32.mrf.mxu2 }
0x2708   :  { %v4464_v30 = vadd.f32 %v5891_v54, %v4463_v12 }
0x270a   :  { %v4475_v46 = vpack.c.bf16 %v4464_v30, %v4464_v30 }
0x270c   :  { %v4573_v47 = vunpack.c.l.b16 %v4475_v46  ;;  %v5893_v46 = vld [vmem:[%s7259_s26 + $0x1] ss:$0 sm:$0xff] }
0x270e   :  { %v4574_v26 = vpack.c.b16 %v4573_v47, %v4572_v7 }
0x2710   :  { %4586 = vmatpush.bf16.msra.mxu0 %v4574_v26 }
0x2765   :  { %v4358_v5 = vpop.f32.mrf.mxu3 }
0x2766   :  { %v7126_v2 = vadd.f32 %v4358_v5, %v4111_v0  ;;  %v5892_v5 = vld [vmem:[%s7257_s22 + $0x1] ss:$0 sm:$0xff] }
0x276d   :  { %v4360_v8 = vpop.f32.mrf.mxu3 }
0x276e   :  { %v7131_v9 = vadd.f32 %v4360_v8, %v7092_v33 }
0x2777   :  { %v4496_v13 = vpop.f32.mrf.mxu3 }
0x2778   :  { %v4524_v14 = vsel %vm1446_vm10, %v4496_v13, -inf }
0x2779   :  { %4525 = vmax.xlane.f32.xlu1 %v4524_v14 }
0x277f   :  { %v4498_v20 = vpop.f32.mrf.mxu3 }
0x2781   :  { %v4520_v21 = vpop.f32.mrf.mxu0 }
0x2782   :  { %v4527_v15 = vsel %vm1446_vm10, %v4520_v21, -inf }
0x2783   :  { %4528 = vmax.xlane.f32.xlu2 %v4527_v15 }
0x2789   :  { %v4522_v17 = vpop.f32.mrf.mxu0 }
0x27ec   :  { %v4526_v33 = vpop.xlane.xlu1 %4525 }
0x27ed   :  { %v4530_v23 = vsub.f32 %v4496_v13, %v4526_v33 }
0x27ef   :  { %v4532_v16 = vmul.f32 1.442695, %v4530_v23 }
0x27f1   :  { %6039 = vpow2.f32 %v4532_v16 }
0x27f6   :  { %v4529_v1 = vpop.xlane.xlu2 %4528 }
0x27f7   :  { %v6040_v38 = vpop.eup %6039  ;;  %v4531_v19 = vsub.f32 %v4520_v21, %v4529_v1 }
0x27f8   :  { %v4536_v36 = vsel %vm1446_vm10, %v6040_v38, 0.0 }
0x27f9   :  { %v4534_v58 = vmul.f32 1.442695, %v4531_v19  ;;  %4537 = vadd.xlane.f32.xlu0 %v4536_v36 }
0x27fb   :  { %6041 = vpow2.f32 %v4534_v58  ;;  %v5786_v58 = vld [vmem:[%s7258_s23 + $0x10] sm:$0xff] }
0x2801   :  { %v6042_v10 = vpop.eup %6041 }
0x2802   :  { %v4539_v45 = vsel %vm1446_vm10, %v6042_v10, 0.0 }
0x2803   :  { %4540 = vadd.xlane.f32.xlu1 %v4539_v45 }
0x286c   :  { %v4538_v53 = vpop.xlane.xlu0 %4537 }
0x286d   :  { %6043 = vrcp.f32 %v4538_v53 }
0x2873   :  { %v6044_v48 = vpop.eup %6043 }
0x2874   :  { %v4544_v62 = vmul.f32 %v6044_v48, %v6040_v38 }
0x2876   :  { %v4546_v55 = vpack.c.bf16 %v4544_v62, %v4544_v62  ;;  %v4615_v56 = vadd.f32 %v4544_v62, %v7103_v27  ;;  %v4541_v57 = vpop.xlane.xlu1 %4540 }
0x2877   :  { %6045 = vrcp.f32 %v4541_v57 }
0x2878   :  { %v4622_v35 = vmul.f32 0.25, %v4615_v56  ;;  %5655 = vmatmul.msk.bf16.vlgmr.msrb.gmra.mxu3 %vm1446_vm10, %v4546_v55 }
0x287a   :  { %4820 = vst.msk [vmem:[#allocation4 + $0x10] sm:$0xff] %vm1446_vm10, %v4622_v35  ;;  %v5791_v35 = vld [vmem:[%s7261_s1 + $0x38] sm:$0xff] }
0x287b   :  { %4750 = vmatpush.bf16.msra.mxu3 %v5791_v35 }
0x287d   :  { %v6046_v43 = vpop.eup %6045 }
0x287e   :  { %v4545_v44 = vmul.f32 %v6046_v43, %v6042_v10  ;;  %v5790_v43 = vld [vmem:[%s7261_s1 + $0x30] sm:$0xff] }
0x287f   :  { %4751 = vmatpush.bf16.msra.mxu3 %v5790_v43 }
0x2880   :  { %v4547_v32 = vpack.c.bf16 %v4545_v44, %v4545_v44  ;;  %v4616_v61 = vadd.f32 %v4545_v44, %v7108_v22  ;;  %v5789_v44 = vld [vmem:[%s7261_s1 + $0x28] sm:$0xff] }
0x2882   :  { %v4623_v25 = vmul.f32 0.25, %v4616_v61  ;;  %5656 = vmatmul.msk.bf16.vlgmr.msra.gmra.mxu0 %vm1446_vm10, %v4547_v32  ;;  %v5788_v32 = vld [vmem:[%s7261_s1 + $0x20] sm:$0xff] }
0x2883   :  { %4752 = vmatpush.bf16.msra.mxu3 %v5789_v44 }
0x2884   :  { %4821 = vst.msk [vmem:[#allocation4 + $0x18] sm:$0xff] %vm1446_vm10, %v4623_v25  ;;  %v5895_v25 = vld [vmem:[%s7262_s2 + $0x1] ss:$0 sm:$0xff] }
0x2887   :  { %4753 = vmatpush.bf16.msra.mxu3 %v5788_v32 }
0x28fb   :  { %v4566_v24 = vpop.f32.mrf.mxu3 }
0x28ff   :  { %v4588_v27 = vpop.f32.mrf.mxu0 }
0x2900   :  { %v4592_v34 = vpack.c.bf16 %v4588_v27, %v4566_v24 }
0x2902   :  { %5657 = vmatmul.msk.bf16.vlgmr.msra.gmra.mxu1 %vm414_vm1, %v4592_v34 }
0x2903   :  { %v4568_v63 = vpop.f32.mrf.mxu3 }
0x2907   :  { %v4590_v0 = vpop.f32.mrf.mxu0 }
0x297f   :  { %v4608_v50 = vpop.f32.mrf.mxu1 }
0x2980   :  { %v4613_v6 = vadd.f32 %v4608_v50, %v7126_v2  ;;  %v5896_v50 = vld [vmem:[%s7263_s7 + $0x1] ss:$0 sm:$0xff] }
0x2982   :  { %v4620_v8 = vadd.f32 %v5892_v5, %v4613_v6 }
0x2984   :  { %v4624_v13 = vadd.f32 %v4620_v8, %v6988_v18 }
0x2986   :  { %v4626_v22 = vsel %vm327_vm0, %v4624_v13, 0.0 }
0x2987   :  { %4627 = vadd.xlane.f32.xlu2 %v4626_v22  ;;  %v4610_v14 = vpop.f32.mrf.mxu1 }
0x2988   :  { %v4614_v20 = vadd.f32 %v4610_v14, %v7131_v9 }
0x298a   :  { %v4621_v21 = vadd.f32 %v5892_v5, %v4614_v20 }
0x298c   :  { %v4625_v15 = vadd.f32 %v4621_v21, %v6990_v60  ;;  %v5787_v60 = vld [vmem:[%s7258_s23 + $0x18] sm:$0xff] }
0x298d   :  { %4705 = vmatpush.bf16.msra.mxu2 %v5787_v60 }
0x298e   :  { %v4629_v17 = vsel %vm327_vm0, %v4625_v15, 0.0 }
0x298f   :  { %4630 = vadd.xlane.f32.xlu0 %v4629_v17 }
0x2991   :  { %4706 = vmatpush.bf16.msra.mxu2 %v5786_v58 }
0x29fa   :  { %v4628_v33 = vpop.xlane.xlu2 %4627 }
0x29fb   :  { %v4632_v23 = vmul.f32 %v4628_v33, %v6530_v3 }
0x29fd   :  { %v4634_v2 = vsub.f32 %v4624_v13, %v4632_v23 }
0x29ff   :  { %v4636_v16 = vmul.f32 %v4634_v2, %v4634_v2 }
0x2a01   :  { %v4638_v18 = vsel %vm327_vm0, %v4636_v16, 0.0 }
0x2a02   :  { %4639 = vadd.xlane.f32.xlu1 %v4638_v18  ;;  %v4631_v54 = vpop.xlane.xlu0 %4630 }
0x2a03   :  { %v4633_v42 = vmul.f32 %v4631_v54, %v6530_v3 }
0x2a05   :  { %v4635_v9 = vsub.f32 %v4625_v15, %v4633_v42 }
0x2a07   :  { %v4637_v1 = vmul.f32 %v4635_v9, %v4635_v9 }
0x2a09   :  { %v4641_v38 = vsel %vm327_vm0, %v4637_v1, 0.0 }
0x2a0a   :  { %4642 = vadd.xlane.f32.xlu2 %v4641_v38 }
0x2a75   :  { %v4640_v19 = vpop.xlane.xlu1 %4639 }
0x2a76   :  { %v4644_v36 = vmul.f32 %v4640_v19, %v6530_v3 }
0x2a78   :  { %v4646_v29 = vadd.f32 1e-05, %v4644_v36 }
0x2a7a   :  { %6047 = vrsqrt.f32 %v4646_v29  ;;  %vm4654_vm2 = vweird.f32 %v4646_v29 }
0x2a7d   :  { %v4643_v37 = vpop.xlane.xlu2 %4642 }
0x2a7e   :  { %v4645_v51 = vmul.f32 %v4643_v37, %v6530_v3 }
0x2a80   :  { %v6048_v11 = vpop.eup %6047  ;;  %v4647_v4 = vadd.f32 1e-05, %v4645_v51 }
0x2a81   :  { %v4649_v31 = vmul.f32 %v6048_v11, %v4646_v29  ;;  %vm4655_vm1 = vweird.f32 %v6048_v11 }
0x2a82   :  { %6049 = vrsqrt.f32 %v4647_v4  ;;  %vm4656_vm10 = vmor %vm4654_vm2, %vm4655_vm1  ;;  %vm4664_vm7 = vweird.f32 %v4647_v4 }
0x2a83   :  { %v4650_v10 = vmul.f32 %v6048_v11, %v4649_v31 }
0x2a85   :  { %v4651_v45 = vmul.f32 0.5, %v4650_v10 }
0x2a87   :  { %v4652_v39 = vsub.f32 1.5, %v4651_v45 }
0x2a88   :  { %v6050_v41 = vpop.eup %6049 }
0x2a89   :  { %v4653_v28 = vmul.f32 %v6048_v11, %v4652_v39  ;;  %v4659_v59 = vmul.f32 %v6050_v41, %v4647_v4  ;;  %vm4665_vm6 = vweird.f32 %v6050_v41 }
0x2a8a   :  { %vm4666_vm8 = vmor %vm4664_vm7, %vm4665_vm6 }
0x2a8b   :  { %v4660_v40 = vmul.f32 %v6050_v41, %v4659_v59  ;;  %v4657_v12 = vsel %vm4656_vm10, %v6048_v11, %v4653_v28 }
0x2a8c   :  { %v4668_v47 = vmul.f32 %v4657_v12, %v4634_v2  ;;  %v5898_v12 = vld [vmem:[%s7265_s11 + $0x1] ss:$0 sm:$0xff] }
0x2a8d   :  { %v4661_v30 = vmul.f32 0.5, %v4660_v40 }
0x2a8e   :  { %v4673_v53 = vmul.f32 %v5893_v46, %v4668_v47 }
0x2a8f   :  { %v4662_v7 = vsub.f32 1.5, %v4661_v30 }
0x2a90   :  { %v4678_v55 = vadd.f32 %v5894_v52, %v4673_v53 }
0x2a91   :  { %v4663_v26 = vmul.f32 %v6050_v41, %v4662_v7 }
0x2a93   :  { %v4667_v49 = vsel %vm4666_vm8, %v6050_v41, %v4663_v26  ;;  %v5897_v41 = vld [vmem:[%s7264_s10 + $0x1] ss:$0 sm:$0xff] }
0x2a94   :  { %v4669_v48 = vmul.f32 %v4667_v49, %v4635_v9 }
0x2a96   :  { %v4674_v62 = vmul.f32 %v5893_v46, %v4669_v48 }
0x2a98   :  { %v4679_v56 = vadd.f32 %v5894_v52, %v4674_v62 }
0x2a9a   :  { %v4680_v57 = vpack.c.bf16 %v4679_v56, %v4678_v55 }
0x2a9c   :  { %5666 = vmatmul.msk.bf16.vlgmr.msra.gmra.mxu2 %vm327_vm0, %v4680_v57 }
0x2b1f   :  { %v4708_v61 = vpop.f32.mrf.mxu2 }
0x2b20   :  { %v4709_v24 = vadd.f32 %v5895_v25, %v4708_v61 }
0x2b22   :  { %v4713_v63 = vmax.f32 %v4709_v24, 0.0 }
0x2b27   :  { %v4710_v27 = vpop.f32.mrf.mxu2 }
0x2b28   :  { %v4711_v34 = vadd.f32 %v5895_v25, %v4710_v27 }
0x2b2a   :  { %v4714_v0 = vmax.f32 %v4711_v34, 0.0 }
0x2b2c   :  { %v4715_v5 = vpack.c.bf16 %v4714_v0, %v4713_v63 }
0x2b2e   :  { %5683 = vmatmul.msk.bf16.vlgmr.msra.gmra.mxu3 %vm2412_vm4, %v4715_v5 }
0x2bb1   :  { %v4755_v6 = vpop.f32.mrf.mxu3 }
0x2bb2   :  { %v4756_v8 = vadd.f32 %v5896_v50, %v4755_v6 }
0x2bb4   :  { %v4760_v13 = vadd.f32 %v4756_v8, %v4678_v55 }
0x2bb6   :  { %v4762_v22 = vsel %vm327_vm0, %v4760_v13, 0.0 }
0x2bb7   :  { %4763 = vadd.xlane.f32.xlu0 %v4762_v22 }
0x2bb9   :  { %v4757_v14 = vpop.f32.mrf.mxu3 }
0x2bba   :  { %v4758_v20 = vadd.f32 %v5896_v50, %v4757_v14 }
0x2bbc   :  { %v4761_v21 = vadd.f32 %v4758_v20, %v4679_v56 }
0x2bbe   :  { %v4765_v15 = vsel %vm327_vm0, %v4761_v21, 0.0 }
0x2bbf   :  { %4766 = vadd.xlane.f32.xlu1 %v4765_v15 }
0x2c2a   :  { %v4764_v17 = vpop.xlane.xlu0 %4763 }
0x2c2b   :  { %v4768_v33 = vmul.f32 %v4764_v17, %v6530_v3 }
0x2c2d   :  { %v4770_v23 = vsub.f32 %v4760_v13, %v4768_v33 }
0x2c2f   :  { %v4772_v2 = vmul.f32 %v4770_v23, %v4770_v23 }
0x2c31   :  { %v4774_v16 = vsel %vm327_vm0, %v4772_v2, 0.0 }
0x2c32   :  { %v4767_v18 = vpop.xlane.xlu1 %4766  ;;  %4775 = vadd.xlane.f32.xlu2 %v4774_v16 }
0x2c33   :  { %v4769_v54 = vmul.f32 %v4767_v18, %v6530_v3 }
0x2c35   :  { %v4771_v42 = vsub.f32 %v4761_v21, %v4769_v54 }
0x2c37   :  { %v4773_v9 = vmul.f32 %v4771_v42, %v4771_v42 }
0x2c39   :  { %v4777_v1 = vsel %vm327_vm0, %v4773_v9, 0.0 }
0x2c3a   :  { %4778 = vadd.xlane.f32.xlu0 %v4777_v1 }
0x2ca5   :  { %v4776_v38 = vpop.xlane.xlu2 %4775 }
0x2ca6   :  { %v4780_v60 = vmul.f32 %v4776_v38, %v6530_v3 }
0x2ca8   :  { %v4782_v19 = vadd.f32 1e-05, %v4780_v60 }
0x2caa   :  { %6051 = vrsqrt.f32 %v4782_v19  ;;  %vm4790_vm9 = vweird.f32 %v4782_v19 }
0x2cad   :  { %v4779_v36 = vpop.xlane.xlu0 %4778 }
0x2cae   :  { %v4781_v29 = vmul.f32 %v4779_v36, %v6530_v3 }
0x2cb0   :  { %v6052_v58 = vpop.eup %6051  ;;  %v4783_v37 = vadd.f32 1e-05, %v4781_v29 }
0x2cb1   :  { %v4785_v51 = vmul.f32 %v6052_v58, %v4782_v19  ;;  %vm4791_vm4 = vweird.f32 %v6052_v58 }
0x2cb2   :  { %6053 = vrsqrt.f32 %v4783_v37  ;;  %vm4792_vm11 = vmor %vm4790_vm9, %vm4791_vm4  ;;  %vm4800_vm13 = vweird.f32 %v4783_v37 }
0x2cb3   :  { %v4786_v11 = vmul.f32 %v6052_v58, %v4785_v51 }
0x2cb5   :  { %v4787_v4 = vmul.f32 0.5, %v4786_v11 }
0x2cb7   :  { %v4788_v31 = vsub.f32 1.5, %v4787_v4 }
0x2cb8   :  { %v6054_v10 = vpop.eup %6053 }
0x2cb9   :  { %v4789_v45 = vmul.f32 %v6052_v58, %v4788_v31  ;;  %v4795_v39 = vmul.f32 %v6054_v10, %v4783_v37  ;;  %vm4801_vm12 = vweird.f32 %v6054_v10 }
0x2cba   :  { %vm4802_vm14 = vmor %vm4800_vm13, %vm4801_vm12 }
0x2cbb   :  { %v4796_v28 = vmul.f32 %v6054_v10, %v4795_v39  ;;  %v4793_v59 = vsel %vm4792_vm11, %v6052_v58, %v4789_v45 }
0x2cbc   :  { %v4804_v40 = vmul.f32 %v4793_v59, %v4770_v23 }
0x2cbd   :  { %v4797_v30 = vmul.f32 0.5, %v4796_v28 }
0x2cbe   :  { %v4809_v7 = vmul.f32 %v5897_v41, %v4804_v40 }
0x2cbf   :  { %v4798_v46 = vsub.f32 1.5, %v4797_v30 }
0x2cc0   :  { %v4814_v47 = vadd.f32 %v5898_v12, %v4809_v7 }
0x2cc1   :  { %v4799_v26 = vmul.f32 %v6054_v10, %v4798_v46 }
0x2cc2   :  { %v4824_v49 = vsel %vm327_vm0, %v4814_v47, 0.0 }
0x2cc3   :  { %4825 = vadd.xlane.f32.xlu1 %v4824_v49  ;;  %v4803_v52 = vsel %vm4802_vm14, %v6054_v10, %v4799_v26 }
0x2cc4   :  { %v4805_v53 = vmul.f32 %v4803_v52, %v4771_v42 }
0x2cc6   :  { %v4810_v48 = vmul.f32 %v5897_v41, %v4805_v53 }
0x2cc8   :  { %v4815_v62 = vadd.f32 %v5898_v12, %v4810_v48 }
0x2cca   :  { %v4827_v55 = vsel %vm327_vm0, %v4815_v62, 0.0 }
0x2ccb   :  { %4828 = vadd.xlane.f32.xlu2 %v4827_v55 }
0x2d36   :  { %v4826_v56 = vpop.xlane.xlu1 %4825 }
0x2d37   :  { %v4830_v57 = vmul.f32 %v4826_v56, %v6530_v3 }
0x2d39   :  { %v7189_v35 = vsub.f32 %v4814_v47, %v4830_v57 }
0x2d3b   :  { %v4834_v43 = vmul.f32 %v7189_v35, %v7189_v35 }
0x2d3d   :  { %v4836_v44 = vsel %vm327_vm0, %v4834_v43, 0.0 }
0x2d3e   :  { %4837 = vadd.xlane.f32.xlu0 %v4836_v44  ;;  %v4829_v32 = vpop.xlane.xlu2 %4828 }
0x2d3f   :  { %v4831_v61 = vmul.f32 %v4829_v32, %v6530_v3 }
0x2d41   :  { %v7195_v25 = vsub.f32 %v4815_v62, %v4831_v61 }
0x2d43   :  { %v4835_v24 = vmul.f32 %v7195_v25, %v7195_v25 }
0x2d45   :  { %v4839_v27 = vsel %vm327_vm0, %v4835_v24, 0.0 }
0x2d46   :  { %4840 = vadd.xlane.f32.xlu1 %v4839_v27 }
0x2d47   :  { %6086 = shalt.err (!%p6083_p4)
}
0x2d48   :  { %s6151_s14 = smov 128   ;;  %s6152_s19 = smov 8  }
0x2d49   :  { %4894 = dma.vmem_to_hbm [thread:$0]  %s4887_s21, 512, %s4889_s25, [#allocation3], %s6151_s14, %s6151_s14, %s6152_s19  }
0x2d4a   :  { %s6153_s24 = smov [#allocation4]   ;;  %s4901_s12 = sshll.u32 %s6332_s30, 4  ;;  %s4902_s12 = int_to_ptr.hbm [resolvable:$true] %s4901_s12 }
0x2d4b   :  { %s4899_s6 = sshll.u32 %s6153_s24, 4  ;;  %s6099_s0 = sshra.s32 %s4902_s12, 4  ;;  %s4900_s6 = int_to_ptr.vmem [resolvable:$true] %s4899_s6  ;;  %s6100_s0 = int_to_ptr.hbm [resolvable:$true] %s6099_s0 }
0x2d4c   :  { %s6101_s5 = scalar_lea.hbm %s6100_s0, 32  ;;  %s6103_s4 = scalar_lea.hbm %s6332_s30, 32 }
0x2d4d   :  { %p6102_p5 = scmp.ne.s32.totalorder %s6100_s0, %s6101_s5  ;;  %p6104_p6 = scmp.lt.s32.totalorder %s6100_s0, %s6332_s30 }
0x2d4e   :  { %p6105_p7 = scmp.lt.s32.totalorder %s6103_s4, %s6101_s5 }
0x2d50   :  { %p6106_p8 = por %p6105_p7, %p6104_p6 }
0x2d52   :  { %p6107_p9 = pnand %p6106_p8, %p6102_p5 }
0x2d54   :  { %6110 = shalt.err (!%p6107_p9)
}
0x2d55   :  { %4907 = dma.vmem_to_hbm [thread:$0]  %s4900_s6, 512, %s4902_s12, [#allocation5], %s6151_s14, %s6151_s14, %s6152_s19  }
0x2d56   :  { %s7266_s9 = sld [smem:[#allocation24_spill]] }
0x2d5c   :  { %v5899_v33 = vld [vmem:[%s7266_s9] ss:$0 sm:$0xff] }
0x2db1   :  { %v4838_v34 = vpop.xlane.xlu0 %4837 }
0x2db2   :  { %v4842_v63 = vmul.f32 %v4838_v34, %v6530_v3 }
0x2db4   :  { %v4844_v0 = vadd.f32 1e-05, %v4842_v63 }
0x2db6   :  { %6055 = vrsqrt.f32 %v4844_v0  ;;  %vm4852_vm3 = vweird.f32 %v4844_v0 }
0x2db9   :  { %v4841_v5 = vpop.xlane.xlu1 %4840 }
0x2dba   :  { %v4843_v50 = vmul.f32 %v4841_v5, %v6530_v3  ;;  %v5900_v3 = vld [vmem:[%s6317_s20] ss:$0 sm:$0xff] }
0x2dbc   :  { %v6056_v6 = vpop.eup %6055  ;;  %v4845_v8 = vadd.f32 1e-05, %v4843_v50 }
0x2dbd   :  { %v4847_v13 = vmul.f32 %v6056_v6, %v4844_v0  ;;  %vm4853_vm15 = vweird.f32 %v6056_v6 }
0x2dbe   :  { %6057 = vrsqrt.f32 %v4845_v8  ;;  %vm4854_vm5 = vmor %vm4852_vm3, %vm4853_vm15  ;;  %vm4862_vm2 = vweird.f32 %v4845_v8 }
0x2dbf   :  { %v4848_v22 = vmul.f32 %v6056_v6, %v4847_v13 }
0x2dc1   :  { %v4849_v14 = vmul.f32 0.5, %v4848_v22 }
0x2dc3   :  { %v4850_v20 = vsub.f32 1.5, %v4849_v14 }
0x2dc4   :  { %v6058_v21 = vpop.eup %6057 }
0x2dc5   :  { %v4851_v15 = vmul.f32 %v6056_v6, %v4850_v20  ;;  %v4857_v17 = vmul.f32 %v6058_v21, %v4845_v8  ;;  %vm4863_vm1 = vweird.f32 %v6058_v21 }
0x2dc6   :  { %vm4864_vm10 = vmor %vm4862_vm2, %vm4863_vm1 }
0x2dc7   :  { %v4855_v23 = vsel %vm4854_vm5, %v6056_v6, %v4851_v15  ;;  %v4858_v2 = vmul.f32 %v6058_v21, %v4857_v17 }
0x2dc8   :  { %v4866_v16 = vmul.f32 %v4855_v23, %v7189_v35 }
0x2dc9   :  { %v4859_v18 = vmul.f32 0.5, %v4858_v2 }
0x2dca   :  { %v4871_v54 = vmul.f32 %v5899_v33, %v4866_v16 }
0x2dcb   :  { %v4860_v42 = vsub.f32 1.5, %v4859_v18 }
0x2dcc   :  { %v4876_v9 = vadd.f32 %v5900_v3, %v4871_v54 }
0x2dcd   :  { %v4861_v1 = vmul.f32 %v6058_v21, %v4860_v42 }
0x2dce   :  { %4878 = vst.msk [vmem:[%s6322_s27] sm:$0xff] %vm327_vm0, %v4876_v9 }
0x2dcf   :  { %v4865_v38 = vsel %vm4864_vm10, %v6058_v21, %v4861_v1 }
0x2dd0   :  { %v4867_v60 = vmul.f32 %v4865_v38, %v7195_v25 }
0x2dd2   :  { %v4872_v19 = vmul.f32 %v5899_v33, %v4867_v60 }
0x2dd4   :  { %v4877_v36 = vadd.f32 %v5900_v3, %v4872_v19 }
0x2dd6   :  { %4879 = vst.msk [vmem:[%s6322_s27 + $0x8] sm:$0xff] %vm327_vm0, %v4877_v36 }
0x2dd7   :  { %6111 = dma.done.wait [#allocation3], 512  }
0x2dd8   :  { %6112 = vsyncadd [#allocation3], 4294966784 }
0x2dd9   :  { %6113 = dma.done.wait [#allocation5], 512  }
0x2dda   :  { %6114 = vsyncadd [#allocation5], 4294966784 }
0x2ddb   :  { %4918 = vsyncpa [#allocation3], 1 }
0x2ddc   :  { %4919 = vsyncpa [#allocation5], 1 }

</bundles_post_ra>
